<compile_context>
chip_gen: v7x
topology: tpu7x:2x2x1
jax: 0.10.0
libtpu: 0.0.40
codegen_flags: <defaults>
</compile_context>

<pallas_src>
import math

import numpy as np
import jax
import jax.numpy as jnp
from jax.experimental import pallas as pl
from jax.experimental.pallas import tpu as pltpu

F32 = jnp.float32
BF16 = jnp.bfloat16


def _hswish(x):
    # F.relu6(x + 3) / 6 * x
    return jnp.clip(x + 3.0, 0.0, 6.0) * (1.0 / 6.0) * x


# ---------------------------------------------------------------------------
# The single fused kernel (one sample per grid step; everything stays in VMEM)
# ---------------------------------------------------------------------------

def se2dnet_kernel(p0_ref, w0_ref, b0_ref,
                   g1_ref, w1_ref, c1_ref, se1a_ref, se1b_ref,
                   g2_ref, w2_ref, c2_ref, se2a_ref, se2b_ref,
                   w3_ref, d0w_ref, d0b_ref, d1w_ref, d1b_ref,
                   o_ref):
    # ---- conv0: Conv2d(1, 32, 3, bias=True) + ReLU --------------------------
    # p0: (680, 9) bf16 im2col patches of the 28x28 image (row r = i*26 + j,
    # plus 4 zero pad rows that are never selected downstream).
    x1 = jnp.dot(p0_ref[0], w0_ref[...], preferred_element_type=F32)
    x1 = jnp.maximum(x1 + b0_ref[...], 0.0).astype(BF16)            # (680, 32)

    # ---- conv1: Conv2d(32,32,3,bias=False) + BN(eval) + AvgPool2d(2) + ReLU -
    # G1[t] (144,680) gathers + 2x2-averages (x0.25) the rows needed by 3x3
    # tap t; W1[t] (32,32) already has the BN scale folded into its columns.
    acc = jnp.zeros((144, 32), F32)
    for t in range(9):
        pooled = jnp.dot(g1_ref[t], x1, preferred_element_type=F32)  # (144, 32)
        acc = acc + jnp.dot(pooled.astype(BF16), w1_ref[t],
                            preferred_element_type=F32)
    x2 = jnp.maximum(acc + c1_ref[...], 0.0)                         # (144, 32)

    # ---- conv1_se: x *= sigmoid(relu(mean(x) @ W) @ W') ---------------------
    m = jnp.mean(x2, axis=0, keepdims=True)                          # (1, 32)
    h = jnp.maximum(jnp.dot(m.astype(BF16), se1a_ref[...],
                            preferred_element_type=F32), 0.0)
    s = jax.nn.sigmoid(jnp.dot(h.astype(BF16), se1b_ref[...],
                               preferred_element_type=F32))
    x2 = (x2 * s).astype(BF16)                                       # (144, 32)

    # ---- conv2: Conv2d(32,48,3,bias=False) + BN(eval) + AvgPool2d(2) + ReLU -
    acc = jnp.zeros((25, 48), F32)
    for t in range(9):
        pooled = jnp.dot(g2_ref[t], x2, preferred_element_type=F32)  # (25, 32)
        acc = acc + jnp.dot(pooled.astype(BF16), w2_ref[t],
                            preferred_element_type=F32)
    x3 = jnp.maximum(acc + c2_ref[...], 0.0)                         # (25, 48)

    # ---- conv2_se ------------------------------------------------------------
    m = jnp.mean(x3, axis=0, keepdims=True)                          # (1, 48)
    h = jnp.maximum(jnp.dot(m.astype(BF16), se2a_ref[...],
                            preferred_element_type=F32), 0.0)
    s = jax.nn.sigmoid(jnp.dot(h.astype(BF16), se2b_ref[...],
                               preferred_element_type=F32))
    x3 = x3 * s                                                      # (25, 48) f32

    # ---- conv3: Conv2d(48, 108, 5, bias=False) on 5x5 -> 1x1, then hswish ---
    # 25 tiny (1,48)@(48,108) dots; they pipeline through the MXU and avoid an
    # in-kernel (25,48)->(1,1200) lane relayout.
    z = jnp.zeros((1, 108), F32)
    for t in range(25):                                              # tap t = a*5 + b
        z = z + jnp.dot(x3[t:t + 1, :].astype(BF16), w3_ref[t],
                        preferred_element_type=F32)
    z = _hswish(z)                                                   # (1, 108)

    # ---- dense0: Linear(108,108) + BatchNorm1d(eval, folded) + hswish -------
    h = jnp.dot(z.astype(BF16), d0w_ref[...], preferred_element_type=F32)
    h = _hswish(h + d0b_ref[...])
    # TODO(synk): Dropout(p=0.25) and the per-forward re-randomized dropout1
    # are identity in eval/inference mode, so no dropout RNG is applied here.

    # ---- dense1: Linear(108,10) + LogSoftmax(dim=1) --------------------------
    logits = jnp.dot(h.astype(BF16), d1w_ref[...], preferred_element_type=F32)
    logits = logits + d1b_ref[...]
    mx = jnp.max(logits, axis=-1, keepdims=True)
    lse = jnp.log(jnp.sum(jnp.exp(logits - mx), axis=-1, keepdims=True)) + mx
    o_ref[0] = logits - lse                                          # (1, 10)


# ---------------------------------------------------------------------------
# Plain-JAX glue: pallas_call wrapper and parameter / constant setup
# ---------------------------------------------------------------------------

def _bcast_spec(shape):
    # Grid-invariant operand: constant block index -> DMA'd once, stays resident.
    zeros = (0,) * len(shape)
    return pl.BlockSpec(tuple(shape), lambda i, z=zeros: z)


def se2dnet_forward(x_nchw, p):
    x = x_nchw.astype(F32)
    n = x.shape[0]
    img = x[:, 0]                                            # (N, 28, 28), 1 channel

    # conv0 patches — the only glue-side im2col (1 input channel, ~12 KiB/sample).
    cols = [img[:, a:a + 26, b:b + 26] for a in range(3) for b in range(3)]
    pat = jnp.stack(cols, axis=-1).reshape(n, 26 * 26, 9)    # row r = i*26 + j
    pat = jnp.pad(pat, ((0, 0), (0, 4), (0, 0))).astype(BF16)   # (N, 680, 9)

    args = (pat, p['w0'], p['b0'],
            p['g1'], p['w1'], p['c1'], p['se1_w1'], p['se1_w2'],
            p['g2'], p['w2'], p['c2'], p['se2_w1'], p['se2_w2'],
            p['w3'], p['d0_w'], p['d0_b'], p['d1_w'], p['d1_b'])

    in_specs = [pl.BlockSpec((1, 680, 9), lambda i: (i, 0, 0))]
    in_specs += [_bcast_spec(a.shape) for a in args[1:]]

    out = pl.pallas_call(
        se2dnet_kernel,
        grid=(n,),
        in_specs=in_specs,
        out_specs=pl.BlockSpec((1, 1, 10), lambda i: (i, 0, 0)),
        out_shape=jax.ShapeDtypeStruct((n, 1, 10), F32),
        compiler_params=pltpu.CompilerParams(
            dimension_semantics=("parallel",),        # batch sharded across TCs on v7x
            vmem_limit_bytes=32 * 1024 * 1024),       # explicit; safe on v5e/v6e/v7x
    )(*args)
    return out.reshape(n, 10)


def _pool_conv_gather(kh, kw, in_h, in_w, pad_rows=0):
    """G[t, q, r]: for 3x3 tap t=(a,b) of a valid conv followed by AvgPool2d(2),
    gathers (and 2x2-averages with the 0.25 factor) the rows of the flattened
    (in_h*in_w, C) input needed at pooled output position q = I*pw + J."""
    ch, cw = in_h - kh + 1, in_w - kw + 1
    ph, pw = ch // 2, cw // 2
    g = np.zeros((kh * kw, ph * pw, in_h * in_w + pad_rows), np.float32)
    for a in range(kh):
        for b in range(kw):
            t = a * kw + b
            for ii in range(ph):
                for jj in range(pw):
                    q = ii * pw + jj
                    for dh in range(2):
                        for dw in range(2):
                            r = (2 * ii + dh + a) * in_w + (2 * jj + dw + b)
                            g[t, q, r] += 0.25
    return jnp.asarray(g, BF16)


def init_params(key):
    keys = iter(jax.random.split(key, 28))
    nxt = lambda: next(keys)
    eps = 1e-5

    def unif(k, shape, bound):
        return jax.random.uniform(k, shape, F32, -bound, bound)

    def conv_w(k, o, c, kh, kw):
        return unif(k, (o, c, kh, kw), 1.0 / math.sqrt(c * kh * kw))

    def lin_wt(k, out_dim, in_dim):
        # PyTorch Linear weight is (out, in); kernel consumes its transpose (in, out).
        return unif(k, (out_dim, in_dim), 1.0 / math.sqrt(in_dim)).T

    def conv_taps(w_oihw):
        # (O, C, kh, kw) -> (kh*kw, C, O), tap index t = a*kw + b
        o, c, kh, kw = w_oihw.shape
        return jnp.transpose(w_oihw, (2, 3, 1, 0)).reshape(kh * kw, c, o)

    def bn_fold(c):
        gamma = 1.0 + unif(nxt(), (c,), 0.1)
        beta = unif(nxt(), (c,), 0.1)
        mean = unif(nxt(), (c,), 0.1)
        var = jax.random.uniform(nxt(), (c,), F32, 0.5, 1.5)
        s = gamma / jnp.sqrt(var + eps)
        return s, beta - mean * s

    p = {}
    # conv0: Conv2d(1, 32, 3, bias=True)
    p['w0'] = conv_taps(conv_w(nxt(), 32, 1, 3, 3)).reshape(9, 32).astype(BF16)
    p['b0'] = unif(nxt(), (1, 32), 1.0 / 3.0)

    # conv1: Conv2d(32, 32, 3, bias=False) + BN2d(32); BN scale folded into W
    s1, c1 = bn_fold(32)
    p['w1'] = (conv_taps(conv_w(nxt(), 32, 32, 3, 3)) * s1[None, None, :]).astype(BF16)
    p['c1'] = c1.reshape(1, 32)
    p['se1_w1'] = lin_wt(nxt(), 32, 32).astype(BF16)   # nn_se_2d uses bias=False
    p['se1_w2'] = lin_wt(nxt(), 32, 32).astype(BF16)

    # conv2: Conv2d(32, 48, 3, bias=False) + BN2d(48)
    s2, c2 = bn_fold(48)
    p['w2'] = (conv_taps(conv_w(nxt(), 48, 32, 3, 3)) * s2[None, None, :]).astype(BF16)
    p['c2'] = c2.reshape(1, 48)
    p['se2_w1'] = lin_wt(nxt(), 48, 48).astype(BF16)
    p['se2_w2'] = lin_wt(nxt(), 48, 48).astype(BF16)

    # conv3: Conv2d(48, 108, 5, bias=False)
    p['w3'] = conv_taps(conv_w(nxt(), 108, 48, 5, 5)).astype(BF16)   # (25, 48, 108)

    # dense0: Linear(108,108,bias=True) + BN1d(108); fold BN scale into W and bias
    s0, c0 = bn_fold(108)
    d0w = lin_wt(nxt(), 108, 108)
    d0b = unif(nxt(), (108,), 1.0 / math.sqrt(108))
    p['d0_w'] = (d0w * s0[None, :]).astype(BF16)
    p['d0_b'] = (d0b * s0 + c0).reshape(1, 108)

    # dense1: Linear(108, 10, bias=True)
    p['d1_w'] = lin_wt(nxt(), 10, 108).astype(BF16)
    p['d1_b'] = unif(nxt(), (1, 10), 1.0 / math.sqrt(108))

    # Structural constants: fused tap-gather + AvgPool2d(2) selection matrices.
    p['g1'] = _pool_conv_gather(3, 3, 26, 26, pad_rows=4)   # (9, 144, 680)
    p['g2'] = _pool_conv_gather(3, 3, 12, 12)               # (9, 25, 144)
    return p


if __name__ == "__main__":
    key = jax.random.PRNGKey(0)
    kx, kp = jax.random.split(key)
    params = init_params(kp)
    # MNIST-like NCHW input: the architecture requires 1 channel and 28x28
    # spatial so the final 5x5 conv reduces exactly to 1x1; batch=2.
    x = jax.random.normal(kx, (2, 1, 28, 28), F32)

    fwd = jax.jit(se2dnet_forward)
    out = jax.block_until_ready(fwd(x, params))

    assert out.shape == (2, 10)
    assert bool(jnp.all(jnp.isfinite(out)))
    print("KERNEL_OK")
</pallas_src>

<mosaic_0001>
module attributes {stable_mosaic.version = 11 : i64} {
  func.func @se2dnet_kernel(%arg0: i32, %arg1: memref<1x680x9xbf16, #tpu.memory_space<vmem>>, %arg2: memref<9x32xbf16, #tpu.memory_space<vmem>>, %arg3: memref<1x32xf32, #tpu.memory_space<vmem>>, %arg4: memref<9x144x680xbf16, #tpu.memory_space<vmem>>, %arg5: memref<9x32x32xbf16, #tpu.memory_space<vmem>>, %arg6: memref<1x32xf32, #tpu.memory_space<vmem>>, %arg7: memref<32x32xbf16, #tpu.memory_space<vmem>>, %arg8: memref<32x32xbf16, #tpu.memory_space<vmem>>, %arg9: memref<9x25x144xbf16, #tpu.memory_space<vmem>>, %arg10: memref<9x32x48xbf16, #tpu.memory_space<vmem>>, %arg11: memref<1x48xf32, #tpu.memory_space<vmem>>, %arg12: memref<48x48xbf16, #tpu.memory_space<vmem>>, %arg13: memref<48x48xbf16, #tpu.memory_space<vmem>>, %arg14: memref<25x48x108xbf16, #tpu.memory_space<vmem>>, %arg15: memref<108x108xbf16, #tpu.memory_space<vmem>>, %arg16: memref<1x108xf32, #tpu.memory_space<vmem>>, %arg17: memref<108x10xbf16, #tpu.memory_space<vmem>>, %arg18: memref<1x10xf32, #tpu.memory_space<vmem>>, %arg19: memref<1x1x10xf32, #tpu.memory_space<vmem>>) attributes {dimension_semantics = [#tpu.dimension_semantics<parallel>], iteration_bounds = array<i64: 2>, scalar_prefetch = 0 : i64, scratch_operands = 0 : i64, tpu.core_type = #tpu.core_type<tc>, window_params = [{transform_indices = @transform_0, window_bounds = array<i64: 1, 680, 9>}, {pipeline_mode = #tpu.pipeline_mode<synchronous>, transform_indices = @transform_1, window_bounds = array<i64: 9, 32>}, {pipeline_mode = #tpu.pipeline_mode<synchronous>, transform_indices = @transform_2, window_bounds = array<i64: 1, 32>}, {pipeline_mode = #tpu.pipeline_mode<synchronous>, transform_indices = @transform_3, window_bounds = array<i64: 9, 144, 680>}, {pipeline_mode = #tpu.pipeline_mode<synchronous>, transform_indices = @transform_4, window_bounds = array<i64: 9, 32, 32>}, {pipeline_mode = #tpu.pipeline_mode<synchronous>, transform_indices = @transform_5, window_bounds = array<i64: 1, 32>}, {pipeline_mode = #tpu.pipeline_mode<synchronous>, transform_indices = @transform_6, window_bounds = array<i64: 32, 32>}, {pipeline_mode = #tpu.pipeline_mode<synchronous>, transform_indices = @transform_7, window_bounds = array<i64: 32, 32>}, {pipeline_mode = #tpu.pipeline_mode<synchronous>, transform_indices = @transform_8, window_bounds = array<i64: 9, 25, 144>}, {pipeline_mode = #tpu.pipeline_mode<synchronous>, transform_indices = @transform_9, window_bounds = array<i64: 9, 32, 48>}, {pipeline_mode = #tpu.pipeline_mode<synchronous>, transform_indices = @transform_10, window_bounds = array<i64: 1, 48>}, {pipeline_mode = #tpu.pipeline_mode<synchronous>, transform_indices = @transform_11, window_bounds = array<i64: 48, 48>}, {pipeline_mode = #tpu.pipeline_mode<synchronous>, transform_indices = @transform_12, window_bounds = array<i64: 48, 48>}, {pipeline_mode = #tpu.pipeline_mode<synchronous>, transform_indices = @transform_13, window_bounds = array<i64: 25, 48, 108>}, {pipeline_mode = #tpu.pipeline_mode<synchronous>, transform_indices = @transform_14, window_bounds = array<i64: 108, 108>}, {pipeline_mode = #tpu.pipeline_mode<synchronous>, transform_indices = @transform_15, window_bounds = array<i64: 1, 108>}, {pipeline_mode = #tpu.pipeline_mode<synchronous>, transform_indices = @transform_16, window_bounds = array<i64: 108, 10>}, {pipeline_mode = #tpu.pipeline_mode<synchronous>, transform_indices = @transform_17, window_bounds = array<i64: 1, 10>}, {transform_indices = @transform_18, window_bounds = array<i64: 1, 1, 10>}]} {
    %c0 = arith.constant 0 : index
    %c0_0 = arith.constant 0 : index
    %c0_1 = arith.constant 0 : index
    %0 = vector.load %arg1[%c0, %c0_0, %c0_1] : memref<1x680x9xbf16, #tpu.memory_space<vmem>>, vector<1x680x9xbf16>
    %1 = vector.shape_cast %0 : vector<1x680x9xbf16> to vector<680x9xbf16>
    %c0_2 = arith.constant 0 : index
    %c0_3 = arith.constant 0 : index
    %2 = vector.load %arg2[%c0_2, %c0_3] : memref<9x32xbf16, #tpu.memory_space<vmem>>, vector<9x32xbf16>
    %cst = arith.constant dense<0.000000e+00> : vector<680x32xf32>
    %3 = tpu.matmul %1, %2, %cst {dimension_numbers = #tpu.dot_dimension_numbers<[1], [0], [0], [1], [0, 0, 1, 1], [], []>} : vector<680x9xbf16>, vector<9x32xbf16>, vector<680x32xf32> -> vector<680x32xf32>
    %c0_4 = arith.constant 0 : index
    %c0_5 = arith.constant 0 : index
    %4 = vector.load %arg3[%c0_4, %c0_5] : memref<1x32xf32, #tpu.memory_space<vmem>>, vector<1x32xf32>
    %5 = vector.broadcast %4 : vector<1x32xf32> to vector<680x32xf32>
    %6 = arith.addf %3, %5 : vector<680x32xf32>
    %cst_6 = arith.constant 0.000000e+00 : f32
    %7 = vector.broadcast %cst_6 : f32 to vector<680x32xf32>
    %8 = arith.maximumf %6, %7 : vector<680x32xf32>
    %9 = arith.truncf %8 : vector<680x32xf32> to vector<680x32xbf16>
    %cst_7 = arith.constant 0.000000e+00 : f32
    %10 = vector.broadcast %cst_7 : f32 to vector<144x32xf32>
    %c0_8 = arith.constant 0 : index
    %c0_9 = arith.constant 0 : index
    %c0_10 = arith.constant 0 : index
    %11 = vector.load %arg4[%c0_8, %c0_9, %c0_10] : memref<9x144x680xbf16, #tpu.memory_space<vmem>>, vector<1x144x680xbf16>
    %12 = vector.shape_cast %11 : vector<1x144x680xbf16> to vector<144x680xbf16>
    %cst_11 = arith.constant dense<0.000000e+00> : vector<144x32xf32>
    %13 = tpu.matmul %12, %9, %cst_11 {dimension_numbers = #tpu.dot_dimension_numbers<[1], [0], [0], [1], [0, 0, 1, 1], [], []>} : vector<144x680xbf16>, vector<680x32xbf16>, vector<144x32xf32> -> vector<144x32xf32>
    %14 = arith.truncf %13 : vector<144x32xf32> to vector<144x32xbf16>
    %c0_12 = arith.constant 0 : index
    %c0_13 = arith.constant 0 : index
    %c0_14 = arith.constant 0 : index
    %15 = vector.load %arg5[%c0_12, %c0_13, %c0_14] : memref<9x32x32xbf16, #tpu.memory_space<vmem>>, vector<1x32x32xbf16>
    %16 = vector.shape_cast %15 : vector<1x32x32xbf16> to vector<32x32xbf16>
    %cst_15 = arith.constant dense<0.000000e+00> : vector<144x32xf32>
    %17 = tpu.matmul %14, %16, %cst_15 {dimension_numbers = #tpu.dot_dimension_numbers<[1], [0], [0], [1], [0, 0, 1, 1], [], []>} : vector<144x32xbf16>, vector<32x32xbf16>, vector<144x32xf32> -> vector<144x32xf32>
    %18 = arith.addf %10, %17 : vector<144x32xf32>
    %c1 = arith.constant 1 : index
    %c0_16 = arith.constant 0 : index
    %c0_17 = arith.constant 0 : index
    %19 = vector.load %arg4[%c1, %c0_16, %c0_17] : memref<9x144x680xbf16, #tpu.memory_space<vmem>>, vector<1x144x680xbf16>
    %20 = vector.shape_cast %19 : vector<1x144x680xbf16> to vector<144x680xbf16>
    %cst_18 = arith.constant dense<0.000000e+00> : vector<144x32xf32>
    %21 = tpu.matmul %20, %9, %cst_18 {dimension_numbers = #tpu.dot_dimension_numbers<[1], [0], [0], [1], [0, 0, 1, 1], [], []>} : vector<144x680xbf16>, vector<680x32xbf16>, vector<144x32xf32> -> vector<144x32xf32>
    %22 = arith.truncf %21 : vector<144x32xf32> to vector<144x32xbf16>
    %c1_19 = arith.constant 1 : index
    %c0_20 = arith.constant 0 : index
    %c0_21 = arith.constant 0 : index
    %23 = vector.load %arg5[%c1_19, %c0_20, %c0_21] : memref<9x32x32xbf16, #tpu.memory_space<vmem>>, vector<1x32x32xbf16>
    %24 = vector.shape_cast %23 : vector<1x32x32xbf16> to vector<32x32xbf16>
    %cst_22 = arith.constant dense<0.000000e+00> : vector<144x32xf32>
    %25 = tpu.matmul %22, %24, %cst_22 {dimension_numbers = #tpu.dot_dimension_numbers<[1], [0], [0], [1], [0, 0, 1, 1], [], []>} : vector<144x32xbf16>, vector<32x32xbf16>, vector<144x32xf32> -> vector<144x32xf32>
    %26 = arith.addf %18, %25 : vector<144x32xf32>
    %c2 = arith.constant 2 : index
    %c0_23 = arith.constant 0 : index
    %c0_24 = arith.constant 0 : index
    %27 = vector.load %arg4[%c2, %c0_23, %c0_24] : memref<9x144x680xbf16, #tpu.memory_space<vmem>>, vector<1x144x680xbf16>
    %28 = vector.shape_cast %27 : vector<1x144x680xbf16> to vector<144x680xbf16>
    %cst_25 = arith.constant dense<0.000000e+00> : vector<144x32xf32>
    %29 = tpu.matmul %28, %9, %cst_25 {dimension_numbers = #tpu.dot_dimension_numbers<[1], [0], [0], [1], [0, 0, 1, 1], [], []>} : vector<144x680xbf16>, vector<680x32xbf16>, vector<144x32xf32> -> vector<144x32xf32>
    %30 = arith.truncf %29 : vector<144x32xf32> to vector<144x32xbf16>
    %c2_26 = arith.constant 2 : index
    %c0_27 = arith.constant 0 : index
    %c0_28 = arith.constant 0 : index
    %31 = vector.load %arg5[%c2_26, %c0_27, %c0_28] : memref<9x32x32xbf16, #tpu.memory_space<vmem>>, vector<1x32x32xbf16>
    %32 = vector.shape_cast %31 : vector<1x32x32xbf16> to vector<32x32xbf16>
    %cst_29 = arith.constant dense<0.000000e+00> : vector<144x32xf32>
    %33 = tpu.matmul %30, %32, %cst_29 {dimension_numbers = #tpu.dot_dimension_numbers<[1], [0], [0], [1], [0, 0, 1, 1], [], []>} : vector<144x32xbf16>, vector<32x32xbf16>, vector<144x32xf32> -> vector<144x32xf32>
    %34 = arith.addf %26, %33 : vector<144x32xf32>
    %c3 = arith.constant 3 : index
    %c0_30 = arith.constant 0 : index
    %c0_31 = arith.constant 0 : index
    %35 = vector.load %arg4[%c3, %c0_30, %c0_31] : memref<9x144x680xbf16, #tpu.memory_space<vmem>>, vector<1x144x680xbf16>
    %36 = vector.shape_cast %35 : vector<1x144x680xbf16> to vector<144x680xbf16>
    %cst_32 = arith.constant dense<0.000000e+00> : vector<144x32xf32>
    %37 = tpu.matmul %36, %9, %cst_32 {dimension_numbers = #tpu.dot_dimension_numbers<[1], [0], [0], [1], [0, 0, 1, 1], [], []>} : vector<144x680xbf16>, vector<680x32xbf16>, vector<144x32xf32> -> vector<144x32xf32>
    %38 = arith.truncf %37 : vector<144x32xf32> to vector<144x32xbf16>
    %c3_33 = arith.constant 3 : index
    %c0_34 = arith.constant 0 : index
    %c0_35 = arith.constant 0 : index
    %39 = vector.load %arg5[%c3_33, %c0_34, %c0_35] : memref<9x32x32xbf16, #tpu.memory_space<vmem>>, vector<1x32x32xbf16>
    %40 = vector.shape_cast %39 : vector<1x32x32xbf16> to vector<32x32xbf16>
    %cst_36 = arith.constant dense<0.000000e+00> : vector<144x32xf32>
    %41 = tpu.matmul %38, %40, %cst_36 {dimension_numbers = #tpu.dot_dimension_numbers<[1], [0], [0], [1], [0, 0, 1, 1], [], []>} : vector<144x32xbf16>, vector<32x32xbf16>, vector<144x32xf32> -> vector<144x32xf32>
    %42 = arith.addf %34, %41 : vector<144x32xf32>
    %c4 = arith.constant 4 : index
    %c0_37 = arith.constant 0 : index
    %c0_38 = arith.constant 0 : index
    %43 = vector.load %arg4[%c4, %c0_37, %c0_38] : memref<9x144x680xbf16, #tpu.memory_space<vmem>>, vector<1x144x680xbf16>
    %44 = vector.shape_cast %43 : vector<1x144x680xbf16> to vector<144x680xbf16>
    %cst_39 = arith.constant dense<0.000000e+00> : vector<144x32xf32>
    %45 = tpu.matmul %44, %9, %cst_39 {dimension_numbers = #tpu.dot_dimension_numbers<[1], [0], [0], [1], [0, 0, 1, 1], [], []>} : vector<144x680xbf16>, vector<680x32xbf16>, vector<144x32xf32> -> vector<144x32xf32>
    %46 = arith.truncf %45 : vector<144x32xf32> to vector<144x32xbf16>
    %c4_40 = arith.constant 4 : index
    %c0_41 = arith.constant 0 : index
    %c0_42 = arith.constant 0 : index
    %47 = vector.load %arg5[%c4_40, %c0_41, %c0_42] : memref<9x32x32xbf16, #tpu.memory_space<vmem>>, vector<1x32x32xbf16>
    %48 = vector.shape_cast %47 : vector<1x32x32xbf16> to vector<32x32xbf16>
    %cst_43 = arith.constant dense<0.000000e+00> : vector<144x32xf32>
    %49 = tpu.matmul %46, %48, %cst_43 {dimension_numbers = #tpu.dot_dimension_numbers<[1], [0], [0], [1], [0, 0, 1, 1], [], []>} : vector<144x32xbf16>, vector<32x32xbf16>, vector<144x32xf32> -> vector<144x32xf32>
    %50 = arith.addf %42, %49 : vector<144x32xf32>
    %c5 = arith.constant 5 : index
    %c0_44 = arith.constant 0 : index
    %c0_45 = arith.constant 0 : index
    %51 = vector.load %arg4[%c5, %c0_44, %c0_45] : memref<9x144x680xbf16, #tpu.memory_space<vmem>>, vector<1x144x680xbf16>
    %52 = vector.shape_cast %51 : vector<1x144x680xbf16> to vector<144x680xbf16>
    %cst_46 = arith.constant dense<0.000000e+00> : vector<144x32xf32>
    %53 = tpu.matmul %52, %9, %cst_46 {dimension_numbers = #tpu.dot_dimension_numbers<[1], [0], [0], [1], [0, 0, 1, 1], [], []>} : vector<144x680xbf16>, vector<680x32xbf16>, vector<144x32xf32> -> vector<144x32xf32>
    %54 = arith.truncf %53 : vector<144x32xf32> to vector<144x32xbf16>
    %c5_47 = arith.constant 5 : index
    %c0_48 = arith.constant 0 : index
    %c0_49 = arith.constant 0 : index
    %55 = vector.load %arg5[%c5_47, %c0_48, %c0_49] : memref<9x32x32xbf16, #tpu.memory_space<vmem>>, vector<1x32x32xbf16>
    %56 = vector.shape_cast %55 : vector<1x32x32xbf16> to vector<32x32xbf16>
    %cst_50 = arith.constant dense<0.000000e+00> : vector<144x32xf32>
    %57 = tpu.matmul %54, %56, %cst_50 {dimension_numbers = #tpu.dot_dimension_numbers<[1], [0], [0], [1], [0, 0, 1, 1], [], []>} : vector<144x32xbf16>, vector<32x32xbf16>, vector<144x32xf32> -> vector<144x32xf32>
    %58 = arith.addf %50, %57 : vector<144x32xf32>
    %c6 = arith.constant 6 : index
    %c0_51 = arith.constant 0 : index
    %c0_52 = arith.constant 0 : index
    %59 = vector.load %arg4[%c6, %c0_51, %c0_52] : memref<9x144x680xbf16, #tpu.memory_space<vmem>>, vector<1x144x680xbf16>
    %60 = vector.shape_cast %59 : vector<1x144x680xbf16> to vector<144x680xbf16>
    %cst_53 = arith.constant dense<0.000000e+00> : vector<144x32xf32>
    %61 = tpu.matmul %60, %9, %cst_53 {dimension_numbers = #tpu.dot_dimension_numbers<[1], [0], [0], [1], [0, 0, 1, 1], [], []>} : vector<144x680xbf16>, vector<680x32xbf16>, vector<144x32xf32> -> vector<144x32xf32>
    %62 = arith.truncf %61 : vector<144x32xf32> to vector<144x32xbf16>
    %c6_54 = arith.constant 6 : index
    %c0_55 = arith.constant 0 : index
    %c0_56 = arith.constant 0 : index
    %63 = vector.load %arg5[%c6_54, %c0_55, %c0_56] : memref<9x32x32xbf16, #tpu.memory_space<vmem>>, vector<1x32x32xbf16>
    %64 = vector.shape_cast %63 : vector<1x32x32xbf16> to vector<32x32xbf16>
    %cst_57 = arith.constant dense<0.000000e+00> : vector<144x32xf32>
    %65 = tpu.matmul %62, %64, %cst_57 {dimension_numbers = #tpu.dot_dimension_numbers<[1], [0], [0], [1], [0, 0, 1, 1], [], []>} : vector<144x32xbf16>, vector<32x32xbf16>, vector<144x32xf32> -> vector<144x32xf32>
    %66 = arith.addf %58, %65 : vector<144x32xf32>
    %c7 = arith.constant 7 : index
    %c0_58 = arith.constant 0 : index
    %c0_59 = arith.constant 0 : index
    %67 = vector.load %arg4[%c7, %c0_58, %c0_59] : memref<9x144x680xbf16, #tpu.memory_space<vmem>>, vector<1x144x680xbf16>
    %68 = vector.shape_cast %67 : vector<1x144x680xbf16> to vector<144x680xbf16>
    %cst_60 = arith.constant dense<0.000000e+00> : vector<144x32xf32>
    %69 = tpu.matmul %68, %9, %cst_60 {dimension_numbers = #tpu.dot_dimension_numbers<[1], [0], [0], [1], [0, 0, 1, 1], [], []>} : vector<144x680xbf16>, vector<680x32xbf16>, vector<144x32xf32> -> vector<144x32xf32>
    %70 = arith.truncf %69 : vector<144x32xf32> to vector<144x32xbf16>
    %c7_61 = arith.constant 7 : index
    %c0_62 = arith.constant 0 : index
    %c0_63 = arith.constant 0 : index
    %71 = vector.load %arg5[%c7_61, %c0_62, %c0_63] : memref<9x32x32xbf16, #tpu.memory_space<vmem>>, vector<1x32x32xbf16>
    %72 = vector.shape_cast %71 : vector<1x32x32xbf16> to vector<32x32xbf16>
    %cst_64 = arith.constant dense<0.000000e+00> : vector<144x32xf32>
    %73 = tpu.matmul %70, %72, %cst_64 {dimension_numbers = #tpu.dot_dimension_numbers<[1], [0], [0], [1], [0, 0, 1, 1], [], []>} : vector<144x32xbf16>, vector<32x32xbf16>, vector<144x32xf32> -> vector<144x32xf32>
    %74 = arith.addf %66, %73 : vector<144x32xf32>
    %c8 = arith.constant 8 : index
    %c0_65 = arith.constant 0 : index
    %c0_66 = arith.constant 0 : index
    %75 = vector.load %arg4[%c8, %c0_65, %c0_66] : memref<9x144x680xbf16, #tpu.memory_space<vmem>>, vector<1x144x680xbf16>
    %76 = vector.shape_cast %75 : vector<1x144x680xbf16> to vector<144x680xbf16>
    %cst_67 = arith.constant dense<0.000000e+00> : vector<144x32xf32>
    %77 = tpu.matmul %76, %9, %cst_67 {dimension_numbers = #tpu.dot_dimension_numbers<[1], [0], [0], [1], [0, 0, 1, 1], [], []>} : vector<144x680xbf16>, vector<680x32xbf16>, vector<144x32xf32> -> vector<144x32xf32>
    %78 = arith.truncf %77 : vector<144x32xf32> to vector<144x32xbf16>
    %c8_68 = arith.constant 8 : index
    %c0_69 = arith.constant 0 : index
    %c0_70 = arith.constant 0 : index
    %79 = vector.load %arg5[%c8_68, %c0_69, %c0_70] : memref<9x32x32xbf16, #tpu.memory_space<vmem>>, vector<1x32x32xbf16>
    %80 = vector.shape_cast %79 : vector<1x32x32xbf16> to vector<32x32xbf16>
    %cst_71 = arith.constant dense<0.000000e+00> : vector<144x32xf32>
    %81 = tpu.matmul %78, %80, %cst_71 {dimension_numbers = #tpu.dot_dimension_numbers<[1], [0], [0], [1], [0, 0, 1, 1], [], []>} : vector<144x32xbf16>, vector<32x32xbf16>, vector<144x32xf32> -> vector<144x32xf32>
    %82 = arith.addf %74, %81 : vector<144x32xf32>
    %c0_72 = arith.constant 0 : index
    %c0_73 = arith.constant 0 : index
    %83 = vector.load %arg6[%c0_72, %c0_73] : memref<1x32xf32, #tpu.memory_space<vmem>>, vector<1x32xf32>
    %84 = vector.broadcast %83 : vector<1x32xf32> to vector<144x32xf32>
    %85 = arith.addf %82, %84 : vector<144x32xf32>
    %cst_74 = arith.constant 0.000000e+00 : f32
    %86 = vector.broadcast %cst_74 : f32 to vector<144x32xf32>
    %87 = arith.maximumf %85, %86 : vector<144x32xf32>
    %cst_75 = arith.constant dense<0.000000e+00> : vector<32xf32>
    %88 = vector.multi_reduction <add>, %87, %cst_75 [0] : vector<144x32xf32> to vector<32xf32>
    %89 = vector.shape_cast %88 : vector<32xf32> to vector<1x32xf32>
    %cst_76 = arith.constant 1.440000e+02 : f32
    %90 = vector.broadcast %cst_76 : f32 to vector<1x32xf32>
    %91 = arith.divf %89, %90 : vector<1x32xf32>
    %92 = arith.truncf %91 : vector<1x32xf32> to vector<1x32xbf16>
    %c0_77 = arith.constant 0 : index
    %c0_78 = arith.constant 0 : index
    %93 = vector.load %arg7[%c0_77, %c0_78] : memref<32x32xbf16, #tpu.memory_space<vmem>>, vector<32x32xbf16>
    %cst_79 = arith.constant dense<0.000000e+00> : vector<1x32xf32>
    %94 = tpu.matmul %92, %93, %cst_79 {dimension_numbers = #tpu.dot_dimension_numbers<[1], [0], [0], [1], [0, 0, 1, 1], [], []>} : vector<1x32xbf16>, vector<32x32xbf16>, vector<1x32xf32> -> vector<1x32xf32>
    %cst_80 = arith.constant 0.000000e+00 : f32
    %95 = vector.broadcast %cst_80 : f32 to vector<1x32xf32>
    %96 = arith.maximumf %94, %95 : vector<1x32xf32>
    %97 = arith.truncf %96 : vector<1x32xf32> to vector<1x32xbf16>
    %c0_81 = arith.constant 0 : index
    %c0_82 = arith.constant 0 : index
    %98 = vector.load %arg8[%c0_81, %c0_82] : memref<32x32xbf16, #tpu.memory_space<vmem>>, vector<32x32xbf16>
    %cst_83 = arith.constant dense<0.000000e+00> : vector<1x32xf32>
    %99 = tpu.matmul %97, %98, %cst_83 {dimension_numbers = #tpu.dot_dimension_numbers<[1], [0], [0], [1], [0, 0, 1, 1], [], []>} : vector<1x32xbf16>, vector<32x32xbf16>, vector<1x32xf32> -> vector<1x32xf32>
    %100 = arith.negf %99 : vector<1x32xf32>
    %101 = math.exp %100 : vector<1x32xf32>
    %cst_84 = arith.constant 1.000000e+00 : f32
    %102 = vector.broadcast %cst_84 : f32 to vector<1x32xf32>
    %103 = arith.addf %102, %101 : vector<1x32xf32>
    %104 = arith.divf %102, %103 : vector<1x32xf32>
    %105 = vector.broadcast %104 : vector<1x32xf32> to vector<144x32xf32>
    %106 = arith.mulf %87, %105 : vector<144x32xf32>
    %107 = arith.truncf %106 : vector<144x32xf32> to vector<144x32xbf16>
    %cst_85 = arith.constant 0.000000e+00 : f32
    %108 = vector.broadcast %cst_85 : f32 to vector<25x48xf32>
    %c0_86 = arith.constant 0 : index
    %c0_87 = arith.constant 0 : index
    %c0_88 = arith.constant 0 : index
    %109 = vector.load %arg9[%c0_86, %c0_87, %c0_88] : memref<9x25x144xbf16, #tpu.memory_space<vmem>>, vector<1x25x144xbf16>
    %110 = vector.shape_cast %109 : vector<1x25x144xbf16> to vector<25x144xbf16>
    %cst_89 = arith.constant dense<0.000000e+00> : vector<25x32xf32>
    %111 = tpu.matmul %110, %107, %cst_89 {dimension_numbers = #tpu.dot_dimension_numbers<[1], [0], [0], [1], [0, 0, 1, 1], [], []>} : vector<25x144xbf16>, vector<144x32xbf16>, vector<25x32xf32> -> vector<25x32xf32>
    %112 = arith.truncf %111 : vector<25x32xf32> to vector<25x32xbf16>
    %c0_90 = arith.constant 0 : index
    %c0_91 = arith.constant 0 : index
    %c0_92 = arith.constant 0 : index
    %113 = vector.load %arg10[%c0_90, %c0_91, %c0_92] : memref<9x32x48xbf16, #tpu.memory_space<vmem>>, vector<1x32x48xbf16>
    %114 = vector.shape_cast %113 : vector<1x32x48xbf16> to vector<32x48xbf16>
    %cst_93 = arith.constant dense<0.000000e+00> : vector<25x48xf32>
    %115 = tpu.matmul %112, %114, %cst_93 {dimension_numbers = #tpu.dot_dimension_numbers<[1], [0], [0], [1], [0, 0, 1, 1], [], []>} : vector<25x32xbf16>, vector<32x48xbf16>, vector<25x48xf32> -> vector<25x48xf32>
    %116 = arith.addf %108, %115 : vector<25x48xf32>
    %c1_94 = arith.constant 1 : index
    %c0_95 = arith.constant 0 : index
    %c0_96 = arith.constant 0 : index
    %117 = vector.load %arg9[%c1_94, %c0_95, %c0_96] : memref<9x25x144xbf16, #tpu.memory_space<vmem>>, vector<1x25x144xbf16>
    %118 = vector.shape_cast %117 : vector<1x25x144xbf16> to vector<25x144xbf16>
    %cst_97 = arith.constant dense<0.000000e+00> : vector<25x32xf32>
    %119 = tpu.matmul %118, %107, %cst_97 {dimension_numbers = #tpu.dot_dimension_numbers<[1], [0], [0], [1], [0, 0, 1, 1], [], []>} : vector<25x144xbf16>, vector<144x32xbf16>, vector<25x32xf32> -> vector<25x32xf32>
    %120 = arith.truncf %119 : vector<25x32xf32> to vector<25x32xbf16>
    %c1_98 = arith.constant 1 : index
    %c0_99 = arith.constant 0 : index
    %c0_100 = arith.constant 0 : index
    %121 = vector.load %arg10[%c1_98, %c0_99, %c0_100] : memref<9x32x48xbf16, #tpu.memory_space<vmem>>, vector<1x32x48xbf16>
    %122 = vector.shape_cast %121 : vector<1x32x48xbf16> to vector<32x48xbf16>
    %cst_101 = arith.constant dense<0.000000e+00> : vector<25x48xf32>
    %123 = tpu.matmul %120, %122, %cst_101 {dimension_numbers = #tpu.dot_dimension_numbers<[1], [0], [0], [1], [0, 0, 1, 1], [], []>} : vector<25x32xbf16>, vector<32x48xbf16>, vector<25x48xf32> -> vector<25x48xf32>
    %124 = arith.addf %116, %123 : vector<25x48xf32>
    %c2_102 = arith.constant 2 : index
    %c0_103 = arith.constant 0 : index
    %c0_104 = arith.constant 0 : index
    %125 = vector.load %arg9[%c2_102, %c0_103, %c0_104] : memref<9x25x144xbf16, #tpu.memory_space<vmem>>, vector<1x25x144xbf16>
    %126 = vector.shape_cast %125 : vector<1x25x144xbf16> to vector<25x144xbf16>
    %cst_105 = arith.constant dense<0.000000e+00> : vector<25x32xf32>
    %127 = tpu.matmul %126, %107, %cst_105 {dimension_numbers = #tpu.dot_dimension_numbers<[1], [0], [0], [1], [0, 0, 1, 1], [], []>} : vector<25x144xbf16>, vector<144x32xbf16>, vector<25x32xf32> -> vector<25x32xf32>
    %128 = arith.truncf %127 : vector<25x32xf32> to vector<25x32xbf16>
    %c2_106 = arith.constant 2 : index
    %c0_107 = arith.constant 0 : index
    %c0_108 = arith.constant 0 : index
    %129 = vector.load %arg10[%c2_106, %c0_107, %c0_108] : memref<9x32x48xbf16, #tpu.memory_space<vmem>>, vector<1x32x48xbf16>
    %130 = vector.shape_cast %129 : vector<1x32x48xbf16> to vector<32x48xbf16>
    %cst_109 = arith.constant dense<0.000000e+00> : vector<25x48xf32>
    %131 = tpu.matmul %128, %130, %cst_109 {dimension_numbers = #tpu.dot_dimension_numbers<[1], [0], [0], [1], [0, 0, 1, 1], [], []>} : vector<25x32xbf16>, vector<32x48xbf16>, vector<25x48xf32> -> vector<25x48xf32>
    %132 = arith.addf %124, %131 : vector<25x48xf32>
    %c3_110 = arith.constant 3 : index
    %c0_111 = arith.constant 0 : index
    %c0_112 = arith.constant 0 : index
    %133 = vector.load %arg9[%c3_110, %c0_111, %c0_112] : memref<9x25x144xbf16, #tpu.memory_space<vmem>>, vector<1x25x144xbf16>
    %134 = vector.shape_cast %133 : vector<1x25x144xbf16> to vector<25x144xbf16>
    %cst_113 = arith.constant dense<0.000000e+00> : vector<25x32xf32>
    %135 = tpu.matmul %134, %107, %cst_113 {dimension_numbers = #tpu.dot_dimension_numbers<[1], [0], [0], [1], [0, 0, 1, 1], [], []>} : vector<25x144xbf16>, vector<144x32xbf16>, vector<25x32xf32> -> vector<25x32xf32>
    %136 = arith.truncf %135 : vector<25x32xf32> to vector<25x32xbf16>
    %c3_114 = arith.constant 3 : index
    %c0_115 = arith.constant 0 : index
    %c0_116 = arith.constant 0 : index
    %137 = vector.load %arg10[%c3_114, %c0_115, %c0_116] : memref<9x32x48xbf16, #tpu.memory_space<vmem>>, vector<1x32x48xbf16>
    %138 = vector.shape_cast %137 : vector<1x32x48xbf16> to vector<32x48xbf16>
    %cst_117 = arith.constant dense<0.000000e+00> : vector<25x48xf32>
    %139 = tpu.matmul %136, %138, %cst_117 {dimension_numbers = #tpu.dot_dimension_numbers<[1], [0], [0], [1], [0, 0, 1, 1], [], []>} : vector<25x32xbf16>, vector<32x48xbf16>, vector<25x48xf32> -> vector<25x48xf32>
    %140 = arith.addf %132, %139 : vector<25x48xf32>
    %c4_118 = arith.constant 4 : index
    %c0_119 = arith.constant 0 : index
    %c0_120 = arith.constant 0 : index
    %141 = vector.load %arg9[%c4_118, %c0_119, %c0_120] : memref<9x25x144xbf16, #tpu.memory_space<vmem>>, vector<1x25x144xbf16>
    %142 = vector.shape_cast %141 : vector<1x25x144xbf16> to vector<25x144xbf16>
    %cst_121 = arith.constant dense<0.000000e+00> : vector<25x32xf32>
    %143 = tpu.matmul %142, %107, %cst_121 {dimension_numbers = #tpu.dot_dimension_numbers<[1], [0], [0], [1], [0, 0, 1, 1], [], []>} : vector<25x144xbf16>, vector<144x32xbf16>, vector<25x32xf32> -> vector<25x32xf32>
    %144 = arith.truncf %143 : vector<25x32xf32> to vector<25x32xbf16>
    %c4_122 = arith.constant 4 : index
    %c0_123 = arith.constant 0 : index
    %c0_124 = arith.constant 0 : index
    %145 = vector.load %arg10[%c4_122, %c0_123, %c0_124] : memref<9x32x48xbf16, #tpu.memory_space<vmem>>, vector<1x32x48xbf16>
    %146 = vector.shape_cast %145 : vector<1x32x48xbf16> to vector<32x48xbf16>
    %cst_125 = arith.constant dense<0.000000e+00> : vector<25x48xf32>
    %147 = tpu.matmul %144, %146, %cst_125 {dimension_numbers = #tpu.dot_dimension_numbers<[1], [0], [0], [1], [0, 0, 1, 1], [], []>} : vector<25x32xbf16>, vector<32x48xbf16>, vector<25x48xf32> -> vector<25x48xf32>
    %148 = arith.addf %140, %147 : vector<25x48xf32>
    %c5_126 = arith.constant 5 : index
    %c0_127 = arith.constant 0 : index
    %c0_128 = arith.constant 0 : index
    %149 = vector.load %arg9[%c5_126, %c0_127, %c0_128] : memref<9x25x144xbf16, #tpu.memory_space<vmem>>, vector<1x25x144xbf16>
    %150 = vector.shape_cast %149 : vector<1x25x144xbf16> to vector<25x144xbf16>
    %cst_129 = arith.constant dense<0.000000e+00> : vector<25x32xf32>
    %151 = tpu.matmul %150, %107, %cst_129 {dimension_numbers = #tpu.dot_dimension_numbers<[1], [0], [0], [1], [0, 0, 1, 1], [], []>} : vector<25x144xbf16>, vector<144x32xbf16>, vector<25x32xf32> -> vector<25x32xf32>
    %152 = arith.truncf %151 : vector<25x32xf32> to vector<25x32xbf16>
    %c5_130 = arith.constant 5 : index
    %c0_131 = arith.constant 0 : index
    %c0_132 = arith.constant 0 : index
    %153 = vector.load %arg10[%c5_130, %c0_131, %c0_132] : memref<9x32x48xbf16, #tpu.memory_space<vmem>>, vector<1x32x48xbf16>
    %154 = vector.shape_cast %153 : vector<1x32x48xbf16> to vector<32x48xbf16>
    %cst_133 = arith.constant dense<0.000000e+00> : vector<25x48xf32>
    %155 = tpu.matmul %152, %154, %cst_133 {dimension_numbers = #tpu.dot_dimension_numbers<[1], [0], [0], [1], [0, 0, 1, 1], [], []>} : vector<25x32xbf16>, vector<32x48xbf16>, vector<25x48xf32> -> vector<25x48xf32>
    %156 = arith.addf %148, %155 : vector<25x48xf32>
    %c6_134 = arith.constant 6 : index
    %c0_135 = arith.constant 0 : index
    %c0_136 = arith.constant 0 : index
    %157 = vector.load %arg9[%c6_134, %c0_135, %c0_136] : memref<9x25x144xbf16, #tpu.memory_space<vmem>>, vector<1x25x144xbf16>
    %158 = vector.shape_cast %157 : vector<1x25x144xbf16> to vector<25x144xbf16>
    %cst_137 = arith.constant dense<0.000000e+00> : vector<25x32xf32>
    %159 = tpu.matmul %158, %107, %cst_137 {dimension_numbers = #tpu.dot_dimension_numbers<[1], [0], [0], [1], [0, 0, 1, 1], [], []>} : vector<25x144xbf16>, vector<144x32xbf16>, vector<25x32xf32> -> vector<25x32xf32>
    %160 = arith.truncf %159 : vector<25x32xf32> to vector<25x32xbf16>
    %c6_138 = arith.constant 6 : index
    %c0_139 = arith.constant 0 : index
    %c0_140 = arith.constant 0 : index
    %161 = vector.load %arg10[%c6_138, %c0_139, %c0_140] : memref<9x32x48xbf16, #tpu.memory_space<vmem>>, vector<1x32x48xbf16>
    %162 = vector.shape_cast %161 : vector<1x32x48xbf16> to vector<32x48xbf16>
    %cst_141 = arith.constant dense<0.000000e+00> : vector<25x48xf32>
    %163 = tpu.matmul %160, %162, %cst_141 {dimension_numbers = #tpu.dot_dimension_numbers<[1], [0], [0], [1], [0, 0, 1, 1], [], []>} : vector<25x32xbf16>, vector<32x48xbf16>, vector<25x48xf32> -> vector<25x48xf32>
    %164 = arith.addf %156, %163 : vector<25x48xf32>
    %c7_142 = arith.constant 7 : index
    %c0_143 = arith.constant 0 : index
    %c0_144 = arith.constant 0 : index
    %165 = vector.load %arg9[%c7_142, %c0_143, %c0_144] : memref<9x25x144xbf16, #tpu.memory_space<vmem>>, vector<1x25x144xbf16>
    %166 = vector.shape_cast %165 : vector<1x25x144xbf16> to vector<25x144xbf16>
    %cst_145 = arith.constant dense<0.000000e+00> : vector<25x32xf32>
    %167 = tpu.matmul %166, %107, %cst_145 {dimension_numbers = #tpu.dot_dimension_numbers<[1], [0], [0], [1], [0, 0, 1, 1], [], []>} : vector<25x144xbf16>, vector<144x32xbf16>, vector<25x32xf32> -> vector<25x32xf32>
    %168 = arith.truncf %167 : vector<25x32xf32> to vector<25x32xbf16>
    %c7_146 = arith.constant 7 : index
    %c0_147 = arith.constant 0 : index
    %c0_148 = arith.constant 0 : index
    %169 = vector.load %arg10[%c7_146, %c0_147, %c0_148] : memref<9x32x48xbf16, #tpu.memory_space<vmem>>, vector<1x32x48xbf16>
    %170 = vector.shape_cast %169 : vector<1x32x48xbf16> to vector<32x48xbf16>
    %cst_149 = arith.constant dense<0.000000e+00> : vector<25x48xf32>
    %171 = tpu.matmul %168, %170, %cst_149 {dimension_numbers = #tpu.dot_dimension_numbers<[1], [0], [0], [1], [0, 0, 1, 1], [], []>} : vector<25x32xbf16>, vector<32x48xbf16>, vector<25x48xf32> -> vector<25x48xf32>
    %172 = arith.addf %164, %171 : vector<25x48xf32>
    %c8_150 = arith.constant 8 : index
    %c0_151 = arith.constant 0 : index
    %c0_152 = arith.constant 0 : index
    %173 = vector.load %arg9[%c8_150, %c0_151, %c0_152] : memref<9x25x144xbf16, #tpu.memory_space<vmem>>, vector<1x25x144xbf16>
    %174 = vector.shape_cast %173 : vector<1x25x144xbf16> to vector<25x144xbf16>
    %cst_153 = arith.constant dense<0.000000e+00> : vector<25x32xf32>
    %175 = tpu.matmul %174, %107, %cst_153 {dimension_numbers = #tpu.dot_dimension_numbers<[1], [0], [0], [1], [0, 0, 1, 1], [], []>} : vector<25x144xbf16>, vector<144x32xbf16>, vector<25x32xf32> -> vector<25x32xf32>
    %176 = arith.truncf %175 : vector<25x32xf32> to vector<25x32xbf16>
    %c8_154 = arith.constant 8 : index
    %c0_155 = arith.constant 0 : index
    %c0_156 = arith.constant 0 : index
    %177 = vector.load %arg10[%c8_154, %c0_155, %c0_156] : memref<9x32x48xbf16, #tpu.memory_space<vmem>>, vector<1x32x48xbf16>
    %178 = vector.shape_cast %177 : vector<1x32x48xbf16> to vector<32x48xbf16>
    %cst_157 = arith.constant dense<0.000000e+00> : vector<25x48xf32>
    %179 = tpu.matmul %176, %178, %cst_157 {dimension_numbers = #tpu.dot_dimension_numbers<[1], [0], [0], [1], [0, 0, 1, 1], [], []>} : vector<25x32xbf16>, vector<32x48xbf16>, vector<25x48xf32> -> vector<25x48xf32>
    %180 = arith.addf %172, %179 : vector<25x48xf32>
    %c0_158 = arith.constant 0 : index
    %c0_159 = arith.constant 0 : index
    %181 = vector.load %arg11[%c0_158, %c0_159] : memref<1x48xf32, #tpu.memory_space<vmem>>, vector<1x48xf32>
    %182 = vector.broadcast %181 : vector<1x48xf32> to vector<25x48xf32>
    %183 = arith.addf %180, %182 : vector<25x48xf32>
    %cst_160 = arith.constant 0.000000e+00 : f32
    %184 = vector.broadcast %cst_160 : f32 to vector<25x48xf32>
    %185 = arith.maximumf %183, %184 : vector<25x48xf32>
    %cst_161 = arith.constant dense<0.000000e+00> : vector<48xf32>
    %186 = vector.multi_reduction <add>, %185, %cst_161 [0] : vector<25x48xf32> to vector<48xf32>
    %187 = vector.shape_cast %186 : vector<48xf32> to vector<1x48xf32>
    %cst_162 = arith.constant 2.500000e+01 : f32
    %188 = vector.broadcast %cst_162 : f32 to vector<1x48xf32>
    %189 = arith.divf %187, %188 : vector<1x48xf32>
    %190 = arith.truncf %189 : vector<1x48xf32> to vector<1x48xbf16>
    %c0_163 = arith.constant 0 : index
    %c0_164 = arith.constant 0 : index
    %191 = vector.load %arg12[%c0_163, %c0_164] : memref<48x48xbf16, #tpu.memory_space<vmem>>, vector<48x48xbf16>
    %cst_165 = arith.constant dense<0.000000e+00> : vector<1x48xf32>
    %192 = tpu.matmul %190, %191, %cst_165 {dimension_numbers = #tpu.dot_dimension_numbers<[1], [0], [0], [1], [0, 0, 1, 1], [], []>} : vector<1x48xbf16>, vector<48x48xbf16>, vector<1x48xf32> -> vector<1x48xf32>
    %cst_166 = arith.constant 0.000000e+00 : f32
    %193 = vector.broadcast %cst_166 : f32 to vector<1x48xf32>
    %194 = arith.maximumf %192, %193 : vector<1x48xf32>
    %195 = arith.truncf %194 : vector<1x48xf32> to vector<1x48xbf16>
    %c0_167 = arith.constant 0 : index
    %c0_168 = arith.constant 0 : index
    %196 = vector.load %arg13[%c0_167, %c0_168] : memref<48x48xbf16, #tpu.memory_space<vmem>>, vector<48x48xbf16>
    %cst_169 = arith.constant dense<0.000000e+00> : vector<1x48xf32>
    %197 = tpu.matmul %195, %196, %cst_169 {dimension_numbers = #tpu.dot_dimension_numbers<[1], [0], [0], [1], [0, 0, 1, 1], [], []>} : vector<1x48xbf16>, vector<48x48xbf16>, vector<1x48xf32> -> vector<1x48xf32>
    %198 = arith.negf %197 : vector<1x48xf32>
    %199 = math.exp %198 : vector<1x48xf32>
    %cst_170 = arith.constant 1.000000e+00 : f32
    %200 = vector.broadcast %cst_170 : f32 to vector<1x48xf32>
    %201 = arith.addf %200, %199 : vector<1x48xf32>
    %202 = arith.divf %200, %201 : vector<1x48xf32>
    %203 = vector.broadcast %202 : vector<1x48xf32> to vector<25x48xf32>
    %204 = arith.mulf %185, %203 : vector<25x48xf32>
    %cst_171 = arith.constant 0.000000e+00 : f32
    %205 = vector.broadcast %cst_171 : f32 to vector<1x108xf32>
    %206 = vector.extract_strided_slice %204 {offsets = [0, 0], sizes = [1, 48], strides = [1, 1]} : vector<25x48xf32> to vector<1x48xf32>
    %207 = arith.truncf %206 : vector<1x48xf32> to vector<1x48xbf16>
    %c0_172 = arith.constant 0 : index
    %c0_173 = arith.constant 0 : index
    %c0_174 = arith.constant 0 : index
    %208 = vector.load %arg14[%c0_172, %c0_173, %c0_174] : memref<25x48x108xbf16, #tpu.memory_space<vmem>>, vector<1x48x108xbf16>
    %209 = vector.shape_cast %208 : vector<1x48x108xbf16> to vector<48x108xbf16>
    %cst_175 = arith.constant dense<0.000000e+00> : vector<1x108xf32>
    %210 = tpu.matmul %207, %209, %cst_175 {dimension_numbers = #tpu.dot_dimension_numbers<[1], [0], [0], [1], [0, 0, 1, 1], [], []>} : vector<1x48xbf16>, vector<48x108xbf16>, vector<1x108xf32> -> vector<1x108xf32>
    %211 = arith.addf %205, %210 : vector<1x108xf32>
    %212 = vector.extract_strided_slice %204 {offsets = [1, 0], sizes = [1, 48], strides = [1, 1]} : vector<25x48xf32> to vector<1x48xf32>
    %213 = arith.truncf %212 : vector<1x48xf32> to vector<1x48xbf16>
    %c1_176 = arith.constant 1 : index
    %c0_177 = arith.constant 0 : index
    %c0_178 = arith.constant 0 : index
    %214 = vector.load %arg14[%c1_176, %c0_177, %c0_178] : memref<25x48x108xbf16, #tpu.memory_space<vmem>>, vector<1x48x108xbf16>
    %215 = vector.shape_cast %214 : vector<1x48x108xbf16> to vector<48x108xbf16>
    %cst_179 = arith.constant dense<0.000000e+00> : vector<1x108xf32>
    %216 = tpu.matmul %213, %215, %cst_179 {dimension_numbers = #tpu.dot_dimension_numbers<[1], [0], [0], [1], [0, 0, 1, 1], [], []>} : vector<1x48xbf16>, vector<48x108xbf16>, vector<1x108xf32> -> vector<1x108xf32>
    %217 = arith.addf %211, %216 : vector<1x108xf32>
    %218 = vector.extract_strided_slice %204 {offsets = [2, 0], sizes = [1, 48], strides = [1, 1]} : vector<25x48xf32> to vector<1x48xf32>
    %219 = arith.truncf %218 : vector<1x48xf32> to vector<1x48xbf16>
    %c2_180 = arith.constant 2 : index
    %c0_181 = arith.constant 0 : index
    %c0_182 = arith.constant 0 : index
    %220 = vector.load %arg14[%c2_180, %c0_181, %c0_182] : memref<25x48x108xbf16, #tpu.memory_space<vmem>>, vector<1x48x108xbf16>
    %221 = vector.shape_cast %220 : vector<1x48x108xbf16> to vector<48x108xbf16>
    %cst_183 = arith.constant dense<0.000000e+00> : vector<1x108xf32>
    %222 = tpu.matmul %219, %221, %cst_183 {dimension_numbers = #tpu.dot_dimension_numbers<[1], [0], [0], [1], [0, 0, 1, 1], [], []>} : vector<1x48xbf16>, vector<48x108xbf16>, vector<1x108xf32> -> vector<1x108xf32>
    %223 = arith.addf %217, %222 : vector<1x108xf32>
    %224 = vector.extract_strided_slice %204 {offsets = [3, 0], sizes = [1, 48], strides = [1, 1]} : vector<25x48xf32> to vector<1x48xf32>
    %225 = arith.truncf %224 : vector<1x48xf32> to vector<1x48xbf16>
    %c3_184 = arith.constant 3 : index
    %c0_185 = arith.constant 0 : index
    %c0_186 = arith.constant 0 : index
    %226 = vector.load %arg14[%c3_184, %c0_185, %c0_186] : memref<25x48x108xbf16, #tpu.memory_space<vmem>>, vector<1x48x108xbf16>
    %227 = vector.shape_cast %226 : vector<1x48x108xbf16> to vector<48x108xbf16>
    %cst_187 = arith.constant dense<0.000000e+00> : vector<1x108xf32>
    %228 = tpu.matmul %225, %227, %cst_187 {dimension_numbers = #tpu.dot_dimension_numbers<[1], [0], [0], [1], [0, 0, 1, 1], [], []>} : vector<1x48xbf16>, vector<48x108xbf16>, vector<1x108xf32> -> vector<1x108xf32>
    %229 = arith.addf %223, %228 : vector<1x108xf32>
    %230 = vector.extract_strided_slice %204 {offsets = [4, 0], sizes = [1, 48], strides = [1, 1]} : vector<25x48xf32> to vector<1x48xf32>
    %231 = arith.truncf %230 : vector<1x48xf32> to vector<1x48xbf16>
    %c4_188 = arith.constant 4 : index
    %c0_189 = arith.constant 0 : index
    %c0_190 = arith.constant 0 : index
    %232 = vector.load %arg14[%c4_188, %c0_189, %c0_190] : memref<25x48x108xbf16, #tpu.memory_space<vmem>>, vector<1x48x108xbf16>
    %233 = vector.shape_cast %232 : vector<1x48x108xbf16> to vector<48x108xbf16>
    %cst_191 = arith.constant dense<0.000000e+00> : vector<1x108xf32>
    %234 = tpu.matmul %231, %233, %cst_191 {dimension_numbers = #tpu.dot_dimension_numbers<[1], [0], [0], [1], [0, 0, 1, 1], [], []>} : vector<1x48xbf16>, vector<48x108xbf16>, vector<1x108xf32> -> vector<1x108xf32>
    %235 = arith.addf %229, %234 : vector<1x108xf32>
    %236 = vector.extract_strided_slice %204 {offsets = [5, 0], sizes = [1, 48], strides = [1, 1]} : vector<25x48xf32> to vector<1x48xf32>
    %237 = arith.truncf %236 : vector<1x48xf32> to vector<1x48xbf16>
    %c5_192 = arith.constant 5 : index
    %c0_193 = arith.constant 0 : index
    %c0_194 = arith.constant 0 : index
    %238 = vector.load %arg14[%c5_192, %c0_193, %c0_194] : memref<25x48x108xbf16, #tpu.memory_space<vmem>>, vector<1x48x108xbf16>
    %239 = vector.shape_cast %238 : vector<1x48x108xbf16> to vector<48x108xbf16>
    %cst_195 = arith.constant dense<0.000000e+00> : vector<1x108xf32>
    %240 = tpu.matmul %237, %239, %cst_195 {dimension_numbers = #tpu.dot_dimension_numbers<[1], [0], [0], [1], [0, 0, 1, 1], [], []>} : vector<1x48xbf16>, vector<48x108xbf16>, vector<1x108xf32> -> vector<1x108xf32>
    %241 = arith.addf %235, %240 : vector<1x108xf32>
    %242 = vector.extract_strided_slice %204 {offsets = [6, 0], sizes = [1, 48], strides = [1, 1]} : vector<25x48xf32> to vector<1x48xf32>
    %243 = arith.truncf %242 : vector<1x48xf32> to vector<1x48xbf16>
    %c6_196 = arith.constant 6 : index
    %c0_197 = arith.constant 0 : index
    %c0_198 = arith.constant 0 : index
    %244 = vector.load %arg14[%c6_196, %c0_197, %c0_198] : memref<25x48x108xbf16, #tpu.memory_space<vmem>>, vector<1x48x108xbf16>
    %245 = vector.shape_cast %244 : vector<1x48x108xbf16> to vector<48x108xbf16>
    %cst_199 = arith.constant dense<0.000000e+00> : vector<1x108xf32>
    %246 = tpu.matmul %243, %245, %cst_199 {dimension_numbers = #tpu.dot_dimension_numbers<[1], [0], [0], [1], [0, 0, 1, 1], [], []>} : vector<1x48xbf16>, vector<48x108xbf16>, vector<1x108xf32> -> vector<1x108xf32>
    %247 = arith.addf %241, %246 : vector<1x108xf32>
    %248 = vector.extract_strided_slice %204 {offsets = [7, 0], sizes = [1, 48], strides = [1, 1]} : vector<25x48xf32> to vector<1x48xf32>
    %249 = arith.truncf %248 : vector<1x48xf32> to vector<1x48xbf16>
    %c7_200 = arith.constant 7 : index
    %c0_201 = arith.constant 0 : index
    %c0_202 = arith.constant 0 : index
    %250 = vector.load %arg14[%c7_200, %c0_201, %c0_202] : memref<25x48x108xbf16, #tpu.memory_space<vmem>>, vector<1x48x108xbf16>
    %251 = vector.shape_cast %250 : vector<1x48x108xbf16> to vector<48x108xbf16>
    %cst_203 = arith.constant dense<0.000000e+00> : vector<1x108xf32>
    %252 = tpu.matmul %249, %251, %cst_203 {dimension_numbers = #tpu.dot_dimension_numbers<[1], [0], [0], [1], [0, 0, 1, 1], [], []>} : vector<1x48xbf16>, vector<48x108xbf16>, vector<1x108xf32> -> vector<1x108xf32>
    %253 = arith.addf %247, %252 : vector<1x108xf32>
    %254 = vector.extract_strided_slice %204 {offsets = [8, 0], sizes = [1, 48], strides = [1, 1]} : vector<25x48xf32> to vector<1x48xf32>
    %255 = arith.truncf %254 : vector<1x48xf32> to vector<1x48xbf16>
    %c8_204 = arith.constant 8 : index
    %c0_205 = arith.constant 0 : index
    %c0_206 = arith.constant 0 : index
    %256 = vector.load %arg14[%c8_204, %c0_205, %c0_206] : memref<25x48x108xbf16, #tpu.memory_space<vmem>>, vector<1x48x108xbf16>
    %257 = vector.shape_cast %256 : vector<1x48x108xbf16> to vector<48x108xbf16>
    %cst_207 = arith.constant dense<0.000000e+00> : vector<1x108xf32>
    %258 = tpu.matmul %255, %257, %cst_207 {dimension_numbers = #tpu.dot_dimension_numbers<[1], [0], [0], [1], [0, 0, 1, 1], [], []>} : vector<1x48xbf16>, vector<48x108xbf16>, vector<1x108xf32> -> vector<1x108xf32>
    %259 = arith.addf %253, %258 : vector<1x108xf32>
    %260 = vector.extract_strided_slice %204 {offsets = [9, 0], sizes = [1, 48], strides = [1, 1]} : vector<25x48xf32> to vector<1x48xf32>
    %261 = arith.truncf %260 : vector<1x48xf32> to vector<1x48xbf16>
    %c9 = arith.constant 9 : index
    %c0_208 = arith.constant 0 : index
    %c0_209 = arith.constant 0 : index
    %262 = vector.load %arg14[%c9, %c0_208, %c0_209] : memref<25x48x108xbf16, #tpu.memory_space<vmem>>, vector<1x48x108xbf16>
    %263 = vector.shape_cast %262 : vector<1x48x108xbf16> to vector<48x108xbf16>
    %cst_210 = arith.constant dense<0.000000e+00> : vector<1x108xf32>
    %264 = tpu.matmul %261, %263, %cst_210 {dimension_numbers = #tpu.dot_dimension_numbers<[1], [0], [0], [1], [0, 0, 1, 1], [], []>} : vector<1x48xbf16>, vector<48x108xbf16>, vector<1x108xf32> -> vector<1x108xf32>
    %265 = arith.addf %259, %264 : vector<1x108xf32>
    %266 = vector.extract_strided_slice %204 {offsets = [10, 0], sizes = [1, 48], strides = [1, 1]} : vector<25x48xf32> to vector<1x48xf32>
    %267 = arith.truncf %266 : vector<1x48xf32> to vector<1x48xbf16>
    %c10 = arith.constant 10 : index
    %c0_211 = arith.constant 0 : index
    %c0_212 = arith.constant 0 : index
    %268 = vector.load %arg14[%c10, %c0_211, %c0_212] : memref<25x48x108xbf16, #tpu.memory_space<vmem>>, vector<1x48x108xbf16>
    %269 = vector.shape_cast %268 : vector<1x48x108xbf16> to vector<48x108xbf16>
    %cst_213 = arith.constant dense<0.000000e+00> : vector<1x108xf32>
    %270 = tpu.matmul %267, %269, %cst_213 {dimension_numbers = #tpu.dot_dimension_numbers<[1], [0], [0], [1], [0, 0, 1, 1], [], []>} : vector<1x48xbf16>, vector<48x108xbf16>, vector<1x108xf32> -> vector<1x108xf32>
    %271 = arith.addf %265, %270 : vector<1x108xf32>
    %272 = vector.extract_strided_slice %204 {offsets = [11, 0], sizes = [1, 48], strides = [1, 1]} : vector<25x48xf32> to vector<1x48xf32>
    %273 = arith.truncf %272 : vector<1x48xf32> to vector<1x48xbf16>
    %c11 = arith.constant 11 : index
    %c0_214 = arith.constant 0 : index
    %c0_215 = arith.constant 0 : index
    %274 = vector.load %arg14[%c11, %c0_214, %c0_215] : memref<25x48x108xbf16, #tpu.memory_space<vmem>>, vector<1x48x108xbf16>
    %275 = vector.shape_cast %274 : vector<1x48x108xbf16> to vector<48x108xbf16>
    %cst_216 = arith.constant dense<0.000000e+00> : vector<1x108xf32>
    %276 = tpu.matmul %273, %275, %cst_216 {dimension_numbers = #tpu.dot_dimension_numbers<[1], [0], [0], [1], [0, 0, 1, 1], [], []>} : vector<1x48xbf16>, vector<48x108xbf16>, vector<1x108xf32> -> vector<1x108xf32>
    %277 = arith.addf %271, %276 : vector<1x108xf32>
    %278 = vector.extract_strided_slice %204 {offsets = [12, 0], sizes = [1, 48], strides = [1, 1]} : vector<25x48xf32> to vector<1x48xf32>
    %279 = arith.truncf %278 : vector<1x48xf32> to vector<1x48xbf16>
    %c12 = arith.constant 12 : index
    %c0_217 = arith.constant 0 : index
    %c0_218 = arith.constant 0 : index
    %280 = vector.load %arg14[%c12, %c0_217, %c0_218] : memref<25x48x108xbf16, #tpu.memory_space<vmem>>, vector<1x48x108xbf16>
    %281 = vector.shape_cast %280 : vector<1x48x108xbf16> to vector<48x108xbf16>
    %cst_219 = arith.constant dense<0.000000e+00> : vector<1x108xf32>
    %282 = tpu.matmul %279, %281, %cst_219 {dimension_numbers = #tpu.dot_dimension_numbers<[1], [0], [0], [1], [0, 0, 1, 1], [], []>} : vector<1x48xbf16>, vector<48x108xbf16>, vector<1x108xf32> -> vector<1x108xf32>
    %283 = arith.addf %277, %282 : vector<1x108xf32>
    %284 = vector.extract_strided_slice %204 {offsets = [13, 0], sizes = [1, 48], strides = [1, 1]} : vector<25x48xf32> to vector<1x48xf32>
    %285 = arith.truncf %284 : vector<1x48xf32> to vector<1x48xbf16>
    %c13 = arith.constant 13 : index
    %c0_220 = arith.constant 0 : index
    %c0_221 = arith.constant 0 : index
    %286 = vector.load %arg14[%c13, %c0_220, %c0_221] : memref<25x48x108xbf16, #tpu.memory_space<vmem>>, vector<1x48x108xbf16>
    %287 = vector.shape_cast %286 : vector<1x48x108xbf16> to vector<48x108xbf16>
    %cst_222 = arith.constant dense<0.000000e+00> : vector<1x108xf32>
    %288 = tpu.matmul %285, %287, %cst_222 {dimension_numbers = #tpu.dot_dimension_numbers<[1], [0], [0], [1], [0, 0, 1, 1], [], []>} : vector<1x48xbf16>, vector<48x108xbf16>, vector<1x108xf32> -> vector<1x108xf32>
    %289 = arith.addf %283, %288 : vector<1x108xf32>
    %290 = vector.extract_strided_slice %204 {offsets = [14, 0], sizes = [1, 48], strides = [1, 1]} : vector<25x48xf32> to vector<1x48xf32>
    %291 = arith.truncf %290 : vector<1x48xf32> to vector<1x48xbf16>
    %c14 = arith.constant 14 : index
    %c0_223 = arith.constant 0 : index
    %c0_224 = arith.constant 0 : index
    %292 = vector.load %arg14[%c14, %c0_223, %c0_224] : memref<25x48x108xbf16, #tpu.memory_space<vmem>>, vector<1x48x108xbf16>
    %293 = vector.shape_cast %292 : vector<1x48x108xbf16> to vector<48x108xbf16>
    %cst_225 = arith.constant dense<0.000000e+00> : vector<1x108xf32>
    %294 = tpu.matmul %291, %293, %cst_225 {dimension_numbers = #tpu.dot_dimension_numbers<[1], [0], [0], [1], [0, 0, 1, 1], [], []>} : vector<1x48xbf16>, vector<48x108xbf16>, vector<1x108xf32> -> vector<1x108xf32>
    %295 = arith.addf %289, %294 : vector<1x108xf32>
    %296 = vector.extract_strided_slice %204 {offsets = [15, 0], sizes = [1, 48], strides = [1, 1]} : vector<25x48xf32> to vector<1x48xf32>
    %297 = arith.truncf %296 : vector<1x48xf32> to vector<1x48xbf16>
    %c15 = arith.constant 15 : index
    %c0_226 = arith.constant 0 : index
    %c0_227 = arith.constant 0 : index
    %298 = vector.load %arg14[%c15, %c0_226, %c0_227] : memref<25x48x108xbf16, #tpu.memory_space<vmem>>, vector<1x48x108xbf16>
    %299 = vector.shape_cast %298 : vector<1x48x108xbf16> to vector<48x108xbf16>
    %cst_228 = arith.constant dense<0.000000e+00> : vector<1x108xf32>
    %300 = tpu.matmul %297, %299, %cst_228 {dimension_numbers = #tpu.dot_dimension_numbers<[1], [0], [0], [1], [0, 0, 1, 1], [], []>} : vector<1x48xbf16>, vector<48x108xbf16>, vector<1x108xf32> -> vector<1x108xf32>
    %301 = arith.addf %295, %300 : vector<1x108xf32>
    %302 = vector.extract_strided_slice %204 {offsets = [16, 0], sizes = [1, 48], strides = [1, 1]} : vector<25x48xf32> to vector<1x48xf32>
    %303 = arith.truncf %302 : vector<1x48xf32> to vector<1x48xbf16>
    %c16 = arith.constant 16 : index
    %c0_229 = arith.constant 0 : index
    %c0_230 = arith.constant 0 : index
    %304 = vector.load %arg14[%c16, %c0_229, %c0_230] : memref<25x48x108xbf16, #tpu.memory_space<vmem>>, vector<1x48x108xbf16>
    %305 = vector.shape_cast %304 : vector<1x48x108xbf16> to vector<48x108xbf16>
    %cst_231 = arith.constant dense<0.000000e+00> : vector<1x108xf32>
    %306 = tpu.matmul %303, %305, %cst_231 {dimension_numbers = #tpu.dot_dimension_numbers<[1], [0], [0], [1], [0, 0, 1, 1], [], []>} : vector<1x48xbf16>, vector<48x108xbf16>, vector<1x108xf32> -> vector<1x108xf32>
    %307 = arith.addf %301, %306 : vector<1x108xf32>
    %308 = vector.extract_strided_slice %204 {offsets = [17, 0], sizes = [1, 48], strides = [1, 1]} : vector<25x48xf32> to vector<1x48xf32>
    %309 = arith.truncf %308 : vector<1x48xf32> to vector<1x48xbf16>
    %c17 = arith.constant 17 : index
    %c0_232 = arith.constant 0 : index
    %c0_233 = arith.constant 0 : index
    %310 = vector.load %arg14[%c17, %c0_232, %c0_233] : memref<25x48x108xbf16, #tpu.memory_space<vmem>>, vector<1x48x108xbf16>
    %311 = vector.shape_cast %310 : vector<1x48x108xbf16> to vector<48x108xbf16>
    %cst_234 = arith.constant dense<0.000000e+00> : vector<1x108xf32>
    %312 = tpu.matmul %309, %311, %cst_234 {dimension_numbers = #tpu.dot_dimension_numbers<[1], [0], [0], [1], [0, 0, 1, 1], [], []>} : vector<1x48xbf16>, vector<48x108xbf16>, vector<1x108xf32> -> vector<1x108xf32>
    %313 = arith.addf %307, %312 : vector<1x108xf32>
    %314 = vector.extract_strided_slice %204 {offsets = [18, 0], sizes = [1, 48], strides = [1, 1]} : vector<25x48xf32> to vector<1x48xf32>
    %315 = arith.truncf %314 : vector<1x48xf32> to vector<1x48xbf16>
    %c18 = arith.constant 18 : index
    %c0_235 = arith.constant 0 : index
    %c0_236 = arith.constant 0 : index
    %316 = vector.load %arg14[%c18, %c0_235, %c0_236] : memref<25x48x108xbf16, #tpu.memory_space<vmem>>, vector<1x48x108xbf16>
    %317 = vector.shape_cast %316 : vector<1x48x108xbf16> to vector<48x108xbf16>
    %cst_237 = arith.constant dense<0.000000e+00> : vector<1x108xf32>
    %318 = tpu.matmul %315, %317, %cst_237 {dimension_numbers = #tpu.dot_dimension_numbers<[1], [0], [0], [1], [0, 0, 1, 1], [], []>} : vector<1x48xbf16>, vector<48x108xbf16>, vector<1x108xf32> -> vector<1x108xf32>
    %319 = arith.addf %313, %318 : vector<1x108xf32>
    %320 = vector.extract_strided_slice %204 {offsets = [19, 0], sizes = [1, 48], strides = [1, 1]} : vector<25x48xf32> to vector<1x48xf32>
    %321 = arith.truncf %320 : vector<1x48xf32> to vector<1x48xbf16>
    %c19 = arith.constant 19 : index
    %c0_238 = arith.constant 0 : index
    %c0_239 = arith.constant 0 : index
    %322 = vector.load %arg14[%c19, %c0_238, %c0_239] : memref<25x48x108xbf16, #tpu.memory_space<vmem>>, vector<1x48x108xbf16>
    %323 = vector.shape_cast %322 : vector<1x48x108xbf16> to vector<48x108xbf16>
    %cst_240 = arith.constant dense<0.000000e+00> : vector<1x108xf32>
    %324 = tpu.matmul %321, %323, %cst_240 {dimension_numbers = #tpu.dot_dimension_numbers<[1], [0], [0], [1], [0, 0, 1, 1], [], []>} : vector<1x48xbf16>, vector<48x108xbf16>, vector<1x108xf32> -> vector<1x108xf32>
    %325 = arith.addf %319, %324 : vector<1x108xf32>
    %326 = vector.extract_strided_slice %204 {offsets = [20, 0], sizes = [1, 48], strides = [1, 1]} : vector<25x48xf32> to vector<1x48xf32>
    %327 = arith.truncf %326 : vector<1x48xf32> to vector<1x48xbf16>
    %c20 = arith.constant 20 : index
    %c0_241 = arith.constant 0 : index
    %c0_242 = arith.constant 0 : index
    %328 = vector.load %arg14[%c20, %c0_241, %c0_242] : memref<25x48x108xbf16, #tpu.memory_space<vmem>>, vector<1x48x108xbf16>
    %329 = vector.shape_cast %328 : vector<1x48x108xbf16> to vector<48x108xbf16>
    %cst_243 = arith.constant dense<0.000000e+00> : vector<1x108xf32>
    %330 = tpu.matmul %327, %329, %cst_243 {dimension_numbers = #tpu.dot_dimension_numbers<[1], [0], [0], [1], [0, 0, 1, 1], [], []>} : vector<1x48xbf16>, vector<48x108xbf16>, vector<1x108xf32> -> vector<1x108xf32>
    %331 = arith.addf %325, %330 : vector<1x108xf32>
    %332 = vector.extract_strided_slice %204 {offsets = [21, 0], sizes = [1, 48], strides = [1, 1]} : vector<25x48xf32> to vector<1x48xf32>
    %333 = arith.truncf %332 : vector<1x48xf32> to vector<1x48xbf16>
    %c21 = arith.constant 21 : index
    %c0_244 = arith.constant 0 : index
    %c0_245 = arith.constant 0 : index
    %334 = vector.load %arg14[%c21, %c0_244, %c0_245] : memref<25x48x108xbf16, #tpu.memory_space<vmem>>, vector<1x48x108xbf16>
    %335 = vector.shape_cast %334 : vector<1x48x108xbf16> to vector<48x108xbf16>
    %cst_246 = arith.constant dense<0.000000e+00> : vector<1x108xf32>
    %336 = tpu.matmul %333, %335, %cst_246 {dimension_numbers = #tpu.dot_dimension_numbers<[1], [0], [0], [1], [0, 0, 1, 1], [], []>} : vector<1x48xbf16>, vector<48x108xbf16>, vector<1x108xf32> -> vector<1x108xf32>
    %337 = arith.addf %331, %336 : vector<1x108xf32>
    %338 = vector.extract_strided_slice %204 {offsets = [22, 0], sizes = [1, 48], strides = [1, 1]} : vector<25x48xf32> to vector<1x48xf32>
    %339 = arith.truncf %338 : vector<1x48xf32> to vector<1x48xbf16>
    %c22 = arith.constant 22 : index
    %c0_247 = arith.constant 0 : index
    %c0_248 = arith.constant 0 : index
    %340 = vector.load %arg14[%c22, %c0_247, %c0_248] : memref<25x48x108xbf16, #tpu.memory_space<vmem>>, vector<1x48x108xbf16>
    %341 = vector.shape_cast %340 : vector<1x48x108xbf16> to vector<48x108xbf16>
    %cst_249 = arith.constant dense<0.000000e+00> : vector<1x108xf32>
    %342 = tpu.matmul %339, %341, %cst_249 {dimension_numbers = #tpu.dot_dimension_numbers<[1], [0], [0], [1], [0, 0, 1, 1], [], []>} : vector<1x48xbf16>, vector<48x108xbf16>, vector<1x108xf32> -> vector<1x108xf32>
    %343 = arith.addf %337, %342 : vector<1x108xf32>
    %344 = vector.extract_strided_slice %204 {offsets = [23, 0], sizes = [1, 48], strides = [1, 1]} : vector<25x48xf32> to vector<1x48xf32>
    %345 = arith.truncf %344 : vector<1x48xf32> to vector<1x48xbf16>
    %c23 = arith.constant 23 : index
    %c0_250 = arith.constant 0 : index
    %c0_251 = arith.constant 0 : index
    %346 = vector.load %arg14[%c23, %c0_250, %c0_251] : memref<25x48x108xbf16, #tpu.memory_space<vmem>>, vector<1x48x108xbf16>
    %347 = vector.shape_cast %346 : vector<1x48x108xbf16> to vector<48x108xbf16>
    %cst_252 = arith.constant dense<0.000000e+00> : vector<1x108xf32>
    %348 = tpu.matmul %345, %347, %cst_252 {dimension_numbers = #tpu.dot_dimension_numbers<[1], [0], [0], [1], [0, 0, 1, 1], [], []>} : vector<1x48xbf16>, vector<48x108xbf16>, vector<1x108xf32> -> vector<1x108xf32>
    %349 = arith.addf %343, %348 : vector<1x108xf32>
    %350 = vector.extract_strided_slice %204 {offsets = [24, 0], sizes = [1, 48], strides = [1, 1]} : vector<25x48xf32> to vector<1x48xf32>
    %351 = arith.truncf %350 : vector<1x48xf32> to vector<1x48xbf16>
    %c24 = arith.constant 24 : index
    %c0_253 = arith.constant 0 : index
    %c0_254 = arith.constant 0 : index
    %352 = vector.load %arg14[%c24, %c0_253, %c0_254] : memref<25x48x108xbf16, #tpu.memory_space<vmem>>, vector<1x48x108xbf16>
    %353 = vector.shape_cast %352 : vector<1x48x108xbf16> to vector<48x108xbf16>
    %cst_255 = arith.constant dense<0.000000e+00> : vector<1x108xf32>
    %354 = tpu.matmul %351, %353, %cst_255 {dimension_numbers = #tpu.dot_dimension_numbers<[1], [0], [0], [1], [0, 0, 1, 1], [], []>} : vector<1x48xbf16>, vector<48x108xbf16>, vector<1x108xf32> -> vector<1x108xf32>
    %355 = arith.addf %349, %354 : vector<1x108xf32>
    %cst_256 = arith.constant 3.000000e+00 : f32
    %356 = vector.broadcast %cst_256 : f32 to vector<1x108xf32>
    %357 = arith.addf %355, %356 : vector<1x108xf32>
    %cst_257 = arith.constant 0.000000e+00 : f32
    %cst_258 = arith.constant 6.000000e+00 : f32
    %358 = vector.broadcast %cst_257 : f32 to vector<1x108xf32>
    %359 = arith.maximumf %358, %357 : vector<1x108xf32>
    %360 = vector.broadcast %cst_258 : f32 to vector<1x108xf32>
    %361 = arith.minimumf %360, %359 : vector<1x108xf32>
    %cst_259 = arith.constant 0.166666672 : f32
    %362 = vector.broadcast %cst_259 : f32 to vector<1x108xf32>
    %363 = arith.mulf %361, %362 : vector<1x108xf32>
    %364 = arith.mulf %363, %355 : vector<1x108xf32>
    %365 = arith.truncf %364 : vector<1x108xf32> to vector<1x108xbf16>
    %c0_260 = arith.constant 0 : index
    %c0_261 = arith.constant 0 : index
    %366 = vector.load %arg15[%c0_260, %c0_261] : memref<108x108xbf16, #tpu.memory_space<vmem>>, vector<108x108xbf16>
    %cst_262 = arith.constant dense<0.000000e+00> : vector<1x108xf32>
    %367 = tpu.matmul %365, %366, %cst_262 {dimension_numbers = #tpu.dot_dimension_numbers<[1], [0], [0], [1], [0, 0, 1, 1], [], []>} : vector<1x108xbf16>, vector<108x108xbf16>, vector<1x108xf32> -> vector<1x108xf32>
    %c0_263 = arith.constant 0 : index
    %c0_264 = arith.constant 0 : index
    %368 = vector.load %arg16[%c0_263, %c0_264] : memref<1x108xf32, #tpu.memory_space<vmem>>, vector<1x108xf32>
    %369 = arith.addf %367, %368 : vector<1x108xf32>
    %cst_265 = arith.constant 3.000000e+00 : f32
    %370 = vector.broadcast %cst_265 : f32 to vector<1x108xf32>
    %371 = arith.addf %369, %370 : vector<1x108xf32>
    %cst_266 = arith.constant 0.000000e+00 : f32
    %cst_267 = arith.constant 6.000000e+00 : f32
    %372 = vector.broadcast %cst_266 : f32 to vector<1x108xf32>
    %373 = arith.maximumf %372, %371 : vector<1x108xf32>
    %374 = vector.broadcast %cst_267 : f32 to vector<1x108xf32>
    %375 = arith.minimumf %374, %373 : vector<1x108xf32>
    %cst_268 = arith.constant 0.166666672 : f32
    %376 = vector.broadcast %cst_268 : f32 to vector<1x108xf32>
    %377 = arith.mulf %375, %376 : vector<1x108xf32>
    %378 = arith.mulf %377, %369 : vector<1x108xf32>
    %379 = arith.truncf %378 : vector<1x108xf32> to vector<1x108xbf16>
    %c0_269 = arith.constant 0 : index
    %c0_270 = arith.constant 0 : index
    %380 = vector.load %arg17[%c0_269, %c0_270] : memref<108x10xbf16, #tpu.memory_space<vmem>>, vector<108x10xbf16>
    %cst_271 = arith.constant dense<0.000000e+00> : vector<1x10xf32>
    %381 = tpu.matmul %379, %380, %cst_271 {dimension_numbers = #tpu.dot_dimension_numbers<[1], [0], [0], [1], [0, 0, 1, 1], [], []>} : vector<1x108xbf16>, vector<108x10xbf16>, vector<1x10xf32> -> vector<1x10xf32>
    %c0_272 = arith.constant 0 : index
    %c0_273 = arith.constant 0 : index
    %382 = vector.load %arg18[%c0_272, %c0_273] : memref<1x10xf32, #tpu.memory_space<vmem>>, vector<1x10xf32>
    %383 = arith.addf %381, %382 : vector<1x10xf32>
    %cst_274 = arith.constant dense<0xFF800000> : vector<1xf32>
    %384 = vector.multi_reduction <maximumf>, %383, %cst_274 [1] : vector<1x10xf32> to vector<1xf32>
    %385 = vector.shape_cast %384 : vector<1xf32> to vector<1x1xf32>
    %386 = vector.broadcast %385 : vector<1x1xf32> to vector<1x10xf32>
    %387 = arith.subf %383, %386 : vector<1x10xf32>
    %388 = math.exp %387 : vector<1x10xf32>
    %cst_275 = arith.constant dense<0.000000e+00> : vector<1xf32>
    %389 = vector.multi_reduction <add>, %388, %cst_275 [1] : vector<1x10xf32> to vector<1xf32>
    %390 = vector.shape_cast %389 : vector<1xf32> to vector<1x1xf32>
    %391 = math.log %390 : vector<1x1xf32>
    %392 = arith.addf %391, %385 : vector<1x1xf32>
    %393 = vector.broadcast %392 : vector<1x1xf32> to vector<1x10xf32>
    %394 = arith.subf %383, %393 : vector<1x10xf32>
    %c0_276 = arith.constant 0 : index
    %c0_277 = arith.constant 0 : index
    %c0_278 = arith.constant 0 : index
    %395 = vector.load %arg19[%c0_276, %c0_277, %c0_278] : memref<1x1x10xf32, #tpu.memory_space<vmem>>, vector<1x1x10xf32>
    %396 = vector.shape_cast %395 : vector<1x1x10xf32> to vector<1x10xf32>
    %397 = vector.shape_cast %394 : vector<1x10xf32> to vector<1x1x10xf32>
    tpu.vector_store %arg19[%c0_276, %c0_277, %c0_278], %397 {strides = array<i32>} : memref<1x1x10xf32, #tpu.memory_space<vmem>>, vector<1x1x10xf32>,
    return
  }
  func.func @transform_0(%arg0: i32) -> (i32, i32, i32) {
    %c0_i32 = arith.constant 0 : i32
    %c0_i32_0 = arith.constant 0 : i32
    %c0_i32_1 = arith.constant 0 : i32
    return %arg0, %c0_i32, %c0_i32_0 : i32, i32, i32
  }
  func.func @transform_1(%arg0: i32) -> (i32, i32) {
    %c0_i32 = arith.constant 0 : i32
    %c0_i32_0 = arith.constant 0 : i32
    %c0_i32_1 = arith.constant 0 : i32
    return %c0_i32, %c0_i32_0 : i32, i32
  }
  func.func @transform_2(%arg0: i32) -> (i32, i32) {
    %c0_i32 = arith.constant 0 : i32
    %c0_i32_0 = arith.constant 0 : i32
    %c0_i32_1 = arith.constant 0 : i32
    return %c0_i32, %c0_i32_0 : i32, i32
  }
  func.func @transform_3(%arg0: i32) -> (i32, i32, i32) {
    %c0_i32 = arith.constant 0 : i32
    %c0_i32_0 = arith.constant 0 : i32
    %c0_i32_1 = arith.constant 0 : i32
    %c0_i32_2 = arith.constant 0 : i32
    return %c0_i32, %c0_i32_0, %c0_i32_1 : i32, i32, i32
  }
  func.func @transform_4(%arg0: i32) -> (i32, i32, i32) {
    %c0_i32 = arith.constant 0 : i32
    %c0_i32_0 = arith.constant 0 : i32
    %c0_i32_1 = arith.constant 0 : i32
    %c0_i32_2 = arith.constant 0 : i32
    return %c0_i32, %c0_i32_0, %c0_i32_1 : i32, i32, i32
  }
  func.func @transform_5(%arg0: i32) -> (i32, i32) {
    %c0_i32 = arith.constant 0 : i32
    %c0_i32_0 = arith.constant 0 : i32
    %c0_i32_1 = arith.constant 0 : i32
    return %c0_i32, %c0_i32_0 : i32, i32
  }
  func.func @transform_6(%arg0: i32) -> (i32, i32) {
    %c0_i32 = arith.constant 0 : i32
    %c0_i32_0 = arith.constant 0 : i32
    %c0_i32_1 = arith.constant 0 : i32
    return %c0_i32, %c0_i32_0 : i32, i32
  }
  func.func @transform_7(%arg0: i32) -> (i32, i32) {
    %c0_i32 = arith.constant 0 : i32
    %c0_i32_0 = arith.constant 0 : i32
    %c0_i32_1 = arith.constant 0 : i32
    return %c0_i32, %c0_i32_0 : i32, i32
  }
  func.func @transform_8(%arg0: i32) -> (i32, i32, i32) {
    %c0_i32 = arith.constant 0 : i32
    %c0_i32_0 = arith.constant 0 : i32
    %c0_i32_1 = arith.constant 0 : i32
    %c0_i32_2 = arith.constant 0 : i32
    return %c0_i32, %c0_i32_0, %c0_i32_1 : i32, i32, i32
  }
  func.func @transform_9(%arg0: i32) -> (i32, i32, i32) {
    %c0_i32 = arith.constant 0 : i32
    %c0_i32_0 = arith.constant 0 : i32
    %c0_i32_1 = arith.constant 0 : i32
    %c0_i32_2 = arith.constant 0 : i32
    return %c0_i32, %c0_i32_0, %c0_i32_1 : i32, i32, i32
  }
  func.func @transform_10(%arg0: i32) -> (i32, i32) {
    %c0_i32 = arith.constant 0 : i32
    %c0_i32_0 = arith.constant 0 : i32
    %c0_i32_1 = arith.constant 0 : i32
    return %c0_i32, %c0_i32_0 : i32, i32
  }
  func.func @transform_11(%arg0: i32) -> (i32, i32) {
    %c0_i32 = arith.constant 0 : i32
    %c0_i32_0 = arith.constant 0 : i32
    %c0_i32_1 = arith.constant 0 : i32
    return %c0_i32, %c0_i32_0 : i32, i32
  }
  func.func @transform_12(%arg0: i32) -> (i32, i32) {
    %c0_i32 = arith.constant 0 : i32
    %c0_i32_0 = arith.constant 0 : i32
    %c0_i32_1 = arith.constant 0 : i32
    return %c0_i32, %c0_i32_0 : i32, i32
  }
  func.func @transform_13(%arg0: i32) -> (i32, i32, i32) {
    %c0_i32 = arith.constant 0 : i32
    %c0_i32_0 = arith.constant 0 : i32
    %c0_i32_1 = arith.constant 0 : i32
    %c0_i32_2 = arith.constant 0 : i32
    return %c0_i32, %c0_i32_0, %c0_i32_1 : i32, i32, i32
  }
  func.func @transform_14(%arg0: i32) -> (i32, i32) {
    %c0_i32 = arith.constant 0 : i32
    %c0_i32_0 = arith.constant 0 : i32
    %c0_i32_1 = arith.constant 0 : i32
    return %c0_i32, %c0_i32_0 : i32, i32
  }
  func.func @transform_15(%arg0: i32) -> (i32, i32) {
    %c0_i32 = arith.constant 0 : i32
    %c0_i32_0 = arith.constant 0 : i32
    %c0_i32_1 = arith.constant 0 : i32
    return %c0_i32, %c0_i32_0 : i32, i32
  }
  func.func @transform_16(%arg0: i32) -> (i32, i32) {
    %c0_i32 = arith.constant 0 : i32
    %c0_i32_0 = arith.constant 0 : i32
    %c0_i32_1 = arith.constant 0 : i32
    return %c0_i32, %c0_i32_0 : i32, i32
  }
  func.func @transform_17(%arg0: i32) -> (i32, i32) {
    %c0_i32 = arith.constant 0 : i32
    %c0_i32_0 = arith.constant 0 : i32
    %c0_i32_1 = arith.constant 0 : i32
    return %c0_i32, %c0_i32_0 : i32, i32
  }
  func.func @transform_18(%arg0: i32) -> (i32, i32, i32) {
    %c0_i32 = arith.constant 0 : i32
    %c0_i32_0 = arith.constant 0 : i32
    %c0_i32_1 = arith.constant 0 : i32
    return %arg0, %c0_i32, %c0_i32_0 : i32, i32, i32
  }
}

</mosaic_0001>

<bundles_post_ra>
// kernel: se2dnet_forward.1
= control target key start
LH: loop header
LB: loop body
LE: loop exit
PB: predicated region body
PF: predicated region fallthrough
CT: control target
= control target key end

     0   :  { %s22826_s0 = inlined_call_operand.vmem [shape: bf16[2,680,9], index: 0, kind: input, shape index: {}]   ;;  %s22827_s1 = inlined_call_operand.hbm [shape: bf16[9,32], index: 1, kind: input, shape index: {}]   ;;  %s22828_s2 = inlined_call_operand.hbm [shape: f32[1,32], index: 2, kind: input, shape index: {}]   ;;  %s22829_s3 = inlined_call_operand.hbm [shape: bf16[9,144,680], index: 3, kind: input, shape index: {}]   ;;  %s22830_s4 = inlined_call_operand.vmem [shape: bf16[9,32,32], index: 4, kind: input, shape index: {}]   ;;  %s22831_s5 = inlined_call_operand.hbm [shape: f32[1,32], index: 5, kind: input, shape index: {}]   ;;  %s22832_s6 = inlined_call_operand.hbm [shape: bf16[32,32], index: 6, kind: input, shape index: {}]   ;;  %s22833_s7 = inlined_call_operand.hbm [shape: bf16[32,32], index: 7, kind: input, shape index: {}]   ;;  %s22834_s8 = inlined_call_operand.vmem [shape: bf16[9,25,144], index: 8, kind: input, shape index: {}]   ;;  %s22835_s9 = inlined_call_operand.vmem [shape: bf16[9,32,48], index: 9, kind: input, shape index: {}]   ;;  %s22836_s10 = inlined_call_operand.hbm [shape: f32[1,48], index: 10, kind: input, shape index: {}]   ;;  %s22837_s11 = inlined_call_operand.hbm [shape: bf16[48,48], index: 11, kind: input, shape index: {}]   ;;  %s22838_s12 = inlined_call_operand.hbm [shape: bf16[48,48], index: 12, kind: input, shape index: {}]   ;;  %s22839_s13 = inlined_call_operand.vmem [shape: bf16[25,48,108], index: 13, kind: input, shape index: {}]   ;;  %s22840_s14 = inlined_call_operand.vmem [shape: bf16[108,108], index: 14, kind: input, shape index: {}]   ;;  %s22841_s15 = inlined_call_operand.hbm [shape: f32[1,108], index: 15, kind: input, shape index: {}]   ;;  %s22842_s16 = inlined_call_operand.vmem [shape: bf16[108,10], index: 16, kind: input, shape index: {}]   ;;  %s22843_s17 = inlined_call_operand.hbm [shape: f32[1,10], index: 17, kind: input, shape index: {}]   ;;  %s22844_s18 = inlined_call_operand.hbm [shape: f32[2,1,10], index: 18, kind: output, shape index: {}]  }
   0x1   :  { %22988 = sst [smem:[#allocation90_spill]] %s22826_s0 }
   0x2   :  { %22989 = sst [smem:[#allocation91_spill]] %s22827_s1 }
   0x3   :  { %22990 = sst [smem:[#allocation92_spill]] %s22828_s2 }
   0x4   :  { %22991 = sst [smem:[#allocation93_spill]] %s22831_s5 }
   0x5   :  { %22992 = sst [smem:[#allocation94_spill]] %s22833_s7 }
   0x6   :  { %22993 = sst [smem:[#allocation95_spill]] %s22839_s13 }
   0x7   :  { %22994 = sst [smem:[#allocation96_spill]] %s22840_s14 }
   0x8   :  { %22995 = sst [smem:[#allocation97_spill]] %s22842_s16 }
   0x9   :  { %22996 = sst [smem:[#allocation98_spill]] %s22844_s18 }
   0xa   :  { %23 = vsyncpa [#allocation3], 0 }
   0xb   :  { %24 = vsyncpa [#allocation6], 0 }
   0xc   :  { %25 = vsyncpa [#allocation9], 0 }
   0xd   :  { %26 = vsyncpa [#allocation12], 0 }
   0xe   :  { %27 = vsyncpa [#allocation15], 0 }
   0xf   :  { %28 = vsyncpa [#allocation18], 0 }
  0x10   :  { %29 = vsyncpa [#allocation4], 0 }
  0x11   :  { %31 = vsyncpa [#allocation4 + $0x1], 0  ;;  %s18655_s27 = smov 0   ;;  %s18657_s28 = smov 0  }
  0x12   :  { %s18659_s29 = smov 0   ;;  %s18661_s30 = smov 0  }
  0x13 LB: > { %22997 = sst [smem:[#allocation28_spill]] %s18526_s27  ;;  %s18676_s0 = sadd.s32 4294967295, %s18538_s30   ;;  %s18538_s30 = sphi %s18661_s30, %s23504_s30   ;;  %s18534_s29 = sphi %s18659_s29, %s23507_s29   ;;  %s18530_s28 = sphi %s18657_s28, %s23506_s28   ;;  %s18526_s27 = sphi %s18655_s27, %s23505_s27  }
  0x14   : > { %22998 = sst [smem:[#allocation29_spill]] %s18530_s28  ;;  %s13133_s19 = sadd.s32 4294967294, %s18538_s30  }
  0x15   : > { %22999 = sst [smem:[#allocation30_spill]] %s18534_s29  ;;  %s18680_s1 = sadd.s32 1, %s18538_s30  }
  0x16   : > { %23000 = sst [smem:[#allocation31_spill]] %s18538_s30  ;;  %s427_s20 = sadd.s32 1, %s18534_s29 }
  0x17   : > { %23001 = sst [smem:[#allocation32_spill]] %s18680_s1  ;;  %s424_s21 = ssub.s32 %s18538_s30, %s18680_s1 }
  0x18   : > { %p437_p0 = scmp.ne.s32.totalorder %s18534_s29, %s18530_s28  ;;  %p425_p1 = scmp.eq.s32.totalorder %s424_s21, 0 }
  0x19   : > { %p438_p2 = scmp.eq.s32.totalorder %s18676_s0, 1  ;;  %p443_p3 = scmp.ne.s32.totalorder %s18530_s28, %s18526_s27 }
  0x1a   : > { %p444_p4 = scmp.eq.s32.totalorder %s13133_s19, 1  ;;  %p13134_p7 = scmp.ge.s32.totalorder %s18538_s30, 1 }
  0x1b   : > { %s18691_s22 = scalar_select %p425_p1, %s18534_s29, %s427_s20  }
  0x1c   : > { %p18693_p5 = por %p438_p2, %p437_p0  ;;  %p18697_p6 = por %p444_p4, %p443_p3 }
  0x1d   : > { %23002 = sst [smem:[#allocation33_spill]] %s18691_s22  ;;  %p451_p8 = scmp.lt.s32.totalorder %s18538_s30, 3 }
  0x1e   : > { %s23003_s2 = scalar_select %p18693_p5, 1, 0 }
  0x1f   : > { %s23005_s23 = scalar_select %p18697_p6, 1, 0 }
  0x20   : > { %23004 = sst [smem:[#allocation34_spill]] %s23003_s2  ;;  %p22857_p9 = scmp.eq.s32.totalorder %s18676_s0, 0 }
  0x21   : > { %23006 = sst [smem:[#allocation35_spill]] %s23005_s23  ;;  %p18704_p10 = pnand %p13134_p7, %p451_p8 }
  0x22   : > { %s18540_s25 = smov [#allocation5]   ;;  %s18541_s19 = smov [#allocation8]  }
  0x23   : > { %s23007_s24 = scalar_select %p18704_p10, 1, 0 }
  0x24   : > { %s477_s26 = sshll.u32 %s18540_s25, 4  ;;  %p17057_p11 = pneg %p18704_p10  ;;  %s478_s26 = int_to_ptr.vmem [resolvable:$true] %s477_s26 }
  0x25   : > { %s504_s20 = sshll.u32 %s18541_s19, 4  ;;  %s18542_s22 = smov [#allocation11]   ;;  %s18716_s20 = int_to_ptr.vmem [resolvable:$true] %s504_s20 }
  0x26   : > { %p18712_p12 = pnand %p22857_p9, %p17057_p11  ;;  %s18718_s29 = sshll.u32 %s18542_s22, 4  ;;  %s528_s29 = int_to_ptr.vmem [resolvable:$true] %s18718_s29 }
  0x27   : > { %s23009_s27 = sld [smem:[#allocation92_spill]] }
  0x28   : > { %p18728_p0 = pneg %p18712_p12 }
  0x2d   : > { %s23010_s18 = smov %s23009_s27  ;;  %s18144_s25 = scalar_lea.hbm %s23009_s27, 16 }
  0x2e   : > { %p18145_p13 = scmp.ne.s32.totalorder %s23010_s18, %s18144_s25  ;;  %p18151_p3 = scmp.lt.u32.totalorder %s18144_s25, %s23010_s18 }
  0x30   : > { %p18147_p1 = pnand %p18728_p0, %p18145_p13 }
  0x32   : > { %p18148_p2 = pneg %p18147_p1 }
  0x34   : > { %p18153_p4 = pnand %p18151_p3, %p18148_p2 }
  0x36   : > { %18156 = shalt.err (!%p18153_p4)
}
  0x37   : > { %s18157_s27 = scalar_lea.vmem %s478_s26, 16  ;;  %s18164_s30 = scalar_lea.vmem %s478_s26, 32 }
  0x38   : > { %p18158_p7 = scmp.ne.s32.totalorder %s478_s26, %s18157_s27  ;;  %p18165_p9 = scmp.lt.s32.totalorder %s478_s26, %s478_s26 }
  0x39   : > { %p18166_p6 = scmp.lt.s32.totalorder %s18164_s30, %s18157_s27 }
  0x3a   : > { %p18160_p8 = pnand %p18158_p7, %p18728_p0 }
  0x3b   : > { %p18167_p5 = por %p18166_p6, %p18165_p9 }
  0x3c   : > { %p18161_p11 = pneg %p18160_p8 }
  0x3e   : > { %p18168_p10 = pnand %p18167_p5, %p18161_p11 }
  0x40   : > { %18171 = shalt.err (!%p18168_p10)
}
  0x41   : > { %17063 = dma.hbm_to_vmem [thread:$0]  (!%p18712_p12), %s23010_s18, 16, %s478_s26, [#allocation6]  }
  0x42   : > { %s23012_s5 = sld [smem:[#allocation93_spill]] }
  0x48   : > { %s18172_s25 = scalar_lea.hbm %s23012_s5, 16 }
  0x49   : > { %p18173_p13 = scmp.ne.s32.totalorder %s23012_s5, %s18172_s25  ;;  %p18179_p5 = scmp.lt.u32.totalorder %s18172_s25, %s23012_s5 }
  0x4b   : > { %p18175_p1 = pnand %p18173_p13, %p18728_p0 }
  0x4d   : > { %p18176_p6 = pneg %p18175_p1 }
  0x4f   : > { %p18181_p9 = pnand %p18179_p5, %p18176_p6 }
  0x51   : > { %18184 = shalt.err (!%p18181_p9)
}
  0x52   : > { %s18185_s26 = scalar_lea.vmem %s18716_s20, 16  ;;  %s18192_s16 = scalar_lea.vmem %s18716_s20, 32 }
  0x53   : > { %p18186_p10 = scmp.ne.s32.totalorder %s18716_s20, %s18185_s26  ;;  %p18193_p4 = scmp.lt.s32.totalorder %s18716_s20, %s18716_s20 }
  0x54   : > { %p18194_p7 = scmp.lt.s32.totalorder %s18192_s16, %s18185_s26 }
  0x55   : > { %p18188_p2 = pnand %p18186_p10, %p18728_p0 }
  0x56   : > { %p18195_p8 = por %p18194_p7, %p18193_p4 }
  0x57   : > { %p18189_p3 = pneg %p18188_p2 }
  0x59   : > { %p18196_p11 = pnand %p18195_p8, %p18189_p3 }
  0x5b   : > { %18199 = shalt.err (!%p18196_p11)
}
  0x5c   : > { %17069 = dma.hbm_to_vmem [thread:$0]  (!%p18712_p12), %s23012_s5, 16, %s18716_s20, [#allocation9]  }
  0x5d   : > { %s23013_s7 = sld [smem:[#allocation94_spill]] }
  0x63   : > { %s18200_s25 = scalar_lea.hbm %s23013_s7, 256 }
  0x64   : > { %p18201_p13 = scmp.ne.s32.totalorder %s23013_s7, %s18200_s25  ;;  %p18207_p5 = scmp.lt.u32.totalorder %s18200_s25, %s23013_s7 }
  0x66   : > { %p18203_p1 = pnand %p18201_p13, %p18728_p0 }
  0x68   : > { %p18204_p6 = pneg %p18203_p1 }
  0x6a   : > { %p18209_p9 = pnand %p18207_p5, %p18204_p6 }
  0x6c   : > { %18212 = shalt.err (!%p18209_p9)
}
  0x6d   : > { %s18213_s16 = scalar_lea.vmem %s528_s29, 256  ;;  %p18221_p4 = scmp.lt.s32.totalorder %s528_s29, %s528_s29 }
  0x6e   : > { %p18214_p10 = scmp.ne.s32.totalorder %s528_s29, %s18213_s16  ;;  %p18222_p7 = scmp.lt.s32.totalorder %s18213_s16, %s18213_s16 }
  0x70   : > { %p18216_p2 = pnand %p18214_p10, %p18728_p0  ;;  %p18223_p8 = por %p18222_p7, %p18221_p4 }
  0x72   : > { %p18217_p3 = pneg %p18216_p2 }
  0x74   : > { %p18224_p11 = pnand %p18223_p8, %p18217_p3 }
  0x76   : > { %18227 = shalt.err (!%p18224_p11)
}
  0x77   : > { %s22864_s20 = smov 64   ;;  %s22866_s1 = smov 4  }
  0x78   : > { %17075 = dma.hbm_to_vmem [thread:$0]  (!%p18712_p12), %s23013_s7, 256, %s528_s29, [#allocation12], %s22864_s20, %s22864_s20, %s22866_s1  }
  0x79   : > { %s18545_s23 = smov [#allocation14]   ;;  %s18546_s22 = smov [#allocation17]  }
  0x7a   : > { %s557_s25 = sshll.u32 %s18545_s23, 4  ;;  %s590_s27 = sshll.u32 %s18546_s22, 4  ;;  %s558_s25 = int_to_ptr.vmem [resolvable:$true] %s557_s25  ;;  %s591_s27 = int_to_ptr.vmem [resolvable:$true] %s590_s27 }
  0x7b   : > { %s18228_s16 = scalar_lea.hbm %s22837_s11, 384 }
  0x7c   : > { %p18229_p13 = scmp.ne.s32.totalorder %s22837_s11, %s18228_s16  ;;  %p18235_p5 = scmp.lt.u32.totalorder %s18228_s16, %s22837_s11 }
  0x7e   : > { %p18231_p1 = pnand %p18229_p13, %p18728_p0 }
  0x80   : > { %p18232_p6 = pneg %p18231_p1 }
  0x82   : > { %p18237_p9 = pnand %p18235_p5, %p18232_p6 }
  0x84   : > { %18240 = shalt.err (!%p18237_p9)
}
  0x85   : > { %s18241_s29 = scalar_lea.vmem %s558_s25, 384  ;;  %p18249_p4 = scmp.lt.s32.totalorder %s558_s25, %s558_s25 }
  0x86   : > { %p18242_p10 = scmp.ne.s32.totalorder %s558_s25, %s18241_s29  ;;  %p18250_p7 = scmp.lt.s32.totalorder %s18241_s29, %s18241_s29 }
  0x88   : > { %p18244_p2 = pnand %p18242_p10, %p18728_p0  ;;  %p18251_p8 = por %p18250_p7, %p18249_p4 }
  0x8a   : > { %p18245_p3 = pneg %p18244_p2 }
  0x8c   : > { %p18252_p11 = pnand %p18251_p8, %p18245_p3 }
  0x8e   : > { %18255 = shalt.err (!%p18252_p11)
}
  0x8f   : > { %17081 = dma.hbm_to_vmem [thread:$0]  (!%p18712_p12), %s22837_s11, 384, %s558_s25, [#allocation15], %s22864_s20, %s22864_s20, %s22866_s1  }
  0x90   : > { %s18256_s2 = scalar_lea.hbm %s22841_s15, 16 }
  0x91   : > { %p18257_p13 = scmp.ne.s32.totalorder %s22841_s15, %s18256_s2  ;;  %p18263_p5 = scmp.lt.u32.totalorder %s18256_s2, %s22841_s15 }
  0x93   : > { %p18259_p1 = pnand %p18257_p13, %p18728_p0 }
  0x95   : > { %p18260_p6 = pneg %p18259_p1 }
  0x97   : > { %p18265_p9 = pnand %p18263_p5, %p18260_p6 }
  0x99   : > { %18268 = shalt.err (!%p18265_p9)
}
  0x9a   : > { %s18269_s26 = scalar_lea.vmem %s591_s27, 16  ;;  %s18276_s25 = scalar_lea.vmem %s591_s27, 32 }
  0x9b   : > { %p18270_p10 = scmp.ne.s32.totalorder %s591_s27, %s18269_s26  ;;  %p18277_p4 = scmp.lt.s32.totalorder %s591_s27, %s591_s27 }
  0x9c   : > { %p18278_p7 = scmp.lt.s32.totalorder %s18276_s25, %s18269_s26 }
  0x9d   : > { %p18272_p2 = pnand %p18270_p10, %p18728_p0 }
  0x9e   : > { %p18279_p8 = por %p18278_p7, %p18277_p4 }
  0x9f   : > { %p18273_p3 = pneg %p18272_p2 }
  0xa1   : > { %p18280_p11 = pnand %p18279_p8, %p18273_p3 }
  0xa3   : > { %18283 = shalt.err (!%p18280_p11)
}
  0xa4   : > { %17087 = dma.hbm_to_vmem [thread:$0]  (!%p18712_p12), %s22841_s15, 16, %s591_s27, [#allocation18]  }
  0xa5   : > { %s18547_s5 = smov [#allocation2]   ;;  %s18548_s14 = smov [#allocation7]  }
  0xa6   : > { %s463_s13 = sshll.u32 %s18547_s5, 4  ;;  %s487_s18 = sshll.u32 %s18548_s14, 4  ;;  %s464_s13 = int_to_ptr.vmem [resolvable:$true] %s463_s13  ;;  %s488_s18 = int_to_ptr.vmem [resolvable:$true] %s487_s18 }
  0xa7   : > { %s23014_s23 = sld [smem:[#allocation91_spill]] }
  0xad   : > { %s18284_s22 = scalar_lea.hbm %s23014_s23, 128 }
  0xae   : > { %p18285_p13 = scmp.ne.s32.totalorder %s23014_s23, %s18284_s22  ;;  %p18291_p5 = scmp.lt.u32.totalorder %s18284_s22, %s23014_s23 }
  0xb0   : > { %p18287_p1 = pnand %p18285_p13, %p18728_p0 }
  0xb2   : > { %p18288_p6 = pneg %p18287_p1 }
  0xb4   : > { %p18293_p9 = pnand %p18291_p5, %p18288_p6 }
  0xb6   : > { %18296 = shalt.err (!%p18293_p9)
}
  0xb7   : > { %s18297_s27 = scalar_lea.vmem %s464_s13, 128  ;;  %p18305_p4 = scmp.lt.s32.totalorder %s464_s13, %s464_s13 }
  0xb8   : > { %p18298_p10 = scmp.ne.s32.totalorder %s464_s13, %s18297_s27  ;;  %p18306_p7 = scmp.lt.s32.totalorder %s18297_s27, %s18297_s27 }
  0xba   : > { %p18300_p2 = pnand %p18298_p10, %p18728_p0  ;;  %p18307_p8 = por %p18306_p7, %p18305_p4 }
  0xbc   : > { %p18301_p3 = pneg %p18300_p2 }
  0xbe   : > { %p18308_p11 = pnand %p18307_p8, %p18301_p3 }
  0xc0   : > { %18311 = shalt.err (!%p18308_p11)
}
  0xc1   : > { %17060 = dma.hbm_to_vmem [thread:$0]  (!%p18712_p12), %s23014_s23, 128, %s464_s13, [#allocation3], %s22864_s20, %s22864_s20, %s22866_s1  }
  0xc2   : > { %s18312_s28 = scalar_lea.hbm %s22829_s3, 62208 }
  0xc3   : > { %p18313_p13 = scmp.ne.s32.totalorder %s22829_s3, %s18312_s28  ;;  %p18319_p5 = scmp.lt.u32.totalorder %s18312_s28, %s22829_s3 }
  0xc5   : > { %p18315_p1 = pnand %p18313_p13, %p18728_p0 }
  0xc7   : > { %p18316_p6 = pneg %p18315_p1 }
  0xc9   : > { %p18321_p9 = pnand %p18319_p5, %p18316_p6 }
  0xcb   : > { %18324 = shalt.err (!%p18321_p9)
}
  0xcc   : > { %s18325_s16 = scalar_lea.vmem %s488_s18, 62208  ;;  %p18333_p4 = scmp.lt.s32.totalorder %s488_s18, %s488_s18 }
  0xcd   : > { %p18326_p10 = scmp.ne.s32.totalorder %s488_s18, %s18325_s16  ;;  %p18334_p7 = scmp.lt.s32.totalorder %s18325_s16, %s18325_s16 }
  0xcf   : > { %p18328_p2 = pnand %p18326_p10, %p18728_p0  ;;  %p18335_p8 = por %p18334_p7, %p18333_p4 }
  0xd1   : > { %p18329_p3 = pneg %p18328_p2 }
  0xd3   : > { %p18336_p11 = pnand %p18335_p8, %p18329_p3 }
  0xd5   : > { %18339 = shalt.err (!%p18336_p11)
}
  0xd6   : > { %s18549_s13 = smov 384   ;;  %s18550_s27 = smov 24  }
  0xd7   : > { %17066 = dma.hbm_to_vmem [thread:$0]  (!%p18712_p12), %s22829_s3, 62208, %s488_s18, [#allocation6], %s18549_s13, %s18549_s13, %s18550_s27  }
  0xd8   : > { %s18551_s14 = smov [#allocation10]   ;;  %s18552_s28 = smov [#allocation13]  }
  0xd9   : > { %s514_s2 = sshll.u32 %s18551_s14, 4  ;;  %s547_s22 = sshll.u32 %s18552_s28, 4  ;;  %s515_s2 = int_to_ptr.vmem [resolvable:$true] %s514_s2  ;;  %s548_s22 = int_to_ptr.vmem [resolvable:$true] %s547_s22 }
  0xda   : > { %s18340_s25 = scalar_lea.hbm %s22832_s6, 256 }
  0xdb   : > { %p18341_p13 = scmp.ne.s32.totalorder %s22832_s6, %s18340_s25  ;;  %p18347_p5 = scmp.lt.u32.totalorder %s18340_s25, %s22832_s6 }
  0xdd   : > { %p18343_p1 = pnand %p18341_p13, %p18728_p0 }
  0xdf   : > { %p18344_p6 = pneg %p18343_p1 }
  0xe1   : > { %p18349_p9 = pnand %p18347_p5, %p18344_p6 }
  0xe3   : > { %18352 = shalt.err (!%p18349_p9)
}
  0xe4   : > { %s18353_s18 = scalar_lea.vmem %s515_s2, 256  ;;  %p18361_p4 = scmp.lt.s32.totalorder %s515_s2, %s515_s2 }
  0xe5   : > { %p18354_p10 = scmp.ne.s32.totalorder %s515_s2, %s18353_s18  ;;  %p18362_p7 = scmp.lt.s32.totalorder %s18353_s18, %s18353_s18 }
  0xe7   : > { %p18356_p2 = pnand %p18354_p10, %p18728_p0  ;;  %p18363_p8 = por %p18362_p7, %p18361_p4 }
  0xe9   : > { %p18357_p3 = pneg %p18356_p2 }
  0xeb   : > { %p18364_p11 = pnand %p18363_p8, %p18357_p3 }
  0xed   : > { %18367 = shalt.err (!%p18364_p11)
}
  0xee   : > { %s23015_s20 = smov 4   ;;  %s23016_s13 = smov 64  }
  0xef   : > { %17072 = dma.hbm_to_vmem [thread:$0]  (!%p18712_p12), %s22832_s6, 256, %s515_s2, [#allocation9], %s23016_s13, %s23016_s13, %s23015_s20  }
  0xf0   : > { %s18368_s5 = scalar_lea.hbm %s22836_s10, 16 }
  0xf1   : > { %p18369_p13 = scmp.ne.s32.totalorder %s22836_s10, %s18368_s5  ;;  %p18375_p5 = scmp.lt.u32.totalorder %s18368_s5, %s22836_s10 }
  0xf3   : > { %p18371_p1 = pnand %p18369_p13, %p18728_p0 }
  0xf5   : > { %p18372_p6 = pneg %p18371_p1 }
  0xf7   : > { %p18377_p9 = pnand %p18375_p5, %p18372_p6 }
  0xf9   : > { %18380 = shalt.err (!%p18377_p9)
}
  0xfa   : > { %s18381_s25 = scalar_lea.vmem %s548_s22, 16  ;;  %s18388_s2 = scalar_lea.vmem %s548_s22, 32 }
  0xfb   : > { %p18382_p10 = scmp.ne.s32.totalorder %s548_s22, %s18381_s25  ;;  %p18389_p4 = scmp.lt.s32.totalorder %s548_s22, %s548_s22 }
  0xfc   : > { %p18390_p7 = scmp.lt.s32.totalorder %s18388_s2, %s18381_s25 }
  0xfd   : > { %p18384_p2 = pnand %p18382_p10, %p18728_p0 }
  0xfe   : > { %p18391_p8 = por %p18390_p7, %p18389_p4 }
  0xff   : > { %p18385_p3 = pneg %p18384_p2 }
 0x101   : > { %p18392_p11 = pnand %p18391_p8, %p18385_p3 }
 0x103   : > { %18395 = shalt.err (!%p18392_p11)
}
 0x104   : > { %17078 = dma.hbm_to_vmem [thread:$0]  (!%p18712_p12), %s22836_s10, 16, %s548_s22, [#allocation12]  }
 0x105   : > { %s18553_s7 = smov [#allocation16]   ;;  %s18554_s27 = smov [#allocation19]  }
 0x106   : > { %s570_s1 = sshll.u32 %s18553_s7, 4  ;;  %s604_s29 = sshll.u32 %s18554_s27, 4  ;;  %s571_s1 = int_to_ptr.vmem [resolvable:$true] %s570_s1  ;;  %s605_s29 = int_to_ptr.vmem [resolvable:$true] %s604_s29 }
 0x107   : > { %s18396_s28 = scalar_lea.hbm %s22838_s12, 384 }
 0x108   : > { %p18397_p13 = scmp.ne.s32.totalorder %s22838_s12, %s18396_s28  ;;  %p18403_p5 = scmp.lt.u32.totalorder %s18396_s28, %s22838_s12 }
 0x10a   : > { %p18399_p1 = pnand %p18397_p13, %p18728_p0 }
 0x10c   : > { %p18400_p6 = pneg %p18399_p1 }
 0x10e   : > { %p18405_p9 = pnand %p18403_p5, %p18400_p6 }
 0x110   : > { %18408 = shalt.err (!%p18405_p9)
}
 0x111   : > { %s18409_s22 = scalar_lea.vmem %s571_s1, 384  ;;  %p18417_p4 = scmp.lt.s32.totalorder %s571_s1, %s571_s1 }
 0x112   : > { %p18410_p10 = scmp.ne.s32.totalorder %s571_s1, %s18409_s22  ;;  %p18418_p7 = scmp.lt.s32.totalorder %s18409_s22, %s18409_s22 }
 0x114   : > { %p18412_p2 = pnand %p18410_p10, %p18728_p0  ;;  %p18419_p8 = por %p18418_p7, %p18417_p4 }
 0x116   : > { %p18413_p3 = pneg %p18412_p2 }
 0x118   : > { %p18420_p11 = pnand %p18419_p8, %p18413_p3 }
 0x11a   : > { %18423 = shalt.err (!%p18420_p11)
}
 0x11b   : > { %17084 = dma.hbm_to_vmem [thread:$0]  (!%p18712_p12), %s22838_s12, 384, %s571_s1, [#allocation15], %s23016_s13, %s23016_s13, %s23015_s20  }
 0x11c   : > { %s18424_s5 = scalar_lea.hbm %s22843_s17, 16 }
 0x11d   : > { %p18425_p13 = scmp.ne.s32.totalorder %s22843_s17, %s18424_s5  ;;  %p18431_p5 = scmp.lt.u32.totalorder %s18424_s5, %s22843_s17 }
 0x11f   : > { %p18427_p1 = pnand %p18425_p13, %p18728_p0 }
 0x121   : > { %p18428_p6 = pneg %p18427_p1 }
 0x123   : > { %p18433_p9 = pnand %p18431_p5, %p18428_p6 }
 0x125   : > { %18436 = shalt.err (!%p18433_p9)
}
 0x126   : > { %s18437_s25 = scalar_lea.vmem %s605_s29, 16  ;;  %s18444_s20 = scalar_lea.vmem %s605_s29, 32 }
 0x127   : > { %p18438_p10 = scmp.ne.s32.totalorder %s605_s29, %s18437_s25  ;;  %p18445_p4 = scmp.lt.s32.totalorder %s605_s29, %s605_s29 }
 0x128   : > { %p18446_p7 = scmp.lt.s32.totalorder %s18444_s20, %s18437_s25 }
 0x129   : > { %p18440_p2 = pnand %p18438_p10, %p18728_p0 }
 0x12a   : > { %p18447_p8 = por %p18446_p7, %p18445_p4 }
 0x12b   : > { %p18441_p3 = pneg %p18440_p2 }
 0x12d   : > { %p18448_p11 = pnand %p18447_p8, %p18441_p3 }
 0x12f   : > { %18451 = shalt.err (!%p18448_p11)
}
 0x130   : > { %17090 = dma.hbm_to_vmem [thread:$0]  (!%p18712_p12), %s22843_s17, 16, %s605_s29, [#allocation18]  }
 0x131   : > { %p23017_p13 = scmp.ne.s32.totalorder %s23007_s24, 0 }
 0x133   : > { %625 = sbr.rel (%p23017_p13) target bundleno = 7261 (0x1c5d), region = 92 }
 0x13a   : > { %p23018_p1 = scmp.eq.s32.totalorder %s18676_s0, 0 }
 0x13c   : > { %18497 = dma.done.wait (%p23018_p1), [#allocation3], 128   ;;  %p23019_p0 = pmov %p23018_p1 }
 0x13e   : > { %18499 = vsyncadd (%p23019_p0), [#allocation3], 4294967168  ;;  %p23020_p6 = pmov %p23019_p0 }
 0x13f   : > { %p23021_p5 = pmov %p23019_p0 }
 0x140   : > { %18501 = dma.done.wait (%p23020_p6), [#allocation6], 62224  }
 0x141   : > { %18503 = vsyncadd (%p23021_p5), [#allocation6], 4294905072  ;;  %p23022_p9 = pmov %p23019_p0 }
 0x142   : > { %p23023_p12 = pmov %p23019_p0 }
 0x143   : > { %18505 = dma.done.wait (%p23022_p9), [#allocation9], 272  }
 0x144   : > { %18507 = vsyncadd (%p23023_p12), [#allocation9], 4294967024  ;;  %p23024_p10 = pmov %p23019_p0 }
 0x145   : > { %p23025_p2 = pmov %p23019_p0 }
 0x146   : > { %18509 = dma.done.wait (%p23024_p10), [#allocation12], 272  }
 0x147   : > { %18511 = vsyncadd (%p23025_p2), [#allocation12], 4294967024  ;;  %p23026_p3 = pmov %p23019_p0 }
 0x148   : > { %p23027_p4 = pmov %p23019_p0 }
 0x149   : > { %18513 = dma.done.wait (%p23026_p3), [#allocation15], 768  }
 0x14a   : > { %18515 = vsyncadd (%p23027_p4), [#allocation15], 4294966528  ;;  %p23028_p7 = pmov %p23019_p0 }
 0x14b   : > { %p23029_p8 = pmov %p23019_p0 }
 0x14c   : > { %18517 = dma.done.wait (%p23028_p7), [#allocation18], 32  }
 0x14d   : > { %18519 = vsyncadd (%p23029_p8), [#allocation18], 4294967264  ;;  %vm1166_vm0 = vcmask 1043456   ;;  %v22870_v0 = vmov 0.0   ;;  %p718_p11 = scmp.lt.s32.totalorder %s18676_s0, 1  ;;  %vm18556_vm1 = vmmov 0  }
 0x14e   : > { %15950 = vmatprep.subr.bf16.mxu0 %v22870_v0  ;;  %15952 = vmatprep.mubr.msk.bf16.mxu0 %vm18556_vm1, %v22870_v0  ;;  %vm1167_vm2 = vcmask 1044480   ;;  %v18557_v1 = vmov 65535   ;;  %v17169_v4 = vld [vmem:[#allocation2] sm:$0x1f]   ;;  %s23030_s2 = sld [smem:[#allocation90_spill]]  ;;  %vm1036_vm3 = vcmask 72704  }
 0x14f   : > { %v1168_v2 = vsel %vm1166_vm0, 4294967295, %v18557_v1  ;;  %s719_s24 = scalar_select %p718_p11, %s18676_s0, 1  ;;  %v19088_v33 = vld [vmem:[#allocation5] ss:$0 sm:$0xff]  ;;  %vm1992_vm4 = vcmask 326656   ;;  %vm3035_vm5 = vcmask 261120  }
 0x150   : > { %v1169_v3 = vsel %vm1167_vm2, %v1168_v2, 0  ;;  %vm9416_vm6 = vcmask 130048   ;;  %vm10804_vm7 = vcmask 392192   ;;  %vm10810_vm8 = vcmask 385024   ;;  %s23493_s13 = sld [smem:[#allocation96_spill]]  ;;  %s23494_s7 = sld [smem:[#allocation97_spill]] }
 0x151   : > { %s17010_s21 = smul.u32 340, %s719_s24  ;;  %v1171_v5 = vand.u32 %v17169_v4, %v1169_v3  ;;  %s23492_s24 = sld [smem:[#allocation95_spill]]  ;;  %vm12791_vm9 = vcmask 1045504   ;;  %vm12787_vm10 = vcmask 883712   ;;  %vm12943_vm11 = vcmask 73728  }
 0x152   : > { %s14378_s18 = sshll.u32 %s18676_s0, 4  ;;  %s23497_s30 = sld [smem:[#allocation98_spill]] }
 0x153   : > { %15951 = vmatpush3.bf16.msra.mxu0 %v1171_v5  ;;  %s18559_s0 = smov [#allocation20]  }
 0x154   : > { %s18981_s22 = scalar_lea.vmem %s23030_s2, %s17010_s21  ;;  %s23495_s2 = sld [smem:[#allocation29_spill]] }
 0x155   : > { %v17170_v6 = vld [vmem:[%s18981_s22] sm:$0xff]   ;;  %v17171_v7 = vld [vmem:[%s18981_s22 + $0x8] sm:$0xff]   ;;  %v17172_v8 = vld [vmem:[%s18981_s22 + $0x10] sm:$0xff]   ;;  %s18456_s21 = sshll.u32 %s18559_s0, 4  ;;  %s18457_s21 = int_to_ptr.vmem [resolvable:$false] %s18456_s21 }
 0x156   : > { %15953 = vmatmul.mubr.msk.bf16.vlgmr.msra.gmra.mrb[0].mxu0 %vm1036_vm3, %v17170_v6  ;;  %v17173_v9 = vld [vmem:[%s18981_s22 + $0x18] sm:$0xff]   ;;  %v17174_v10 = vld [vmem:[%s18981_s22 + $0x20] sm:$0xff]   ;;  %v17175_v11 = vld [vmem:[%s18981_s22 + $0x28] sm:$0xff]   ;;  %s18458_s19 = scalar_lea.vmem %s18457_s21, 32 }
 0x157   : > { %15956 = vmatprep.mubr.msk.bf16.mxu0 %vm18556_vm1, %v22870_v0  ;;  %v17176_v12 = vld [vmem:[%s18981_s22 + $0x30] sm:$0xff]   ;;  %v17177_v13 = vld [vmem:[%s18981_s22 + $0x38] sm:$0xff]   ;;  %v17178_v14 = vld [vmem:[%s18981_s22 + $0x40] sm:$0xff]  }
 0x158   : > { %v17179_v15 = vld [vmem:[%s18981_s22 + $0x48] sm:$0xff]   ;;  %v17180_v16 = vld [vmem:[%s18981_s22 + $0x50] sm:$0xff]   ;;  %v17181_v17 = vld [vmem:[%s18981_s22 + $0x58] sm:$0xff]   ;;  %s23498_s26 = smov %s23497_s30  ;;  %s22783_s25 = scalar_lea.hbm %s23497_s30, %s14378_s18 }
 0x159   : > { %v17182_v18 = vld [vmem:[%s18981_s22 + $0x60] sm:$0xff]   ;;  %v17183_v19 = vld [vmem:[%s18981_s22 + $0x68] sm:$0xff]   ;;  %v17184_v20 = vld [vmem:[%s18981_s22 + $0x70] sm:$0xff]  }
 0x15a   : > { %v17185_v21 = vld [vmem:[%s18981_s22 + $0x78] sm:$0xff]   ;;  %v17186_v22 = vld [vmem:[%s18981_s22 + $0x80] sm:$0xff]   ;;  %v17187_v23 = vld [vmem:[%s18981_s22 + $0x88] sm:$0xff]   ;;  %s716_s16 = sand.u32 1, %s23495_s2  }
 0x15b   : > { %v17188_v24 = vld [vmem:[%s18981_s22 + $0x90] sm:$0xff]   ;;  %v17189_v25 = vld [vmem:[%s18981_s22 + $0x98] sm:$0xff]   ;;  %v17190_v26 = vld [vmem:[%s18981_s22 + $0xa0] sm:$0xff]   ;;  %s717_s27 = scalar_lea.vmem [#allocation20], %s716_s16  ;;  %s12959_s20 = scalar_lea.sflag [#allocation4], %s716_s16 }
 0x15c   : > { %v17191_v27 = vld [vmem:[%s18981_s22 + $0xa8] sm:$0xff]   ;;  %v17192_v28 = vld [vmem:[%s18981_s22 + $0xb0] sm:$0xff]   ;;  %v17193_v29 = vld [vmem:[%s18981_s22 + $0xb8] sm:$0xff]   ;;  %s12971_s5 = sshll.u32 %s717_s27, 4  ;;  %s22785_s5 = int_to_ptr.vmem [resolvable:$true] %s12971_s5 }
 0x15d   : > { %v17194_v30 = vld [vmem:[%s18981_s22 + $0xc0] sm:$0xff]   ;;  %v17195_v31 = vld [vmem:[%s18981_s22 + $0xc8] sm:$0xff]   ;;  %v17196_v32 = vld [vmem:[%s18981_s22 + $0xd0] sm:$0xff]   ;;  %s18452_s1 = scalar_lea.vmem %s22785_s5, 16  ;;  %p18459_p5 = scmp.lt.s32.totalorder %s22785_s5, %s18457_s21 }
 0x15e   : > { %15957 = vmatmul.mubr.msk.bf16.gmra.mrb[4].mxu0 %vm1036_vm3, %v17171_v7  ;;  %v17197_v34 = vld [vmem:[%s18981_s22 + $0xd8] sm:$0xff]   ;;  %v17198_v44 = vld [vmem:[%s18981_s22 + $0xe0] sm:$0xff]   ;;  %v17199_v54 = vld [vmem:[%s18981_s22 + $0xe8] sm:$0xff]   ;;  %p18453_p13 = scmp.ne.s32.totalorder %s22785_s5, %s18452_s1  ;;  %p18460_p9 = scmp.lt.s32.totalorder %s18458_s19, %s18452_s1 }
 0x15f   : > { %15960 = vmatprep.mubr.msk.bf16.mxu0 %vm18556_vm1, %v22870_v0  ;;  %v17200_v1 = vld [vmem:[%s18981_s22 + $0xf0] sm:$0xff]  }
 0x160   : > { %p18461_p12 = por %p18460_p9, %p18459_p5 }
 0x166   : > { %15961 = vmatmul.mubr.msk.bf16.gmra.mrb[8].mxu0 %vm1036_vm3, %v17172_v8 }
 0x167   : > { %15964 = vmatprep.mubr.msk.bf16.mxu0 %vm18556_vm1, %v22870_v0 }
 0x16e   : > { %15965 = vmatmul.mubr.msk.bf16.gmra.mrb[12].mxu0 %vm1036_vm3, %v17173_v9 }
 0x16f   : > { %15968 = vmatprep.mubr.msk.bf16.mxu0 %vm18556_vm1, %v22870_v0 }
 0x176   : > { %15969 = vmatmul.mubr.msk.bf16.gmra.mrb[16].mxu0 %vm1036_vm3, %v17174_v10 }
 0x177   : > { %15972 = vmatprep.mubr.msk.bf16.mxu0 %vm18556_vm1, %v22870_v0 }
 0x17e   : > { %15973 = vmatmul.mubr.msk.bf16.gmra.mrb[20].mxu0 %vm1036_vm3, %v17175_v11 }
 0x17f   : > { %15976 = vmatprep.mubr.msk.bf16.mxu0 %vm18556_vm1, %v22870_v0 }
 0x186   : > { %15977 = vmatmul.mubr.msk.bf16.gmra.mrb[24].mxu0 %vm1036_vm3, %v17176_v12 }
 0x187   : > { %15980 = vmatprep.mubr.msk.bf16.mxu0 %vm18556_vm1, %v22870_v0 }
 0x18e   : > { %15981 = vmatmul.mubr.msk.bf16.gmra.mrb[28].mxu0 %vm1036_vm3, %v17177_v13 }
 0x18f   : > { %15984 = vmatprep.mubr.msk.bf16.mxu0 %vm18556_vm1, %v22870_v0 }
 0x196   : > { %15985 = vmatmul.mubr.msk.bf16.gmra.mrb[32].mxu0 %vm1036_vm3, %v17178_v14  ;;  %v17201_v14 = vld [vmem:[%s18981_s22 + $0xf8] sm:$0xff]  }
 0x197   : > { %15988 = vmatprep.mubr.msk.bf16.mxu0 %vm18556_vm1, %v22870_v0 }
 0x19e   : > { %15989 = vmatmul.mubr.msk.bf16.gmra.mrb[36].mxu0 %vm1036_vm3, %v17179_v15 }
 0x19f   : > { %15992 = vmatprep.mubr.msk.bf16.mxu0 %vm18556_vm1, %v22870_v0 }
 0x1a6   : > { %15993 = vmatmul.mubr.msk.bf16.gmra.mrb[40].mxu0 %vm1036_vm3, %v17180_v16 }
 0x1a7   : > { %15996 = vmatprep.mubr.msk.bf16.mxu0 %vm18556_vm1, %v22870_v0 }
 0x1ae   : > { %15997 = vmatmul.mubr.msk.bf16.gmra.mrb[44].mxu0 %vm1036_vm3, %v17181_v17 }
 0x1af   : > { %16000 = vmatprep.mubr.msk.bf16.mxu0 %vm18556_vm1, %v22870_v0 }
 0x1b6   : > { %16001 = vmatmul.mubr.msk.bf16.gmra.mrb[48].mxu0 %vm1036_vm3, %v17182_v18 }
 0x1b7   : > { %16004 = vmatprep.mubr.msk.bf16.mxu0 %vm18556_vm1, %v22870_v0 }
 0x1be   : > { %16005 = vmatmul.mubr.msk.bf16.gmra.mrb[52].mxu0 %vm1036_vm3, %v17183_v19 }
 0x1bf   : > { %16008 = vmatprep.mubr.msk.bf16.mxu0 %vm18556_vm1, %v22870_v0 }
 0x1c6   : > { %16009 = vmatmul.mubr.msk.bf16.gmra.mrb[56].mxu0 %vm1036_vm3, %v17184_v20 }
 0x1c7   : > { %16012 = vmatprep.mubr.msk.bf16.mxu0 %vm18556_vm1, %v22870_v0 }
 0x1ce   : > { %16013 = vmatmul.mubr.msk.bf16.gmra.mrb[60].mxu0 %vm1036_vm3, %v17185_v21 }
 0x1cf   : > { %16016 = vmatprep.mubr.msk.bf16.mxu0 %vm18556_vm1, %v22870_v0 }
 0x1d6   : > { %16017 = vmatmul.mubr.msk.bf16.gmra.mrb[64].mxu0 %vm1036_vm3, %v17186_v22 }
 0x1d7   : > { %16020 = vmatprep.mubr.msk.bf16.mxu0 %vm18556_vm1, %v22870_v0 }
 0x1de   : > { %16021 = vmatmul.mubr.msk.bf16.gmra.mrb[68].mxu0 %vm1036_vm3, %v17187_v23 }
 0x1df   : > { %16024 = vmatprep.mubr.msk.bf16.mxu0 %vm18556_vm1, %v22870_v0 }
 0x1e6   : > { %16025 = vmatmul.mubr.msk.bf16.gmra.mrb[72].mxu0 %vm1036_vm3, %v17188_v24  ;;  %v17202_v24 = vld [vmem:[%s18981_s22 + $0x100] sm:$0xff]  }
 0x1e7   : > { %16028 = vmatprep.mubr.msk.bf16.mxu0 %vm18556_vm1, %v22870_v0 }
 0x1ee   : > { %16029 = vmatmul.mubr.msk.bf16.gmra.mrb[76].mxu0 %vm1036_vm3, %v17189_v25 }
 0x1ef   : > { %16032 = vmatprep.mubr.msk.bf16.mxu0 %vm18556_vm1, %v22870_v0 }
 0x1f6   : > { %16033 = vmatmul.mubr.msk.bf16.gmra.mrb[80].mxu0 %vm1036_vm3, %v17190_v26 }
 0x1f7   : > { %16036 = vmatprep.mubr.msk.bf16.mxu0 %vm18556_vm1, %v22870_v0 }
 0x1fe   : > { %16037 = vmatmul.mubr.msk.bf16.gmra.mrb[84].mxu0 %vm1036_vm3, %v17191_v27 }
 0x1ff   : > { %16040 = vmatprep.mubr.msk.bf16.mxu0 %vm18556_vm1, %v22870_v0 }
 0x206   : > { %16041 = vmatmul.mubr.msk.bf16.gmra.mrb[88].mxu0 %vm1036_vm3, %v17192_v28 }
 0x207   : > { %16044 = vmatprep.mubr.msk.bf16.mxu0 %vm18556_vm1, %v22870_v0 }
 0x20e   : > { %16045 = vmatmul.mubr.msk.bf16.gmra.mrb[92].mxu0 %vm1036_vm3, %v17193_v29 }
 0x20f   : > { %16048 = vmatprep.mubr.msk.bf16.mxu0 %vm18556_vm1, %v22870_v0 }
 0x216   : > { %16049 = vmatmul.mubr.msk.bf16.gmra.mrb[96].mxu0 %vm1036_vm3, %v17194_v30 }
 0x217   : > { %16052 = vmatprep.mubr.msk.bf16.mxu0 %vm18556_vm1, %v22870_v0 }
 0x21e   : > { %16053 = vmatmul.mubr.msk.bf16.gmra.mrb[100].mxu0 %vm1036_vm3, %v17195_v31 }
 0x21f   : > { %16056 = vmatprep.mubr.msk.bf16.mxu0 %vm18556_vm1, %v22870_v0 }
 0x226   : > { %16057 = vmatmul.mubr.msk.bf16.gmra.mrb[104].mxu0 %vm1036_vm3, %v17196_v32 }
 0x227   : > { %16060 = vmatprep.mubr.msk.bf16.mxu0 %vm18556_vm1, %v22870_v0 }
 0x229   : > { %v1207_v35 = vpop.f32.mrb[0].mxu0 }
 0x22a   : > { %v1208_v36 = vadd.f32 %v19088_v33, %v1207_v35  ;;  %v15954_v37 = vpop.f32.mrb[1].mxu0  ;;  %v17203_v35 = vld [vmem:[%s18981_s22 + $0x108] sm:$0xff]  }
 0x22b   : > { %v1210_v38 = vpop.f32.mrb[2].mxu0 }
 0x22c   : > { %v1211_v39 = vadd.f32 %v19088_v33, %v1210_v38  ;;  %v15955_v40 = vpop.f32.mrb[3].mxu0  ;;  %v1549_v41 = vmax.f32 %v1208_v36, 0.0 }
 0x22e   : > { %v1550_v42 = vmax.f32 %v1211_v39, 0.0  ;;  %16061 = vmatmul.mubr.msk.bf16.gmra.mrb[108].mxu0 %vm1036_vm3, %v17197_v34 }
 0x22f   : > { %16064 = vmatprep.mubr.msk.bf16.mxu0 %vm18556_vm1, %v22870_v0 }
 0x230   : > { %v19099_v43 = vpack.c.bf16 %v1550_v42, %v1549_v41 }
 0x231   : > { %v1215_v45 = vpop.f32.mrb[4].mxu0 }
 0x232   : > { %v1216_v46 = vadd.f32 %v19088_v33, %v1215_v45  ;;  %v15958_v47 = vpop.f32.mrb[5].mxu0 }
 0x233   : > { %v1218_v48 = vpop.f32.mrb[6].mxu0 }
 0x234   : > { %v1551_v49 = vmax.f32 %v1216_v46, 0.0  ;;  %v1219_v50 = vadd.f32 %v19088_v33, %v1218_v48  ;;  %v15959_v51 = vpop.f32.mrb[7].mxu0  ;;  %v17204_v46 = vld [vmem:[%s18981_s22 + $0x110] sm:$0xff]  }
 0x236   : > { %v1552_v52 = vmax.f32 %v1219_v50, 0.0  ;;  %16065 = vmatmul.mubr.msk.bf16.gmra.mrb[112].mxu0 %vm1036_vm3, %v17198_v44 }
 0x237   : > { %16068 = vmatprep.mubr.msk.bf16.mxu0 %vm18556_vm1, %v22870_v0 }
 0x238   : > { %v19107_v53 = vpack.c.bf16 %v1552_v52, %v1551_v49 }
 0x239   : > { %v1223_v55 = vpop.f32.mrb[8].mxu0 }
 0x23a   : > { %v1224_v56 = vadd.f32 %v19088_v33, %v1223_v55  ;;  %v15962_v57 = vpop.f32.mrb[9].mxu0 }
 0x23b   : > { %v1226_v58 = vpop.f32.mrb[10].mxu0  ;;  %v17205_v57 = vld [vmem:[%s18981_s22 + $0x118] sm:$0xff]  }
 0x23c   : > { %v1227_v59 = vadd.f32 %v19088_v33, %v1226_v58  ;;  %v15963_v60 = vpop.f32.mrb[11].mxu0  ;;  %v1553_v61 = vmax.f32 %v1224_v56, 0.0 }
 0x23e   : > { %v1554_v62 = vmax.f32 %v1227_v59, 0.0  ;;  %16069 = vmatmul.mubr.msk.bf16.gmra.mrb[116].mxu0 %vm1036_vm3, %v17199_v54 }
 0x23f   : > { %16072 = vmatprep.mubr.msk.bf16.mxu0 %vm18556_vm1, %v22870_v0 }
 0x240   : > { %v19115_v63 = vpack.c.bf16 %v1554_v62, %v1553_v61 }
 0x241   : > { %v1231_v2 = vpop.f32.mrb[12].mxu0 }
 0x242   : > { %23031 = vst [vmem:[#allocation36_spill] sm:$0xff] %v19115_v63  ;;  %v1232_v3 = vadd.f32 %v19088_v33, %v1231_v2  ;;  %v15966_v4 = vpop.f32.mrb[13].mxu0 }
 0x243   : > { %v1234_v5 = vpop.f32.mrb[14].mxu0 }
 0x244   : > { %v1235_v6 = vadd.f32 %v19088_v33, %v1234_v5  ;;  %v15967_v7 = vpop.f32.mrb[15].mxu0  ;;  %v1555_v8 = vmax.f32 %v1232_v3, 0.0  ;;  %v17206_v5 = vld [vmem:[%s18981_s22 + $0x120] sm:$0xff]  }
 0x246   : > { %v1556_v9 = vmax.f32 %v1235_v6, 0.0  ;;  %16073 = vmatmul.mubr.msk.bf16.gmra.mrb[120].mxu0 %vm1036_vm3, %v17200_v1 }
 0x247   : > { %16076 = vmatprep.mubr.msk.bf16.mxu0 %vm18556_vm1, %v22870_v0 }
 0x248   : > { %v19123_v10 = vpack.c.bf16 %v1556_v9, %v1555_v8 }
 0x249   : > { %v1239_v11 = vpop.f32.mrb[16].mxu0 }
 0x24a   : > { %23032 = vst [vmem:[#allocation37_spill] sm:$0xff] %v19123_v10  ;;  %v1240_v12 = vadd.f32 %v19088_v33, %v1239_v11  ;;  %v15970_v13 = vpop.f32.mrb[17].mxu0 }
 0x24b   : > { %v1242_v15 = vpop.f32.mrb[18].mxu0 }
 0x24c   : > { %v1243_v16 = vadd.f32 %v19088_v33, %v1242_v15  ;;  %v15971_v17 = vpop.f32.mrb[19].mxu0  ;;  %v1557_v18 = vmax.f32 %v1240_v12, 0.0 }
 0x24e   : > { %v1558_v19 = vmax.f32 %v1243_v16, 0.0  ;;  %16077 = vmatmul.mubr.msk.bf16.gmra.mrb[124].mxu0 %vm1036_vm3, %v17201_v14  ;;  %v17207_v16 = vld [vmem:[%s18981_s22 + $0x128] sm:$0xff]  }
 0x24f   : > { %16080 = vmatprep.mubr.msk.bf16.mxu0 %vm18556_vm1, %v22870_v0 }
 0x250   : > { %v19131_v20 = vpack.c.bf16 %v1558_v19, %v1557_v18 }
 0x251   : > { %v1247_v21 = vpop.f32.mrb[20].mxu0 }
 0x252   : > { %23033 = vst [vmem:[#allocation38_spill] sm:$0xff] %v19131_v20  ;;  %v1248_v22 = vadd.f32 %v19088_v33, %v1247_v21  ;;  %v15974_v23 = vpop.f32.mrb[21].mxu0 }
 0x253   : > { %v1250_v25 = vpop.f32.mrb[22].mxu0 }
 0x254   : > { %v1251_v26 = vadd.f32 %v19088_v33, %v1250_v25  ;;  %v15975_v27 = vpop.f32.mrb[23].mxu0  ;;  %v1559_v28 = vmax.f32 %v1248_v22, 0.0 }
 0x255   : > { %v17208_v27 = vld [vmem:[%s18981_s22 + $0x130] sm:$0xff]  }
 0x256   : > { %v1560_v29 = vmax.f32 %v1251_v26, 0.0  ;;  %16081 = vmatmul.mubr.msk.bf16.gmra.mrb[128].mxu0 %vm1036_vm3, %v17202_v24 }
 0x257   : > { %16084 = vmatprep.mubr.msk.bf16.mxu0 %vm18556_vm1, %v22870_v0 }
 0x258   : > { %v19139_v30 = vpack.c.bf16 %v1560_v29, %v1559_v28 }
 0x259   : > { %v1255_v31 = vpop.f32.mrb[24].mxu0 }
 0x25a   : > { %23034 = vst [vmem:[#allocation39_spill] sm:$0xff] %v19139_v30  ;;  %v1256_v32 = vadd.f32 %v19088_v33, %v1255_v31  ;;  %v15978_v34 = vpop.f32.mrb[25].mxu0 }
 0x25b   : > { %v1258_v36 = vpop.f32.mrb[26].mxu0 }
 0x25c   : > { %v1259_v37 = vadd.f32 %v19088_v33, %v1258_v36  ;;  %v15979_v38 = vpop.f32.mrb[27].mxu0  ;;  %v1561_v39 = vmax.f32 %v1256_v32, 0.0 }
 0x25e   : > { %v1562_v40 = vmax.f32 %v1259_v37, 0.0  ;;  %16085 = vmatmul.mubr.msk.bf16.gmra.mrb[132].mxu0 %vm1036_vm3, %v17203_v35 }
 0x25f   : > { %16088 = vmatprep.mubr.msk.bf16.mxu0 %vm18556_vm1, %v22870_v0 }
 0x260   : > { %v19147_v41 = vpack.c.bf16 %v1562_v40, %v1561_v39  ;;  %v17209_v39 = vld [vmem:[%s18981_s22 + $0x138] sm:$0xff]  }
 0x261   : > { %v1263_v42 = vpop.f32.mrb[28].mxu0 }
 0x262   : > { %23035 = vst [vmem:[#allocation40_spill] sm:$0xff] %v19147_v41  ;;  %v1264_v44 = vadd.f32 %v19088_v33, %v1263_v42  ;;  %v15982_v45 = vpop.f32.mrb[29].mxu0 }
 0x263   : > { %v1266_v47 = vpop.f32.mrb[30].mxu0 }
 0x264   : > { %v1267_v48 = vadd.f32 %v19088_v33, %v1266_v47  ;;  %v15983_v49 = vpop.f32.mrb[31].mxu0  ;;  %v1563_v50 = vmax.f32 %v1264_v44, 0.0 }
 0x266   : > { %v1564_v51 = vmax.f32 %v1267_v48, 0.0  ;;  %16089 = vmatmul.mubr.msk.bf16.gmra.mrb[136].mxu0 %vm1036_vm3, %v17204_v46 }
 0x267   : > { %16092 = vmatprep.mubr.msk.bf16.mxu0 %vm18556_vm1, %v22870_v0 }
 0x268   : > { %v19155_v52 = vpack.c.bf16 %v1564_v51, %v1563_v50  ;;  %v17210_v51 = vld [vmem:[%s18981_s22 + $0x140] sm:$0xff]  }
 0x269   : > { %v1271_v54 = vpop.f32.mrb[32].mxu0 }
 0x26a   : > { %23036 = vst [vmem:[#allocation41_spill] sm:$0xff] %v19155_v52  ;;  %v1272_v55 = vadd.f32 %v19088_v33, %v1271_v54  ;;  %v15986_v56 = vpop.f32.mrb[33].mxu0 }
 0x26b   : > { %v1274_v58 = vpop.f32.mrb[34].mxu0 }
 0x26c   : > { %v1275_v59 = vadd.f32 %v19088_v33, %v1274_v58  ;;  %v15987_v60 = vpop.f32.mrb[35].mxu0  ;;  %v1565_v61 = vmax.f32 %v1272_v55, 0.0 }
 0x26e   : > { %v1566_v62 = vmax.f32 %v1275_v59, 0.0  ;;  %16093 = vmatmul.mubr.msk.bf16.gmra.mrb[140].mxu0 %vm1036_vm3, %v17205_v57 }
 0x26f   : > { %16096 = vmatprep.mubr.msk.bf16.mxu0 %vm18556_vm1, %v22870_v0 }
 0x270   : > { %v19163_v1 = vpack.c.bf16 %v1566_v62, %v1565_v61 }
 0x271   : > { %v1279_v2 = vpop.f32.mrb[36].mxu0 }
 0x272   : > { %23037 = vst [vmem:[#allocation42_spill] sm:$0xff] %v19163_v1  ;;  %v1280_v3 = vadd.f32 %v19088_v33, %v1279_v2  ;;  %v15990_v4 = vpop.f32.mrb[37].mxu0  ;;  %14425 = vmatprep.subr.bf16.mxu0 %v19163_v1  ;;  %v17211_v2 = vld [vmem:[%s18981_s22 + $0x148] sm:$0xff]  }
 0x273   : > { %v1282_v6 = vpop.f32.mrb[38].mxu0  ;;  %14426 = vmatpush3.bf16.msra.mxu0 %v19099_v43 }
 0x274   : > { %v1283_v7 = vadd.f32 %v19088_v33, %v1282_v6  ;;  %v15991_v8 = vpop.f32.mrb[39].mxu0  ;;  %v1567_v9 = vmax.f32 %v1280_v3, 0.0 }
 0x276   : > { %v1568_v11 = vmax.f32 %v1283_v7, 0.0  ;;  %16097 = vmatmul.mubr.msk.bf16.gmra.mrb[144].mxu0 %vm1036_vm3, %v17206_v5 }
 0x277   : > { %16100 = vmatprep.mubr.msk.bf16.mxu0 %vm18556_vm1, %v22870_v0 }
 0x278   : > { %v19173_v12 = vpack.c.bf16 %v1568_v11, %v1567_v9 }
 0x279   : > { %v1287_v13 = vpop.f32.mrb[40].mxu0 }
 0x27a   : > { %v1288_v14 = vadd.f32 %v19088_v33, %v1287_v13  ;;  %v15994_v15 = vpop.f32.mrb[41].mxu0  ;;  %14427 = vmatprep.subr.bf16.mxu0 %v19173_v12 }
 0x27b   : > { %v1290_v17 = vpop.f32.mrb[42].mxu0  ;;  %14428 = vmatpush3.bf16.msra.mxu0 %v19107_v53 }
 0x27c   : > { %v1291_v18 = vadd.f32 %v19088_v33, %v1290_v17  ;;  %v15995_v19 = vpop.f32.mrb[43].mxu0  ;;  %v1569_v21 = vmax.f32 %v1288_v14, 0.0  ;;  %v17212_v14 = vld [vmem:[%s18981_s22 + $0x150] ss:$0 sps:$4 sm:$0xff]   ;;  %s23496_s22 = sld [smem:[#allocation34_spill]] }
 0x27e   : > { %v1570_v22 = vmax.f32 %v1291_v18, 0.0  ;;  %16101 = vmatmul.mubr.msk.bf16.gmra.mrb[148].mxu0 %vm1036_vm3, %v17207_v16 }
 0x27f   : > { %16104 = vmatprep.mubr.msk.bf16.mxu0 %vm18556_vm1, %v22870_v0 }
 0x280   : > { %v19183_v23 = vpack.c.bf16 %v1570_v22, %v1569_v21 }
 0x281   : > { %v1295_v24 = vpop.f32.mrb[44].mxu0 }
 0x282   : > { %v1296_v25 = vadd.f32 %v19088_v33, %v1295_v24  ;;  %v15998_v26 = vpop.f32.mrb[45].mxu0  ;;  %14429 = vmatprep.subr.bf16.mxu0 %v19183_v23  ;;  %p23499_p1 = scmp.ne.s32.totalorder %s23496_s22, 0 }
 0x283   : > { %v1298_v28 = vpop.f32.mrb[46].mxu0  ;;  %14430 = vmatpush3.bf16.msra.mxu0 %v19115_v63 }
 0x284   : > { %v1299_v29 = vadd.f32 %v19088_v33, %v1298_v28  ;;  %v15999_v31 = vpop.f32.mrb[47].mxu0  ;;  %v1571_v32 = vmax.f32 %v1296_v25, 0.0  ;;  %p18454_p0 = pnand %p18453_p13, %p23499_p1 }
 0x286   : > { %v1572_v34 = vmax.f32 %v1299_v29, 0.0  ;;  %16105 = vmatmul.mubr.msk.bf16.gmra.mrb[152].mxu0 %vm1036_vm3, %v17208_v27  ;;  %p18455_p6 = pneg %p18454_p0 }
 0x287   : > { %16108 = vmatprep.mubr.msk.bf16.mxu0 %vm18556_vm1, %v22870_v0 }
 0x288   : > { %v19193_v35 = vpack.c.bf16 %v1572_v34, %v1571_v32  ;;  %v17215_v32 = vld [vmem:[#allocation7 + $0x4] ss:$24 sps:$4 sm:$0xff]   ;;  %p18462_p10 = pnand %p18461_p12, %p18455_p6 }
 0x289   : > { %v1303_v36 = vpop.f32.mrb[48].mxu0  ;;  %v17218_v34 = vld [vmem:[#allocation7 + $0xc] ss:$24 sps:$4 sm:$0xff]  }
 0x28a   : > { %23038 = vst [vmem:[#allocation43_spill] sm:$0xff] %v19193_v35  ;;  %v1304_v37 = vadd.f32 %v19088_v33, %v1303_v36  ;;  %v16002_v38 = vpop.f32.mrb[49].mxu0  ;;  %14431 = vmatprep.subr.bf16.mxu0 %v19193_v35  ;;  %2160 = vmatprep.mubr.bf16.mxu1 %v17218_v34 }
 0x28b   : > { %v1306_v40 = vpop.f32.mrb[50].mxu0  ;;  %14432 = vmatpush3.bf16.msra.mxu0 %v19123_v10 }
 0x28c   : > { %v1307_v42 = vadd.f32 %v19088_v33, %v1306_v40  ;;  %v16003_v44 = vpop.f32.mrb[51].mxu0  ;;  %v1573_v45 = vmax.f32 %v1304_v37, 0.0  ;;  %v17213_v37 = vld [vmem:[#allocation7] ss:$24 sps:$4 sm:$0xff]  }
 0x28e   : > { %v1574_v46 = vmax.f32 %v1307_v42, 0.0  ;;  %16109 = vmatmul.mubr.msk.bf16.gmra.mrb[156].mxu0 %vm1036_vm3, %v17209_v39  ;;  %v22868_v42 = vmov 0  }
 0x28f   : > { %16112 = vmatprep.mubr.msk.bf16.mxu0 %vm18556_vm1, %v22870_v0 }
 0x290   : > { %v19203_v47 = vpack.c.bf16 %v1574_v46, %v1573_v45  ;;  %v19241_v45 = vld [vmem:[#allocation5] ss:$0 sm:$0xff] }
 0x291   : > { %v1311_v48 = vpop.f32.mrb[52].mxu0 }
 0x292   : > { %23039 = vst [vmem:[#allocation44_spill] sm:$0xff] %v19203_v47  ;;  %v1312_v49 = vadd.f32 %v19088_v33, %v1311_v48  ;;  %v16006_v50 = vpop.f32.mrb[53].mxu0  ;;  %14433 = vmatprep.subr.bf16.mxu0 %v19203_v47 }
 0x293   : > { %v1314_v54 = vpop.f32.mrb[54].mxu0  ;;  %14434 = vmatpush3.bf16.msra.mxu0 %v19131_v20 }
 0x294   : > { %v1315_v55 = vadd.f32 %v19088_v33, %v1314_v54  ;;  %v16007_v56 = vpop.f32.mrb[55].mxu0  ;;  %v1575_v57 = vmax.f32 %v1312_v49, 0.0 }
 0x296   : > { %v1576_v58 = vmax.f32 %v1315_v55, 0.0  ;;  %16113 = vmatmul.mubr.msk.bf16.gmra.mrb[160].mxu0 %vm1036_vm3, %v17210_v51 }
 0x297   : > { %16116 = vmatprep.mubr.msk.bf16.mxu0 %vm18556_vm1, %v22870_v0 }
 0x298   : > { %v19213_v59 = vpack.c.bf16 %v1576_v58, %v1575_v57 }
 0x299   : > { %v1319_v60 = vpop.f32.mrb[56].mxu0 }
 0x29a   : > { %23040 = vst [vmem:[#allocation45_spill] sm:$0xff] %v19213_v59  ;;  %v1320_v61 = vadd.f32 %v19088_v33, %v1319_v60  ;;  %v16010_v62 = vpop.f32.mrb[57].mxu0  ;;  %14435 = vmatprep.subr.bf16.mxu0 %v19213_v59 }
 0x29b   : > { %v1322_v3 = vpop.f32.mrb[58].mxu0  ;;  %14436 = vmatpush3.bf16.msra.mxu0 %v19139_v30  ;;  %v17219_v62 = vld [vmem:[#allocation7 + $0x34] ss:$24 sps:$4 sm:$0xff]  }
 0x29c   : > { %v1323_v4 = vadd.f32 %v19088_v33, %v1322_v3  ;;  %v16011_v5 = vpop.f32.mrb[59].mxu0  ;;  %v1577_v6 = vmax.f32 %v1320_v61, 0.0 }
 0x29e   : > { %v1578_v7 = vmax.f32 %v1323_v4, 0.0  ;;  %16117 = vmatmul.mubr.msk.bf16.gmra.mrb[164].mxu0 %vm1036_vm3, %v17211_v2  ;;  %v17223_v2 = vld [vmem:[#allocation7 + $0x30] ss:$24 sps:$4 sm:$0xff]  }
 0x29f   : > { %16120 = vmatprep.mubr.msk.bf16.mxu0 %vm18556_vm1, %v22870_v0 }
 0x2a0   : > { %v19223_v8 = vpack.c.bf16 %v1578_v7, %v1577_v6 }
 0x2a1   : > { %v1327_v9 = vpop.f32.mrb[60].mxu0 }
 0x2a2   : > { %23041 = vst [vmem:[#allocation46_spill] sm:$0xff] %v19223_v8  ;;  %v1328_v11 = vadd.f32 %v19088_v33, %v1327_v9  ;;  %v16014_v13 = vpop.f32.mrb[61].mxu0  ;;  %14437 = vmatprep.subr.bf16.mxu0 %v19223_v8 }
 0x2a3   : > { %v1330_v15 = vpop.f32.mrb[62].mxu0  ;;  %14438 = vmatpush3.bf16.msra.mxu0 %v19147_v41 }
 0x2a4   : > { %v1331_v16 = vadd.f32 %v19088_v33, %v1330_v15  ;;  %v16015_v17 = vpop.f32.mrb[63].mxu0  ;;  %v1579_v18 = vmax.f32 %v1328_v11, 0.0  ;;  %v17225_v15 = vld [vmem:[#allocation7 + $0x64] ss:$24 sps:$4 sm:$0xff]  }
 0x2a6   : > { %v1580_v19 = vmax.f32 %v1331_v16, 0.0  ;;  %16121 = vmatmul.mubr.msk.bf16.gmra.mrb[168].mxu0 %vm1036_vm3, %v17212_v14  ;;  %v17229_v16 = vld [vmem:[#allocation7 + $0x60] ss:$24 sps:$4 sm:$0xff]  }
 0x2a7   : > { %2055 = vmatprep.mubr.bf16.mxu0 %v17215_v32 }
 0x2a8   : > { %v19231_v21 = vpack.c.bf16 %v1580_v19, %v1579_v18 }
 0x2a9   : > { %v1335_v22 = vpop.f32.mrb[64].mxu0 }
 0x2aa   : > { %23042 = vst [vmem:[#allocation47_spill] sm:$0xff] %v19231_v21  ;;  %v1336_v24 = vadd.f32 %v19088_v33, %v1335_v22  ;;  %v16018_v25 = vpop.f32.mrb[65].mxu0  ;;  %14439 = vmatprep.subr.bf16.mxu0 %v19231_v21 }
 0x2ab   : > { %v1338_v26 = vpop.f32.mrb[66].mxu0  ;;  %14440 = vmatpush3.bf16.msra.mxu0 %v19155_v52 }
 0x2ac   : > { %v1339_v27 = vadd.f32 %v19088_v33, %v1338_v26  ;;  %v16019_v28 = vpop.f32.mrb[67].mxu0  ;;  %v1581_v29 = vmax.f32 %v1336_v24, 0.0  ;;  %2904 = vmatprep.subr.bf16.mxu0 %v22868_v42 }
 0x2ae   : > { %v1582_v31 = vmax.f32 %v1339_v27, 0.0  ;;  %2056 = vmatmul.mubr.bf16.vlgmr.msra.gmra.mrb[172].mxu0 %v17213_v37 }
 0x2af   : > { %2063 = vmatprep.mubr.bf16.mxu0 %v17219_v62 }
 0x2b0   : > { %v19237_v36 = vpack.c.bf16 %v1582_v31, %v1581_v29  ;;  %v17231_v29 = vld [vmem:[#allocation7 + $0x94] ss:$24 sps:$4 sm:$0xff]   ;;  %v17235_v31 = vld [vmem:[#allocation7 + $0x90] ss:$24 sps:$4 sm:$0xff]  }
 0x2b1   : > { %v1343_v38 = vpop.f32.mrb[68].mxu0 }
 0x2b2   : > { %v1344_v39 = vadd.f32 %v19088_v33, %v1343_v38  ;;  %v16022_v40 = vpop.f32.mrb[69].mxu0 }
 0x2b3   : > { %v1346_v44 = vpop.f32.mrb[70].mxu0 }
 0x2b4   : > { %v1347_v46 = vadd.f32 %v19241_v45, %v1346_v44  ;;  %v16023_v48 = vpop.f32.mrb[71].mxu0  ;;  %v1583_v49 = vmax.f32 %v1344_v39, 0.0 }
 0x2b6   : > { %v1584_v50 = vmax.f32 %v1347_v46, 0.0  ;;  %2064 = vmatmul.mubr.bf16.gmra.mrb[176].mxu0 %v17223_v2  ;;  %v17243_v2 = vld [vmem:[#allocation7 + $0xf4] ss:$24 sps:$4 sm:$0xff]  }
 0x2b7   : > { %2071 = vmatprep.mubr.bf16.mxu0 %v17225_v15 }
 0x2b8   : > { %v19244_v51 = vpack.c.bf16 %v1584_v50, %v1583_v49  ;;  %v17237_v49 = vld [vmem:[#allocation7 + $0xc4] ss:$24 sps:$4 sm:$0xff]   ;;  %v17241_v50 = vld [vmem:[#allocation7 + $0xc0] ss:$24 sps:$4 sm:$0xff]  }
 0x2b9   : > { %v1351_v54 = vpop.f32.mrb[72].mxu0 }
 0x2ba   : > { %v1352_v55 = vadd.f32 %v19241_v45, %v1351_v54  ;;  %v16026_v56 = vpop.f32.mrb[73].mxu0 }
 0x2bb   : > { %v1354_v33 = vpop.f32.mrb[74].mxu0 }
 0x2bc   : > { %v1355_v57 = vadd.f32 %v19241_v45, %v1354_v33  ;;  %v16027_v58 = vpop.f32.mrb[75].mxu0  ;;  %v1585_v60 = vmax.f32 %v1352_v55, 0.0 }
 0x2be   : > { %v1586_v61 = vmax.f32 %v1355_v57, 0.0  ;;  %2072 = vmatmul.mubr.bf16.gmra.mrb[180].mxu0 %v17229_v16 }
 0x2bf   : > { %2079 = vmatprep.mubr.bf16.mxu0 %v17231_v29 }
 0x2c0   : > { %v19248_v3 = vpack.c.bf16 %v1586_v61, %v1585_v60 }
 0x2c1   : > { %v1359_v4 = vpop.f32.mrb[76].mxu0 }
 0x2c2   : > { %v1360_v5 = vadd.f32 %v19241_v45, %v1359_v4  ;;  %v16030_v6 = vpop.f32.mrb[77].mxu0  ;;  %v17247_v4 = vld [vmem:[#allocation7 + $0xf0] ss:$24 sps:$4 sm:$0xff]  }
 0x2c3   : > { %v1362_v7 = vpop.f32.mrb[78].mxu0 }
 0x2c4   : > { %v1363_v9 = vadd.f32 %v19241_v45, %v1362_v7  ;;  %v16031_v11 = vpop.f32.mrb[79].mxu0  ;;  %v1587_v13 = vmax.f32 %v1360_v5, 0.0 }
 0x2c6   : > { %v1588_v14 = vmax.f32 %v1363_v9, 0.0  ;;  %2080 = vmatmul.mubr.bf16.gmra.mrb[184].mxu0 %v17235_v31 }
 0x2c7   : > { %2087 = vmatprep.mubr.bf16.mxu0 %v17237_v49 }
 0x2c8   : > { %v19252_v17 = vpack.c.bf16 %v1588_v14, %v1587_v13 }
 0x2c9   : > { %v1367_v18 = vpop.f32.mrb[80].mxu0 }
 0x2ca   : > { %23043 = vst [vmem:[#allocation48_spill] sm:$0xff] %v19252_v17  ;;  %v1368_v19 = vadd.f32 %v19241_v45, %v1367_v18  ;;  %v16034_v22 = vpop.f32.mrb[81].mxu0  ;;  %v17249_v18 = vld [vmem:[#allocation7 + $0x124] ss:$24 sps:$4 sm:$0xff]  }
 0x2cb   : > { %v1370_v24 = vpop.f32.mrb[82].mxu0 }
 0x2cc   : > { %v1371_v25 = vadd.f32 %v19241_v45, %v1370_v24  ;;  %v16035_v26 = vpop.f32.mrb[83].mxu0  ;;  %v1589_v27 = vmax.f32 %v1368_v19, 0.0  ;;  %v17253_v19 = vld [vmem:[#allocation7 + $0x120] ss:$24 sps:$4 sm:$0xff]  }
 0x2ce   : > { %v1590_v28 = vmax.f32 %v1371_v25, 0.0  ;;  %2088 = vmatmul.mubr.bf16.gmra.mrb[188].mxu0 %v17241_v50 }
 0x2cf   : > { %2095 = vmatprep.mubr.bf16.mxu0 %v17243_v2 }
 0x2d0   : > { %v19256_v32 = vpack.c.bf16 %v1590_v28, %v1589_v27 }
 0x2d1   : > { %v1375_v34 = vpop.f32.mrb[84].mxu0 }
 0x2d2   : > { %23044 = vst [vmem:[#allocation49_spill] sm:$0xff] %v19256_v32  ;;  %v1376_v37 = vadd.f32 %v19241_v45, %v1375_v34  ;;  %v16038_v38 = vpop.f32.mrb[85].mxu0 }
 0x2d3   : > { %v1378_v39 = vpop.f32.mrb[86].mxu0  ;;  %v17259_v38 = vld [vmem:[#allocation7 + $0x150] ss:$24 sps:$4 sm:$0xff]  }
 0x2d4   : > { %v1379_v40 = vadd.f32 %v19241_v45, %v1378_v39  ;;  %v16039_v44 = vpop.f32.mrb[87].mxu0  ;;  %v1591_v46 = vmax.f32 %v1376_v37, 0.0  ;;  %v17255_v37 = vld [vmem:[#allocation7 + $0x154] ss:$24 sps:$4 sm:$0xff]  }
 0x2d6   : > { %v1592_v48 = vmax.f32 %v1379_v40, 0.0  ;;  %2096 = vmatmul.mubr.bf16.gmra.mrb[192].mxu0 %v17247_v4 }
 0x2d7   : > { %2103 = vmatprep.mubr.bf16.mxu0 %v17249_v18 }
 0x2d8   : > { %v19260_v54 = vpack.c.bf16 %v1592_v48, %v1591_v46 }
 0x2d9   : > { %v1383_v55 = vpop.f32.mrb[88].mxu0 }
 0x2da   : > { %23045 = vst [vmem:[#allocation50_spill] sm:$0xff] %v19260_v54  ;;  %v1384_v56 = vadd.f32 %v19241_v45, %v1383_v55  ;;  %v16042_v33 = vpop.f32.mrb[89].mxu0 }
 0x2db   : > { %v1386_v57 = vpop.f32.mrb[90].mxu0  ;;  %v17261_v33 = vld [vmem:[#allocation7 + $0x184] ss:$24 sps:$4 sm:$0xff]  }
 0x2dc   : > { %v1387_v58 = vadd.f32 %v19241_v45, %v1386_v57  ;;  %v16043_v60 = vpop.f32.mrb[91].mxu0  ;;  %v1593_v61 = vmax.f32 %v1384_v56, 0.0  ;;  %v17265_v57 = vld [vmem:[#allocation7 + $0x180] ss:$24 sps:$4 sm:$0xff]  }
 0x2de   : > { %v1594_v62 = vmax.f32 %v1387_v58, 0.0  ;;  %2104 = vmatmul.mubr.bf16.gmra.mrb[196].mxu0 %v17253_v19 }
 0x2df   : > { %2111 = vmatprep.mubr.bf16.mxu0 %v17255_v37 }
 0x2e0   : > { %v19264_v5 = vpack.c.bf16 %v1594_v62, %v1593_v61 }
 0x2e1   : > { %v1391_v6 = vpop.f32.mrb[92].mxu0 }
 0x2e2   : > { %23046 = vst [vmem:[#allocation51_spill] sm:$0xff] %v19264_v5  ;;  %v1392_v7 = vadd.f32 %v19241_v45, %v1391_v6  ;;  %v16046_v9 = vpop.f32.mrb[93].mxu0 }
 0x2e3   : > { %v1394_v11 = vpop.f32.mrb[94].mxu0 }
 0x2e4   : > { %v1395_v13 = vadd.f32 %v19241_v45, %v1394_v11  ;;  %v16047_v14 = vpop.f32.mrb[95].mxu0  ;;  %v1595_v15 = vmax.f32 %v1392_v7, 0.0 }
 0x2e6   : > { %v1596_v16 = vmax.f32 %v1395_v13, 0.0  ;;  %2112 = vmatmul.mubr.bf16.gmra.mrb[200].mxu0 %v17259_v38 }
 0x2e7   : > { %2119 = vmatprep.mubr.bf16.mxu0 %v17261_v33 }
 0x2e8   : > { %v19268_v22 = vpack.c.bf16 %v1596_v16, %v1595_v15 }
 0x2e9   : > { %v1399_v24 = vpop.f32.mrb[96].mxu0 }
 0x2ea   : > { %23047 = vst [vmem:[#allocation52_spill] sm:$0xff] %v19268_v22  ;;  %v1400_v25 = vadd.f32 %v19241_v45, %v1399_v24  ;;  %v16050_v26 = vpop.f32.mrb[97].mxu0 }
 0x2eb   : > { %v1402_v27 = vpop.f32.mrb[98].mxu0 }
 0x2ec   : > { %v1403_v28 = vadd.f32 %v19241_v45, %v1402_v27  ;;  %v16051_v29 = vpop.f32.mrb[99].mxu0  ;;  %v1597_v31 = vmax.f32 %v1400_v25, 0.0 }
 0x2ee   : > { %v1598_v34 = vmax.f32 %v1403_v28, 0.0  ;;  %2120 = vmatmul.mubr.bf16.gmra.mrb[204].mxu0 %v17265_v57 }
 0x2f0   : > { %v19272_v39 = vpack.c.bf16 %v1598_v34, %v1597_v31 }
 0x2f1   : > { %v1407_v40 = vpop.f32.mrb[100].mxu0 }
 0x2f2   : > { %23048 = vst [vmem:[#allocation53_spill] sm:$0xff] %v19272_v39  ;;  %v1408_v44 = vadd.f32 %v19241_v45, %v1407_v40  ;;  %v16054_v46 = vpop.f32.mrb[101].mxu0  ;;  %14495 = vmatprep.subr.bf16.mxu1 %v19272_v39 }
 0x2f3   : > { %v1410_v48 = vpop.f32.mrb[102].mxu0  ;;  %14496 = vmatpush3.bf16.msra.mxu1 %v19237_v36 }
 0x2f4   : > { %v1411_v49 = vadd.f32 %v19241_v45, %v1410_v48  ;;  %v16055_v50 = vpop.f32.mrb[103].mxu0  ;;  %v1599_v55 = vmax.f32 %v1408_v44, 0.0 }
 0x2f6   : > { %v1600_v56 = vmax.f32 %v1411_v49, 0.0 }
 0x2f8   : > { %v19278_v58 = vpack.c.bf16 %v1600_v56, %v1599_v55 }
 0x2f9   : > { %v1415_v60 = vpop.f32.mrb[104].mxu0 }
 0x2fa   : > { %v1416_v61 = vadd.f32 %v19241_v45, %v1415_v60  ;;  %v16058_v62 = vpop.f32.mrb[105].mxu0  ;;  %14497 = vmatprep.subr.bf16.mxu1 %v19278_v58 }
 0x2fb   : > { %v1418_v2 = vpop.f32.mrb[106].mxu0  ;;  %14498 = vmatpush3.bf16.msra.mxu1 %v19244_v51 }
 0x2fc   : > { %v1419_v4 = vadd.f32 %v19241_v45, %v1418_v2  ;;  %v16059_v6 = vpop.f32.mrb[107].mxu0  ;;  %v1601_v7 = vmax.f32 %v1416_v61, 0.0 }
 0x2fe   : > { %v1602_v9 = vmax.f32 %v1419_v4, 0.0 }
 0x300   : > { %v19284_v11 = vpack.c.bf16 %v1602_v9, %v1601_v7 }
 0x301   : > { %v1423_v13 = vpop.f32.mrb[108].mxu0 }
 0x302   : > { %v1424_v14 = vadd.f32 %v19241_v45, %v1423_v13  ;;  %v16062_v15 = vpop.f32.mrb[109].mxu0  ;;  %14499 = vmatprep.subr.bf16.mxu1 %v19284_v11 }
 0x303   : > { %v1426_v16 = vpop.f32.mrb[110].mxu0  ;;  %14500 = vmatpush3.bf16.msra.mxu1 %v19248_v3 }
 0x304   : > { %v1427_v18 = vadd.f32 %v19241_v45, %v1426_v16  ;;  %v16063_v19 = vpop.f32.mrb[111].mxu0  ;;  %v1603_v24 = vmax.f32 %v1424_v14, 0.0 }
 0x306   : > { %v1604_v25 = vmax.f32 %v1427_v18, 0.0 }
 0x308   : > { %v19290_v26 = vpack.c.bf16 %v1604_v25, %v1603_v24 }
 0x309   : > { %v1431_v27 = vpop.f32.mrb[112].mxu0 }
 0x30a   : > { %23049 = vst [vmem:[#allocation54_spill] sm:$0xff] %v19290_v26  ;;  %v1432_v28 = vadd.f32 %v19241_v45, %v1431_v27  ;;  %v16066_v29 = vpop.f32.mrb[113].mxu0  ;;  %14501 = vmatprep.subr.bf16.mxu1 %v19290_v26 }
 0x30b   : > { %v1434_v31 = vpop.f32.mrb[114].mxu0  ;;  %14502 = vmatpush3.bf16.msra.mxu1 %v19252_v17 }
 0x30c   : > { %v1435_v34 = vadd.f32 %v19241_v45, %v1434_v31  ;;  %v16067_v37 = vpop.f32.mrb[115].mxu0  ;;  %v1605_v38 = vmax.f32 %v1432_v28, 0.0 }
 0x30e   : > { %v1606_v40 = vmax.f32 %v1435_v34, 0.0 }
 0x310   : > { %v19296_v44 = vpack.c.bf16 %v1606_v40, %v1605_v38  ;;  %v17216_v38 = vld [vmem:[#allocation7 + $0x8] ss:$24 sps:$4 sm:$0xff]  }
 0x311   : > { %v1439_v46 = vpop.f32.mrb[116].mxu0 }
 0x312   : > { %23050 = vst [vmem:[#allocation55_spill] sm:$0xff] %v19296_v44  ;;  %v1440_v48 = vadd.f32 %v19241_v45, %v1439_v46  ;;  %v16070_v49 = vpop.f32.mrb[117].mxu0  ;;  %14503 = vmatprep.subr.bf16.mxu1 %v19296_v44  ;;  %v17221_v46 = vld [vmem:[#allocation7 + $0x3c] ss:$24 sps:$4 sm:$0xff]  }
 0x313   : > { %v1442_v50 = vpop.f32.mrb[118].mxu0  ;;  %14504 = vmatpush3.bf16.msra.mxu1 %v19256_v32 }
 0x314   : > { %v1443_v55 = vadd.f32 %v19241_v45, %v1442_v50  ;;  %v16071_v56 = vpop.f32.mrb[119].mxu0  ;;  %v1607_v33 = vmax.f32 %v1440_v48, 0.0 }
 0x316   : > { %v1608_v57 = vmax.f32 %v1443_v55, 0.0 }
 0x318   : > { %v19302_v60 = vpack.c.bf16 %v1608_v57, %v1607_v33 }
 0x319   : > { %v1447_v61 = vpop.f32.mrb[120].mxu0 }
 0x31a   : > { %23051 = vst [vmem:[#allocation56_spill] sm:$0xff] %v19302_v60  ;;  %v1448_v62 = vadd.f32 %v19241_v45, %v1447_v61  ;;  %v16074_v2 = vpop.f32.mrb[121].mxu0  ;;  %14505 = vmatprep.subr.bf16.mxu1 %v19302_v60 }
 0x31b   : > { %v1450_v4 = vpop.f32.mrb[122].mxu0  ;;  %14506 = vmatpush3.bf16.msra.mxu1 %v19260_v54 }
 0x31c   : > { %v1451_v6 = vadd.f32 %v19241_v45, %v1450_v4  ;;  %v16075_v7 = vpop.f32.mrb[123].mxu0  ;;  %v1609_v9 = vmax.f32 %v1448_v62, 0.0  ;;  %v17224_v62 = vld [vmem:[#allocation7 + $0x38] ss:$24 sps:$4 sm:$0xff]   ;;  %v17227_v4 = vld [vmem:[#allocation7 + $0x6c] ss:$24 sps:$4 sm:$0xff]  }
 0x31e   : > { %v1610_v13 = vmax.f32 %v1451_v6, 0.0 }
 0x320   : > { %v19308_v14 = vpack.c.bf16 %v1610_v13, %v1609_v9 }
 0x321   : > { %v1455_v15 = vpop.f32.mrb[124].mxu0 }
 0x322   : > { %23052 = vst [vmem:[#allocation57_spill] sm:$0xff] %v19308_v14  ;;  %v1456_v16 = vadd.f32 %v19241_v45, %v1455_v15  ;;  %v16078_v18 = vpop.f32.mrb[125].mxu0  ;;  %14507 = vmatprep.subr.bf16.mxu1 %v19308_v14 }
 0x323   : > { %v1458_v19 = vpop.f32.mrb[126].mxu0  ;;  %14508 = vmatpush3.bf16.msra.mxu1 %v19264_v5 }
 0x324   : > { %v1459_v24 = vadd.f32 %v19241_v45, %v1458_v19  ;;  %v16079_v25 = vpop.f32.mrb[127].mxu0  ;;  %v1611_v27 = vmax.f32 %v1456_v16, 0.0 }
 0x326   : > { %v1612_v28 = vmax.f32 %v1459_v24, 0.0  ;;  %v17230_v24 = vld [vmem:[#allocation7 + $0x68] ss:$24 sps:$4 sm:$0xff]  }
 0x328   : > { %v19314_v29 = vpack.c.bf16 %v1612_v28, %v1611_v27  ;;  %v17233_v27 = vld [vmem:[#allocation7 + $0x9c] ss:$24 sps:$4 sm:$0xff]  }
 0x329   : > { %v1463_v31 = vpop.f32.mrb[128].mxu0 }
 0x32a   : > { %23053 = vst [vmem:[#allocation58_spill] sm:$0xff] %v19314_v29  ;;  %v1464_v34 = vadd.f32 %v19241_v45, %v1463_v31  ;;  %v16082_v37 = vpop.f32.mrb[129].mxu0  ;;  %14509 = vmatprep.subr.bf16.mxu1 %v19314_v29 }
 0x32b   : > { %v1466_v40 = vpop.f32.mrb[130].mxu0  ;;  %14510 = vmatpush3.bf16.msra.mxu1 %v19268_v22 }
 0x32c   : > { %v1467_v48 = vadd.f32 %v19241_v45, %v1466_v40  ;;  %v16083_v49 = vpop.f32.mrb[131].mxu0  ;;  %2233 = vmatprep.subr.bf16.mxu1 %v22868_v42  ;;  %v1613_v50 = vmax.f32 %v1464_v34, 0.0 }
 0x32d   : > { %v17236_v49 = vld [vmem:[#allocation7 + $0x98] ss:$24 sps:$4 sm:$0xff]  }
 0x32e   : > { %v1614_v55 = vmax.f32 %v1467_v48, 0.0  ;;  %2161 = vmatmul.mubr.bf16.vlgmr.msra.gmra.mrb[0].mxu1 %v17216_v38 }
 0x32f   : > { %2168 = vmatprep.mubr.bf16.mxu1 %v17221_v46 }
 0x330   : > { %v19321_v56 = vpack.c.bf16 %v1614_v55, %v1613_v50  ;;  %v17239_v55 = vld [vmem:[#allocation7 + $0xcc] ss:$24 sps:$4 sm:$0xff]  }
 0x331   : > { %v1471_v33 = vpop.f32.mrb[132].mxu0 }
 0x332   : > { %23054 = vst [vmem:[#allocation59_spill] sm:$0xff] %v19321_v56  ;;  %v1472_v57 = vadd.f32 %v19241_v45, %v1471_v33  ;;  %v16086_v61 = vpop.f32.mrb[133].mxu0  ;;  %2234 = vmatpush1.bf16.msra.mxu1 %v19321_v56  ;;  %2905 = vmatpush1.bf16.msra.mxu0 %v19321_v56 }
 0x333   : > { %v1474_v2 = vpop.f32.mrb[134].mxu0  ;;  %2235 = vmatprep.subr.bf16.mxu1 %v22868_v42  ;;  %2906 = vmatprep.subr.bf16.mxu0 %v22868_v42 }
 0x334   : > { %v1475_v6 = vadd.f32 %v19241_v45, %v1474_v2  ;;  %v16087_v7 = vpop.f32.mrb[135].mxu0  ;;  %v1615_v9 = vmax.f32 %v1472_v57, 0.0 }
 0x336   : > { %v1616_v13 = vmax.f32 %v1475_v6, 0.0  ;;  %2169 = vmatmul.mubr.bf16.gmra.mrb[4].mxu1 %v17224_v62 }
 0x337   : > { %2176 = vmatprep.mubr.bf16.mxu1 %v17227_v4 }
 0x338   : > { %v19329_v15 = vpack.c.bf16 %v1616_v13, %v1615_v9  ;;  %v17242_v9 = vld [vmem:[#allocation7 + $0xc8] ss:$24 sps:$4 sm:$0xff]  }
 0x339   : > { %v1479_v16 = vpop.f32.mrb[136].mxu0 }
 0x33a   : > { %23055 = vst [vmem:[#allocation60_spill] sm:$0xff] %v19329_v15  ;;  %v1480_v18 = vadd.f32 %v19241_v45, %v1479_v16  ;;  %v16090_v19 = vpop.f32.mrb[137].mxu0  ;;  %2236 = vmatpush1.bf16.msra.mxu1 %v19329_v15  ;;  %2907 = vmatpush1.bf16.msra.mxu0 %v19329_v15  ;;  %v17245_v16 = vld [vmem:[#allocation7 + $0xfc] ss:$24 sps:$4 sm:$0xff]  }
 0x33b   : > { %v1482_v25 = vpop.f32.mrb[138].mxu0  ;;  %2237 = vmatprep.subr.bf16.mxu1 %v22868_v42  ;;  %2908 = vmatprep.subr.bf16.mxu0 %v22868_v42 }
 0x33c   : > { %v1483_v28 = vadd.f32 %v19241_v45, %v1482_v25  ;;  %v16091_v31 = vpop.f32.mrb[139].mxu0  ;;  %v1617_v34 = vmax.f32 %v1480_v18, 0.0 }
 0x33e   : > { %v1618_v37 = vmax.f32 %v1483_v28, 0.0  ;;  %2177 = vmatmul.mubr.bf16.gmra.mrb[8].mxu1 %v17230_v24 }
 0x33f   : > { %2184 = vmatprep.mubr.bf16.mxu1 %v17233_v27 }
 0x340   : > { %v19337_v38 = vpack.c.bf16 %v1618_v37, %v1617_v34  ;;  %v17248_v37 = vld [vmem:[#allocation7 + $0xf8] ss:$24 sps:$4 sm:$0xff]  }
 0x341   : > { %v1487_v40 = vpop.f32.mrb[140].mxu0 }
 0x342   : > { %23056 = vst [vmem:[#allocation61_spill] sm:$0xff] %v19337_v38  ;;  %v1488_v46 = vadd.f32 %v19241_v45, %v1487_v40  ;;  %v16094_v48 = vpop.f32.mrb[141].mxu0  ;;  %2238 = vmatpush1.bf16.msra.mxu1 %v19337_v38  ;;  %2909 = vmatpush1.bf16.msra.mxu0 %v19337_v38 }
 0x343   : > { %v1490_v50 = vpop.f32.mrb[142].mxu0  ;;  %2239 = vmatprep.subr.bf16.mxu1 %v22868_v42  ;;  %2910 = vmatprep.subr.bf16.mxu0 %v22868_v42 }
 0x344   : > { %v1491_v33 = vadd.f32 %v19241_v45, %v1490_v50  ;;  %v16095_v57 = vpop.f32.mrb[143].mxu0  ;;  %v1619_v61 = vmax.f32 %v1488_v46, 0.0  ;;  %v17251_v46 = vld [vmem:[#allocation7 + $0x12c] ss:$24 sps:$4 sm:$0xff]  }
 0x346   : > { %v1620_v62 = vmax.f32 %v1491_v33, 0.0  ;;  %2185 = vmatmul.mubr.bf16.gmra.mrb[12].mxu1 %v17236_v49 }
 0x347   : > { %2192 = vmatprep.mubr.bf16.mxu1 %v17239_v55 }
 0x348   : > { %v19345_v2 = vpack.c.bf16 %v1620_v62, %v1619_v61 }
 0x349   : > { %v1495_v4 = vpop.f32.mrb[144].mxu0 }
 0x34a   : > { %23057 = vst [vmem:[#allocation62_spill] sm:$0xff] %v19345_v2  ;;  %v1496_v6 = vadd.f32 %v19241_v45, %v1495_v4  ;;  %v16098_v7 = vpop.f32.mrb[145].mxu0  ;;  %2240 = vmatpush1.bf16.msra.mxu1 %v19345_v2  ;;  %2911 = vmatpush1.bf16.msra.mxu0 %v19345_v2  ;;  %v17254_v4 = vld [vmem:[#allocation7 + $0x128] ss:$24 sps:$4 sm:$0xff]  }
 0x34b   : > { %v1498_v13 = vpop.f32.mrb[146].mxu0  ;;  %2241 = vmatprep.subr.bf16.mxu1 %v22868_v42  ;;  %2912 = vmatprep.subr.bf16.mxu0 %v22868_v42  ;;  %v17257_v7 = vld [vmem:[#allocation7 + $0x15c] ss:$24 sps:$4 sm:$0xff]  }
 0x34c   : > { %v1499_v18 = vadd.f32 %v19241_v45, %v1498_v13  ;;  %v16099_v19 = vpop.f32.mrb[147].mxu0  ;;  %v1621_v24 = vmax.f32 %v1496_v6, 0.0 }
 0x34e   : > { %v1622_v25 = vmax.f32 %v1499_v18, 0.0  ;;  %2193 = vmatmul.mubr.bf16.gmra.mrb[16].mxu1 %v17242_v9 }
 0x34f   : > { %2200 = vmatprep.mubr.bf16.mxu1 %v17245_v16 }
 0x350   : > { %v19353_v27 = vpack.c.bf16 %v1622_v25, %v1621_v24 }
 0x351   : > { %v1503_v28 = vpop.f32.mrb[148].mxu0 }
 0x352   : > { %23058 = vst [vmem:[#allocation63_spill] sm:$0xff] %v19353_v27  ;;  %v1504_v31 = vadd.f32 %v19241_v45, %v1503_v28  ;;  %v16102_v34 = vpop.f32.mrb[149].mxu0  ;;  %2242 = vmatpush1.bf16.msra.mxu1 %v19353_v27  ;;  %2913 = vmatpush1.bf16.msra.mxu0 %v19353_v27  ;;  %v17364_v27 = vld [vmem:[#allocation7 + $0x2e0] ss:$24 sps:$4 sm:$0xff]  }
 0x353   : > { %v1506_v40 = vpop.f32.mrb[150].mxu0  ;;  %2243 = vmatprep.subr.bf16.mxu1 %v22868_v42  ;;  %2914 = vmatprep.subr.bf16.mxu0 %v22868_v42 }
 0x354   : > { %v1507_v48 = vadd.f32 %v19241_v45, %v1506_v40  ;;  %v16103_v49 = vpop.f32.mrb[151].mxu0  ;;  %v1623_v50 = vmax.f32 %v1504_v31, 0.0  ;;  %v17260_v31 = vld [vmem:[#allocation7 + $0x158] ss:$24 sps:$4 sm:$0xff]  }
 0x356   : > { %v1624_v55 = vmax.f32 %v1507_v48, 0.0  ;;  %2201 = vmatmul.mubr.bf16.gmra.mrb[20].mxu1 %v17248_v37  ;;  %v17263_v37 = vld [vmem:[#allocation7 + $0x18c] ss:$24 sps:$4 sm:$0xff]  }
 0x357   : > { %2208 = vmatprep.mubr.bf16.mxu1 %v17251_v46 }
 0x358   : > { %v19361_v33 = vpack.c.bf16 %v1624_v55, %v1623_v50 }
 0x359   : > { %v1511_v57 = vpop.f32.mrb[152].mxu0 }
 0x35a   : > { %23059 = vst [vmem:[#allocation64_spill] sm:$0xff] %v19361_v33  ;;  %v1512_v61 = vadd.f32 %v19241_v45, %v1511_v57  ;;  %v16106_v62 = vpop.f32.mrb[153].mxu0  ;;  %2244 = vmatpush1.bf16.msra.mxu1 %v19361_v33  ;;  %2915 = vmatpush1.bf16.msra.mxu0 %v19361_v33 }
 0x35b   : > { %v1514_v6 = vpop.f32.mrb[154].mxu0  ;;  %2245 = vmatprep.subr.bf16.mxu1 %v22868_v42  ;;  %2916 = vmatprep.subr.bf16.mxu0 %v22868_v42  ;;  %v17266_v62 = vld [vmem:[#allocation7 + $0x188] ss:$24 sps:$4 sm:$0xff]  }
 0x35c   : > { %v1515_v9 = vadd.f32 %v19241_v45, %v1514_v6  ;;  %v16107_v13 = vpop.f32.mrb[155].mxu0  ;;  %v1625_v16 = vmax.f32 %v1512_v61, 0.0  ;;  %v17269_v6 = vld [vmem:[#allocation7 + $0x14] ss:$24 sps:$4 sm:$0xff]  }
 0x35e   : > { %v1626_v18 = vmax.f32 %v1515_v9, 0.0  ;;  %2209 = vmatmul.mubr.bf16.gmra.mrb[24].mxu1 %v17254_v4 }
 0x35f   : > { %2216 = vmatprep.mubr.bf16.mxu1 %v17257_v7 }
 0x360   : > { %v19369_v19 = vpack.c.bf16 %v1626_v18, %v1625_v16 }
 0x361   : > { %v1519_v24 = vpop.f32.mrb[156].mxu0 }
 0x362   : > { %23060 = vst [vmem:[#allocation65_spill] sm:$0xff] %v19369_v19  ;;  %v1520_v25 = vadd.f32 %v19241_v45, %v1519_v24  ;;  %v16110_v28 = vpop.f32.mrb[157].mxu0  ;;  %2246 = vmatpush1.bf16.msra.mxu1 %v19369_v19  ;;  %2917 = vmatpush1.bf16.msra.mxu0 %v19369_v19  ;;  %v17358_v19 = vld [vmem:[#allocation7 + $0x2b0] ss:$24 sps:$4 sm:$0xff]  }
 0x363   : > { %v1522_v34 = vpop.f32.mrb[158].mxu0  ;;  %2247 = vmatprep.subr.bf16.mxu1 %v22868_v42  ;;  %2918 = vmatprep.subr.bf16.mxu0 %v22868_v42 }
 0x364   : > { %v1523_v40 = vadd.f32 %v19241_v45, %v1522_v34  ;;  %v16111_v46 = vpop.f32.mrb[159].mxu0  ;;  %v1627_v48 = vmax.f32 %v1520_v25, 0.0 }
 0x366   : > { %v1628_v49 = vmax.f32 %v1523_v40, 0.0  ;;  %2217 = vmatmul.mubr.bf16.gmra.mrb[28].mxu1 %v17260_v31 }
 0x367   : > { %2224 = vmatprep.mubr.bf16.mxu1 %v17263_v37 }
 0x368   : > { %v19377_v50 = vpack.c.bf16 %v1628_v49, %v1627_v48 }
 0x369   : > { %v1527_v55 = vpop.f32.mrb[160].mxu0 }
 0x36a   : > { %23061 = vst [vmem:[#allocation66_spill] sm:$0xff] %v19377_v50  ;;  %v1528_v57 = vadd.f32 %v19241_v45, %v1527_v55  ;;  %v16114_v61 = vpop.f32.mrb[161].mxu0  ;;  %2248 = vmatpush1.bf16.msra.mxu1 %v19377_v50  ;;  %2919 = vmatpush1.bf16.msra.mxu0 %v19377_v50 }
 0x36b   : > { %v1530_v4 = vpop.f32.mrb[162].mxu0  ;;  %2249 = vmatprep.subr.bf16.mxu1 %v22868_v42  ;;  %2920 = vmatprep.subr.bf16.mxu0 %v22868_v42 }
 0x36c   : > { %v1531_v7 = vadd.f32 %v19241_v45, %v1530_v4  ;;  %v16115_v9 = vpop.f32.mrb[163].mxu0  ;;  %v1629_v13 = vmax.f32 %v1528_v57, 0.0 }
 0x36d   : > { %v17267_v9 = vld [vmem:[#allocation7 + $0x10] ss:$24 sps:$4 sm:$0xff]  }
 0x36e   : > { %v1630_v16 = vmax.f32 %v1531_v7, 0.0  ;;  %2225 = vmatmul.mubr.bf16.gmra.mrb[32].mxu1 %v17266_v62 }
 0x36f   : > { %13302 = vmatprep.mubr.msk.bf16.mxu1 %vm1992_vm4, %v17269_v6 }
 0x370   : > { %v19386_v18 = vpack.c.bf16 %v1630_v16, %v1629_v13  ;;  %v17272_v16 = vld [vmem:[#allocation7 + $0x40] ss:$24 sps:$4 sm:$0xff]  }
 0x371   : > { %v1535_v24 = vpop.f32.mrb[164].mxu0 }
 0x372   : > { %23062 = vst [vmem:[#allocation67_spill] sm:$0xff] %v19386_v18  ;;  %v1536_v25 = vadd.f32 %v19241_v45, %v1535_v24  ;;  %v16118_v28 = vpop.f32.mrb[165].mxu0  ;;  %2250 = vmatpush1.bf16.msra.mxu1 %v19386_v18  ;;  %2921 = vmatpush1.bf16.msra.mxu0 %v19386_v18  ;;  %v17273_v24 = vld [vmem:[#allocation7 + $0x74] ss:$24 sps:$4 sm:$0xff]   ;;  %v17352_v18 = vld [vmem:[#allocation7 + $0x280] ss:$24 sps:$4 sm:$0xff]  }
 0x373   : > { %v1538_v31 = vpop.f32.mrb[166].mxu0  ;;  %2251 = vmatprep.subr.bf16.mxu1 %v22868_v42  ;;  %2922 = vmatprep.subr.bf16.mxu0 %v22868_v42 }
 0x374   : > { %v1539_v34 = vadd.f32 %v19241_v45, %v1538_v31  ;;  %v16119_v37 = vpop.f32.mrb[167].mxu0  ;;  %v1631_v40 = vmax.f32 %v1536_v25, 0.0 }
 0x376   : > { %v1632_v46 = vmax.f32 %v1539_v34, 0.0 }
 0x378   : > { %v19394_v48 = vpack.c.bf16 %v1632_v46, %v1631_v40  ;;  %v17275_v40 = vld [vmem:[#allocation7 + $0x70] ss:$24 sps:$4 sm:$0xff]   ;;  %v17276_v46 = vld [vmem:[#allocation7 + $0xa4] ss:$24 sps:$4 sm:$0xff]  }
 0x379   : > { %v1543_v49 = vpop.f32.mrb[168].mxu0 }
 0x37a   : > { %23063 = vst [vmem:[#allocation68_spill] sm:$0xff] %v19394_v48  ;;  %v1544_v55 = vadd.f32 %v19241_v45, %v1543_v49  ;;  %v16122_v57 = vpop.f32.mrb[169].mxu0  ;;  %2252 = vmatpush1.bf16.msra.mxu1 %v19394_v48  ;;  %2923 = vmatpush1.bf16.msra.mxu0 %v19394_v48  ;;  %v17270_v45 = vld [vmem:[#allocation7 + $0x44] ss:$24 sps:$4 sm:$0xff]  }
 0x37b   : > { %v1546_v61 = vpop.f32.mrb[170].mxu0  ;;  %2253 = vmatprep.subr.bf16.mxu1 %v22868_v42  ;;  %2924 = vmatprep.subr.bf16.mxu0 %v22868_v42  ;;  %v17285_v42 = vld [vmem:[#allocation7 + $0x134] ss:$24 sps:$4 sm:$0xff]  }
 0x37c   : > { %v1633_v62 = vmax.f32 %v1544_v55, 0.0  ;;  %v16123_v4 = vpop.f32.mrb[171].mxu0  ;;  %v17327_v55 = vld [vmem:[#allocation7 + $0x1c4] ss:$24 sps:$4 sm:$0xff]   ;;  %v17325_v61 = vld [vmem:[#allocation7 + $0x1c0] ss:$24 sps:$4 sm:$0xff]  }
 0x37d   : > { %13365 = vmatprep.mubr.msk.bf16.mxu0 %vm1992_vm4, %v17327_v55 }
 0x37e   : > { %v1676_v6 = vpack.c.bf16 %v1633_v62, %v1633_v62  ;;  %v19428_v62 = vld [vmem:[%s22830_s4 + $0x10] sm:$0xff]  }
 0x380   : > { %v19402_v7 = vsel %vm1166_vm0, %v1676_v6, 0 }
 0x381   : > { %23064 = vst [vmem:[#allocation69_spill] sm:$0xff] %v19402_v7  ;;  %2254 = vmatpush1.bf16.msra.mxu1 %v19402_v7  ;;  %2925 = vmatpush1.bf16.msra.mxu0 %v19402_v7  ;;  %v14441_v13 = vpop.f32.mrb[172].mxu0  ;;  %v17346_v7 = vld [vmem:[#allocation7 + $0x250] ss:$24 sps:$4 sm:$0xff]  }
 0x382   : > { %14565 = vmatprep.subr.bf16.mxu1 %v19163_v1  ;;  %16124 = vmatprep.subr.bf16.mxu0 %v22870_v0  ;;  %v14442_v25 = vpop.f32.mrb[173].mxu0 }
 0x383   : > { %v19415_v28 = vadd.f32 %v14442_v25, %v14441_v13  ;;  %v14444_v31 = vpop.f32.mrb[174].mxu0 }
 0x384   : > { %2266 = vmatmul.mubr.bf16.vlgmr.msra.gmra.mrb[36].mxu1 %v17267_v9  ;;  %v14445_v34 = vpop.f32.mrb[175].mxu0  ;;  %2937 = vmatmul.mubr.bf16.vlgmr.msra.gmra.mrb[208].mxu0 %v17325_v61 }
 0x385   : > { %14566 = vmatpush3.bf16.msra.mxu1 %v19099_v43  ;;  %13303 = vmatprep.mubr.msk.bf16.mxu1 %vm1992_vm4, %v17270_v45  ;;  %v19418_v37 = vadd.f32 %v14445_v34, %v14444_v31  ;;  %v17278_v45 = vld [vmem:[#allocation7 + $0xa0] ss:$24 sps:$4 sm:$0xff]   ;;  %v17332_v31 = vld [vmem:[#allocation7 + $0x1f4] ss:$24 sps:$4 sm:$0xff]   ;;  %v17334_v34 = vld [vmem:[#allocation7 + $0x1f0] ss:$24 sps:$4 sm:$0xff]  }
 0x386   : > { %14567 = vmatprep.subr.bf16.mxu1 %v19173_v12  ;;  %16125 = vmatpush3.bf16.msra.mxu0 %v19428_v62 }
 0x387   : > { %16126 = vmatprep.subr.bf16.mxu0 %v22870_v0  ;;  %13366 = vmatprep.mubr.msk.bf16.mxu0 %vm1992_vm4, %v17332_v31 }
 0x389   : > { %14568 = vmatpush3.bf16.msra.mxu1 %v19107_v53  ;;  %v14447_v49 = vpop.f32.mrb[176].mxu0 }
 0x38a   : > { %14569 = vmatprep.subr.bf16.mxu1 %v19183_v23  ;;  %v14448_v57 = vpop.f32.mrb[177].mxu0 }
 0x38b   : > { %v19430_v4 = vadd.f32 %v14448_v57, %v14447_v49  ;;  %v14450_v6 = vpop.f32.mrb[178].mxu0  ;;  %v17281_v57 = vld [vmem:[#allocation7 + $0xd0] ss:$24 sps:$4 sm:$0xff]  }
 0x38c   : > { %2274 = vmatmul.mubr.bf16.gmra.mrb[40].mxu1 %v17272_v16  ;;  %v14451_v9 = vpop.f32.mrb[179].mxu0  ;;  %v17279_v16 = vld [vmem:[#allocation7 + $0xd4] ss:$24 sps:$4 sm:$0xff]   ;;  %2945 = vmatmul.mubr.bf16.gmra.mrb[212].mxu0 %v17334_v34 }
 0x38d   : > { %14570 = vmatpush3.bf16.msra.mxu1 %v19115_v63  ;;  %13304 = vmatprep.mubr.msk.bf16.mxu1 %vm1992_vm4, %v17273_v24  ;;  %v19433_v13 = vadd.f32 %v14451_v9, %v14450_v6  ;;  %v19442_v24 = vld [vmem:[%s22830_s4 + $0x18] sm:$0xff]   ;;  %v17282_v6 = vld [vmem:[#allocation7 + $0x104] ss:$24 sps:$4 sm:$0xff]  }
 0x38e   : > { %14571 = vmatprep.subr.bf16.mxu1 %v19193_v35  ;;  %16127 = vmatpush3.bf16.msra.mxu0 %v19442_v24 }
 0x38f   : > { %16164 = vmatprep.subr.bf16.mxu0 %v22870_v0 }
 0x391   : > { %14572 = vmatpush3.bf16.msra.mxu1 %v19123_v10  ;;  %v14453_v25 = vpop.f32.mrb[180].mxu0 }
 0x392   : > { %14573 = vmatprep.subr.bf16.mxu1 %v19203_v47 }
 0x394   : > { %2282 = vmatmul.mubr.bf16.gmra.mrb[44].mxu1 %v17275_v40  ;;  %v14454_v40 = vpop.f32.mrb[181].mxu0 }
 0x395   : > { %14574 = vmatpush3.bf16.msra.mxu1 %v19131_v20  ;;  %13305 = vmatprep.mubr.msk.bf16.mxu1 %vm1992_vm4, %v17276_v46  ;;  %v19448_v46 = vadd.f32 %v14454_v40, %v14453_v25  ;;  %v14456_v49 = vpop.f32.mrb[182].mxu0 }
 0x396   : > { %14575 = vmatprep.subr.bf16.mxu1 %v19213_v59  ;;  %v14457_v55 = vpop.f32.mrb[183].mxu0 }
 0x397   : > { %v19452_v61 = vadd.f32 %v14457_v55, %v14456_v49  ;;  %v17284_v49 = vld [vmem:[#allocation7 + $0x100] ss:$24 sps:$4 sm:$0xff]  }
 0x399   : > { %14576 = vmatpush3.bf16.msra.mxu1 %v19139_v30  ;;  %v14459_v9 = vpop.f32.mrb[184].mxu0 }
 0x39a   : > { %14577 = vmatprep.subr.bf16.mxu1 %v19223_v8  ;;  %v14460_v25 = vpop.f32.mrb[185].mxu0 }
 0x39b   : > { %v19457_v31 = vadd.f32 %v14460_v25, %v14459_v9  ;;  %v14462_v34 = vpop.f32.mrb[186].mxu0 }
 0x39c   : > { %2290 = vmatmul.mubr.bf16.gmra.mrb[48].mxu1 %v17278_v45  ;;  %v17338_v45 = vld [vmem:[#allocation7 + $0x224] ss:$24 sps:$4 sm:$0xff]   ;;  %v14463_v40 = vpop.f32.mrb[187].mxu0 }
 0x39d   : > { %14578 = vmatpush3.bf16.msra.mxu1 %v19147_v41  ;;  %13306 = vmatprep.mubr.msk.bf16.mxu1 %vm1992_vm4, %v17279_v16  ;;  %v17340_v16 = vld [vmem:[#allocation7 + $0x220] ss:$24 sps:$4 sm:$0xff]   ;;  %v19460_v55 = vadd.f32 %v14463_v40, %v14462_v34  ;;  %v17288_v34 = vld [vmem:[#allocation7 + $0x164] ss:$24 sps:$4 sm:$0xff]  }
 0x39e   : > { %14579 = vmatprep.subr.bf16.mxu1 %v19231_v21  ;;  %13367 = vmatprep.mubr.msk.bf16.mxu0 %vm1992_vm4, %v17338_v45 }
 0x39f   : > { %2953 = vmatmul.mubr.bf16.gmra.mrb[216].mxu0 %v17340_v16  ;;  %v17287_v16 = vld [vmem:[#allocation7 + $0x130] ss:$24 sps:$4 sm:$0xff]  }
 0x3a1   : > { %14580 = vmatpush3.bf16.msra.mxu1 %v19155_v52  ;;  %v14465_v0 = vpop.f32.mrb[188].mxu0 }
 0x3a2   : > { %14635 = vmatprep.subr.bf16.mxu1 %v19272_v39  ;;  %v14466_v48 = vpop.f32.mrb[189].mxu0 }
 0x3a3   : > { %v14468_v9 = vpop.f32.mrb[190].mxu0 }
 0x3a4   : > { %2298 = vmatmul.mubr.bf16.gmra.mrb[52].mxu1 %v17281_v57  ;;  %v17344_v57 = vld [vmem:[#allocation7 + $0x254] ss:$24 sps:$4 sm:$0xff]   ;;  %v14469_v45 = vpop.f32.mrb[191].mxu0 }
 0x3a5   : > { %13307 = vmatprep.mubr.msk.bf16.mxu1 %vm1992_vm4, %v17282_v6  ;;  %v19463_v6 = vadd.f32 %v14466_v48, %v14465_v0  ;;  %13368 = vmatprep.mubr.msk.bf16.mxu0 %vm1992_vm4, %v17344_v57  ;;  %v19466_v25 = vadd.f32 %v14469_v45, %v14468_v9  ;;  %v17291_v9 = vld [vmem:[#allocation7 + $0x194] ss:$24 sps:$4 sm:$0xff]  }
 0x3a7   : > { %2961 = vmatmul.mubr.bf16.gmra.mrb[220].mxu0 %v17346_v7  ;;  %v17290_v7 = vld [vmem:[#allocation7 + $0x160] ss:$24 sps:$4 sm:$0xff]  }
 0x3a9   : > { %v14471_v40 = vpop.f32.mrb[192].mxu0 }
 0x3aa   : > { %v14472_v50 = vpop.f32.mrb[193].mxu0 }
 0x3ab   : > { %v14474_v0 = vpop.f32.mrb[194].mxu0 }
 0x3ac   : > { %2306 = vmatmul.mubr.bf16.gmra.mrb[56].mxu1 %v17284_v49  ;;  %v17350_v49 = vld [vmem:[#allocation7 + $0x284] ss:$24 sps:$4 sm:$0xff]   ;;  %v14475_v48 = vpop.f32.mrb[195].mxu0 }
 0x3ad   : > { %13308 = vmatprep.mubr.msk.bf16.mxu1 %vm1992_vm4, %v17285_v42  ;;  %v19469_v42 = vadd.f32 %v14472_v50, %v14471_v40  ;;  %13369 = vmatprep.mubr.msk.bf16.mxu0 %vm1992_vm4, %v17350_v49  ;;  %v19472_v57 = vadd.f32 %v14475_v48, %v14474_v0  ;;  %v17296_v0 = vld [vmem:[#allocation7 + $0x1b4] ss:$24 sps:$4 sm:$0xff]  }
 0x3af   : > { %2969 = vmatmul.mubr.bf16.gmra.mrb[224].mxu0 %v17352_v18  ;;  %v17293_v18 = vld [vmem:[#allocation7 + $0x190] ss:$24 sps:$4 sm:$0xff]  }
 0x3b1   : > { %v14477_v45 = vpop.f32.mrb[196].mxu0 }
 0x3b2   : > { %v14478_v33 = vpop.f32.mrb[197].mxu0 }
 0x3b3   : > { %v14480_v50 = vpop.f32.mrb[198].mxu0 }
 0x3b4   : > { %2314 = vmatmul.mubr.bf16.gmra.mrb[60].mxu1 %v17287_v16  ;;  %v17356_v16 = vld [vmem:[#allocation7 + $0x2b4] ss:$24 sps:$4 sm:$0xff]   ;;  %v14481_v40 = vpop.f32.mrb[199].mxu0 }
 0x3b5   : > { %13309 = vmatprep.mubr.msk.bf16.mxu1 %vm1992_vm4, %v17288_v34  ;;  %v19475_v34 = vadd.f32 %v14478_v33, %v14477_v45  ;;  %13370 = vmatprep.mubr.msk.bf16.mxu0 %vm1992_vm4, %v17356_v16  ;;  %v19478_v49 = vadd.f32 %v14481_v40, %v14480_v50  ;;  %v17294_v45 = vld [vmem:[#allocation7 + $0x1b0] ss:$24 sps:$4 sm:$0xff]   ;;  %v17297_v16 = vld [vmem:[#allocation7 + $0x1e4] ss:$24 sps:$4 sm:$0xff]   ;;  %v17368_v40 = vld [vmem:[#allocation7 + $0x314] ss:$24 sps:$4 sm:$0xff]  }
 0x3b7   : > { %2977 = vmatmul.mubr.bf16.gmra.mrb[228].mxu0 %v17358_v19 }
 0x3b9   : > { %v14483_v48 = vpop.f32.mrb[200].mxu0 }
 0x3ba   : > { %v14484_v2 = vpop.f32.mrb[201].mxu0 }
 0x3bb   : > { %v19480_v38 = vadd.f32 %v14484_v2, %v14483_v48  ;;  %v14486_v33 = vpop.f32.mrb[202].mxu0 }
 0x3bc   : > { %2322 = vmatmul.mubr.bf16.gmra.mrb[64].mxu1 %v17290_v7  ;;  %v17362_v7 = vld [vmem:[#allocation7 + $0x2e4] ss:$24 sps:$4 sm:$0xff]  }
 0x3bd   : > { %13310 = vmatprep.mubr.msk.bf16.mxu1 %vm1992_vm4, %v17291_v9  ;;  %13371 = vmatprep.mubr.msk.bf16.mxu0 %vm1992_vm4, %v17362_v7  ;;  %v14487_v9 = vpop.f32.mrb[203].mxu0  ;;  %v17299_v7 = vld [vmem:[#allocation7 + $0x1e0] ss:$24 sps:$4 sm:$0xff]  }
 0x3be   : > { %v19483_v19 = vadd.f32 %v14487_v9, %v14486_v33  ;;  %v17300_v9 = vld [vmem:[#allocation7 + $0x214] ss:$24 sps:$4 sm:$0xff]  }
 0x3bf   : > { %2985 = vmatmul.mubr.bf16.gmra.mrb[232].mxu0 %v17364_v27 }
 0x3c0   : > { %13372 = vmatprep.mubr.msk.bf16.mxu0 %vm1992_vm4, %v17368_v40  ;;  %v23065_v40 = vmov 0.0  }
 0x3c1   : > { %v14489_v50 = vpop.f32.mrb[204].mxu0 }
 0x3c4   : > { %2330 = vmatmul.mubr.bf16.gmra.mrb[68].mxu1 %v17293_v18  ;;  %v17370_v18 = vld [vmem:[#allocation7 + $0x310] ss:$24 sps:$4 sm:$0xff]  }
 0x3c5   : > { %2726 = vmatprep.mubr.bf16.mxu1 %v17296_v0  ;;  %v14490_v0 = vpop.f32.mrb[205].mxu0 }
 0x3c6   : > { %v19487_v2 = vadd.f32 %v14490_v0, %v14489_v50  ;;  %v14492_v27 = vpop.f32.mrb[206].mxu0  ;;  %v17302_v50 = vld [vmem:[#allocation7 + $0x210] ss:$24 sps:$4 sm:$0xff]   ;;  %v17305_v0 = vld [vmem:[#allocation7 + $0x240] ss:$24 sps:$4 sm:$0xff]  }
 0x3c7   : > { %2993 = vmatmul.mubr.bf16.gmra.mrb[236].mxu0 %v17370_v18  ;;  %v14493_v48 = vpop.f32.mrb[207].mxu0  ;;  %v17303_v18 = vld [vmem:[#allocation7 + $0x244] ss:$24 sps:$4 sm:$0xff]  }
 0x3c8   : > { %v19490_v33 = vadd.f32 %v14493_v48, %v14492_v27  ;;  %v17306_v27 = vld [vmem:[#allocation7 + $0x274] ss:$24 sps:$4 sm:$0xff]   ;;  %v17308_v48 = vld [vmem:[#allocation7 + $0x270] ss:$24 sps:$4 sm:$0xff]  }
 0x3cc   : > { %2727 = vmatmul.mubr.bf16.vlgmr.msra.gmra.mrb[72].mxu1 %v17294_v45  ;;  %v17374_v45 = vld [vmem:[#allocation7 + $0x344] ss:$24 sps:$4 sm:$0xff]  }
 0x3cd   : > { %14636 = vmatpush3.bf16.msra.mxu1 %v19237_v36  ;;  %2734 = vmatprep.mubr.bf16.mxu1 %v17297_v16  ;;  %v17376_v16 = vld [vmem:[#allocation7 + $0x340] ss:$24 sps:$4 sm:$0xff]  }
 0x3ce   : > { %14637 = vmatprep.subr.bf16.mxu1 %v19278_v58  ;;  %13373 = vmatprep.mubr.msk.bf16.mxu0 %vm1992_vm4, %v17374_v45  ;;  %v17312_v45 = vld [vmem:[#allocation7 + $0x2d4] ss:$24 sps:$4 sm:$0xff]  }
 0x3cf   : > { %3001 = vmatmul.mubr.bf16.gmra.mrb[240].mxu0 %v17376_v16  ;;  %v17314_v16 = vld [vmem:[#allocation7 + $0x2d0] ss:$24 sps:$4 sm:$0xff]  }
 0x3d0   : > { %16128 = vmatprep.mubr.msk.bf16.mxu0 %vm18556_vm1, %v23065_v40 }
 0x3d1   : > { %14638 = vmatpush3.bf16.msra.mxu1 %v19244_v51 }
 0x3d2   : > { %14639 = vmatprep.subr.bf16.mxu1 %v19284_v11 }
 0x3d4   : > { %2735 = vmatmul.mubr.bf16.gmra.mrb[76].mxu1 %v17299_v7  ;;  %v17309_v7 = vld [vmem:[#allocation7 + $0x2a4] ss:$24 sps:$4 sm:$0xff]  }
 0x3d5   : > { %14640 = vmatpush3.bf16.msra.mxu1 %v19248_v3  ;;  %2742 = vmatprep.mubr.bf16.mxu1 %v17300_v9  ;;  %v17311_v9 = vld [vmem:[#allocation7 + $0x2a0] ss:$24 sps:$4 sm:$0xff]  }
 0x3d6   : > { %14641 = vmatprep.subr.bf16.mxu1 %v19290_v26 }
 0x3d9   : > { %14642 = vmatpush3.bf16.msra.mxu1 %v19252_v17 }
 0x3da   : > { %14643 = vmatprep.subr.bf16.mxu1 %v19296_v44 }
 0x3dc   : > { %2743 = vmatmul.mubr.bf16.gmra.mrb[80].mxu1 %v17302_v50  ;;  %v17315_v50 = vld [vmem:[#allocation7 + $0x304] ss:$24 sps:$4 sm:$0xff]  }
 0x3dd   : > { %14644 = vmatpush3.bf16.msra.mxu1 %v19256_v32  ;;  %2750 = vmatprep.mubr.bf16.mxu1 %v17303_v18  ;;  %v17317_v18 = vld [vmem:[#allocation7 + $0x300] ss:$24 sps:$4 sm:$0xff]  }
 0x3de   : > { %14645 = vmatprep.subr.bf16.mxu1 %v19302_v60 }
 0x3e1   : > { %14646 = vmatpush3.bf16.msra.mxu1 %v19260_v54 }
 0x3e2   : > { %14647 = vmatprep.subr.bf16.mxu1 %v19308_v14 }
 0x3e4   : > { %2751 = vmatmul.mubr.bf16.gmra.mrb[84].mxu1 %v17305_v0  ;;  %v17318_v0 = vld [vmem:[#allocation7 + $0x334] ss:$24 sps:$4 sm:$0xff]  }
 0x3e5   : > { %14648 = vmatpush3.bf16.msra.mxu1 %v19264_v5  ;;  %2758 = vmatprep.mubr.bf16.mxu1 %v17306_v27 }
 0x3e6   : > { %14649 = vmatprep.subr.bf16.mxu1 %v19314_v29 }
 0x3e9   : > { %14650 = vmatpush3.bf16.msra.mxu1 %v19268_v22 }
 0x3ea   : > { %16878 = vmatprep.subr.bf16.mxu1 %v23065_v40 }
 0x3ec   : > { %2759 = vmatmul.mubr.bf16.gmra.mrb[88].mxu1 %v17308_v48 }
 0x3ed   : > { %2766 = vmatprep.mubr.bf16.mxu1 %v17309_v7 }
 0x3f4   : > { %2767 = vmatmul.mubr.bf16.gmra.mrb[92].mxu1 %v17311_v9  ;;  %v17320_v9 = vld [vmem:[#allocation7 + $0x330] ss:$24 sps:$4 sm:$0xff]  }
 0x3f5   : > { %2774 = vmatprep.mubr.bf16.mxu1 %v17312_v45  ;;  %v17323_v45 = vld [vmem:[#allocation7 + $0x1bc] ss:$24 sps:$4 sm:$0xff]  }
 0x3fc   : > { %2775 = vmatmul.mubr.bf16.gmra.mrb[96].mxu1 %v17314_v16 }
 0x3fd   : > { %2782 = vmatprep.mubr.bf16.mxu1 %v17315_v50 }
 0x401   : > { %v14511_v27 = vpop.f32.mrb[0].mxu1 }
 0x402   : > { %v14512_v15 = vpop.f32.mrb[1].mxu1 }
 0x403   : > { %v14513_v56 = vadd.f32 %v14512_v15, %v14511_v27  ;;  %v14514_v52 = vpop.f32.mrb[2].mxu1 }
 0x404   : > { %2783 = vmatmul.mubr.bf16.gmra.mrb[100].mxu1 %v17317_v18  ;;  %v14515_v22 = vpop.f32.mrb[3].mxu1 }
 0x405   : > { %2790 = vmatprep.mubr.bf16.mxu1 %v17318_v0  ;;  %v14516_v29 = vadd.f32 %v14515_v22, %v14514_v52  ;;  %v19510_v48 = vadd.f32 %v14513_v56, %v19415_v28  ;;  %v17321_v22 = vld [vmem:[#allocation7 + $0x1b8] ss:$24 sps:$4 sm:$0xff]   ;;  %v17329_v56 = vld [vmem:[#allocation7 + $0x1ec] ss:$24 sps:$4 sm:$0xff]  }
 0x407   : > { %v19513_v7 = vadd.f32 %v14516_v29, %v19418_v37 }
 0x409   : > { %v14517_v16 = vpop.f32.mrb[4].mxu1 }
 0x40a   : > { %v14518_v50 = vpop.f32.mrb[5].mxu1 }
 0x40b   : > { %v14519_v21 = vadd.f32 %v14518_v50, %v14517_v16  ;;  %v14520_v5 = vpop.f32.mrb[6].mxu1 }
 0x40c   : > { %2791 = vmatmul.mubr.bf16.gmra.mrb[104].mxu1 %v17320_v9  ;;  %v14521_v41 = vpop.f32.mrb[7].mxu1 }
 0x40d   : > { %2831 = vmatprep.mubr.bf16.mxu1 %v17323_v45  ;;  %v14522_v15 = vadd.f32 %v14521_v41, %v14520_v5  ;;  %v19516_v18 = vadd.f32 %v14519_v21, %v19430_v4  ;;  %v17331_v5 = vld [vmem:[#allocation7 + $0x1e8] ss:$24 sps:$4 sm:$0xff]   ;;  %v17335_v4 = vld [vmem:[#allocation7 + $0x21c] ss:$24 sps:$4 sm:$0xff]  }
 0x40f   : > { %v19519_v52 = vadd.f32 %v14522_v15, %v19433_v13 }
 0x411   : > { %v14523_v29 = vpop.f32.mrb[8].mxu1 }
 0x412   : > { %v14524_v28 = vpop.f32.mrb[9].mxu1 }
 0x413   : > { %v14525_v37 = vadd.f32 %v14524_v28, %v14523_v29  ;;  %v14526_v0 = vpop.f32.mrb[10].mxu1 }
 0x414   : > { %2832 = vmatmul.mubr.bf16.vlgmr.msra.gmra.mrb[108].mxu1 %v17321_v22  ;;  %v14527_v27 = vpop.f32.mrb[11].mxu1  ;;  %v17337_v22 = vld [vmem:[#allocation7 + $0x218] ss:$24 sps:$4 sm:$0xff]  }
 0x415   : > { %16880 = vmatpush3.bf16.msra.mxu1 %v19428_v62  ;;  %2839 = vmatprep.mubr.bf16.mxu1 %v17329_v56  ;;  %v14528_v9 = vadd.f32 %v14527_v27, %v14526_v0  ;;  %v19523_v41 = vadd.f32 %v14525_v37, %v19448_v46  ;;  %v17341_v56 = vld [vmem:[#allocation7 + $0x24c] ss:$24 sps:$4 sm:$0xff]  }
 0x416   : > { %16879 = vmatprep.subr.bf16.mxu1 %v23065_v40 }
 0x417   : > { %v19527_v21 = vadd.f32 %v14528_v9, %v19452_v61 }
 0x419   : > { %16881 = vmatpush3.bf16.msra.mxu1 %v19442_v24  ;;  %v14529_v13 = vpop.f32.mrb[12].mxu1 }
 0x41a   : > { %14727 = vmatprep.subr.bf16.mxu1 %v19163_v1  ;;  %v14530_v45 = vpop.f32.mrb[13].mxu1 }
 0x41b   : > { %v14531_v16 = vadd.f32 %v14530_v45, %v14529_v13  ;;  %v14532_v62 = vpop.f32.mrb[14].mxu1 }
 0x41c   : > { %2840 = vmatmul.mubr.bf16.gmra.mrb[112].mxu1 %v17331_v5  ;;  %v14533_v50 = vpop.f32.mrb[15].mxu1 }
 0x41d   : > { %2847 = vmatprep.mubr.bf16.mxu1 %v17335_v4  ;;  %v14534_v46 = vadd.f32 %v14533_v50, %v14532_v62  ;;  %v19532_v15 = vadd.f32 %v14531_v16, %v19457_v31  ;;  %v17343_v31 = vld [vmem:[#allocation7 + $0x248] ss:$24 sps:$4 sm:$0xff]   ;;  %v17347_v4 = vld [vmem:[#allocation7 + $0x27c] ss:$24 sps:$4 sm:$0xff]  }
 0x41f   : > { %v19535_v61 = vadd.f32 %v14534_v46, %v19460_v55 }
 0x421   : > { %v14535_v24 = vpop.f32.mrb[16].mxu1 }
 0x422   : > { %v14536_v29 = vpop.f32.mrb[17].mxu1 }
 0x423   : > { %v14537_v28 = vadd.f32 %v14536_v29, %v14535_v24  ;;  %v14538_v37 = vpop.f32.mrb[18].mxu1 }
 0x424   : > { %2848 = vmatmul.mubr.bf16.gmra.mrb[116].mxu1 %v17337_v22  ;;  %v14539_v0 = vpop.f32.mrb[19].mxu1 }
 0x425   : > { %2855 = vmatprep.mubr.bf16.mxu1 %v17341_v56  ;;  %v14540_v27 = vadd.f32 %v14539_v0, %v14538_v37  ;;  %v19538_v9 = vadd.f32 %v14537_v28, %v19463_v6  ;;  %v17349_v6 = vld [vmem:[#allocation7 + $0x278] ss:$24 sps:$4 sm:$0xff]   ;;  %v17353_v56 = vld [vmem:[#allocation7 + $0x2ac] ss:$24 sps:$4 sm:$0xff]  }
 0x427   : > { %v19541_v5 = vadd.f32 %v14540_v27, %v19466_v25 }
 0x429   : > { %v14541_v55 = vpop.f32.mrb[20].mxu1 }
 0x42a   : > { %v14542_v13 = vpop.f32.mrb[21].mxu1 }
 0x42b   : > { %v14543_v45 = vadd.f32 %v14542_v13, %v14541_v55  ;;  %v14544_v16 = vpop.f32.mrb[22].mxu1 }
 0x42c   : > { %2856 = vmatmul.mubr.bf16.gmra.mrb[120].mxu1 %v17343_v31  ;;  %v14545_v62 = vpop.f32.mrb[23].mxu1 }
 0x42d   : > { %2863 = vmatprep.mubr.bf16.mxu1 %v17347_v4  ;;  %v14546_v50 = vadd.f32 %v14545_v62, %v14544_v16  ;;  %v19544_v46 = vadd.f32 %v14543_v45, %v19469_v42  ;;  %v17355_v42 = vld [vmem:[#allocation7 + $0x2a8] ss:$24 sps:$4 sm:$0xff]   ;;  %v17359_v4 = vld [vmem:[#allocation7 + $0x2dc] ss:$24 sps:$4 sm:$0xff]  }
 0x42f   : > { %v19547_v22 = vadd.f32 %v14546_v50, %v19472_v57 }
 0x431   : > { %v14547_v25 = vpop.f32.mrb[24].mxu1 }
 0x432   : > { %v14548_v24 = vpop.f32.mrb[25].mxu1 }
 0x433   : > { %v14549_v29 = vadd.f32 %v14548_v24, %v14547_v25  ;;  %v14550_v28 = vpop.f32.mrb[26].mxu1 }
 0x434   : > { %2864 = vmatmul.mubr.bf16.gmra.mrb[124].mxu1 %v17349_v6  ;;  %v14551_v37 = vpop.f32.mrb[27].mxu1 }
 0x435   : > { %2871 = vmatprep.mubr.bf16.mxu1 %v17353_v56  ;;  %v14552_v0 = vadd.f32 %v14551_v37, %v14550_v28  ;;  %v19550_v27 = vadd.f32 %v14549_v29, %v19475_v34  ;;  %v17361_v34 = vld [vmem:[#allocation7 + $0x2d8] ss:$24 sps:$4 sm:$0xff]   ;;  %v17365_v56 = vld [vmem:[#allocation7 + $0x30c] ss:$24 sps:$4 sm:$0xff]  }
 0x437   : > { %v19553_v31 = vadd.f32 %v14552_v0, %v19478_v49 }
 0x439   : > { %v14553_v57 = vpop.f32.mrb[28].mxu1 }
 0x43a   : > { %v14554_v55 = vpop.f32.mrb[29].mxu1 }
 0x43b   : > { %v14555_v13 = vadd.f32 %v14554_v55, %v14553_v57  ;;  %v14556_v45 = vpop.f32.mrb[30].mxu1 }
 0x43c   : > { %2872 = vmatmul.mubr.bf16.gmra.mrb[128].mxu1 %v17355_v42  ;;  %v14557_v16 = vpop.f32.mrb[31].mxu1 }
 0x43d   : > { %2879 = vmatprep.mubr.bf16.mxu1 %v17359_v4  ;;  %v14558_v62 = vadd.f32 %v14557_v16, %v14556_v45  ;;  %v19556_v50 = vadd.f32 %v14555_v13, %v19480_v38  ;;  %v17367_v38 = vld [vmem:[#allocation7 + $0x308] ss:$24 sps:$4 sm:$0xff]   ;;  %v17371_v4 = vld [vmem:[#allocation7 + $0x33c] ss:$24 sps:$4 sm:$0xff]  }
 0x43f   : > { %v19559_v6 = vadd.f32 %v14558_v62, %v19483_v19  ;;  %v17373_v19 = vld [vmem:[#allocation7 + $0x338] ss:$24 sps:$4 sm:$0xff]  }
 0x441   : > { %v14559_v49 = vpop.f32.mrb[32].mxu1 }
 0x442   : > { %v14560_v25 = vpop.f32.mrb[33].mxu1 }
 0x443   : > { %v14561_v24 = vadd.f32 %v14560_v25, %v14559_v49  ;;  %v14562_v29 = vpop.f32.mrb[34].mxu1 }
 0x444   : > { %2880 = vmatmul.mubr.bf16.gmra.mrb[132].mxu1 %v17361_v34  ;;  %v14563_v28 = vpop.f32.mrb[35].mxu1 }
 0x445   : > { %2887 = vmatprep.mubr.bf16.mxu1 %v17365_v56  ;;  %v14564_v37 = vadd.f32 %v14563_v28, %v14562_v29  ;;  %v19562_v0 = vadd.f32 %v14561_v24, %v19487_v2 }
 0x447   : > { %v19565_v42 = vadd.f32 %v14564_v37, %v19490_v33 }
 0x44c   : > { %2888 = vmatmul.mubr.bf16.gmra.mrb[136].mxu1 %v17367_v38 }
 0x44d   : > { %2895 = vmatprep.mubr.bf16.mxu1 %v17371_v4 }
 0x454   : > { %2896 = vmatmul.mubr.bf16.gmra.mrb[140].mxu1 %v17373_v19 }
 0x455   : > { %16148 = vmatprep.mubr.msk.bf16.mxu1 %vm18556_vm1, %v23065_v40 }
 0x457   : > { %v2267_v57 = vpop.f32.mrb[36].mxu1  ;;  %v19591_v4 = vpop.f32.mrb[208].mxu0 }
 0x458   : > { %v19570_v55 = vadd.f32 %v2267_v57, %v19510_v48  ;;  %v2269_v13 = vpop.f32.mrb[37].mxu1  ;;  %v2940_v19 = vpop.f32.mrb[209].mxu0 }
 0x459   : > { %v2270_v45 = vpop.f32.mrb[38].mxu1  ;;  %v19595_v57 = vpop.f32.mrb[210].mxu0 }
 0x45a   : > { %v19573_v2 = vadd.f32 %v2270_v45, %v19513_v7  ;;  %v2272_v33 = vpop.f32.mrb[39].mxu1  ;;  %v2943_v13 = vpop.f32.mrb[211].mxu0 }
 0x45f   : > { %v2275_v62 = vpop.f32.mrb[40].mxu1 }
 0x460   : > { %v19578_v34 = vadd.f32 %v2275_v62, %v19516_v18  ;;  %v2277_v56 = vpop.f32.mrb[41].mxu1 }
 0x461   : > { %v2278_v49 = vpop.f32.mrb[42].mxu1 }
 0x462   : > { %v19581_v25 = vadd.f32 %v2278_v49, %v19519_v52  ;;  %v2280_v48 = vpop.f32.mrb[43].mxu1  ;;  %v19603_v49 = vpop.f32.mrb[212].mxu0 }
 0x463   : > { %v2948_v48 = vpop.f32.mrb[213].mxu0 }
 0x467   : > { %v2283_v29 = vpop.f32.mrb[44].mxu1 }
 0x468   : > { %v19586_v7 = vadd.f32 %v2283_v29, %v19523_v41  ;;  %v2285_v28 = vpop.f32.mrb[45].mxu1 }
 0x469   : > { %v2286_v37 = vpop.f32.mrb[46].mxu1  ;;  %v19607_v28 = vpop.f32.mrb[214].mxu0 }
 0x46a   : > { %23066 = vst [vmem:[#allocation70_spill] sm:$0xff] %v19586_v7  ;;  %v19589_v38 = vadd.f32 %v2286_v37, %v19527_v21  ;;  %v2288_v18 = vpop.f32.mrb[47].mxu1  ;;  %v2951_v37 = vpop.f32.mrb[215].mxu0 }
 0x46c   : > { %23067 = vst [vmem:[#allocation71_spill] sm:$0xff] %v19589_v38 }
 0x46f   : > { %v2291_v45 = vpop.f32.mrb[48].mxu1 }
 0x470   : > { %v19598_v33 = vadd.f32 %v2291_v45, %v19532_v15  ;;  %v2293_v41 = vpop.f32.mrb[49].mxu1 }
 0x471   : > { %v2294_v62 = vpop.f32.mrb[50].mxu1 }
 0x472   : > { %23068 = vst [vmem:[#allocation72_spill] sm:$0xff] %v19598_v33  ;;  %v19601_v56 = vadd.f32 %v2294_v62, %v19535_v61  ;;  %v2296_v21 = vpop.f32.mrb[51].mxu1  ;;  %v19615_v41 = vpop.f32.mrb[216].mxu0 }
 0x473   : > { %v2956_v62 = vpop.f32.mrb[217].mxu0 }
 0x474   : > { %23069 = vst [vmem:[#allocation73_spill] sm:$0xff] %v19601_v56  ;;  %v19619_v48 = vpop.f32.mrb[218].mxu0 }
 0x475   : > { %v2959_v29 = vpop.f32.mrb[219].mxu0 }
 0x477   : > { %v2299_v18 = vpop.f32.mrb[52].mxu1 }
 0x478   : > { %v19610_v19 = vadd.f32 %v2299_v18, %v19538_v9  ;;  %v2301_v15 = vpop.f32.mrb[53].mxu1 }
 0x479   : > { %v2302_v13 = vpop.f32.mrb[54].mxu1 }
 0x47a   : > { %23070 = vst [vmem:[#allocation74_spill] sm:$0xff] %v19610_v19  ;;  %v19613_v45 = vadd.f32 %v2302_v13, %v19541_v5  ;;  %v2304_v61 = vpop.f32.mrb[55].mxu1  ;;  %v19627_v13 = vpop.f32.mrb[220].mxu0 }
 0x47b   : > { %v2964_v61 = vpop.f32.mrb[221].mxu0 }
 0x47c   : > { %23071 = vst [vmem:[#allocation75_spill] sm:$0xff] %v19613_v45  ;;  %v19631_v21 = vpop.f32.mrb[222].mxu0 }
 0x47d   : > { %v2967_v24 = vpop.f32.mrb[223].mxu0 }
 0x47f   : > { %v2307_v37 = vpop.f32.mrb[56].mxu1 }
 0x480   : > { %v19622_v52 = vadd.f32 %v2307_v37, %v19544_v46  ;;  %v2309_v9 = vpop.f32.mrb[57].mxu1 }
 0x481   : > { %v2310_v18 = vpop.f32.mrb[58].mxu1 }
 0x482   : > { %23072 = vst [vmem:[#allocation76_spill] sm:$0xff] %v19622_v52  ;;  %v19625_v15 = vadd.f32 %v2310_v18, %v19547_v22  ;;  %v2312_v5 = vpop.f32.mrb[59].mxu1  ;;  %v19639_v18 = vpop.f32.mrb[224].mxu0 }
 0x483   : > { %v2972_v5 = vpop.f32.mrb[225].mxu0 }
 0x484   : > { %23073 = vst [vmem:[#allocation77_spill] sm:$0xff] %v19625_v15  ;;  %v19643_v62 = vpop.f32.mrb[226].mxu0 }
 0x485   : > { %v2975_v1 = vpop.f32.mrb[227].mxu0 }
 0x487   : > { %v2315_v29 = vpop.f32.mrb[60].mxu1 }
 0x488   : > { %v19634_v16 = vadd.f32 %v2315_v29, %v19550_v27  ;;  %v2317_v46 = vpop.f32.mrb[61].mxu1 }
 0x489   : > { %v2318_v37 = vpop.f32.mrb[62].mxu1 }
 0x48a   : > { %23074 = vst [vmem:[#allocation78_spill] sm:$0xff] %v19634_v16  ;;  %v19637_v9 = vadd.f32 %v2318_v37, %v19553_v31  ;;  %v2320_v22 = vpop.f32.mrb[63].mxu1  ;;  %v19651_v37 = vpop.f32.mrb[228].mxu0 }
 0x48b   : > { %v2980_v22 = vpop.f32.mrb[229].mxu0 }
 0x48c   : > { %23075 = vst [vmem:[#allocation79_spill] sm:$0xff] %v19637_v9  ;;  %v19655_v61 = vpop.f32.mrb[230].mxu0 }
 0x48d   : > { %v2983_v16 = vpop.f32.mrb[231].mxu0 }
 0x48f   : > { %v2323_v24 = vpop.f32.mrb[64].mxu1 }
 0x490   : > { %v19646_v52 = vadd.f32 %v2323_v24, %v19556_v50  ;;  %v2325_v27 = vpop.f32.mrb[65].mxu1 }
 0x491   : > { %v2326_v29 = vpop.f32.mrb[66].mxu1 }
 0x492   : > { %23076 = vst [vmem:[#allocation80_spill] sm:$0xff] %v19646_v52  ;;  %v19649_v46 = vadd.f32 %v2326_v29, %v19559_v6  ;;  %v2328_v31 = vpop.f32.mrb[67].mxu1  ;;  %v19663_v29 = vpop.f32.mrb[232].mxu0 }
 0x493   : > { %v2988_v31 = vpop.f32.mrb[233].mxu0 }
 0x494   : > { %23077 = vst [vmem:[#allocation81_spill] sm:$0xff] %v19649_v46  ;;  %v19667_v5 = vpop.f32.mrb[234].mxu0 }
 0x495   : > { %v2991_v52 = vpop.f32.mrb[235].mxu0 }
 0x497   : > { %v2331_v1 = vpop.f32.mrb[68].mxu1 }
 0x498   : > { %v19658_v9 = vadd.f32 %v2331_v1, %v19562_v0  ;;  %v2333_v50 = vpop.f32.mrb[69].mxu1 }
 0x499   : > { %v2334_v24 = vpop.f32.mrb[70].mxu1 }
 0x49a   : > { %23078 = vst [vmem:[#allocation82_spill] sm:$0xff] %v19658_v9  ;;  %v19661_v27 = vadd.f32 %v2334_v24, %v19565_v42  ;;  %v2336_v6 = vpop.f32.mrb[71].mxu1  ;;  %v19671_v50 = vpop.f32.mrb[236].mxu0 }
 0x49b   : > { %v2996_v24 = vpop.f32.mrb[237].mxu0 }
 0x49c   : > { %23079 = vst [vmem:[#allocation83_spill] sm:$0xff] %v19661_v27  ;;  %v19675_v6 = vpop.f32.mrb[238].mxu0 }
 0x49d   : > { %23080 = vst [vmem:[#allocation84_spill] sm:$0xff] %v19675_v6  ;;  %v2999_v31 = vpop.f32.mrb[239].mxu0 }
 0x49f   : > { %v14581_v16 = vpop.f32.mrb[72].mxu1 }
 0x4a0   : > { %v14582_v46 = vpop.f32.mrb[73].mxu1 }
 0x4a1   : > { %v19669_v15 = vadd.f32 %v14582_v46, %v14581_v16  ;;  %v14584_v0 = vpop.f32.mrb[74].mxu1 }
 0x4a2   : > { %v14585_v1 = vpop.f32.mrb[75].mxu1  ;;  %v19679_v27 = vpop.f32.mrb[240].mxu0 }
 0x4a3   : > { %v19673_v42 = vadd.f32 %v14585_v1, %v14584_v0  ;;  %23081 = vst [vmem:[#allocation85_spill] sm:$0xff] %v19679_v27  ;;  %v3004_v16 = vpop.f32.mrb[241].mxu0 }
 0x4a4   : > { %v19683_v33 = vpop.f32.mrb[242].mxu0 }
 0x4a5   : > { %23082 = vst [vmem:[#allocation86_spill] sm:$0xff] %v19683_v33  ;;  %v3007_v56 = vpop.f32.mrb[243].mxu0 }
 0x4a7   : > { %v14587_v19 = vpop.f32.mrb[76].mxu1 }
 0x4a8   : > { %v14588_v45 = vpop.f32.mrb[77].mxu1 }
 0x4a9   : > { %v19677_v22 = vadd.f32 %v14588_v45, %v14587_v19  ;;  %v14590_v9 = vpop.f32.mrb[78].mxu1 }
 0x4aa   : > { %v14591_v52 = vpop.f32.mrb[79].mxu1 }
 0x4ab   : > { %v19681_v46 = vadd.f32 %v14591_v52, %v14590_v9 }
 0x4af   : > { %v14593_v0 = vpop.f32.mrb[80].mxu1 }
 0x4b0   : > { %v14594_v1 = vpop.f32.mrb[81].mxu1 }
 0x4b1   : > { %v19685_v24 = vadd.f32 %v14594_v1, %v14593_v0  ;;  %v14596_v14 = vpop.f32.mrb[82].mxu1 }
 0x4b2   : > { %v14597_v31 = vpop.f32.mrb[83].mxu1 }
 0x4b3   : > { %v19687_v8 = vadd.f32 %v14597_v31, %v14596_v14 }
 0x4b7   : > { %v14599_v19 = vpop.f32.mrb[84].mxu1 }
 0x4b8   : > { %v14600_v45 = vpop.f32.mrb[85].mxu1 }
 0x4b9   : > { %v19689_v54 = vadd.f32 %v14600_v45, %v14599_v19  ;;  %v14602_v30 = vpop.f32.mrb[86].mxu1 }
 0x4ba   : > { %v14603_v60 = vpop.f32.mrb[87].mxu1 }
 0x4bb   : > { %v19691_v9 = vadd.f32 %v14603_v60, %v14602_v30 }
 0x4bf   : > { %v14605_v52 = vpop.f32.mrb[88].mxu1 }
 0x4c0   : > { %v14606_v16 = vpop.f32.mrb[89].mxu1 }
 0x4c1   : > { %v19693_v33 = vadd.f32 %v14606_v16, %v14605_v52  ;;  %v14608_v56 = vpop.f32.mrb[90].mxu1 }
 0x4c2   : > { %v14609_v59 = vpop.f32.mrb[91].mxu1 }
 0x4c3   : > { %v19695_v0 = vadd.f32 %v14609_v59, %v14608_v56 }
 0x4c7   : > { %v14611_v1 = vpop.f32.mrb[92].mxu1 }
 0x4c8   : > { %v14612_v27 = vpop.f32.mrb[93].mxu1 }
 0x4c9   : > { %v19697_v14 = vadd.f32 %v14612_v27, %v14611_v1  ;;  %v14614_v31 = vpop.f32.mrb[94].mxu1 }
 0x4ca   : > { %v14615_v32 = vpop.f32.mrb[95].mxu1 }
 0x4cb   : > { %v19699_v19 = vadd.f32 %v14615_v32, %v14614_v31 }
 0x4cf   : > { %v14617_v45 = vpop.f32.mrb[96].mxu1 }
 0x4d0   : > { %v14618_v20 = vpop.f32.mrb[97].mxu1 }
 0x4d1   : > { %v19701_v30 = vadd.f32 %v14618_v20, %v14617_v45  ;;  %v14620_v60 = vpop.f32.mrb[98].mxu1 }
 0x4d2   : > { %v14621_v7 = vpop.f32.mrb[99].mxu1 }
 0x4d3   : > { %v19703_v52 = vadd.f32 %v14621_v7, %v14620_v60 }
 0x4d7   : > { %v14623_v16 = vpop.f32.mrb[100].mxu1 }
 0x4d8   : > { %v14624_v38 = vpop.f32.mrb[101].mxu1 }
 0x4d9   : > { %v19705_v59 = vadd.f32 %v14624_v38, %v14623_v16  ;;  %v14626_v56 = vpop.f32.mrb[102].mxu1 }
 0x4da   : > { %v14627_v44 = vpop.f32.mrb[103].mxu1 }
 0x4db   : > { %v19707_v27 = vadd.f32 %v14627_v44, %v14626_v56 }
 0x4df   : > { %v14629_v1 = vpop.f32.mrb[104].mxu1 }
 0x4e0   : > { %v14630_v47 = vpop.f32.mrb[105].mxu1 }
 0x4e1   : > { %v19709_v32 = vadd.f32 %v14630_v47, %v14629_v1  ;;  %v14632_v31 = vpop.f32.mrb[106].mxu1 }
 0x4e2   : > { %v14633_v17 = vpop.f32.mrb[107].mxu1 }
 0x4e3   : > { %v19711_v20 = vadd.f32 %v14633_v17, %v14632_v31  ;;  %v17377_v17 = vld [vmem:[%s22830_s4] sm:$0xff]  }
 0x4e5   : > { %23083 = vst [vmem:[#allocation87_spill] sm:$0xff] %v19711_v20 }
 0x4e7   : > { %v14651_v45 = vpop.f32.mrb[108].mxu1 }
 0x4e8   : > { %v14652_v10 = vpop.f32.mrb[109].mxu1 }
 0x4e9   : > { %v14653_v7 = vadd.f32 %v14652_v10, %v14651_v45  ;;  %v14654_v60 = vpop.f32.mrb[110].mxu1 }
 0x4ea   : > { %v14655_v6 = vpop.f32.mrb[111].mxu1 }
 0x4eb   : > { %v2834_v38 = vadd.f32 %v14653_v7, %v19669_v15  ;;  %v14656_v16 = vadd.f32 %v14655_v6, %v14654_v60 }
 0x4ed   : > { %v2939_v26 = vadd.f32 %v19591_v4, %v2834_v38  ;;  %v2837_v44 = vadd.f32 %v14656_v16, %v19673_v42  ;;  %v17378_v4 = vld [vmem:[%s22830_s4 + $0x8] sm:$0xff]  }
 0x4ef   : > { %v2942_v56 = vadd.f32 %v19595_v57, %v2837_v44  ;;  %v14657_v47 = vpop.f32.mrb[112].mxu1 }
 0x4f0   : > { %v14658_v1 = vpop.f32.mrb[113].mxu1 }
 0x4f1   : > { %v3009_v31 = vpack.c.bf16 %v2942_v56, %v2939_v26  ;;  %v14659_v10 = vadd.f32 %v14658_v1, %v14657_v47  ;;  %v14660_v45 = vpop.f32.mrb[114].mxu1 }
 0x4f2   : > { %v14661_v20 = vpop.f32.mrb[115].mxu1 }
 0x4f3   : > { %v2842_v15 = vadd.f32 %v14659_v10, %v19677_v22  ;;  %v14662_v6 = vadd.f32 %v14661_v20, %v14660_v45  ;;  %16129 = vmatmul.mubr.msk.bf16.vlgmr.msra.gmra.mrb[244].mxu0 %vm3035_vm5, %v3009_v31 }
 0x4f4   : > { %16165 = vmatpush3.bf16.msra.mxu0 %v17377_v17  ;;  %16132 = vmatprep.mubr.msk.bf16.mxu0 %vm18556_vm1, %v23065_v40 }
 0x4f5   : > { %v2947_v57 = vadd.f32 %v19603_v49, %v2842_v15  ;;  %v2845_v26 = vadd.f32 %v14662_v6, %v19681_v46  ;;  %16166 = vmatprep.subr.bf16.mxu0 %v23065_v40 }
 0x4f7   : > { %v2950_v42 = vadd.f32 %v19607_v28, %v2845_v26  ;;  %v14663_v22 = vpop.f32.mrb[116].mxu1 }
 0x4f8   : > { %16167 = vmatpush3.bf16.msra.mxu0 %v17378_v4  ;;  %v14664_v20 = vpop.f32.mrb[117].mxu1 }
 0x4f9   : > { %v3010_v7 = vpack.c.bf16 %v2950_v42, %v2947_v57  ;;  %v14665_v60 = vadd.f32 %v14664_v20, %v14663_v22  ;;  %14797 = vmatprep.subr.bf16.mxu0 %v19272_v39  ;;  %v14666_v38 = vpop.f32.mrb[118].mxu1 }
 0x4fa   : > { %v14667_v16 = vpop.f32.mrb[119].mxu1 }
 0x4fb   : > { %v2850_v44 = vadd.f32 %v14665_v60, %v19685_v24  ;;  %v14668_v56 = vadd.f32 %v14667_v16, %v14666_v38  ;;  %16133 = vmatmul.mubr.msk.bf16.gmra.mrb[248].mxu0 %vm3035_vm5, %v3010_v7 }
 0x4fc   : > { %16136 = vmatprep.mubr.msk.bf16.mxu0 %vm18556_vm1, %v23065_v40 }
 0x4fd   : > { %v2955_v49 = vadd.f32 %v19615_v41, %v2850_v44  ;;  %v2853_v28 = vadd.f32 %v14668_v56, %v19687_v8 }
 0x4ff   : > { %v2958_v46 = vadd.f32 %v19619_v48, %v2853_v28  ;;  %v14669_v47 = vpop.f32.mrb[120].mxu1 }
 0x500   : > { %v14670_v1 = vpop.f32.mrb[121].mxu1 }
 0x501   : > { %v3011_v17 = vpack.c.bf16 %v2958_v46, %v2955_v49  ;;  %v14671_v31 = vadd.f32 %v14670_v1, %v14669_v47  ;;  %v14672_v10 = vpop.f32.mrb[122].mxu1 }
 0x502   : > { %v14673_v45 = vpop.f32.mrb[123].mxu1 }
 0x503   : > { %v2858_v24 = vadd.f32 %v14671_v31, %v19689_v54  ;;  %v14674_v15 = vadd.f32 %v14673_v45, %v14672_v10  ;;  %16137 = vmatmul.mubr.msk.bf16.gmra.mrb[252].mxu0 %vm3035_vm5, %v3011_v17  ;;  %v23084_v45 = vpack.c.bf16 %v19573_v2, %v19570_v55 }
 0x504   : > { %16140 = vmatprep.mubr.msk.bf16.mxu0 %vm18556_vm1, %v23065_v40 }
 0x505   : > { %v2963_v41 = vadd.f32 %v19627_v13, %v2858_v24  ;;  %v2861_v8 = vadd.f32 %v14674_v15, %v19691_v9 }
 0x507   : > { %v2966_v48 = vadd.f32 %v19631_v21, %v2861_v8  ;;  %v14675_v6 = vpop.f32.mrb[124].mxu1 }
 0x508   : > { %v14676_v4 = vpop.f32.mrb[125].mxu1 }
 0x509   : > { %v3012_v57 = vpack.c.bf16 %v2966_v48, %v2963_v41  ;;  %v14677_v26 = vadd.f32 %v14676_v4, %v14675_v6  ;;  %v14678_v42 = vpop.f32.mrb[126].mxu1  ;;  %v23086_v6 = vld [vmem:[#allocation54_spill] sm:$0xff]  ;;  %v23088_v4 = vld [vmem:[#allocation37_spill] sm:$0xff] }
 0x50a   : > { %v14679_v22 = vpop.f32.mrb[127].mxu1 }
 0x50b   : > { %v2866_v54 = vadd.f32 %v14677_v26, %v19693_v33  ;;  %v14680_v20 = vadd.f32 %v14679_v22, %v14678_v42  ;;  %16141 = vmatmul.mubr.msk.bf16.gmra.mrb[0].mxu0 %vm3035_vm5, %v3012_v57  ;;  %v23089_v57 = vld [vmem:[#allocation48_spill] sm:$0xff]  ;;  %v23091_v22 = vld [vmem:[#allocation55_spill] sm:$0xff] }
 0x50c   : > { %16144 = vmatprep.mubr.msk.bf16.mxu0 %vm18556_vm1, %v23065_v40  ;;  %v23090_v42 = vld [vmem:[#allocation44_spill] sm:$0xff] }
 0x50d   : > { %v2971_v13 = vadd.f32 %v19639_v18, %v2866_v54  ;;  %v2869_v9 = vadd.f32 %v14680_v20, %v19695_v0 }
 0x50f   : > { %v2974_v21 = vadd.f32 %v19643_v62, %v2869_v9  ;;  %v14681_v7 = vpop.f32.mrb[128].mxu1 }
 0x510   : > { %v14682_v60 = vpop.f32.mrb[129].mxu1 }
 0x511   : > { %v3013_v38 = vpack.c.bf16 %v2974_v21, %v2971_v13  ;;  %v14683_v16 = vadd.f32 %v14682_v60, %v14681_v7  ;;  %v14684_v44 = vpop.f32.mrb[130].mxu1  ;;  %v23092_v21 = vld [vmem:[#allocation71_spill] sm:$0xff]  ;;  %v23093_v7 = vld [vmem:[#allocation70_spill] sm:$0xff] }
 0x512   : > { %v14685_v56 = vpop.f32.mrb[131].mxu1  ;;  %v23094_v60 = vpack.c.bf16 %v23092_v21, %v23093_v7  ;;  %v23127_v21 = vld [vmem:[#allocation78_spill] sm:$0xff] }
 0x513   : > { %v2874_v33 = vadd.f32 %v14683_v16, %v19697_v14  ;;  %v14686_v49 = vadd.f32 %v14685_v56, %v14684_v44  ;;  %16145 = vmatmul.mubr.msk.bf16.gmra.mrb[4].mxu0 %vm3035_vm5, %v3013_v38  ;;  %v23095_v38 = vld [vmem:[#allocation38_spill] sm:$0xff]  ;;  %v23096_v16 = vld [vmem:[#allocation49_spill] sm:$0xff] }
 0x514   : > { %16168 = vmatprep.mubr.msk.bf16.mxu0 %vm18556_vm1, %v23065_v40  ;;  %v23097_v44 = vld [vmem:[#allocation85_spill] sm:$0xff] }
 0x515   : > { %v2979_v18 = vadd.f32 %v19651_v37, %v2874_v33  ;;  %v2877_v0 = vadd.f32 %v14686_v49, %v19699_v19  ;;  %v23098_v33 = vld [vmem:[#allocation87_spill] sm:$0xff] }
 0x517   : > { %v2982_v62 = vadd.f32 %v19655_v61, %v2877_v0  ;;  %v14687_v28 = vpop.f32.mrb[132].mxu1  ;;  %v23100_v0 = vld [vmem:[#allocation56_spill] sm:$0xff] }
 0x518   : > { %v14688_v46 = vpop.f32.mrb[133].mxu1 }
 0x519   : > { %v3014_v47 = vpack.c.bf16 %v2982_v62, %v2979_v18  ;;  %v14689_v1 = vadd.f32 %v14688_v46, %v14687_v28  ;;  %v14690_v17 = vpop.f32.mrb[134].mxu1  ;;  %v23099_v18 = vld [vmem:[#allocation45_spill] sm:$0xff]  ;;  %v23102_v28 = vld [vmem:[#allocation39_spill] sm:$0xff]  ;;  %v23103_v46 = vld [vmem:[#allocation50_spill] sm:$0xff] }
 0x51a   : > { %v14691_v31 = vpop.f32.mrb[135].mxu1 }
 0x51b   : > { %v2882_v14 = vadd.f32 %v14689_v1, %v19701_v30  ;;  %v14692_v10 = vadd.f32 %v14691_v31, %v14690_v17  ;;  %16149 = vmatmul.mubr.msk.bf16.vlgmr.msra.gmra.mrb[144].mxu1 %vm3035_vm5, %v3014_v47  ;;  %16169 = vmatmul.mubr.msk.bf16.vlgmr.msra.gmra.mrb[8].mxu0 %vm3035_vm5, %v23084_v45  ;;  %v23104_v1 = vld [vmem:[#allocation46_spill] sm:$0xff]  ;;  %v23105_v17 = vld [vmem:[#allocation57_spill] sm:$0xff] }
 0x51c   : > { %14728 = vmatpush3.bf16.msra.mxu1 %v19099_v43  ;;  %14798 = vmatpush3.bf16.msra.mxu0 %v19237_v36  ;;  %v17381_v31 = vld [vmem:[#allocation7 + $0x364] ss:$24 sps:$4 sm:$0xff]  }
 0x51d   : > { %v2987_v61 = vadd.f32 %v19663_v29, %v2882_v14  ;;  %v2885_v37 = vadd.f32 %v14692_v10, %v19703_v52  ;;  %14729 = vmatprep.subr.bf16.mxu1 %v19173_v12  ;;  %14799 = vmatprep.subr.bf16.mxu0 %v19278_v58  ;;  %v23106_v14 = vld [vmem:[#allocation73_spill] sm:$0xff]  ;;  %v23107_v10 = vld [vmem:[#allocation72_spill] sm:$0xff] }
 0x51e   : > { %16152 = vmatprep.mubr.msk.bf16.mxu1 %vm18556_vm1, %v23065_v40  ;;  %16172 = vmatprep.mubr.msk.bf16.mxu0 %vm18556_vm1, %v23065_v40  ;;  %v23108_v45 = vpack.c.bf16 %v23106_v14, %v23107_v10  ;;  %v23135_v14 = vld [vmem:[#allocation66_spill] sm:$0xff]  ;;  %v17394_v10 = vld [vmem:[#allocation7 + $0x454] ss:$24 sps:$4 sm:$0xff]  }
 0x51f   : > { %v2990_v55 = vadd.f32 %v19667_v5, %v2885_v37  ;;  %v14693_v2 = vpop.f32.mrb[136].mxu1  ;;  %v23085_v5 = vpack.c.bf16 %v19581_v25, %v19578_v34  ;;  %v23087_v34 = vld [vmem:[#allocation84_spill] sm:$0xff]  ;;  %v23110_v37 = vld [vmem:[#allocation51_spill] sm:$0xff] }
 0x520   : > { %14730 = vmatpush3.bf16.msra.mxu1 %v19107_v53  ;;  %14800 = vmatpush3.bf16.msra.mxu0 %v19244_v51  ;;  %v14694_v29 = vpop.f32.mrb[137].mxu1 }
 0x521   : > { %v3015_v19 = vpack.c.bf16 %v2990_v55, %v2987_v61  ;;  %v14695_v30 = vadd.f32 %v14694_v29, %v14693_v2  ;;  %14731 = vmatprep.subr.bf16.mxu1 %v19183_v23  ;;  %14801 = vmatprep.subr.bf16.mxu0 %v19284_v11  ;;  %v14696_v52 = vpop.f32.mrb[138].mxu1  ;;  %v23109_v61 = vld [vmem:[#allocation40_spill] sm:$0xff]  ;;  %v23111_v55 = vld [vmem:[#allocation47_spill] sm:$0xff]  ;;  %v23112_v2 = vld [vmem:[#allocation58_spill] sm:$0xff] }
 0x522   : > { %v14697_v24 = vpop.f32.mrb[139].mxu1  ;;  %v17379_v29 = vld [vmem:[#allocation7 + $0x360] ss:$24 sps:$4 sm:$0xff]  }
 0x523   : > { %v2890_v15 = vadd.f32 %v14695_v30, %v19705_v59  ;;  %v14698_v41 = vadd.f32 %v14697_v24, %v14696_v52  ;;  %16153 = vmatmul.mubr.msk.bf16.gmra.mrb[148].mxu1 %vm3035_vm5, %v3015_v19  ;;  %16173 = vmatmul.mubr.msk.bf16.gmra.mrb[12].mxu0 %vm3035_vm5, %v23085_v5  ;;  %v23113_v19 = vld [vmem:[#allocation41_spill] sm:$0xff]  ;;  %v23114_v30 = vld [vmem:[#allocation52_spill] sm:$0xff]  ;;  %v23115_v52 = vmov 0  }
 0x524   : > { %14732 = vmatpush3.bf16.msra.mxu1 %v19115_v63  ;;  %14802 = vmatpush3.bf16.msra.mxu0 %v19248_v3  ;;  %v17382_v24 = vld [vmem:[#allocation7 + $0x394] ss:$24 sps:$4 sm:$0xff]  }
 0x525   : > { %v2995_v8 = vadd.f32 %v19671_v50, %v2890_v15  ;;  %v2893_v48 = vadd.f32 %v14698_v41, %v19707_v27  ;;  %14733 = vmatprep.subr.bf16.mxu1 %v19193_v35  ;;  %14803 = vmatprep.subr.bf16.mxu0 %v23086_v6  ;;  %v23116_v15 = vld [vmem:[#allocation75_spill] sm:$0xff]  ;;  %v23117_v41 = vld [vmem:[#allocation74_spill] sm:$0xff] }
 0x526   : > { %16156 = vmatprep.mubr.msk.bf16.mxu1 %vm18556_vm1, %v23065_v40  ;;  %16176 = vmatprep.mubr.msk.bf16.mxu0 %vm18556_vm1, %v23065_v40  ;;  %v23118_v5 = vpack.c.bf16 %v23116_v15, %v23117_v41  ;;  %v23139_v41 = vld [vmem:[#allocation67_spill] sm:$0xff] }
 0x527   : > { %v2998_v25 = vadd.f32 %v23087_v34, %v2893_v48  ;;  %v14699_v59 = vpop.f32.mrb[140].mxu1  ;;  %v17384_v48 = vld [vmem:[#allocation7 + $0x390] ss:$24 sps:$4 sm:$0xff]  }
 0x528   : > { %14734 = vmatpush3.bf16.msra.mxu1 %v23088_v4  ;;  %14804 = vmatpush3.bf16.msra.mxu0 %v23089_v57  ;;  %v14700_v50 = vpop.f32.mrb[141].mxu1  ;;  %v23120_v34 = vld [vmem:[#allocation60_spill] sm:$0xff] }
 0x529   : > { %v3016_v26 = vpack.c.bf16 %v2998_v25, %v2995_v8  ;;  %v14701_v27 = vadd.f32 %v14700_v50, %v14699_v59  ;;  %14735 = vmatprep.subr.bf16.mxu1 %v23090_v42  ;;  %14805 = vmatprep.subr.bf16.mxu0 %v23091_v22  ;;  %v14702_v54 = vpop.f32.mrb[142].mxu1  ;;  %v23119_v8 = vld [vmem:[#allocation59_spill] sm:$0xff]  ;;  %v23121_v59 = vld [vmem:[#allocation77_spill] sm:$0xff]  ;;  %v23122_v50 = vld [vmem:[#allocation76_spill] sm:$0xff] }
 0x52a   : > { %v14703_v20 = vpop.f32.mrb[143].mxu1  ;;  %v17385_v25 = vld [vmem:[#allocation7 + $0x3c4] ss:$24 sps:$4 sm:$0xff]  }
 0x52b   : > { %v2898_v13 = vadd.f32 %v14701_v27, %v19709_v32  ;;  %v14704_v9 = vadd.f32 %v14703_v20, %v14702_v54  ;;  %16157 = vmatmul.mubr.msk.bf16.gmra.mrb[152].mxu1 %vm3035_vm5, %v3016_v26  ;;  %16177 = vmatmul.mubr.msk.bf16.gmra.mrb[16].mxu0 %vm3035_vm5, %v23094_v60  ;;  %v23101_v32 = vld [vmem:[#allocation86_spill] sm:$0xff]  ;;  %v23123_v26 = vpack.c.bf16 %v23121_v59, %v23122_v50  ;;  %v23124_v27 = vld [vmem:[#allocation61_spill] sm:$0xff]  ;;  %v23129_v60 = vld [vmem:[#allocation63_spill] sm:$0xff] }
 0x52c   : > { %14736 = vmatpush3.bf16.msra.mxu1 %v23095_v38  ;;  %14806 = vmatpush3.bf16.msra.mxu0 %v23096_v16  ;;  %v17387_v54 = vld [vmem:[#allocation7 + $0x3c0] ss:$24 sps:$4 sm:$0xff]   ;;  %v17402_v50 = vld [vmem:[#allocation7 + $0x484] ss:$24 sps:$4 sm:$0xff]  }
 0x52d   : > { %v3003_v56 = vadd.f32 %v23097_v44, %v2898_v13  ;;  %v2901_v49 = vadd.f32 %v14704_v9, %v23098_v33  ;;  %14737 = vmatprep.subr.bf16.mxu1 %v23099_v18  ;;  %14807 = vmatprep.subr.bf16.mxu0 %v23100_v0  ;;  %v23125_v20 = vld [vmem:[#allocation62_spill] sm:$0xff]  ;;  %v17388_v13 = vld [vmem:[#allocation7 + $0x3f4] ss:$24 sps:$4 sm:$0xff]   ;;  %v23126_v9 = vld [vmem:[#allocation79_spill] sm:$0xff] }
 0x52e   : > { %16160 = vmatprep.mubr.msk.bf16.mxu1 %vm18556_vm1, %v23065_v40  ;;  %16180 = vmatprep.mubr.msk.bf16.mxu0 %vm18556_vm1, %v23065_v40  ;;  %v23128_v7 = vpack.c.bf16 %v23126_v9, %v23127_v21  ;;  %v17390_v44 = vld [vmem:[#allocation7 + $0x3f0] ss:$24 sps:$4 sm:$0xff]   ;;  %v17391_v33 = vld [vmem:[#allocation7 + $0x424] ss:$24 sps:$4 sm:$0xff]  }
 0x52f   : > { %v3006_v62 = vadd.f32 %v23101_v32, %v2901_v49  ;;  %v23131_v49 = vld [vmem:[#allocation81_spill] sm:$0xff]  ;;  %v23132_v32 = vld [vmem:[#allocation80_spill] sm:$0xff]  ;;  %v23142_v9 = vld [vmem:[#allocation42_spill] sm:$0xff] }
 0x530   : > { %14738 = vmatpush3.bf16.msra.mxu1 %v23102_v28  ;;  %14808 = vmatpush3.bf16.msra.mxu0 %v23103_v46  ;;  %v17400_v59 = vld [vmem:[%s22830_s4 + $0x20] sm:$0xff]  }
 0x531   : > { %v3017_v47 = vpack.c.bf16 %v3006_v62, %v3003_v56  ;;  %14739 = vmatprep.subr.bf16.mxu1 %v23104_v1  ;;  %14809 = vmatprep.subr.bf16.mxu0 %v23105_v17  ;;  %v23130_v56 = vld [vmem:[#allocation64_spill] sm:$0xff]  ;;  %v23133_v62 = vpack.c.bf16 %v23131_v49, %v23132_v32 }
 0x532   : > { %v17404_v21 = vld [vmem:[#allocation7 + $0x398] ss:$24 sps:$4 sm:$0xff]   ;;  %v17410_v49 = vld [vmem:[#allocation7 + $0x3c8] ss:$24 sps:$4 sm:$0xff]  }
 0x533   : > { %16161 = vmatmul.mubr.msk.bf16.gmra.mrb[156].mxu1 %vm3035_vm5, %v3017_v47  ;;  %16181 = vmatmul.mubr.msk.bf16.gmra.mrb[20].mxu0 %vm3035_vm5, %v23108_v45  ;;  %v23134_v47 = vld [vmem:[#allocation65_spill] sm:$0xff]  ;;  %v17398_v45 = vld [vmem:[#allocation7 + $0x36c] ss:$24 sps:$4 sm:$0xff]  }
 0x534   : > { %14740 = vmatpush3.bf16.msra.mxu1 %v23109_v61  ;;  %14810 = vmatpush3.bf16.msra.mxu0 %v23110_v37  ;;  %v17413_v32 = vld [vmem:[#allocation7 + $0x4b0] ss:$24 sps:$4 sm:$0xff]  }
 0x535   : > { %14741 = vmatprep.subr.bf16.mxu1 %v23111_v55  ;;  %14811 = vmatprep.subr.bf16.mxu0 %v23112_v2  ;;  %v17494_v2 = vld [vmem:[#allocation7 + $0x554] ss:$24 sps:$4 sm:$0xff]  }
 0x536   : > { %16184 = vmatprep.mubr.msk.bf16.mxu0 %vm18556_vm1, %v23065_v40  ;;  %3687 = vmatprep.mubr.bf16.mxu1 %v17381_v31  ;;  %v17393_v31 = vld [vmem:[#allocation7 + $0x420] ss:$24 sps:$4 sm:$0xff]  }
 0x538   : > { %14742 = vmatpush3.bf16.msra.mxu1 %v23113_v19  ;;  %14812 = vmatpush3.bf16.msra.mxu0 %v23114_v30  ;;  %v17482_v30 = vld [vmem:[#allocation7 + $0x634] ss:$24 sps:$4 sm:$0xff]  }
 0x539   : > { %3865 = vmatprep.subr.bf16.mxu1 %v23115_v52  ;;  %16204 = vmatprep.subr.bf16.mxu0 %v23065_v40 }
 0x53b   : > { %16185 = vmatmul.mubr.msk.bf16.gmra.mrb[24].mxu0 %vm3035_vm5, %v23118_v5  ;;  %3688 = vmatmul.mubr.bf16.vlgmr.msra.gmra.mrb[160].mxu1 %v17379_v29  ;;  %v23136_v29 = vld [vmem:[#allocation83_spill] sm:$0xff] }
 0x53c   : > { %3866 = vmatpush1.bf16.msra.mxu1 %v23119_v8  ;;  %16188 = vmatprep.mubr.msk.bf16.mxu0 %vm18556_vm1, %v23065_v40  ;;  %v17396_v5 = vld [vmem:[#allocation7 + $0x368] ss:$24 sps:$4 sm:$0xff]  }
 0x53d   : > { %3867 = vmatprep.subr.bf16.mxu1 %v23115_v52  ;;  %3695 = vmatprep.mubr.bf16.mxu1 %v17382_v24  ;;  %v23137_v24 = vld [vmem:[#allocation82_spill] sm:$0xff] }
 0x53e   : > { %v23138_v15 = vpack.c.bf16 %v23136_v29, %v23137_v24  ;;  %v17422_v29 = vld [vmem:[#allocation7 + $0x42c] ss:$24 sps:$4 sm:$0xff]  }
 0x53f   : > { %v17425_v24 = vld [vmem:[#allocation7 + $0x374] ss:$24 sps:$4 sm:$0xff]  }
 0x540   : > { %3868 = vmatpush1.bf16.msra.mxu1 %v23120_v34 }
 0x541   : > { %3869 = vmatprep.subr.bf16.mxu1 %v23115_v52 }
 0x543   : > { %16189 = vmatmul.mubr.msk.bf16.gmra.mrb[28].mxu0 %vm3035_vm5, %v23123_v26  ;;  %3696 = vmatmul.mubr.bf16.gmra.mrb[164].mxu1 %v17384_v48  ;;  %v17399_v48 = vld [vmem:[#allocation7 + $0x450] ss:$24 sps:$4 sm:$0xff]   ;;  %v17406_v26 = vld [vmem:[#allocation7 + $0x39c] ss:$24 sps:$4 sm:$0xff]  }
 0x544   : > { %3870 = vmatpush1.bf16.msra.mxu1 %v23124_v27  ;;  %16192 = vmatprep.mubr.msk.bf16.mxu0 %vm18556_vm1, %v23065_v40 }
 0x545   : > { %3871 = vmatprep.subr.bf16.mxu1 %v23115_v52  ;;  %3703 = vmatprep.mubr.bf16.mxu1 %v17385_v25  ;;  %v23140_v25 = vld [vmem:[#allocation68_spill] sm:$0xff] }
 0x548   : > { %3872 = vmatpush1.bf16.msra.mxu1 %v23125_v20 }
 0x549   : > { %3873 = vmatprep.subr.bf16.mxu1 %v23115_v52 }
 0x54b   : > { %16193 = vmatmul.mubr.msk.bf16.gmra.mrb[32].mxu0 %vm3035_vm5, %v23128_v7  ;;  %3704 = vmatmul.mubr.bf16.gmra.mrb[168].mxu1 %v17387_v54  ;;  %v23141_v54 = vld [vmem:[#allocation69_spill] sm:$0xff] }
 0x54c   : > { %3874 = vmatpush1.bf16.msra.mxu1 %v23129_v60  ;;  %16196 = vmatprep.mubr.msk.bf16.mxu0 %vm18556_vm1, %v23065_v40  ;;  %v17407_v7 = vld [vmem:[#allocation7 + $0x480] ss:$24 sps:$4 sm:$0xff]  }
 0x54d   : > { %3875 = vmatprep.subr.bf16.mxu1 %v23115_v52  ;;  %3711 = vmatprep.mubr.bf16.mxu1 %v17388_v13  ;;  %v17401_v13 = vld [vmem:[%s22830_s4 + $0x28] sm:$0xff]  }
 0x550   : > { %3876 = vmatpush1.bf16.msra.mxu1 %v23130_v56 }
 0x551   : > { %3877 = vmatprep.subr.bf16.mxu1 %v23115_v52 }
 0x553   : > { %16197 = vmatmul.mubr.msk.bf16.gmra.mrb[36].mxu0 %vm3035_vm5, %v23133_v62  ;;  %3712 = vmatmul.mubr.bf16.gmra.mrb[172].mxu1 %v17390_v44  ;;  %v17408_v44 = vld [vmem:[#allocation7 + $0x4b4] ss:$24 sps:$4 sm:$0xff]   ;;  %v17414_v62 = vld [vmem:[#allocation7 + $0x4e4] ss:$24 sps:$4 sm:$0xff]  }
 0x554   : > { %3878 = vmatpush1.bf16.msra.mxu1 %v23134_v47  ;;  %16200 = vmatprep.mubr.msk.bf16.mxu0 %vm18556_vm1, %v23065_v40 }
 0x555   : > { %3879 = vmatprep.subr.bf16.mxu1 %v23115_v52  ;;  %3719 = vmatprep.mubr.bf16.mxu1 %v17391_v33  ;;  %v17412_v33 = vld [vmem:[#allocation7 + $0x3cc] ss:$24 sps:$4 sm:$0xff]  }
 0x558   : > { %3880 = vmatpush1.bf16.msra.mxu1 %v23135_v14 }
 0x559   : > { %3881 = vmatprep.subr.bf16.mxu1 %v23115_v52 }
 0x55b   : > { %16201 = vmatmul.mubr.msk.bf16.gmra.mrb[40].mxu0 %vm3035_vm5, %v23138_v15  ;;  %3720 = vmatmul.mubr.bf16.gmra.mrb[176].mxu1 %v17393_v31  ;;  %v17418_v31 = vld [vmem:[#allocation7 + $0x3fc] ss:$24 sps:$4 sm:$0xff]   ;;  %v17420_v15 = vld [vmem:[#allocation7 + $0x428] ss:$24 sps:$4 sm:$0xff]  }
 0x55c   : > { %3882 = vmatpush1.bf16.msra.mxu1 %v23139_v41  ;;  %3727 = vmatprep.mubr.bf16.mxu1 %v17394_v10  ;;  %v17416_v10 = vld [vmem:[#allocation7 + $0x3f8] ss:$24 sps:$4 sm:$0xff]  }
 0x55d   : > { %3883 = vmatprep.subr.bf16.mxu1 %v23115_v52  ;;  %3792 = vmatprep.mubr.bf16.mxu0 %v17398_v45  ;;  %v17419_v45 = vld [vmem:[#allocation7 + $0x4e0] ss:$24 sps:$4 sm:$0xff]  }
 0x560   : > { %3884 = vmatpush1.bf16.msra.mxu1 %v23140_v25 }
 0x561   : > { %3885 = vmatprep.subr.bf16.mxu1 %v23115_v52 }
 0x563   : > { %3728 = vmatmul.mubr.bf16.gmra.mrb[180].mxu1 %v17399_v48  ;;  %3793 = vmatmul.mubr.bf16.vlgmr.msra.gmra.mrb[44].mxu0 %v17396_v5  ;;  %v17423_v5 = vld [vmem:[#allocation7 + $0x370] ss:$24 sps:$4 sm:$0xff]   ;;  %v17428_v48 = vld [vmem:[#allocation7 + $0x45c] ss:$24 sps:$4 sm:$0xff]  }
 0x564   : > { %3886 = vmatpush1.bf16.msra.mxu1 %v23141_v54  ;;  %16205 = vmatpush3.bf16.msra.mxu0 %v17400_v59  ;;  %v17429_v59 = vld [vmem:[#allocation7 + $0x3a4] ss:$24 sps:$4 sm:$0xff]  }
 0x565   : > { %14878 = vmatprep.subr.bf16.mxu1 %v23142_v9  ;;  %16206 = vmatprep.subr.bf16.mxu0 %v23065_v40 }
 0x566   : > { %3735 = vmatprep.mubr.bf16.mxu1 %v17402_v50  ;;  %3800 = vmatprep.mubr.bf16.mxu0 %v17406_v26  ;;  %v17426_v50 = vld [vmem:[#allocation7 + $0x458] ss:$24 sps:$4 sm:$0xff]  }
 0x567   : > { %v17431_v26 = vld [vmem:[#allocation7 + $0x3a0] ss:$24 sps:$4 sm:$0xff]  }
 0x568   : > { %16207 = vmatpush3.bf16.msra.mxu0 %v17401_v13  ;;  %v17434_v13 = vld [vmem:[#allocation7 + $0x48c] ss:$24 sps:$4 sm:$0xff]  }
 0x569   : > { %14948 = vmatprep.subr.bf16.mxu0 %v19272_v39 }
 0x56b   : > { %3736 = vmatmul.mubr.bf16.gmra.mrb[184].mxu1 %v17407_v7  ;;  %3801 = vmatmul.mubr.bf16.gmra.mrb[48].mxu0 %v17404_v21  ;;  %v17435_v21 = vld [vmem:[#allocation7 + $0x3d4] ss:$24 sps:$4 sm:$0xff]   ;;  %v17432_v7 = vld [vmem:[#allocation7 + $0x488] ss:$24 sps:$4 sm:$0xff]  }
 0x56c   : > { %3743 = vmatprep.mubr.bf16.mxu1 %v17408_v44  ;;  %3808 = vmatprep.mubr.bf16.mxu0 %v17412_v33  ;;  %v17437_v44 = vld [vmem:[#allocation7 + $0x3d0] ss:$24 sps:$4 sm:$0xff]   ;;  %v17440_v33 = vld [vmem:[#allocation7 + $0x4bc] ss:$24 sps:$4 sm:$0xff]  }
 0x573   : > { %3744 = vmatmul.mubr.bf16.gmra.mrb[188].mxu1 %v17413_v32  ;;  %3809 = vmatmul.mubr.bf16.gmra.mrb[52].mxu0 %v17410_v49  ;;  %v17441_v49 = vld [vmem:[#allocation7 + $0x404] ss:$24 sps:$4 sm:$0xff]   ;;  %v17438_v32 = vld [vmem:[#allocation7 + $0x4b8] ss:$24 sps:$4 sm:$0xff]  }
 0x574   : > { %3751 = vmatprep.mubr.bf16.mxu1 %v17414_v62  ;;  %3816 = vmatprep.mubr.bf16.mxu0 %v17418_v31  ;;  %v17443_v62 = vld [vmem:[#allocation7 + $0x400] ss:$24 sps:$4 sm:$0xff]   ;;  %v17446_v31 = vld [vmem:[#allocation7 + $0x4ec] ss:$24 sps:$4 sm:$0xff]  }
 0x57b   : > { %3752 = vmatmul.mubr.bf16.gmra.mrb[192].mxu1 %v17419_v45  ;;  %3817 = vmatmul.mubr.bf16.gmra.mrb[56].mxu0 %v17416_v10  ;;  %v17447_v10 = vld [vmem:[#allocation7 + $0x434] ss:$24 sps:$4 sm:$0xff]   ;;  %v17444_v45 = vld [vmem:[#allocation7 + $0x4e8] ss:$24 sps:$4 sm:$0xff]  }
 0x57c   : > { %3824 = vmatprep.mubr.bf16.mxu0 %v17422_v29  ;;  %13454 = vmatprep.mubr.msk.bf16.mxu1 %vm1992_vm4, %v17425_v24  ;;  %v17449_v29 = vld [vmem:[#allocation7 + $0x430] ss:$24 sps:$4 sm:$0xff]   ;;  %v17450_v24 = vld [vmem:[#allocation7 + $0x464] ss:$24 sps:$4 sm:$0xff]  }
 0x583   : > { %3825 = vmatmul.mubr.bf16.gmra.mrb[60].mxu0 %v17420_v15  ;;  %3898 = vmatmul.mubr.bf16.vlgmr.msra.gmra.mrb[196].mxu1 %v17423_v5  ;;  %v17452_v15 = vld [vmem:[#allocation7 + $0x460] ss:$24 sps:$4 sm:$0xff]   ;;  %v17453_v5 = vld [vmem:[#allocation7 + $0x494] ss:$24 sps:$4 sm:$0xff]  }
 0x584   : > { %14879 = vmatpush3.bf16.msra.mxu1 %v19099_v43  ;;  %3832 = vmatprep.mubr.bf16.mxu0 %v17428_v48  ;;  %v17455_v48 = vld [vmem:[#allocation7 + $0x490] ss:$24 sps:$4 sm:$0xff]  }
 0x585   : > { %14880 = vmatprep.subr.bf16.mxu1 %v19173_v12  ;;  %13455 = vmatprep.mubr.msk.bf16.mxu1 %vm1992_vm4, %v17429_v59  ;;  %v17456_v59 = vld [vmem:[#allocation7 + $0x4c4] ss:$24 sps:$4 sm:$0xff]  }
 0x588   : > { %14881 = vmatpush3.bf16.msra.mxu1 %v19107_v53 }
 0x589   : > { %14882 = vmatprep.subr.bf16.mxu1 %v19183_v23 }
 0x58b   : > { %3833 = vmatmul.mubr.bf16.gmra.mrb[64].mxu0 %v17426_v50  ;;  %3906 = vmatmul.mubr.bf16.gmra.mrb[200].mxu1 %v17431_v26  ;;  %v17458_v50 = vld [vmem:[#allocation7 + $0x4c0] ss:$24 sps:$4 sm:$0xff]   ;;  %v17459_v26 = vld [vmem:[#allocation7 + $0x4f4] ss:$24 sps:$4 sm:$0xff]  }
 0x58c   : > { %14883 = vmatpush3.bf16.msra.mxu1 %v19115_v63  ;;  %3840 = vmatprep.mubr.bf16.mxu0 %v17434_v13  ;;  %v17461_v13 = vld [vmem:[#allocation7 + $0x4f0] ss:$24 sps:$4 sm:$0xff]  }
 0x58d   : > { %14884 = vmatprep.subr.bf16.mxu1 %v19193_v35  ;;  %13456 = vmatprep.mubr.msk.bf16.mxu1 %vm1992_vm4, %v17435_v21  ;;  %v17464_v21 = vld [vmem:[#allocation7 + $0x514] ss:$24 sps:$4 sm:$0xff]  }
 0x590   : > { %14885 = vmatpush3.bf16.msra.mxu1 %v23088_v4 }
 0x591   : > { %14886 = vmatprep.subr.bf16.mxu1 %v23090_v42 }
 0x593   : > { %3841 = vmatmul.mubr.bf16.gmra.mrb[68].mxu0 %v17432_v7  ;;  %3914 = vmatmul.mubr.bf16.gmra.mrb[204].mxu1 %v17437_v44 }
 0x594   : > { %14887 = vmatpush3.bf16.msra.mxu1 %v23095_v38  ;;  %3848 = vmatprep.mubr.bf16.mxu0 %v17440_v33  ;;  %v17462_v33 = vld [vmem:[#allocation7 + $0x510] ss:$24 sps:$4 sm:$0xff]  }
 0x595   : > { %14888 = vmatprep.subr.bf16.mxu1 %v23099_v18  ;;  %13457 = vmatprep.mubr.msk.bf16.mxu1 %vm1992_vm4, %v17441_v49 }
 0x598   : > { %14889 = vmatpush3.bf16.msra.mxu1 %v23102_v28 }
 0x599   : > { %14890 = vmatprep.subr.bf16.mxu1 %v23104_v1 }
 0x59b   : > { %3849 = vmatmul.mubr.bf16.gmra.mrb[72].mxu0 %v17438_v32  ;;  %3922 = vmatmul.mubr.bf16.gmra.mrb[208].mxu1 %v17443_v62  ;;  %v17465_v32 = vld [vmem:[#allocation7 + $0x544] ss:$24 sps:$4 sm:$0xff]  }
 0x59c   : > { %14891 = vmatpush3.bf16.msra.mxu1 %v23109_v61  ;;  %3856 = vmatprep.mubr.bf16.mxu0 %v17446_v31 }
 0x59d   : > { %14892 = vmatprep.subr.bf16.mxu1 %v23111_v55  ;;  %13458 = vmatprep.mubr.msk.bf16.mxu1 %vm1992_vm4, %v17447_v10 }
 0x5a0   : > { %14893 = vmatpush3.bf16.msra.mxu1 %v23113_v19 }
 0x5a1   : > { %4699 = vmatprep.subr.bf16.mxu1 %v23115_v52 }
 0x5a3   : > { %3857 = vmatmul.mubr.bf16.gmra.mrb[76].mxu0 %v17444_v45  ;;  %3930 = vmatmul.mubr.bf16.gmra.mrb[212].mxu1 %v17449_v29  ;;  %v17467_v45 = vld [vmem:[#allocation7 + $0x540] ss:$24 sps:$4 sm:$0xff]  }
 0x5a4   : > { %13459 = vmatprep.mubr.msk.bf16.mxu1 %vm1992_vm4, %v17450_v24  ;;  %16208 = vmatprep.mubr.msk.bf16.mxu0 %vm18556_vm1, %v23065_v40  ;;  %v17468_v24 = vld [vmem:[#allocation7 + $0x574] ss:$24 sps:$4 sm:$0xff]  }
 0x5ab   : > { %3938 = vmatmul.mubr.bf16.gmra.mrb[216].mxu1 %v17452_v15 }
 0x5ac   : > { %13460 = vmatprep.mubr.msk.bf16.mxu1 %vm1992_vm4, %v17453_v5 }
 0x5b3   : > { %3946 = vmatmul.mubr.bf16.gmra.mrb[220].mxu1 %v17455_v48 }
 0x5b4   : > { %13461 = vmatprep.mubr.msk.bf16.mxu1 %vm1992_vm4, %v17456_v59  ;;  %v17470_v59 = vld [vmem:[#allocation7 + $0x570] ss:$24 sps:$4 sm:$0xff]  }
 0x5bb   : > { %3954 = vmatmul.mubr.bf16.gmra.mrb[224].mxu1 %v17458_v50 }
 0x5bc   : > { %13462 = vmatprep.mubr.msk.bf16.mxu1 %vm1992_vm4, %v17459_v26  ;;  %v17471_v26 = vld [vmem:[#allocation7 + $0x5a4] ss:$24 sps:$4 sm:$0xff]  }
 0x5c3   : > { %3962 = vmatmul.mubr.bf16.gmra.mrb[228].mxu1 %v17461_v13 }
 0x5c4   : > { %4521 = vmatprep.mubr.bf16.mxu1 %v17464_v21 }
 0x5c6   : > { %v3097_v7 = vpop.f32.mrb[244].mxu0 }
 0x5c7   : > { %v16130_v44 = vpop.f32.mrb[245].mxu0 }
 0x5c8   : > { %v19923_v49 = vpop.f32.mrb[246].mxu0 }
 0x5c9   : > { %v16131_v62 = vpop.f32.mrb[247].mxu0 }
 0x5ca   : > { %v17474_v62 = vld [vmem:[#allocation7 + $0x5d4] ss:$24 sps:$4 sm:$0xff]  }
 0x5cb   : > { %4522 = vmatmul.mubr.bf16.vlgmr.msra.gmra.mrb[232].mxu1 %v17462_v33  ;;  %v17473_v33 = vld [vmem:[#allocation7 + $0x5a0] ss:$24 sps:$4 sm:$0xff]  }
 0x5cc   : > { %4700 = vmatpush1.bf16.msra.mxu1 %v23119_v8  ;;  %4529 = vmatprep.mubr.bf16.mxu1 %v17465_v32 }
 0x5cd   : > { %4701 = vmatprep.subr.bf16.mxu1 %v23115_v52 }
 0x5ce   : > { %v19927_v31 = vpop.f32.mrb[248].mxu0 }
 0x5cf   : > { %v16134_v10 = vpop.f32.mrb[249].mxu0 }
 0x5d0   : > { %4702 = vmatpush1.bf16.msra.mxu1 %v23120_v34  ;;  %v19930_v29 = vpop.f32.mrb[250].mxu0 }
 0x5d1   : > { %v16135_v15 = vpop.f32.mrb[251].mxu0  ;;  %4703 = vmatprep.subr.bf16.mxu1 %v23115_v52 }
 0x5d2   : > { %v17476_v15 = vld [vmem:[#allocation7 + $0x5d0] ss:$24 sps:$4 sm:$0xff]  }
 0x5d3   : > { %4530 = vmatmul.mubr.bf16.gmra.mrb[236].mxu1 %v17467_v45 }
 0x5d4   : > { %4704 = vmatpush1.bf16.msra.mxu1 %v23124_v27  ;;  %4537 = vmatprep.mubr.bf16.mxu1 %v17468_v24 }
 0x5d5   : > { %4705 = vmatprep.subr.bf16.mxu1 %v23115_v52 }
 0x5d6   : > { %v19935_v5 = vpop.f32.mrb[252].mxu0 }
 0x5d7   : > { %v16138_v48 = vpop.f32.mrb[253].mxu0 }
 0x5d8   : > { %4706 = vmatpush1.bf16.msra.mxu1 %v23125_v20  ;;  %v19938_v50 = vpop.f32.mrb[254].mxu0 }
 0x5d9   : > { %v16139_v13 = vpop.f32.mrb[255].mxu0  ;;  %4707 = vmatprep.subr.bf16.mxu1 %v23115_v52 }
 0x5db   : > { %4538 = vmatmul.mubr.bf16.gmra.mrb[240].mxu1 %v17470_v59  ;;  %v17477_v59 = vld [vmem:[#allocation7 + $0x604] ss:$24 sps:$4 sm:$0xff]  }
 0x5dc   : > { %4708 = vmatpush1.bf16.msra.mxu1 %v23129_v60  ;;  %4545 = vmatprep.mubr.bf16.mxu1 %v17471_v26 }
 0x5dd   : > { %4709 = vmatprep.subr.bf16.mxu1 %v23115_v52 }
 0x5de   : > { %v19943_v21 = vpop.f32.mrb[0].mxu0 }
 0x5df   : > { %v16142_v44 = vpop.f32.mrb[1].mxu0 }
 0x5e0   : > { %4710 = vmatpush1.bf16.msra.mxu1 %v23130_v56  ;;  %v19946_v32 = vpop.f32.mrb[2].mxu0 }
 0x5e1   : > { %v16143_v10 = vpop.f32.mrb[3].mxu0  ;;  %4711 = vmatprep.subr.bf16.mxu1 %v23115_v52 }
 0x5e3   : > { %4546 = vmatmul.mubr.bf16.gmra.mrb[244].mxu1 %v17473_v33 }
 0x5e4   : > { %4712 = vmatpush1.bf16.msra.mxu1 %v23134_v47  ;;  %4553 = vmatprep.mubr.bf16.mxu1 %v17474_v62 }
 0x5e5   : > { %4713 = vmatprep.subr.bf16.mxu1 %v23115_v52 }
 0x5e6   : > { %v19951_v45 = vpop.f32.mrb[4].mxu0 }
 0x5e7   : > { %v16146_v24 = vpop.f32.mrb[5].mxu0 }
 0x5e8   : > { %4714 = vmatpush1.bf16.msra.mxu1 %v23135_v14  ;;  %v19954_v48 = vpop.f32.mrb[6].mxu0  ;;  %v17479_v24 = vld [vmem:[#allocation7 + $0x600] ss:$24 sps:$4 sm:$0xff]   ;;  %v17488_v14 = vld [vmem:[#allocation7 + $0x694] ss:$24 sps:$4 sm:$0xff]  }
 0x5e9   : > { %v16147_v26 = vpop.f32.mrb[7].mxu0  ;;  %4715 = vmatprep.subr.bf16.mxu1 %v23115_v52 }
 0x5eb   : > { %4554 = vmatmul.mubr.bf16.gmra.mrb[248].mxu1 %v17476_v15 }
 0x5ec   : > { %4716 = vmatpush1.bf16.msra.mxu1 %v23139_v41  ;;  %4561 = vmatprep.mubr.bf16.mxu1 %v17477_v59 }
 0x5ed   : > { %4717 = vmatprep.subr.bf16.mxu1 %v23115_v52 }
 0x5ee   : > { %v19959_v13 = vpop.f32.mrb[144].mxu1  ;;  %v3241_v44 = vpop.f32.mrb[8].mxu0 }
 0x5ef   : > { %v19961_v33 = vadd.f32 %v3241_v44, %v3097_v7  ;;  %v16150_v62 = vpop.f32.mrb[145].mxu1  ;;  %v16170_v10 = vpop.f32.mrb[9].mxu0 }
 0x5f0   : > { %4718 = vmatpush1.bf16.msra.mxu1 %v23140_v25  ;;  %v19964_v39 = vpop.f32.mrb[146].mxu1  ;;  %v3244_v26 = vpop.f32.mrb[10].mxu0 }
 0x5f1   : > { %23143 = vst [vmem:[#allocation54_spill] sm:$0xff] %v19961_v33  ;;  %v19967_v15 = vadd.f32 %v3244_v26, %v19923_v49  ;;  %v16151_v59 = vpop.f32.mrb[147].mxu1  ;;  %v16171_v41 = vpop.f32.mrb[11].mxu0  ;;  %4719 = vmatprep.subr.bf16.mxu1 %v23115_v52  ;;  %v17480_v49 = vld [vmem:[#allocation7 + $0x630] ss:$24 sps:$4 sm:$0xff]  }
 0x5f2   : > { %v17485_v59 = vld [vmem:[#allocation7 + $0x664] ss:$24 sps:$4 sm:$0xff]  }
 0x5f3   : > { %23144 = vst [vmem:[#allocation84_spill] sm:$0xff] %v19967_v15  ;;  %4562 = vmatmul.mubr.bf16.gmra.mrb[252].mxu1 %v17479_v24 }
 0x5f4   : > { %4720 = vmatpush1.bf16.msra.mxu1 %v23141_v54  ;;  %4569 = vmatprep.mubr.bf16.mxu1 %v17482_v30 }
 0x5f5   : > { %15029 = vmatprep.subr.bf16.mxu1 %v23142_v9 }
 0x5f6   : > { %v19972_v7 = vpop.f32.mrb[148].mxu1  ;;  %v3249_v44 = vpop.f32.mrb[12].mxu0 }
 0x5f7   : > { %v19975_v62 = vadd.f32 %v3249_v44, %v19927_v31  ;;  %v16154_v10 = vpop.f32.mrb[149].mxu1  ;;  %v16174_v33 = vpop.f32.mrb[13].mxu0 }
 0x5f8   : > { %v19977_v26 = vpop.f32.mrb[150].mxu1  ;;  %v3252_v41 = vpop.f32.mrb[14].mxu0  ;;  %v17483_v10 = vld [vmem:[#allocation7 + $0x660] ss:$24 sps:$4 sm:$0xff]  }
 0x5f9   : > { %23145 = vst [vmem:[#allocation48_spill] sm:$0xff] %v19975_v62  ;;  %v19980_v24 = vadd.f32 %v3252_v41, %v19930_v29  ;;  %v16155_v15 = vpop.f32.mrb[151].mxu1  ;;  %v16175_v30 = vpop.f32.mrb[15].mxu0 }
 0x5fb   : > { %23146 = vst [vmem:[#allocation55_spill] sm:$0xff] %v19980_v24  ;;  %4570 = vmatmul.mubr.bf16.gmra.mrb[0].mxu1 %v17480_v49  ;;  %v17491_v24 = vld [vmem:[#allocation7 + $0x524] ss:$24 sps:$4 sm:$0xff]  }
 0x5fc   : > { %4577 = vmatprep.mubr.bf16.mxu1 %v17485_v59 }
 0x5fe   : > { %v19982_v9 = vpop.f32.mrb[152].mxu1  ;;  %v3257_v54 = vpop.f32.mrb[16].mxu0 }
 0x5ff   : > { %v19985_v31 = vadd.f32 %v3257_v54, %v19935_v5  ;;  %v16158_v44 = vpop.f32.mrb[153].mxu1  ;;  %v16178_v33 = vpop.f32.mrb[17].mxu0 }
 0x600   : > { %v19987_v62 = vpop.f32.mrb[154].mxu1  ;;  %v3260_v25 = vpop.f32.mrb[18].mxu0  ;;  %v17486_v44 = vld [vmem:[#allocation7 + $0x690] ss:$24 sps:$4 sm:$0xff]  }
 0x601   : > { %23147 = vst [vmem:[#allocation71_spill] sm:$0xff] %v19985_v31  ;;  %v19990_v29 = vadd.f32 %v3260_v25, %v19938_v50  ;;  %v16159_v15 = vpop.f32.mrb[155].mxu1  ;;  %v16179_v41 = vpop.f32.mrb[19].mxu0 }
 0x603   : > { %23148 = vst [vmem:[#allocation70_spill] sm:$0xff] %v19990_v29  ;;  %4578 = vmatmul.mubr.bf16.gmra.mrb[4].mxu1 %v17483_v10 }
 0x604   : > { %4585 = vmatprep.mubr.bf16.mxu1 %v17488_v14 }
 0x606   : > { %v19992_v49 = vpop.f32.mrb[156].mxu1  ;;  %v3265_v59 = vpop.f32.mrb[20].mxu0 }
 0x607   : > { %v19995_v54 = vadd.f32 %v3265_v59, %v19943_v21  ;;  %v16162_v5 = vpop.f32.mrb[157].mxu1  ;;  %v16182_v30 = vpop.f32.mrb[21].mxu0 }
 0x608   : > { %v19997_v33 = vpop.f32.mrb[158].mxu1  ;;  %v3268_v31 = vpop.f32.mrb[22].mxu0  ;;  %v17489_v5 = vld [vmem:[#allocation7 + $0x520] ss:$24 sps:$4 sm:$0xff]  }
 0x609   : > { %23149 = vst [vmem:[#allocation49_spill] sm:$0xff] %v19995_v54  ;;  %v20000_v25 = vadd.f32 %v3268_v31, %v19946_v32  ;;  %v16163_v50 = vpop.f32.mrb[159].mxu1  ;;  %v16183_v15 = vpop.f32.mrb[23].mxu0 }
 0x60b   : > { %23150 = vst [vmem:[#allocation85_spill] sm:$0xff] %v20000_v25  ;;  %4586 = vmatmul.mubr.bf16.gmra.mrb[8].mxu1 %v17486_v44 }
 0x60c   : > { %13532 = vmatprep.mubr.msk.bf16.mxu1 %vm1992_vm4, %v17491_v24 }
 0x60e   : > { %v3273_v14 = vpop.f32.mrb[24].mxu0  ;;  %v14743_v10 = vpop.f32.mrb[160].mxu1 }
 0x60f   : > { %v20004_v21 = vadd.f32 %v3273_v14, %v19951_v45  ;;  %v16186_v41 = vpop.f32.mrb[25].mxu0  ;;  %v14744_v59 = vpop.f32.mrb[161].mxu1 }
 0x610   : > { %v20006_v30 = vadd.f32 %v14744_v59, %v14743_v10  ;;  %v3276_v54 = vpop.f32.mrb[26].mxu0  ;;  %v14746_v29 = vpop.f32.mrb[162].mxu1  ;;  %v17497_v59 = vld [vmem:[#allocation7 + $0x584] ss:$24 sps:$4 sm:$0xff]  }
 0x611   : > { %23151 = vst [vmem:[#allocation87_spill] sm:$0xff] %v20004_v21  ;;  %v20009_v32 = vadd.f32 %v3276_v54, %v19954_v48  ;;  %v16187_v31 = vpop.f32.mrb[27].mxu0  ;;  %v14747_v44 = vpop.f32.mrb[163].mxu1  ;;  %v17492_v48 = vld [vmem:[#allocation7 + $0x550] ss:$24 sps:$4 sm:$0xff]  }
 0x612   : > { %v20011_v50 = vadd.f32 %v14747_v44, %v14746_v29 }
 0x613   : > { %23152 = vst [vmem:[#allocation86_spill] sm:$0xff] %v20009_v32  ;;  %4732 = vmatmul.mubr.bf16.vlgmr.msra.gmra.mrb[12].mxu1 %v17489_v5 }
 0x614   : > { %15030 = vmatpush3.bf16.msra.mxu1 %v19099_v43  ;;  %13533 = vmatprep.mubr.msk.bf16.mxu1 %vm1992_vm4, %v17494_v2 }
 0x615   : > { %15031 = vmatprep.subr.bf16.mxu1 %v19173_v12 }
 0x616   : > { %v3281_v45 = vpop.f32.mrb[28].mxu0  ;;  %v14749_v24 = vpop.f32.mrb[164].mxu1 }
 0x617   : > { %v20017_v15 = vadd.f32 %v3281_v45, %v19959_v13  ;;  %v16190_v14 = vpop.f32.mrb[29].mxu0  ;;  %v14750_v10 = vpop.f32.mrb[165].mxu1 }
 0x618   : > { %v20019_v54 = vadd.f32 %v14750_v10, %v14749_v24  ;;  %15032 = vmatpush3.bf16.msra.mxu1 %v19107_v53  ;;  %v3284_v29 = vpop.f32.mrb[30].mxu0  ;;  %v14752_v41 = vpop.f32.mrb[166].mxu1  ;;  %v17495_v10 = vld [vmem:[#allocation7 + $0x580] ss:$24 sps:$4 sm:$0xff]  }
 0x619   : > { %23153 = vst [vmem:[#allocation73_spill] sm:$0xff] %v20017_v15  ;;  %v20023_v5 = vadd.f32 %v3284_v29, %v19964_v39  ;;  %15033 = vmatprep.subr.bf16.mxu1 %v19183_v23  ;;  %v16191_v2 = vpop.f32.mrb[31].mxu0  ;;  %v14753_v31 = vpop.f32.mrb[167].mxu1 }
 0x61a   : > { %v20026_v44 = vadd.f32 %v14753_v31, %v14752_v41  ;;  %v17500_v2 = vld [vmem:[#allocation7 + $0x5b4] ss:$24 sps:$4 sm:$0xff]  }
 0x61b   : > { %23154 = vst [vmem:[#allocation72_spill] sm:$0xff] %v20023_v5  ;;  %4740 = vmatmul.mubr.bf16.gmra.mrb[16].mxu1 %v17492_v48 }
 0x61c   : > { %15034 = vmatpush3.bf16.msra.mxu1 %v19115_v63  ;;  %13534 = vmatprep.mubr.msk.bf16.mxu1 %vm1992_vm4, %v17497_v59 }
 0x61d   : > { %15035 = vmatprep.subr.bf16.mxu1 %v19193_v35 }
 0x61e   : > { %v3289_v13 = vpop.f32.mrb[32].mxu0  ;;  %v14755_v45 = vpop.f32.mrb[168].mxu1 }
 0x61f   : > { %v20032_v24 = vadd.f32 %v3289_v13, %v19972_v7  ;;  %v16194_v39 = vpop.f32.mrb[33].mxu0  ;;  %v14756_v14 = vpop.f32.mrb[169].mxu1 }
 0x620   : > { %v20034_v29 = vadd.f32 %v14756_v14, %v14755_v45  ;;  %15036 = vmatpush3.bf16.msra.mxu1 %v23088_v4  ;;  %v3292_v41 = vpop.f32.mrb[34].mxu0  ;;  %v14758_v48 = vpop.f32.mrb[170].mxu1  ;;  %v17498_v14 = vld [vmem:[#allocation7 + $0x5b0] ss:$24 sps:$4 sm:$0xff]  }
 0x621   : > { %23155 = vst [vmem:[#allocation75_spill] sm:$0xff] %v20032_v24  ;;  %v20038_v31 = vadd.f32 %v3292_v41, %v19977_v26  ;;  %15037 = vmatprep.subr.bf16.mxu1 %v23090_v42  ;;  %v16195_v59 = vpop.f32.mrb[35].mxu0  ;;  %v14759_v5 = vpop.f32.mrb[171].mxu1 }
 0x622   : > { %v20041_v15 = vadd.f32 %v14759_v5, %v14758_v48  ;;  %v17503_v48 = vld [vmem:[#allocation7 + $0x5e4] ss:$24 sps:$4 sm:$0xff]  }
 0x623   : > { %23156 = vst [vmem:[#allocation74_spill] sm:$0xff] %v20038_v31  ;;  %4748 = vmatmul.mubr.bf16.gmra.mrb[20].mxu1 %v17495_v10 }
 0x624   : > { %15038 = vmatpush3.bf16.msra.mxu1 %v23095_v38  ;;  %13535 = vmatprep.mubr.msk.bf16.mxu1 %vm1992_vm4, %v17500_v2  ;;  %v17516_v38 = vld [vmem:[#allocation7 + $0x6c0] ss:$24 sps:$4 sm:$0xff]  }
 0x625   : > { %15039 = vmatprep.subr.bf16.mxu1 %v23099_v18 }
 0x626   : > { %v3297_v7 = vpop.f32.mrb[36].mxu0  ;;  %v14761_v13 = vpop.f32.mrb[172].mxu1 }
 0x627   : > { %v20047_v45 = vadd.f32 %v3297_v7, %v19982_v9  ;;  %v16198_v26 = vpop.f32.mrb[37].mxu0  ;;  %v14762_v39 = vpop.f32.mrb[173].mxu1 }
 0x628   : > { %v20049_v41 = vadd.f32 %v14762_v39, %v14761_v13  ;;  %15040 = vmatpush3.bf16.msra.mxu1 %v23102_v28  ;;  %v3300_v5 = vpop.f32.mrb[38].mxu0  ;;  %v14764_v10 = vpop.f32.mrb[174].mxu1  ;;  %v17501_v39 = vld [vmem:[#allocation7 + $0x5e0] ss:$24 sps:$4 sm:$0xff]  }
 0x629   : > { %23157 = vst [vmem:[#allocation59_spill] sm:$0xff] %v20047_v45  ;;  %v20053_v59 = vadd.f32 %v3300_v5, %v19987_v62  ;;  %15041 = vmatprep.subr.bf16.mxu1 %v23104_v1  ;;  %v16199_v2 = vpop.f32.mrb[39].mxu0  ;;  %v14765_v31 = vpop.f32.mrb[175].mxu1 }
 0x62a   : > { %v20056_v24 = vadd.f32 %v14765_v31, %v14764_v10  ;;  %v17506_v10 = vld [vmem:[#allocation7 + $0x614] ss:$24 sps:$4 sm:$0xff]  }
 0x62b   : > { %23158 = vst [vmem:[#allocation60_spill] sm:$0xff] %v20053_v59  ;;  %4756 = vmatmul.mubr.bf16.gmra.mrb[24].mxu1 %v17498_v14 }
 0x62c   : > { %15042 = vmatpush3.bf16.msra.mxu1 %v23109_v61  ;;  %13536 = vmatprep.mubr.msk.bf16.mxu1 %vm1992_vm4, %v17503_v48 }
 0x62d   : > { %15043 = vmatprep.subr.bf16.mxu1 %v23111_v55 }
 0x62e   : > { %v3305_v9 = vpop.f32.mrb[40].mxu0  ;;  %v14767_v7 = vpop.f32.mrb[176].mxu1 }
 0x62f   : > { %v20062_v13 = vadd.f32 %v3305_v9, %v19992_v49  ;;  %v16202_v62 = vpop.f32.mrb[41].mxu0  ;;  %v14768_v26 = vpop.f32.mrb[177].mxu1 }
 0x630   : > { %v20064_v5 = vadd.f32 %v14768_v26, %v14767_v7  ;;  %15044 = vmatpush3.bf16.msra.mxu1 %v23113_v19  ;;  %v3308_v31 = vpop.f32.mrb[42].mxu0  ;;  %v14770_v14 = vpop.f32.mrb[178].mxu1  ;;  %v17504_v26 = vld [vmem:[#allocation7 + $0x610] ss:$24 sps:$4 sm:$0xff]  }
 0x631   : > { %23159 = vst [vmem:[#allocation77_spill] sm:$0xff] %v20062_v13  ;;  %v20068_v2 = vadd.f32 %v3308_v31, %v19997_v33  ;;  %v16203_v48 = vpop.f32.mrb[43].mxu0  ;;  %v14771_v59 = vpop.f32.mrb[179].mxu1  ;;  %5533 = vmatprep.subr.bf16.mxu1 %v23115_v52  ;;  %v17509_v31 = vld [vmem:[#allocation7 + $0x644] ss:$24 sps:$4 sm:$0xff]  }
 0x632   : > { %v20071_v45 = vadd.f32 %v14771_v59, %v14770_v14 }
 0x633   : > { %23160 = vst [vmem:[#allocation76_spill] sm:$0xff] %v20068_v2  ;;  %4764 = vmatmul.mubr.bf16.gmra.mrb[28].mxu1 %v17501_v39 }
 0x634   : > { %13537 = vmatprep.mubr.msk.bf16.mxu1 %vm1992_vm4, %v17506_v10 }
 0x636   : > { %v14773_v49 = vpop.f32.mrb[180].mxu1  ;;  %v14813_v9 = vpop.f32.mrb[44].mxu0 }
 0x637   : > { %v14774_v7 = vpop.f32.mrb[181].mxu1  ;;  %v14814_v62 = vpop.f32.mrb[45].mxu0 }
 0x638   : > { %v20074_v13 = vadd.f32 %v14774_v7, %v14773_v49  ;;  %v14815_v32 = vadd.f32 %v14814_v62, %v14813_v9  ;;  %v14776_v21 = vpop.f32.mrb[182].mxu1  ;;  %v14816_v33 = vpop.f32.mrb[46].mxu0  ;;  %v17507_v62 = vld [vmem:[#allocation7 + $0x640] ss:$24 sps:$4 sm:$0xff]  }
 0x639   : > { %v14777_v48 = vpop.f32.mrb[183].mxu1  ;;  %v14817_v2 = vpop.f32.mrb[47].mxu0 }
 0x63a   : > { %v20076_v25 = vadd.f32 %v14777_v48, %v14776_v21  ;;  %v14818_v59 = vadd.f32 %v14817_v2, %v14816_v33  ;;  %v3795_v39 = vadd.f32 %v14815_v32, %v20006_v30  ;;  %v17512_v48 = vld [vmem:[#allocation7 + $0x674] ss:$24 sps:$4 sm:$0xff]  }
 0x63b   : > { %4772 = vmatmul.mubr.bf16.gmra.mrb[32].mxu1 %v17504_v26 }
 0x63c   : > { %13538 = vmatprep.mubr.msk.bf16.mxu1 %vm1992_vm4, %v17509_v31  ;;  %v20081_v14 = vadd.f32 %v14818_v59, %v20011_v50 }
 0x63e   : > { %v14779_v10 = vpop.f32.mrb[184].mxu1  ;;  %v14819_v49 = vpop.f32.mrb[48].mxu0 }
 0x63f   : > { %v14780_v7 = vpop.f32.mrb[185].mxu1  ;;  %v14820_v9 = vpop.f32.mrb[49].mxu0 }
 0x640   : > { %v20083_v19 = vadd.f32 %v14780_v7, %v14779_v10  ;;  %v14821_v55 = vadd.f32 %v14820_v9, %v14819_v49  ;;  %v14782_v61 = vpop.f32.mrb[186].mxu1  ;;  %v14822_v21 = vpop.f32.mrb[50].mxu0  ;;  %v17510_v7 = vld [vmem:[#allocation7 + $0x670] ss:$24 sps:$4 sm:$0xff]  }
 0x641   : > { %v14783_v2 = vpop.f32.mrb[187].mxu1  ;;  %v14823_v33 = vpop.f32.mrb[51].mxu0 }
 0x642   : > { %v20085_v30 = vadd.f32 %v14783_v2, %v14782_v61  ;;  %v14824_v32 = vadd.f32 %v14823_v33, %v14822_v21  ;;  %v20088_v26 = vadd.f32 %v14821_v55, %v20019_v54  ;;  %v17515_v21 = vld [vmem:[#allocation7 + $0x6a4] ss:$24 sps:$4 sm:$0xff]  }
 0x643   : > { %4780 = vmatmul.mubr.bf16.gmra.mrb[36].mxu1 %v17507_v62 }
 0x644   : > { %13539 = vmatprep.mubr.msk.bf16.mxu1 %vm1992_vm4, %v17512_v48  ;;  %v20092_v50 = vadd.f32 %v14824_v32, %v20026_v44 }
 0x646   : > { %v14785_v31 = vpop.f32.mrb[188].mxu1  ;;  %v14825_v59 = vpop.f32.mrb[52].mxu0 }
 0x647   : > { %v14786_v10 = vpop.f32.mrb[189].mxu1  ;;  %v14826_v49 = vpop.f32.mrb[53].mxu0 }
 0x648   : > { %v20094_v9 = vadd.f32 %v14786_v10, %v14785_v31  ;;  %v14827_v1 = vadd.f32 %v14826_v49, %v14825_v59  ;;  %v14788_v61 = vpop.f32.mrb[190].mxu1  ;;  %v14828_v2 = vpop.f32.mrb[54].mxu0  ;;  %v17513_v49 = vld [vmem:[#allocation7 + $0x6a0] ss:$24 sps:$4 sm:$0xff]  }
 0x649   : > { %v14789_v33 = vpop.f32.mrb[191].mxu1  ;;  %v14829_v55 = vpop.f32.mrb[55].mxu0 }
 0x64a   : > { %v20096_v54 = vadd.f32 %v14789_v33, %v14788_v61  ;;  %v14830_v62 = vadd.f32 %v14829_v55, %v14828_v2  ;;  %v20099_v48 = vadd.f32 %v14827_v1, %v20034_v29  ;;  %v17518_v2 = vld [vmem:[#allocation7 + $0x6c4] ss:$24 sps:$4 sm:$0xff]  }
 0x64b   : > { %4788 = vmatmul.mubr.bf16.gmra.mrb[40].mxu1 %v17510_v7 }
 0x64c   : > { %13540 = vmatprep.mubr.msk.bf16.mxu1 %vm1992_vm4, %v17515_v21  ;;  %v20103_v44 = vadd.f32 %v14830_v62, %v20041_v15 }
 0x64e   : > { %v14791_v32 = vpop.f32.mrb[192].mxu1  ;;  %v14831_v31 = vpop.f32.mrb[56].mxu0 }
 0x64f   : > { %v14792_v59 = vpop.f32.mrb[193].mxu1  ;;  %v14832_v10 = vpop.f32.mrb[57].mxu0 }
 0x650   : > { %v20105_v28 = vadd.f32 %v14792_v59, %v14791_v32  ;;  %v14833_v18 = vadd.f32 %v14832_v10, %v14831_v31  ;;  %v14794_v61 = vpop.f32.mrb[194].mxu1  ;;  %v14834_v33 = vpop.f32.mrb[58].mxu0 }
 0x651   : > { %v14795_v55 = vpop.f32.mrb[195].mxu1  ;;  %v14835_v1 = vpop.f32.mrb[59].mxu0 }
 0x652   : > { %v20107_v29 = vadd.f32 %v14795_v55, %v14794_v61  ;;  %v14836_v7 = vadd.f32 %v14835_v1, %v14834_v33  ;;  %v20110_v21 = vadd.f32 %v14833_v18, %v20049_v41  ;;  %v17521_v61 = vld [vmem:[#allocation7 + $0x6f4] ss:$24 sps:$4 sm:$0xff]  }
 0x653   : > { %4796 = vmatmul.mubr.bf16.gmra.mrb[44].mxu1 %v17513_v49 }
 0x654   : > { %5355 = vmatprep.mubr.bf16.mxu1 %v17518_v2  ;;  %v20113_v15 = vadd.f32 %v14836_v7, %v20056_v24  ;;  %v17524_v7 = vld [vmem:[#allocation7 + $0x724] ss:$24 sps:$4 sm:$0xff]  }
 0x656   : > { %v14837_v62 = vpop.f32.mrb[60].mxu0  ;;  %v3899_v32 = vpop.f32.mrb[196].mxu1 }
 0x657   : > { %v3900_v59 = vadd.f32 %v3899_v32, %v3795_v39  ;;  %v14838_v31 = vpop.f32.mrb[61].mxu0  ;;  %v3901_v10 = vpop.f32.mrb[197].mxu1 }
 0x658   : > { %v14839_v42 = vadd.f32 %v14838_v31, %v14837_v62  ;;  %v14840_v4 = vpop.f32.mrb[62].mxu0  ;;  %v3902_v35 = vpop.f32.mrb[198].mxu1 }
 0x659   : > { %v3903_v33 = vadd.f32 %v3902_v35, %v20081_v14  ;;  %v14841_v55 = vpop.f32.mrb[63].mxu0  ;;  %v3904_v18 = vpop.f32.mrb[199].mxu1 }
 0x65a   : > { %v14842_v41 = vadd.f32 %v14841_v55, %v14840_v4  ;;  %v20117_v49 = vadd.f32 %v14839_v42, %v20064_v5  ;;  %v17519_v5 = vld [vmem:[#allocation7 + $0x6f0] ss:$24 sps:$4 sm:$0xff]  }
 0x65b   : > { %v3970_v24 = vpack.c.bf16 %v3903_v33, %v3900_v59  ;;  %5356 = vmatmul.mubr.bf16.vlgmr.msra.gmra.mrb[48].mxu1 %v17516_v38 }
 0x65c   : > { %5534 = vmatpush1.bf16.msra.mxu1 %v23119_v8  ;;  %5363 = vmatprep.mubr.bf16.mxu1 %v17521_v61  ;;  %v20121_v39 = vadd.f32 %v14842_v41, %v20071_v45  ;;  %v17522_v41 = vld [vmem:[#allocation7 + $0x720] ss:$24 sps:$4 sm:$0xff]  }
 0x65d   : > { %16209 = vmatmul.mubr.msk.bf16.vlgmr.msra.gmra.mrb[80].mxu0 %vm3035_vm5, %v3970_v24  ;;  %5535 = vmatprep.subr.bf16.mxu1 %v23115_v52 }
 0x65e   : > { %14949 = vmatpush3.bf16.msra.mxu0 %v19237_v36  ;;  %v14843_v35 = vpop.f32.mrb[64].mxu0  ;;  %v3907_v14 = vpop.f32.mrb[200].mxu1  ;;  %16212 = vmatprep.mubr.msk.bf16.mxu0 %vm18556_vm1, %v23065_v40 }
 0x65f   : > { %v3908_v4 = vadd.f32 %v3907_v14, %v20088_v26  ;;  %14950 = vmatprep.subr.bf16.mxu0 %v19278_v58  ;;  %v14844_v42 = vpop.f32.mrb[65].mxu0  ;;  %v3909_v38 = vpop.f32.mrb[201].mxu1  ;;  %v17527_v14 = vld [vmem:[#allocation7 + $0x754] ss:$24 sps:$4 sm:$0xff]  }
 0x660   : > { %v14845_v45 = vadd.f32 %v14844_v42, %v14843_v35  ;;  %5536 = vmatpush1.bf16.msra.mxu1 %v23120_v34  ;;  %v14846_v2 = vpop.f32.mrb[66].mxu0  ;;  %v3910_v1 = vpop.f32.mrb[202].mxu1 }
 0x661   : > { %v3911_v62 = vadd.f32 %v3910_v1, %v20092_v50  ;;  %v14847_v32 = vpop.f32.mrb[67].mxu0  ;;  %v3912_v59 = vpop.f32.mrb[203].mxu1  ;;  %5537 = vmatprep.subr.bf16.mxu1 %v23115_v52 }
 0x662   : > { %v14848_v31 = vadd.f32 %v14847_v32, %v14846_v2  ;;  %14951 = vmatpush3.bf16.msra.mxu0 %v19244_v51  ;;  %v20135_v26 = vadd.f32 %v14845_v45, %v20074_v13  ;;  %v17525_v32 = vld [vmem:[#allocation7 + $0x750] ss:$24 sps:$4 sm:$0xff]  }
 0x663   : > { %v3971_v10 = vpack.c.bf16 %v3911_v62, %v3908_v4  ;;  %14952 = vmatprep.subr.bf16.mxu0 %v19284_v11  ;;  %5364 = vmatmul.mubr.bf16.gmra.mrb[52].mxu1 %v17519_v5 }
 0x664   : > { %5538 = vmatpush1.bf16.msra.mxu1 %v23124_v27  ;;  %5371 = vmatprep.mubr.bf16.mxu1 %v17524_v7  ;;  %v20140_v61 = vadd.f32 %v14848_v31, %v20076_v25 }
 0x665   : > { %16213 = vmatmul.mubr.msk.bf16.gmra.mrb[84].mxu0 %vm3035_vm5, %v3971_v10  ;;  %5539 = vmatprep.subr.bf16.mxu1 %v23115_v52  ;;  %v17530_v10 = vld [vmem:[#allocation7 + $0x784] ss:$24 sps:$4 sm:$0xff]  }
 0x666   : > { %14953 = vmatpush3.bf16.msra.mxu0 %v19248_v3  ;;  %v14849_v50 = vpop.f32.mrb[68].mxu0  ;;  %v3915_v33 = vpop.f32.mrb[204].mxu1  ;;  %16216 = vmatprep.mubr.msk.bf16.mxu0 %vm18556_vm1, %v23065_v40 }
 0x667   : > { %v3916_v13 = vadd.f32 %v3915_v33, %v20099_v48  ;;  %14954 = vmatprep.subr.bf16.mxu0 %v23086_v6  ;;  %v14850_v55 = vpop.f32.mrb[69].mxu0  ;;  %v3917_v18 = vpop.f32.mrb[205].mxu1 }
 0x668   : > { %v14851_v25 = vadd.f32 %v14850_v55, %v14849_v50  ;;  %5540 = vmatpush1.bf16.msra.mxu1 %v23125_v20  ;;  %v14852_v24 = vpop.f32.mrb[70].mxu0  ;;  %v3918_v35 = vpop.f32.mrb[206].mxu1 }
 0x669   : > { %v3919_v4 = vadd.f32 %v3918_v35, %v20103_v44  ;;  %v14853_v42 = vpop.f32.mrb[71].mxu0  ;;  %v3920_v38 = vpop.f32.mrb[207].mxu1  ;;  %5541 = vmatprep.subr.bf16.mxu1 %v23115_v52 }
 0x66a   : > { %v14854_v5 = vadd.f32 %v14853_v42, %v14852_v24  ;;  %14955 = vmatpush3.bf16.msra.mxu0 %v23089_v57  ;;  %v20154_v48 = vadd.f32 %v14851_v25, %v20083_v19  ;;  %v23161_v24 = vld [vmem:[#allocation58_spill] sm:$0xff] }
 0x66b   : > { %v3972_v45 = vpack.c.bf16 %v3919_v4, %v3916_v13  ;;  %14956 = vmatprep.subr.bf16.mxu0 %v23091_v22  ;;  %5372 = vmatmul.mubr.bf16.gmra.mrb[56].mxu1 %v17522_v41  ;;  %v17528_v4 = vld [vmem:[#allocation7 + $0x780] ss:$24 sps:$4 sm:$0xff]  }
 0x66c   : > { %5542 = vmatpush1.bf16.msra.mxu1 %v23129_v60  ;;  %5379 = vmatprep.mubr.bf16.mxu1 %v17527_v14  ;;  %v20159_v2 = vadd.f32 %v14854_v5, %v20085_v30  ;;  %v23162_v42 = vld [vmem:[#allocation66_spill] sm:$0xff] }
 0x66d   : > { %16217 = vmatmul.mubr.msk.bf16.gmra.mrb[88].mxu0 %vm3035_vm5, %v3972_v45  ;;  %5543 = vmatprep.subr.bf16.mxu1 %v23115_v52  ;;  %v17533_v45 = vld [vmem:[#allocation7 + $0x7b4] ss:$24 sps:$4 sm:$0xff]  }
 0x66e   : > { %14957 = vmatpush3.bf16.msra.mxu0 %v23096_v16  ;;  %v14855_v44 = vpop.f32.mrb[72].mxu0  ;;  %v3923_v1 = vpop.f32.mrb[208].mxu1  ;;  %16220 = vmatprep.mubr.msk.bf16.mxu0 %vm18556_vm1, %v23065_v40 }
 0x66f   : > { %v3924_v19 = vadd.f32 %v3923_v1, %v20110_v21  ;;  %14958 = vmatprep.subr.bf16.mxu0 %v23100_v0  ;;  %v14856_v7 = vpop.f32.mrb[73].mxu0  ;;  %v3925_v62 = vpop.f32.mrb[209].mxu1 }
 0x670   : > { %v14857_v30 = vadd.f32 %v14856_v7, %v14855_v44  ;;  %5544 = vmatpush1.bf16.msra.mxu1 %v23130_v56  ;;  %v14858_v59 = vpop.f32.mrb[74].mxu0  ;;  %v3926_v31 = vpop.f32.mrb[210].mxu1  ;;  %v23163_v62 = vld [vmem:[#allocation52_spill] sm:$0xff] }
 0x671   : > { %v3927_v50 = vadd.f32 %v3926_v31, %v20113_v15  ;;  %v14859_v33 = vpop.f32.mrb[75].mxu0  ;;  %v3928_v13 = vpop.f32.mrb[211].mxu1  ;;  %5545 = vmatprep.subr.bf16.mxu1 %v23115_v52 }
 0x672   : > { %v14860_v55 = vadd.f32 %v14859_v33, %v14858_v59  ;;  %14959 = vmatpush3.bf16.msra.mxu0 %v23103_v46  ;;  %v20173_v21 = vadd.f32 %v14857_v30, %v20094_v9  ;;  %v23164_v30 = vld [vmem:[#allocation67_spill] sm:$0xff]  ;;  %v17625_v46 = vld [vmem:[#allocation7 + $0x9f4] ss:$24 sps:$4 sm:$0xff]  }
 0x673   : > { %v3973_v18 = vpack.c.bf16 %v3927_v50, %v3924_v19  ;;  %14960 = vmatprep.subr.bf16.mxu0 %v23105_v17  ;;  %5380 = vmatmul.mubr.bf16.gmra.mrb[60].mxu1 %v17525_v32  ;;  %v23165_v50 = vld [vmem:[#allocation68_spill] sm:$0xff]  ;;  %v17536_v13 = vld [vmem:[#allocation7 + $0x7e4] ss:$24 sps:$4 sm:$0xff]  }
 0x674   : > { %5546 = vmatpush1.bf16.msra.mxu1 %v23134_v47  ;;  %5387 = vmatprep.mubr.bf16.mxu1 %v17530_v10  ;;  %v20178_v41 = vadd.f32 %v14860_v55, %v20096_v54  ;;  %v17531_v10 = vld [vmem:[#allocation7 + $0x7b0] ss:$24 sps:$4 sm:$0xff]  }
 0x675   : > { %16221 = vmatmul.mubr.msk.bf16.gmra.mrb[92].mxu0 %vm3035_vm5, %v3973_v18  ;;  %5547 = vmatprep.subr.bf16.mxu1 %v23115_v52 }
 0x676   : > { %14961 = vmatpush3.bf16.msra.mxu0 %v23110_v37  ;;  %v14861_v15 = vpop.f32.mrb[76].mxu0  ;;  %v3931_v25 = vpop.f32.mrb[212].mxu1  ;;  %16224 = vmatprep.mubr.msk.bf16.mxu0 %vm18556_vm1, %v23065_v40 }
 0x677   : > { %v3932_v9 = vadd.f32 %v3931_v25, %v20117_v49  ;;  %14962 = vmatprep.subr.bf16.mxu0 %v23161_v24  ;;  %v14862_v35 = vpop.f32.mrb[77].mxu0  ;;  %v3933_v14 = vpop.f32.mrb[213].mxu1  ;;  %v23167_v25 = vld [vmem:[#allocation42_spill] sm:$0xff]  ;;  %v17595_v24 = vld [vmem:[#allocation7 + $0x854] ss:$24 sps:$4 sm:$0xff]  }
 0x678   : > { %v14863_v54 = vadd.f32 %v14862_v35, %v14861_v15  ;;  %5548 = vmatpush1.bf16.msra.mxu1 %v23162_v42  ;;  %v14864_v38 = vpop.f32.mrb[78].mxu0  ;;  %v3934_v5 = vpop.f32.mrb[214].mxu1  ;;  %v23166_v15 = vld [vmem:[#allocation69_spill] sm:$0xff] }
 0x679   : > { %v3935_v44 = vadd.f32 %v3934_v5, %v20121_v39  ;;  %v14865_v1 = vpop.f32.mrb[79].mxu0  ;;  %v3936_v19 = vpop.f32.mrb[215].mxu1  ;;  %5549 = vmatprep.subr.bf16.mxu1 %v23115_v52 }
 0x67a   : > { %v14866_v7 = vadd.f32 %v14865_v1, %v14864_v38  ;;  %14963 = vmatpush3.bf16.msra.mxu0 %v23163_v62  ;;  %v3859_v49 = vadd.f32 %v14863_v54, %v20105_v28 }
 0x67b   : > { %v3974_v32 = vpack.c.bf16 %v3935_v44, %v3932_v9  ;;  %5388 = vmatmul.mubr.bf16.gmra.mrb[64].mxu1 %v17528_v4  ;;  %16244 = vmatprep.subr.bf16.mxu0 %v23065_v40  ;;  %v17539_v4 = vld [vmem:[#allocation7 + $0x814] ss:$24 sps:$4 sm:$0xff]  }
 0x67c   : > { %5550 = vmatpush1.bf16.msra.mxu1 %v23164_v30  ;;  %5395 = vmatprep.mubr.bf16.mxu1 %v17533_v45  ;;  %v3862_v59 = vadd.f32 %v14866_v7, %v20107_v29  ;;  %v17542_v7 = vld [vmem:[#allocation7 + $0x844] ss:$24 sps:$4 sm:$0xff]  }
 0x67d   : > { %16225 = vmatmul.mubr.msk.bf16.gmra.mrb[96].mxu0 %vm3035_vm5, %v3974_v32  ;;  %5551 = vmatprep.subr.bf16.mxu1 %v23115_v52 }
 0x67e   : > { %v3939_v39 = vpop.f32.mrb[216].mxu1  ;;  %16228 = vmatprep.mubr.msk.bf16.mxu0 %vm18556_vm1, %v23065_v40 }
 0x67f   : > { %v3940_v31 = vadd.f32 %v3939_v39, %v20135_v26  ;;  %v3941_v28 = vpop.f32.mrb[217].mxu1 }
 0x680   : > { %5552 = vmatpush1.bf16.msra.mxu1 %v23165_v50  ;;  %v3942_v33 = vpop.f32.mrb[218].mxu1 }
 0x681   : > { %v3943_v55 = vadd.f32 %v3942_v33, %v20140_v61  ;;  %v3944_v18 = vpop.f32.mrb[219].mxu1  ;;  %5553 = vmatprep.subr.bf16.mxu1 %v23115_v52  ;;  %v17534_v61 = vld [vmem:[#allocation7 + $0x7e0] ss:$24 sps:$4 sm:$0xff]  }
 0x682   : > { %v17540_v33 = vld [vmem:[#allocation7 + $0x840] ss:$24 sps:$4 sm:$0xff]  }
 0x683   : > { %v3975_v29 = vpack.c.bf16 %v3943_v55, %v3940_v31  ;;  %5396 = vmatmul.mubr.bf16.gmra.mrb[68].mxu1 %v17531_v10 }
 0x684   : > { %5554 = vmatpush1.bf16.msra.mxu1 %v23166_v15  ;;  %5403 = vmatprep.mubr.bf16.mxu1 %v17536_v13  ;;  %v17545_v13 = vld [vmem:[#allocation7 + $0x6d4] ss:$24 sps:$4 sm:$0xff]  }
 0x685   : > { %15180 = vmatprep.subr.bf16.mxu1 %v23167_v25  ;;  %16229 = vmatmul.mubr.msk.bf16.gmra.mrb[100].mxu0 %vm3035_vm5, %v3975_v29  ;;  %v17548_v29 = vld [vmem:[#allocation7 + $0x51c] ss:$24 sps:$4 sm:$0xff]  }
 0x686   : > { %v3947_v26 = vpop.f32.mrb[220].mxu1  ;;  %16232 = vmatprep.mubr.msk.bf16.mxu0 %vm18556_vm1, %v23065_v40 }
 0x687   : > { %v3948_v9 = vadd.f32 %v3947_v26, %v20154_v48  ;;  %v3949_v35 = vpop.f32.mrb[221].mxu1  ;;  %v17537_v48 = vld [vmem:[#allocation7 + $0x810] ss:$24 sps:$4 sm:$0xff]  }
 0x688   : > { %v3950_v14 = vpop.f32.mrb[222].mxu1  ;;  %v17546_v35 = vld [vmem:[#allocation7 + $0x518] ss:$24 sps:$4 sm:$0xff]  }
 0x689   : > { %v3951_v54 = vadd.f32 %v3950_v14, %v20159_v2  ;;  %v3952_v38 = vpop.f32.mrb[223].mxu1  ;;  %v17551_v14 = vld [vmem:[#allocation7 + $0x700] ss:$24 sps:$4 sm:$0xff]  }
 0x68a   : > { %v17562_v38 = vld [vmem:[#allocation7 + $0x57c] ss:$24 sps:$4 sm:$0xff]  }
 0x68b   : > { %v3976_v5 = vpack.c.bf16 %v3951_v54, %v3948_v9  ;;  %5404 = vmatmul.mubr.bf16.gmra.mrb[72].mxu1 %v17534_v61  ;;  %v17553_v9 = vld [vmem:[#allocation7 + $0x704] ss:$24 sps:$4 sm:$0xff]   ;;  %v17554_v54 = vld [vmem:[#allocation7 + $0x548] ss:$24 sps:$4 sm:$0xff]  }
 0x68c   : > { %5411 = vmatprep.mubr.bf16.mxu1 %v17539_v4  ;;  %v17556_v61 = vld [vmem:[#allocation7 + $0x54c] ss:$24 sps:$4 sm:$0xff]  }
 0x68d   : > { %16233 = vmatmul.mubr.msk.bf16.gmra.mrb[104].mxu0 %vm3035_vm5, %v3976_v5  ;;  %v17559_v4 = vld [vmem:[#allocation7 + $0x734] ss:$24 sps:$4 sm:$0xff]  }
 0x68e   : > { %v3955_v45 = vpop.f32.mrb[224].mxu1  ;;  %16236 = vmatprep.mubr.msk.bf16.mxu0 %vm18556_vm1, %v23065_v40  ;;  %v23168_v5 = vld [vmem:[#allocation53_spill] sm:$0xff] }
 0x68f   : > { %v3956_v44 = vadd.f32 %v3955_v45, %v20173_v21  ;;  %v3957_v1 = vpop.f32.mrb[225].mxu1  ;;  %v23169_v45 = vld [vmem:[#allocation43_spill] sm:$0xff] }
 0x690   : > { %v3958_v19 = vpop.f32.mrb[226].mxu1  ;;  %v23170_v1 = vld [vmem:[#allocation37_spill] sm:$0xff] }
 0x691   : > { %v3959_v32 = vadd.f32 %v3958_v19, %v20178_v41  ;;  %v3960_v39 = vpop.f32.mrb[227].mxu1  ;;  %v17543_v41 = vld [vmem:[#allocation7 + $0x6d0] ss:$24 sps:$4 sm:$0xff]  }
 0x692   : > { %v23171_v19 = vld [vmem:[#allocation44_spill] sm:$0xff] }
 0x693   : > { %v3977_v2 = vpack.c.bf16 %v3959_v32, %v3956_v44  ;;  %5412 = vmatmul.mubr.bf16.gmra.mrb[76].mxu1 %v17537_v48  ;;  %v17557_v44 = vld [vmem:[#allocation7 + $0x730] ss:$24 sps:$4 sm:$0xff]   ;;  %v17565_v48 = vld [vmem:[#allocation7 + $0x764] ss:$24 sps:$4 sm:$0xff]  }
 0x694   : > { %5419 = vmatprep.mubr.bf16.mxu1 %v17542_v7  ;;  %v17560_v7 = vld [vmem:[#allocation7 + $0x578] ss:$24 sps:$4 sm:$0xff]   ;;  %v17568_v32 = vld [vmem:[#allocation7 + $0x5ac] ss:$24 sps:$4 sm:$0xff]  }
 0x695   : > { %16237 = vmatmul.mubr.msk.bf16.gmra.mrb[108].mxu0 %vm3035_vm5, %v3977_v2  ;;  %v23172_v2 = vld [vmem:[#allocation38_spill] sm:$0xff] }
 0x696   : > { %v3963_v31 = vpop.f32.mrb[228].mxu1  ;;  %16240 = vmatprep.mubr.msk.bf16.mxu0 %vm18556_vm1, %v23065_v40 }
 0x697   : > { %v3964_v28 = vadd.f32 %v3963_v31, %v3859_v49  ;;  %v3965_v10 = vpop.f32.mrb[229].mxu1  ;;  %v17549_v49 = vld [vmem:[%s22830_s4 + $0x30] sm:$0xff]  }
 0x698   : > { %v3966_v21 = vpop.f32.mrb[230].mxu1 }
 0x699   : > { %v3967_v55 = vadd.f32 %v3966_v21, %v3862_v59  ;;  %v3968_v18 = vpop.f32.mrb[231].mxu1  ;;  %v17550_v59 = vld [vmem:[%s22830_s4 + $0x38] sm:$0xff]  }
 0x69a   : > { %v23174_v18 = vld [vmem:[#allocation39_spill] sm:$0xff] }
 0x69b   : > { %v3978_v26 = vpack.c.bf16 %v3967_v55, %v3964_v28  ;;  %5420 = vmatmul.mubr.bf16.gmra.mrb[80].mxu1 %v17540_v33  ;;  %v23173_v28 = vld [vmem:[#allocation45_spill] sm:$0xff] }
 0x69c   : > { %13610 = vmatprep.mubr.msk.bf16.mxu1 %vm1992_vm4, %v17545_v13  ;;  %v17563_v13 = vld [vmem:[#allocation7 + $0x760] ss:$24 sps:$4 sm:$0xff]  }
 0x69d   : > { %16241 = vmatmul.mubr.msk.bf16.gmra.mrb[112].mxu0 %vm3035_vm5, %v3978_v26  ;;  %v23175_v26 = vld [vmem:[#allocation46_spill] sm:$0xff] }
 0x69e   : > { %4626 = vmatprep.mubr.bf16.mxu0 %v17548_v29  ;;  %v14894_v39 = vpop.f32.mrb[232].mxu1  ;;  %v17571_v29 = vld [vmem:[#allocation7 + $0x794] ss:$24 sps:$4 sm:$0xff]  }
 0x69f   : > { %v14895_v31 = vpop.f32.mrb[233].mxu1 }
 0x6a0   : > { %v20241_v10 = vadd.f32 %v14895_v31, %v14894_v39  ;;  %v14897_v33 = vpop.f32.mrb[234].mxu1  ;;  %v17580_v39 = vld [vmem:[#allocation7 + $0x60c] ss:$24 sps:$4 sm:$0xff]  }
 0x6a1   : > { %v14898_v21 = vpop.f32.mrb[235].mxu1 }
 0x6a2   : > { %v20243_v55 = vadd.f32 %v14898_v21, %v14897_v33 }
 0x6a3   : > { %5566 = vmatmul.mubr.bf16.vlgmr.msra.gmra.mrb[84].mxu1 %v17543_v41  ;;  %v17566_v41 = vld [vmem:[#allocation7 + $0x5a8] ss:$24 sps:$4 sm:$0xff]  }
 0x6a4   : > { %15181 = vmatpush3.bf16.msra.mxu1 %v19099_v43  ;;  %13611 = vmatprep.mubr.msk.bf16.mxu1 %vm1992_vm4, %v17553_v9  ;;  %v17574_v9 = vld [vmem:[#allocation7 + $0x5dc] ss:$24 sps:$4 sm:$0xff]  }
 0x6a5   : > { %15182 = vmatprep.subr.bf16.mxu1 %v19173_v12  ;;  %4627 = vmatmul.mubr.bf16.vlgmr.msra.gmra.mrb[116].mxu0 %v17546_v35 }
 0x6a6   : > { %16245 = vmatpush3.bf16.msra.mxu0 %v17549_v49  ;;  %4634 = vmatprep.mubr.bf16.mxu0 %v17556_v61  ;;  %v14900_v35 = vpop.f32.mrb[236].mxu1  ;;  %v23176_v49 = vld [vmem:[#allocation40_spill] sm:$0xff] }
 0x6a7   : > { %16246 = vmatprep.subr.bf16.mxu0 %v23065_v40  ;;  %v14901_v61 = vpop.f32.mrb[237].mxu1 }
 0x6a8   : > { %15183 = vmatpush3.bf16.msra.mxu1 %v19107_v53 }
 0x6a9   : > { %15184 = vmatprep.subr.bf16.mxu1 %v19183_v23 }
 0x6aa   : > { %16247 = vmatpush3.bf16.msra.mxu0 %v17550_v59  ;;  %v23177_v59 = vld [vmem:[#allocation47_spill] sm:$0xff] }
 0x6ab   : > { %15099 = vmatprep.subr.bf16.mxu0 %v23168_v5  ;;  %5574 = vmatmul.mubr.bf16.gmra.mrb[88].mxu1 %v17551_v14  ;;  %v20250_v14 = vadd.f32 %v14901_v61, %v14900_v35  ;;  %v17583_v35 = vld [vmem:[#allocation7 + $0x7f4] ss:$24 sps:$4 sm:$0xff]   ;;  %v17578_v61 = vld [vmem:[#allocation7 + $0x608] ss:$24 sps:$4 sm:$0xff]   ;;  %v17589_v5 = vld [vmem:[#allocation7 + $0x824] ss:$24 sps:$4 sm:$0xff]  }
 0x6ac   : > { %15185 = vmatpush3.bf16.msra.mxu1 %v19115_v63  ;;  %13612 = vmatprep.mubr.msk.bf16.mxu1 %vm1992_vm4, %v17559_v4  ;;  %v14903_v4 = vpop.f32.mrb[238].mxu1 }
 0x6ad   : > { %15186 = vmatprep.subr.bf16.mxu1 %v23169_v45  ;;  %4635 = vmatmul.mubr.bf16.gmra.mrb[120].mxu0 %v17554_v54  ;;  %v14904_v54 = vpop.f32.mrb[239].mxu1 }
 0x6ae   : > { %4642 = vmatprep.mubr.bf16.mxu0 %v17562_v38  ;;  %v17569_v38 = vld [vmem:[#allocation7 + $0x790] ss:$24 sps:$4 sm:$0xff]   ;;  %v14906_v31 = vpop.f32.mrb[240].mxu1 }
 0x6af   : > { %v14907_v33 = vpop.f32.mrb[241].mxu1 }
 0x6b0   : > { %15187 = vmatpush3.bf16.msra.mxu1 %v23170_v1  ;;  %v20257_v21 = vadd.f32 %v14907_v33, %v14906_v31  ;;  %v17581_v33 = vld [vmem:[#allocation7 + $0x7f0] ss:$24 sps:$4 sm:$0xff]  }
 0x6b1   : > { %15188 = vmatprep.subr.bf16.mxu1 %v23171_v19 }
 0x6b3   : > { %5582 = vmatmul.mubr.bf16.gmra.mrb[92].mxu1 %v17557_v44  ;;  %v20252_v44 = vadd.f32 %v14904_v54, %v14903_v4  ;;  %v17586_v4 = vld [vmem:[#allocation7 + $0x63c] ss:$24 sps:$4 sm:$0xff]  }
 0x6b4   : > { %15189 = vmatpush3.bf16.msra.mxu1 %v23172_v2  ;;  %13613 = vmatprep.mubr.msk.bf16.mxu1 %vm1992_vm4, %v17565_v48  ;;  %v23178_v48 = vld [vmem:[#allocation41_spill] sm:$0xff] }
 0x6b5   : > { %15190 = vmatprep.subr.bf16.mxu1 %v23173_v28  ;;  %4643 = vmatmul.mubr.bf16.gmra.mrb[124].mxu0 %v17560_v7  ;;  %v17577_v7 = vld [vmem:[#allocation7 + $0x7c4] ss:$24 sps:$4 sm:$0xff]  }
 0x6b6   : > { %4650 = vmatprep.mubr.bf16.mxu0 %v17568_v32  ;;  %v17572_v32 = vld [vmem:[#allocation7 + $0x5d8] ss:$24 sps:$4 sm:$0xff]  }
 0x6b8   : > { %15191 = vmatpush3.bf16.msra.mxu1 %v23174_v18 }
 0x6b9   : > { %15192 = vmatprep.subr.bf16.mxu1 %v23175_v26 }
 0x6bb   : > { %5590 = vmatmul.mubr.bf16.gmra.mrb[96].mxu1 %v17563_v13  ;;  %v14909_v13 = vpop.f32.mrb[242].mxu1 }
 0x6bc   : > { %15193 = vmatpush3.bf16.msra.mxu1 %v23176_v49  ;;  %13614 = vmatprep.mubr.msk.bf16.mxu1 %vm1992_vm4, %v17571_v29  ;;  %v14910_v29 = vpop.f32.mrb[243].mxu1 }
 0x6bd   : > { %15194 = vmatprep.subr.bf16.mxu1 %v23177_v59  ;;  %4651 = vmatmul.mubr.bf16.gmra.mrb[128].mxu0 %v17566_v41  ;;  %v17575_v41 = vld [vmem:[#allocation7 + $0x7c0] ss:$24 sps:$4 sm:$0xff]   ;;  %v14912_v54 = vpop.f32.mrb[244].mxu1 }
 0x6be   : > { %4658 = vmatprep.mubr.bf16.mxu0 %v17574_v9  ;;  %v20259_v9 = vadd.f32 %v14910_v29, %v14909_v13  ;;  %v17584_v13 = vld [vmem:[#allocation7 + $0x638] ss:$24 sps:$4 sm:$0xff]   ;;  %v17592_v29 = vld [vmem:[#allocation7 + $0x66c] ss:$24 sps:$4 sm:$0xff]  }
 0x6c0   : > { %15195 = vmatpush3.bf16.msra.mxu1 %v23178_v48 }
 0x6c1   : > { %6367 = vmatprep.subr.bf16.mxu1 %v23115_v52 }
 0x6c3   : > { %5598 = vmatmul.mubr.bf16.gmra.mrb[100].mxu1 %v17569_v38  ;;  %v14913_v38 = vpop.f32.mrb[245].mxu1 }
 0x6c4   : > { %13615 = vmatprep.mubr.msk.bf16.mxu1 %vm1992_vm4, %v17577_v7  ;;  %v20262_v7 = vadd.f32 %v14913_v38, %v14912_v54  ;;  %v17587_v38 = vld [vmem:[#allocation7 + $0x820] ss:$24 sps:$4 sm:$0xff]  }
 0x6c5   : > { %4659 = vmatmul.mubr.bf16.gmra.mrb[132].mxu0 %v17572_v32  ;;  %v14915_v32 = vpop.f32.mrb[246].mxu1 }
 0x6c6   : > { %4666 = vmatprep.mubr.bf16.mxu0 %v17580_v39  ;;  %v14916_v31 = vpop.f32.mrb[247].mxu1 }
 0x6c7   : > { %v20264_v39 = vadd.f32 %v14916_v31, %v14915_v32  ;;  %v14918_v62 = vpop.f32.mrb[248].mxu1  ;;  %v17590_v32 = vld [vmem:[#allocation7 + $0x668] ss:$24 sps:$4 sm:$0xff]   ;;  %v17598_v31 = vld [vmem:[#allocation7 + $0x69c] ss:$24 sps:$4 sm:$0xff]  }
 0x6cb   : > { %5606 = vmatmul.mubr.bf16.gmra.mrb[104].mxu1 %v17575_v41  ;;  %v14919_v41 = vpop.f32.mrb[249].mxu1 }
 0x6cc   : > { %13616 = vmatprep.mubr.msk.bf16.mxu1 %vm1992_vm4, %v17583_v35  ;;  %v20267_v35 = vadd.f32 %v14919_v41, %v14918_v62  ;;  %v17593_v41 = vld [vmem:[#allocation7 + $0x850] ss:$24 sps:$4 sm:$0xff]  }
 0x6cd   : > { %4667 = vmatmul.mubr.bf16.gmra.mrb[136].mxu0 %v17578_v61  ;;  %v14921_v61 = vpop.f32.mrb[250].mxu1 }
 0x6ce   : > { %4674 = vmatprep.mubr.bf16.mxu0 %v17586_v4  ;;  %23179 = vst [vmem:[#allocation61_spill] sm:$0xff] %v20267_v35  ;;  %v14922_v54 = vpop.f32.mrb[251].mxu1  ;;  %v17601_v35 = vld [vmem:[#allocation7 + $0x874] ss:$24 sps:$4 sm:$0xff]  }
 0x6cf   : > { %v20269_v4 = vadd.f32 %v14922_v54, %v14921_v61  ;;  %v14924_v37 = vpop.f32.mrb[252].mxu1  ;;  %v17596_v61 = vld [vmem:[#allocation7 + $0x698] ss:$24 sps:$4 sm:$0xff]  }
 0x6d1   : > { %23180 = vst [vmem:[#allocation62_spill] sm:$0xff] %v20269_v4 }
 0x6d3   : > { %5614 = vmatmul.mubr.bf16.gmra.mrb[108].mxu1 %v17581_v33  ;;  %v14925_v33 = vpop.f32.mrb[253].mxu1 }
 0x6d4   : > { %13617 = vmatprep.mubr.msk.bf16.mxu1 %vm1992_vm4, %v17589_v5  ;;  %v20272_v5 = vadd.f32 %v14925_v33, %v14924_v37  ;;  %v17599_v37 = vld [vmem:[#allocation7 + $0x870] ss:$24 sps:$4 sm:$0xff]  }
 0x6d5   : > { %4675 = vmatmul.mubr.bf16.gmra.mrb[140].mxu0 %v17584_v13  ;;  %v14927_v13 = vpop.f32.mrb[254].mxu1 }
 0x6d6   : > { %4682 = vmatprep.mubr.bf16.mxu0 %v17592_v29  ;;  %23181 = vst [vmem:[#allocation79_spill] sm:$0xff] %v20272_v5  ;;  %v14928_v62 = vpop.f32.mrb[255].mxu1 }
 0x6d7   : > { %v20274_v29 = vadd.f32 %v14928_v62, %v14927_v13  ;;  %v14930_v54 = vpop.f32.mrb[0].mxu1 }
 0x6d8   : > { %v14931_v4 = vpop.f32.mrb[1].mxu1 }
 0x6d9   : > { %23182 = vst [vmem:[#allocation78_spill] sm:$0xff] %v20274_v29 }
 0x6db   : > { %5622 = vmatmul.mubr.bf16.gmra.mrb[112].mxu1 %v17587_v38  ;;  %v20276_v38 = vadd.f32 %v14931_v4, %v14930_v54 }
 0x6dc   : > { %13618 = vmatprep.mubr.msk.bf16.mxu1 %vm1992_vm4, %v17595_v24  ;;  %v14933_v24 = vpop.f32.mrb[2].mxu1 }
 0x6dd   : > { %4683 = vmatmul.mubr.bf16.gmra.mrb[144].mxu0 %v17590_v32  ;;  %23183 = vst [vmem:[#allocation63_spill] sm:$0xff] %v20276_v38  ;;  %v14934_v17 = vpop.f32.mrb[3].mxu1  ;;  %v17617_v38 = vld [vmem:[#allocation7 + $0x990] ss:$24 sps:$4 sm:$0xff]  }
 0x6de   : > { %4690 = vmatprep.mubr.bf16.mxu0 %v17598_v31  ;;  %v20280_v32 = vadd.f32 %v14934_v17, %v14933_v24  ;;  %v17604_v31 = vld [vmem:[#allocation7 + $0x8a4] ss:$24 sps:$4 sm:$0xff]   ;;  %v14936_v33 = vpop.f32.mrb[4].mxu1  ;;  %v17607_v17 = vld [vmem:[#allocation7 + $0x8d4] ss:$24 sps:$4 sm:$0xff]  }
 0x6df   : > { %v14937_v13 = vpop.f32.mrb[5].mxu1 }
 0x6e0   : > { %23184 = vst [vmem:[#allocation64_spill] sm:$0xff] %v20280_v32  ;;  %v14939_v4 = vpop.f32.mrb[6].mxu1 }
 0x6e1   : > { %v14940_v62 = vpop.f32.mrb[7].mxu1 }
 0x6e2   : > { %v14942_v54 = vpop.f32.mrb[8].mxu1 }
 0x6e3   : > { %5630 = vmatmul.mubr.bf16.gmra.mrb[116].mxu1 %v17593_v41  ;;  %v17602_v41 = vld [vmem:[#allocation7 + $0x8a0] ss:$24 sps:$4 sm:$0xff]   ;;  %v14943_v24 = vpop.f32.mrb[9].mxu1 }
 0x6e4   : > { %6189 = vmatprep.mubr.bf16.mxu1 %v17601_v35  ;;  %v20284_v35 = vadd.f32 %v14937_v13, %v14936_v33  ;;  %v17605_v13 = vld [vmem:[#allocation7 + $0x8d0] ss:$24 sps:$4 sm:$0xff]  }
 0x6e5   : > { %4691 = vmatmul.mubr.bf16.gmra.mrb[148].mxu0 %v17596_v61  ;;  %v20286_v61 = vadd.f32 %v14940_v62, %v14939_v4  ;;  %v17610_v62 = vld [vmem:[#allocation7 + $0x904] ss:$24 sps:$4 sm:$0xff]  }
 0x6e6   : > { %16248 = vmatprep.mubr.msk.bf16.mxu0 %vm18556_vm1, %v23065_v40  ;;  %23185 = vst [vmem:[#allocation81_spill] sm:$0xff] %v20284_v35  ;;  %v17614_v35 = vld [vmem:[#allocation7 + $0x960] ss:$24 sps:$4 sm:$0xff]  }
 0x6e7   : > { %23186 = vst [vmem:[#allocation80_spill] sm:$0xff] %v20286_v61 }
 0x6eb   : > { %6190 = vmatmul.mubr.bf16.vlgmr.msra.gmra.mrb[120].mxu1 %v17599_v37  ;;  %v20292_v37 = vadd.f32 %v14943_v24, %v14942_v54 }
 0x6ec   : > { %6368 = vmatpush1.bf16.msra.mxu1 %v23119_v8  ;;  %6197 = vmatprep.mubr.bf16.mxu1 %v17604_v31  ;;  %v14945_v31 = vpop.f32.mrb[10].mxu1 }
 0x6ed   : > { %6369 = vmatprep.subr.bf16.mxu1 %v23115_v52  ;;  %23187 = vst [vmem:[#allocation65_spill] sm:$0xff] %v20292_v37  ;;  %v14946_v33 = vpop.f32.mrb[11].mxu1  ;;  %v17608_v37 = vld [vmem:[#allocation7 + $0x900] ss:$24 sps:$4 sm:$0xff]  }
 0x6ee   : > { %v20294_v4 = vadd.f32 %v14946_v33, %v14945_v31  ;;  %v17613_v31 = vld [vmem:[#allocation7 + $0x934] ss:$24 sps:$4 sm:$0xff]  }
 0x6f0   : > { %6370 = vmatpush1.bf16.msra.mxu1 %v23120_v34  ;;  %23188 = vst [vmem:[#allocation83_spill] sm:$0xff] %v20294_v4  ;;  %v17611_v4 = vld [vmem:[#allocation7 + $0x930] ss:$24 sps:$4 sm:$0xff]  }
 0x6f1   : > { %6371 = vmatprep.subr.bf16.mxu1 %v23115_v52 }
 0x6f3   : > { %6198 = vmatmul.mubr.bf16.gmra.mrb[124].mxu1 %v17602_v41  ;;  %v20298_v41 = vpop.f32.mrb[12].mxu1 }
 0x6f4   : > { %6372 = vmatpush1.bf16.msra.mxu1 %v23124_v27  ;;  %6205 = vmatprep.mubr.bf16.mxu1 %v17607_v17  ;;  %v4735_v17 = vpop.f32.mrb[13].mxu1 }
 0x6f5   : > { %6373 = vmatprep.subr.bf16.mxu1 %v23115_v52  ;;  %v20302_v54 = vpop.f32.mrb[14].mxu1 }
 0x6f6   : > { %v4738_v24 = vpop.f32.mrb[15].mxu1 }
 0x6f7   : > { %v20306_v33 = vpop.f32.mrb[16].mxu1  ;;  %v17616_v24 = vld [vmem:[#allocation7 + $0x964] ss:$24 sps:$4 sm:$0xff]  }
 0x6f8   : > { %6374 = vmatpush1.bf16.msra.mxu1 %v23125_v20 }
 0x6f9   : > { %6375 = vmatprep.subr.bf16.mxu1 %v23115_v52 }
 0x6fb   : > { %6206 = vmatmul.mubr.bf16.gmra.mrb[128].mxu1 %v17605_v13  ;;  %v4743_v13 = vpop.f32.mrb[17].mxu1 }
 0x6fc   : > { %6376 = vmatpush1.bf16.msra.mxu1 %v23129_v60  ;;  %6213 = vmatprep.mubr.bf16.mxu1 %v17610_v62  ;;  %v20310_v62 = vpop.f32.mrb[18].mxu1 }
 0x6fd   : > { %6377 = vmatprep.subr.bf16.mxu1 %v23115_v52  ;;  %v4746_v17 = vpop.f32.mrb[19].mxu1 }
 0x6fe   : > { %v20314_v61 = vpop.f32.mrb[20].mxu1  ;;  %v17619_v17 = vld [vmem:[#allocation7 + $0x994] ss:$24 sps:$4 sm:$0xff]  }
 0x700   : > { %6378 = vmatpush1.bf16.msra.mxu1 %v23130_v56 }
 0x701   : > { %6379 = vmatprep.subr.bf16.mxu1 %v23115_v52 }
 0x703   : > { %6214 = vmatmul.mubr.bf16.gmra.mrb[132].mxu1 %v17608_v37  ;;  %v4751_v37 = vpop.f32.mrb[21].mxu1 }
 0x704   : > { %6380 = vmatpush1.bf16.msra.mxu1 %v23134_v47  ;;  %6221 = vmatprep.mubr.bf16.mxu1 %v17613_v31  ;;  %v20318_v31 = vpop.f32.mrb[22].mxu1 }
 0x705   : > { %6381 = vmatprep.subr.bf16.mxu1 %v23115_v52  ;;  %v4754_v13 = vpop.f32.mrb[23].mxu1 }
 0x706   : > { %v20322_v32 = vpop.f32.mrb[24].mxu1  ;;  %v17622_v13 = vld [vmem:[#allocation7 + $0x9c4] ss:$24 sps:$4 sm:$0xff]  }
 0x708   : > { %6382 = vmatpush1.bf16.msra.mxu1 %v23162_v42  ;;  %v17628_v42 = vld [vmem:[#allocation7 + $0x884] ss:$24 sps:$4 sm:$0xff]  }
 0x709   : > { %6383 = vmatprep.subr.bf16.mxu1 %v23115_v52 }
 0x70b   : > { %6222 = vmatmul.mubr.bf16.gmra.mrb[136].mxu1 %v17611_v4  ;;  %v4759_v4 = vpop.f32.mrb[25].mxu1 }
 0x70c   : > { %6384 = vmatpush1.bf16.msra.mxu1 %v23164_v30  ;;  %6229 = vmatprep.mubr.bf16.mxu1 %v17616_v24  ;;  %v20326_v24 = vpop.f32.mrb[26].mxu1  ;;  %v17620_v30 = vld [vmem:[#allocation7 + $0x9c0] ss:$24 sps:$4 sm:$0xff]  }
 0x70d   : > { %6385 = vmatprep.subr.bf16.mxu1 %v23115_v52  ;;  %23189 = vst [vmem:[#allocation82_spill] sm:$0xff] %v20326_v24  ;;  %v4762_v37 = vpop.f32.mrb[27].mxu1 }
 0x70e   : > { %v20328_v29 = vpop.f32.mrb[28].mxu1 }
 0x70f   : > { %23190 = vst [vmem:[#allocation43_spill] sm:$0xff] %v20328_v29  ;;  %v4767_v5 = vpop.f32.mrb[29].mxu1  ;;  %v17631_v29 = vld [vmem:[#allocation7 + $0x8b4] ss:$24 sps:$4 sm:$0xff]  }
 0x710   : > { %6386 = vmatpush1.bf16.msra.mxu1 %v23165_v50  ;;  %v20330_v50 = vpop.f32.mrb[30].mxu1 }
 0x711   : > { %6387 = vmatprep.subr.bf16.mxu1 %v23115_v52  ;;  %23191 = vst [vmem:[#allocation37_spill] sm:$0xff] %v20330_v50  ;;  %v17626_v50 = vld [vmem:[#allocation7 + $0x880] ss:$24 sps:$4 sm:$0xff]  }
 0x713   : > { %6230 = vmatmul.mubr.bf16.gmra.mrb[140].mxu1 %v17614_v35  ;;  %v4770_v35 = vpop.f32.mrb[31].mxu1 }
 0x714   : > { %6388 = vmatpush1.bf16.msra.mxu1 %v23166_v15  ;;  %6237 = vmatprep.mubr.bf16.mxu1 %v17619_v17  ;;  %v20332_v17 = vpop.f32.mrb[32].mxu1  ;;  %v17623_v15 = vld [vmem:[#allocation7 + $0x9f0] ss:$24 sps:$4 sm:$0xff]  }
 0x715   : > { %15331 = vmatprep.subr.bf16.mxu1 %v23167_v25  ;;  %23192 = vst [vmem:[#allocation38_spill] sm:$0xff] %v20332_v17  ;;  %v4775_v4 = vpop.f32.mrb[33].mxu1  ;;  %v23195_v17 = vld [vmem:[#allocation54_spill] sm:$0xff] }
 0x716   : > { %v20334_v25 = vpop.f32.mrb[34].mxu1 }
 0x717   : > { %23193 = vst [vmem:[#allocation88_spill] sm:$0xff] %v20334_v25  ;;  %v4778_v37 = vpop.f32.mrb[35].mxu1 }
 0x718   : > { %v23197_v37 = vld [vmem:[#allocation84_spill] sm:$0xff] }
 0x71b   : > { %6238 = vmatmul.mubr.bf16.gmra.mrb[144].mxu1 %v17617_v38  ;;  %v20336_v38 = vpop.f32.mrb[36].mxu1 }
 0x71c   : > { %6245 = vmatprep.mubr.bf16.mxu1 %v17622_v13  ;;  %23194 = vst [vmem:[#allocation89_spill] sm:$0xff] %v20336_v38  ;;  %v4783_v5 = vpop.f32.mrb[37].mxu1 }
 0x71d   : > { %v20339_v13 = vpop.f32.mrb[38].mxu1 }
 0x71e   : > { %v4786_v35 = vpop.f32.mrb[39].mxu1 }
 0x71f   : > { %v20347_v38 = vpop.f32.mrb[40].mxu1  ;;  %v17629_v35 = vld [vmem:[#allocation7 + $0x8b0] ss:$24 sps:$4 sm:$0xff]  }
 0x723   : > { %6246 = vmatmul.mubr.bf16.gmra.mrb[148].mxu1 %v17620_v30 }
 0x724   : > { %6253 = vmatprep.mubr.bf16.mxu1 %v17625_v46 }
 0x72b   : > { %6254 = vmatmul.mubr.bf16.gmra.mrb[152].mxu1 %v17623_v15 }
 0x72c   : > { %13688 = vmatprep.mubr.msk.bf16.mxu1 %vm1992_vm4, %v17628_v42  ;;  %v4791_v42 = vpop.f32.mrb[41].mxu1 }
 0x72d   : > { %v20352_v5 = vpop.f32.mrb[42].mxu1 }
 0x730   : > { %v4057_v30 = vpop.f32.mrb[80].mxu0 }
 0x731   : > { %v20342_v46 = vadd.f32 %v4057_v30, %v23195_v17  ;;  %v16210_v4 = vpop.f32.mrb[81].mxu0  ;;  %v4794_v17 = vpop.f32.mrb[43].mxu1 }
 0x732   : > { %v4060_v25 = vpop.f32.mrb[82].mxu0  ;;  %v23199_v4 = vld [vmem:[#allocation48_spill] sm:$0xff] }
 0x733   : > { %23196 = vst [vmem:[#allocation54_spill] sm:$0xff] %v20342_v46  ;;  %v20345_v24 = vadd.f32 %v4060_v25, %v23197_v37  ;;  %v16211_v15 = vpop.f32.mrb[83].mxu0  ;;  %6400 = vmatmul.mubr.bf16.vlgmr.msra.gmra.mrb[156].mxu1 %v17626_v50  ;;  %v17634_v25 = vld [vmem:[#allocation7 + $0x8e4] ss:$24 sps:$4 sm:$0xff]   ;;  %v20362_v46 = vpop.f32.mrb[44].mxu1 }
 0x734   : > { %15332 = vmatpush3.bf16.msra.mxu1 %v19099_v43  ;;  %13689 = vmatprep.mubr.msk.bf16.mxu1 %vm1992_vm4, %v17631_v29  ;;  %v4799_v17 = vpop.f32.mrb[45].mxu1 }
 0x735   : > { %23198 = vst [vmem:[#allocation84_spill] sm:$0xff] %v20345_v24  ;;  %15333 = vmatprep.subr.bf16.mxu1 %v19173_v12  ;;  %v23201_v24 = vld [vmem:[#allocation55_spill] sm:$0xff] }
 0x738   : > { %15334 = vmatpush3.bf16.msra.mxu1 %v19107_v53  ;;  %v4065_v30 = vpop.f32.mrb[84].mxu0 }
 0x739   : > { %v20356_v37 = vadd.f32 %v4065_v30, %v23199_v4  ;;  %15335 = vmatprep.subr.bf16.mxu1 %v19183_v23  ;;  %v16214_v50 = vpop.f32.mrb[85].mxu0  ;;  %v20367_v30 = vpop.f32.mrb[46].mxu1 }
 0x73a   : > { %v4068_v15 = vpop.f32.mrb[86].mxu0  ;;  %v4802_v4 = vpop.f32.mrb[47].mxu1 }
 0x73b   : > { %23200 = vst [vmem:[#allocation48_spill] sm:$0xff] %v20356_v37  ;;  %v20360_v29 = vadd.f32 %v4068_v15, %v23201_v24  ;;  %v16215_v42 = vpop.f32.mrb[87].mxu0  ;;  %6408 = vmatmul.mubr.bf16.gmra.mrb[160].mxu1 %v17629_v35  ;;  %v17632_v37 = vld [vmem:[#allocation7 + $0x8e0] ss:$24 sps:$4 sm:$0xff]   ;;  %v17637_v24 = vld [vmem:[#allocation7 + $0x914] ss:$24 sps:$4 sm:$0xff]  }
 0x73c   : > { %15336 = vmatpush3.bf16.msra.mxu1 %v19115_v63  ;;  %13690 = vmatprep.mubr.msk.bf16.mxu1 %vm1992_vm4, %v17634_v25  ;;  %v23203_v15 = vld [vmem:[#allocation71_spill] sm:$0xff]  ;;  %v23205_v63 = vld [vmem:[#allocation70_spill] sm:$0xff] }
 0x73d   : > { %23202 = vst [vmem:[#allocation55_spill] sm:$0xff] %v20360_v29  ;;  %15337 = vmatprep.subr.bf16.mxu1 %v23169_v45  ;;  %v17635_v4 = vld [vmem:[#allocation7 + $0x910] ss:$24 sps:$4 sm:$0xff]  }
 0x740   : > { %15338 = vmatpush3.bf16.msra.mxu1 %v23170_v1  ;;  %v4073_v50 = vpop.f32.mrb[88].mxu0 }
 0x741   : > { %v20371_v42 = vadd.f32 %v4073_v50, %v23203_v15  ;;  %15339 = vmatprep.subr.bf16.mxu1 %v23171_v19  ;;  %v16218_v35 = vpop.f32.mrb[89].mxu0  ;;  %v17640_v15 = vld [vmem:[#allocation7 + $0x944] ss:$24 sps:$4 sm:$0xff]  }
 0x742   : > { %v4076_v29 = vpop.f32.mrb[90].mxu0  ;;  %v23209_v35 = vld [vmem:[#allocation85_spill] sm:$0xff] }
 0x743   : > { %23204 = vst [vmem:[#allocation71_spill] sm:$0xff] %v20371_v42  ;;  %v20375_v25 = vadd.f32 %v4076_v29, %v23205_v63  ;;  %v16219_v17 = vpop.f32.mrb[91].mxu0  ;;  %6416 = vmatmul.mubr.bf16.gmra.mrb[164].mxu1 %v17632_v37  ;;  %v23207_v42 = vld [vmem:[#allocation49_spill] sm:$0xff] }
 0x744   : > { %15340 = vmatpush3.bf16.msra.mxu1 %v23172_v2  ;;  %13691 = vmatprep.mubr.msk.bf16.mxu1 %vm1992_vm4, %v17637_v24  ;;  %v17638_v24 = vld [vmem:[#allocation7 + $0x940] ss:$24 sps:$4 sm:$0xff]  }
 0x745   : > { %23206 = vst [vmem:[#allocation70_spill] sm:$0xff] %v20375_v25  ;;  %15341 = vmatprep.subr.bf16.mxu1 %v23173_v28  ;;  %v23221_v28 = vld [vmem:[#allocation74_spill] sm:$0xff] }
 0x748   : > { %15342 = vmatpush3.bf16.msra.mxu1 %v23174_v18  ;;  %v4081_v50 = vpop.f32.mrb[92].mxu0 }
 0x749   : > { %v20382_v19 = vadd.f32 %v4081_v50, %v23207_v42  ;;  %15343 = vmatprep.subr.bf16.mxu1 %v23175_v26  ;;  %v16222_v63 = vpop.f32.mrb[93].mxu0  ;;  %v17643_v50 = vld [vmem:[#allocation7 + $0x974] ss:$24 sps:$4 sm:$0xff]  }
 0x74a   : > { %v4084_v29 = vpop.f32.mrb[94].mxu0 }
 0x74b   : > { %23208 = vst [vmem:[#allocation49_spill] sm:$0xff] %v20382_v19  ;;  %v20386_v37 = vadd.f32 %v4084_v29, %v23209_v35  ;;  %v16223_v17 = vpop.f32.mrb[95].mxu0  ;;  %6424 = vmatmul.mubr.bf16.gmra.mrb[168].mxu1 %v17635_v4  ;;  %v23211_v19 = vld [vmem:[#allocation87_spill] sm:$0xff]  ;;  %v23213_v35 = vld [vmem:[#allocation86_spill] sm:$0xff] }
 0x74c   : > { %15344 = vmatpush3.bf16.msra.mxu1 %v23176_v49  ;;  %13692 = vmatprep.mubr.msk.bf16.mxu1 %vm1992_vm4, %v17640_v15  ;;  %v17641_v15 = vld [vmem:[#allocation7 + $0x970] ss:$24 sps:$4 sm:$0xff]  }
 0x74d   : > { %23210 = vst [vmem:[#allocation85_spill] sm:$0xff] %v20386_v37  ;;  %15345 = vmatprep.subr.bf16.mxu1 %v23177_v59  ;;  %v17646_v59 = vld [vmem:[#allocation7 + $0x9a4] ss:$24 sps:$4 sm:$0xff]  }
 0x750   : > { %15346 = vmatpush3.bf16.msra.mxu1 %v23178_v48  ;;  %v4089_v42 = vpop.f32.mrb[96].mxu0  ;;  %v23215_v48 = vld [vmem:[#allocation73_spill] sm:$0xff] }
 0x751   : > { %v20393_v25 = vadd.f32 %v4089_v42, %v23211_v19  ;;  %v16226_v63 = vpop.f32.mrb[97].mxu0  ;;  %7201 = vmatprep.subr.bf16.mxu1 %v23115_v52  ;;  %v23217_v42 = vld [vmem:[#allocation72_spill] sm:$0xff] }
 0x752   : > { %v4092_v29 = vpop.f32.mrb[98].mxu0 }
 0x753   : > { %23212 = vst [vmem:[#allocation87_spill] sm:$0xff] %v20393_v25  ;;  %v20397_v4 = vadd.f32 %v4092_v29, %v23213_v35  ;;  %v16227_v17 = vpop.f32.mrb[99].mxu0  ;;  %6432 = vmatmul.mubr.bf16.gmra.mrb[172].mxu1 %v17638_v24  ;;  %v17644_v29 = vld [vmem:[#allocation7 + $0x9a0] ss:$24 sps:$4 sm:$0xff]   ;;  %v17649_v24 = vld [vmem:[#allocation7 + $0x9d4] ss:$24 sps:$4 sm:$0xff]  }
 0x754   : > { %13693 = vmatprep.mubr.msk.bf16.mxu1 %vm1992_vm4, %v17643_v50  ;;  %v23219_v17 = vld [vmem:[#allocation75_spill] sm:$0xff] }
 0x755   : > { %23214 = vst [vmem:[#allocation86_spill] sm:$0xff] %v20397_v4 }
 0x758   : > { %v4097_v37 = vpop.f32.mrb[100].mxu0 }
 0x759   : > { %v20401_v49 = vadd.f32 %v4097_v37, %v23215_v48  ;;  %v16230_v26 = vpop.f32.mrb[101].mxu0  ;;  %v17647_v37 = vld [vmem:[#allocation7 + $0x9d0] ss:$24 sps:$4 sm:$0xff]  }
 0x75a   : > { %v4100_v19 = vpop.f32.mrb[102].mxu0 }
 0x75b   : > { %23216 = vst [vmem:[#allocation73_spill] sm:$0xff] %v20401_v49  ;;  %v20404_v63 = vadd.f32 %v4100_v19, %v23217_v42  ;;  %v16231_v25 = vpop.f32.mrb[103].mxu0  ;;  %6440 = vmatmul.mubr.bf16.gmra.mrb[176].mxu1 %v17641_v15  ;;  %v17652_v15 = vld [vmem:[#allocation7 + $0xa04] ss:$24 sps:$4 sm:$0xff]   ;;  %v23225_v49 = vld [vmem:[#allocation60_spill] sm:$0xff] }
 0x75c   : > { %13694 = vmatprep.mubr.msk.bf16.mxu1 %vm1992_vm4, %v17646_v59  ;;  %v23223_v19 = vld [vmem:[#allocation59_spill] sm:$0xff] }
 0x75d   : > { %23218 = vst [vmem:[#allocation72_spill] sm:$0xff] %v20404_v63 }
 0x760   : > { %v4105_v35 = vpop.f32.mrb[104].mxu0 }
 0x761   : > { %v20408_v50 = vadd.f32 %v4105_v35, %v23219_v17  ;;  %v16234_v4 = vpop.f32.mrb[105].mxu0  ;;  %v23227_v17 = vld [vmem:[#allocation77_spill] sm:$0xff] }
 0x762   : > { %v4108_v18 = vpop.f32.mrb[106].mxu0 }
 0x763   : > { %23220 = vst [vmem:[#allocation75_spill] sm:$0xff] %v20408_v50  ;;  %v20411_v48 = vadd.f32 %v4108_v18, %v23221_v28  ;;  %v16235_v26 = vpop.f32.mrb[107].mxu0  ;;  %6448 = vmatmul.mubr.bf16.gmra.mrb[180].mxu1 %v17644_v29  ;;  %v17650_v28 = vld [vmem:[#allocation7 + $0xa00] ss:$24 sps:$4 sm:$0xff]   ;;  %v17655_v29 = vld [vmem:[#allocation7 + $0xa24] ss:$24 sps:$4 sm:$0xff]  }
 0x764   : > { %13695 = vmatprep.mubr.msk.bf16.mxu1 %vm1992_vm4, %v17649_v24  ;;  %v23228_v50 = vld [vmem:[#allocation76_spill] sm:$0xff] }
 0x765   : > { %23222 = vst [vmem:[#allocation74_spill] sm:$0xff] %v20411_v48 }
 0x768   : > { %v4113_v25 = vpop.f32.mrb[108].mxu0 }
 0x769   : > { %v20415_v59 = vadd.f32 %v4113_v25, %v23223_v19  ;;  %v16238_v42 = vpop.f32.mrb[109].mxu0 }
 0x76a   : > { %v4116_v63 = vpop.f32.mrb[110].mxu0  ;;  %v17658_v42 = vld [vmem:[#allocation7 + $0xa54] ss:$24 sps:$4 sm:$0xff]  }
 0x76b   : > { %23224 = vst [vmem:[#allocation59_spill] sm:$0xff] %v20415_v59  ;;  %v20418_v35 = vadd.f32 %v4116_v63, %v23225_v49  ;;  %v16239_v4 = vpop.f32.mrb[111].mxu0  ;;  %6456 = vmatmul.mubr.bf16.gmra.mrb[184].mxu1 %v17647_v37  ;;  %v17653_v49 = vld [vmem:[#allocation7 + $0xa20] ss:$24 sps:$4 sm:$0xff]  }
 0x76c   : > { %13696 = vmatprep.mubr.msk.bf16.mxu1 %vm1992_vm4, %v17652_v15 }
 0x76d   : > { %23226 = vst [vmem:[#allocation60_spill] sm:$0xff] %v20418_v35 }
 0x770   : > { %v4121_v18 = vpop.f32.mrb[112].mxu0 }
 0x771   : > { %v20422_v24 = vadd.f32 %v4121_v18, %v23227_v17  ;;  %v16242_v26 = vpop.f32.mrb[113].mxu0 }
 0x772   : > { %v4124_v48 = vpop.f32.mrb[114].mxu0 }
 0x773   : > { %v20425_v25 = vadd.f32 %v4124_v48, %v23228_v50  ;;  %v16243_v19 = vpop.f32.mrb[115].mxu0  ;;  %6464 = vmatmul.mubr.bf16.gmra.mrb[188].mxu1 %v17650_v28  ;;  %v17656_v28 = vld [vmem:[#allocation7 + $0xa50] ss:$24 sps:$4 sm:$0xff]  }
 0x774   : > { %7023 = vmatprep.mubr.bf16.mxu1 %v17655_v29 }
 0x778   : > { %v14964_v63 = vpop.f32.mrb[116].mxu0 }
 0x779   : > { %v14965_v37 = vpop.f32.mrb[117].mxu0 }
 0x77a   : > { %v14966_v4 = vadd.f32 %v14965_v37, %v14964_v63  ;;  %v14967_v15 = vpop.f32.mrb[118].mxu0 }
 0x77b   : > { %v14968_v35 = vpop.f32.mrb[119].mxu0  ;;  %7024 = vmatmul.mubr.bf16.vlgmr.msra.gmra.mrb[192].mxu1 %v17653_v49  ;;  %v17661_v49 = vld [vmem:[#allocation7 + $0xa84] ss:$24 sps:$4 sm:$0xff]  }
 0x77c   : > { %v4629_v59 = vadd.f32 %v14966_v4, %v20241_v10  ;;  %v14969_v18 = vadd.f32 %v14968_v35, %v14967_v15  ;;  %7202 = vmatpush1.bf16.msra.mxu1 %v23119_v8  ;;  %7031 = vmatprep.mubr.bf16.mxu1 %v17658_v42 }
 0x77d   : > { %7203 = vmatprep.subr.bf16.mxu1 %v23115_v52 }
 0x77e   : > { %v4734_v50 = vadd.f32 %v20298_v41, %v4629_v59  ;;  %v4632_v48 = vadd.f32 %v14969_v18, %v20243_v55  ;;  %v17659_v59 = vld [vmem:[#allocation7 + $0xa80] ss:$24 sps:$4 sm:$0xff]   ;;  %v17664_v18 = vld [vmem:[#allocation7 + $0xab4] ss:$24 sps:$4 sm:$0xff]  }
 0x780   : > { %v4737_v29 = vadd.f32 %v20302_v54, %v4632_v48  ;;  %7204 = vmatpush1.bf16.msra.mxu1 %v23120_v34  ;;  %v14970_v17 = vpop.f32.mrb[120].mxu0 }
 0x781   : > { %v14971_v26 = vpop.f32.mrb[121].mxu0  ;;  %7205 = vmatprep.subr.bf16.mxu1 %v23115_v52 }
 0x782   : > { %v4804_v10 = vpack.c.bf16 %v4737_v29, %v4734_v50  ;;  %v14972_v35 = vadd.f32 %v14971_v26, %v14970_v17  ;;  %v14973_v19 = vpop.f32.mrb[122].mxu0  ;;  %v17662_v17 = vld [vmem:[#allocation7 + $0xab0] ss:$24 sps:$4 sm:$0xff]  }
 0x783   : > { %v14974_v63 = vpop.f32.mrb[123].mxu0  ;;  %7032 = vmatmul.mubr.bf16.gmra.mrb[196].mxu1 %v17656_v28 }
 0x784   : > { %v4637_v42 = vadd.f32 %v14972_v35, %v20250_v14  ;;  %v14975_v41 = vadd.f32 %v14974_v63, %v14973_v19  ;;  %7206 = vmatpush1.bf16.msra.mxu1 %v23124_v27  ;;  %16249 = vmatmul.mubr.msk.bf16.vlgmr.msra.gmra.mrb[152].mxu0 %vm3035_vm5, %v4804_v10  ;;  %v17667_v19 = vld [vmem:[#allocation7 + $0xae4] ss:$24 sps:$4 sm:$0xff]  }
 0x785   : > { %15100 = vmatpush3.bf16.msra.mxu0 %v19237_v36  ;;  %7207 = vmatprep.subr.bf16.mxu1 %v23115_v52 }
 0x786   : > { %v4742_v55 = vadd.f32 %v20306_v33, %v4637_v42  ;;  %v4640_v54 = vadd.f32 %v14975_v41, %v20252_v44  ;;  %15101 = vmatprep.subr.bf16.mxu0 %v19278_v58  ;;  %7039 = vmatprep.mubr.bf16.mxu1 %v17661_v49 }
 0x787   : > { %16252 = vmatprep.mubr.msk.bf16.mxu0 %vm18556_vm1, %v23065_v40 }
 0x788   : > { %v4745_v14 = vadd.f32 %v20310_v62, %v4640_v54  ;;  %7208 = vmatpush1.bf16.msra.mxu1 %v23125_v20  ;;  %v14976_v37 = vpop.f32.mrb[124].mxu0 }
 0x789   : > { %15102 = vmatpush3.bf16.msra.mxu0 %v19244_v51  ;;  %v14977_v4 = vpop.f32.mrb[125].mxu0  ;;  %7209 = vmatprep.subr.bf16.mxu1 %v23115_v52 }
 0x78a   : > { %v4805_v33 = vpack.c.bf16 %v4745_v14, %v4742_v55  ;;  %v14978_v15 = vadd.f32 %v14977_v4, %v14976_v37  ;;  %15103 = vmatprep.subr.bf16.mxu0 %v19284_v11  ;;  %v14979_v44 = vpop.f32.mrb[126].mxu0  ;;  %v17665_v55 = vld [vmem:[#allocation7 + $0xae0] ss:$24 sps:$4 sm:$0xff]  }
 0x78b   : > { %v14980_v50 = vpop.f32.mrb[127].mxu0  ;;  %7040 = vmatmul.mubr.bf16.gmra.mrb[200].mxu1 %v17659_v59  ;;  %v23230_v59 = vld [vmem:[#allocation66_spill] sm:$0xff] }
 0x78c   : > { %v4645_v48 = vadd.f32 %v14978_v15, %v20257_v21  ;;  %v14981_v28 = vadd.f32 %v14980_v50, %v14979_v44  ;;  %7210 = vmatpush1.bf16.msra.mxu1 %v23129_v60  ;;  %16253 = vmatmul.mubr.msk.bf16.gmra.mrb[156].mxu0 %vm3035_vm5, %v4805_v33  ;;  %v23231_v37 = vld [vmem:[#allocation50_spill] sm:$0xff]  ;;  %v17670_v44 = vld [vmem:[#allocation7 + $0xb14] ss:$24 sps:$4 sm:$0xff]  }
 0x78d   : > { %15104 = vmatpush3.bf16.msra.mxu0 %v19248_v3  ;;  %7211 = vmatprep.subr.bf16.mxu1 %v23115_v52  ;;  %v23233_v50 = vld [vmem:[#allocation61_spill] sm:$0xff] }
 0x78e   : > { %v4750_v62 = vadd.f32 %v20314_v61, %v4645_v48  ;;  %v4648_v29 = vadd.f32 %v14981_v28, %v20259_v9  ;;  %15105 = vmatprep.subr.bf16.mxu0 %v23086_v6  ;;  %7047 = vmatprep.mubr.bf16.mxu1 %v17664_v18 }
 0x78f   : > { %16256 = vmatprep.mubr.msk.bf16.mxu0 %vm18556_vm1, %v23065_v40 }
 0x790   : > { %v4753_v21 = vadd.f32 %v20318_v31, %v4648_v29  ;;  %7212 = vmatpush1.bf16.msra.mxu1 %v23130_v56  ;;  %v14982_v26 = vpop.f32.mrb[128].mxu0  ;;  %v23235_v29 = vld [vmem:[#allocation51_spill] sm:$0xff] }
 0x791   : > { %15106 = vmatpush3.bf16.msra.mxu0 %v23089_v57  ;;  %v14983_v10 = vpop.f32.mrb[129].mxu0  ;;  %7213 = vmatprep.subr.bf16.mxu1 %v23115_v52 }
 0x792   : > { %v4806_v61 = vpack.c.bf16 %v4753_v21, %v4750_v62  ;;  %v14984_v35 = vadd.f32 %v14983_v10, %v14982_v26  ;;  %15107 = vmatprep.subr.bf16.mxu0 %v23091_v22  ;;  %v14985_v9 = vpop.f32.mrb[130].mxu0  ;;  %v23234_v62 = vld [vmem:[#allocation67_spill] sm:$0xff]  ;;  %v23237_v26 = vld [vmem:[#allocation62_spill] sm:$0xff] }
 0x793   : > { %v14986_v49 = vpop.f32.mrb[131].mxu0  ;;  %7048 = vmatmul.mubr.bf16.gmra.mrb[204].mxu1 %v17662_v17  ;;  %v23236_v17 = vld [vmem:[#allocation43_spill] sm:$0xff] }
 0x794   : > { %v4653_v63 = vadd.f32 %v14984_v35, %v20262_v7  ;;  %v14987_v42 = vadd.f32 %v14986_v49, %v14985_v9  ;;  %7214 = vmatpush1.bf16.msra.mxu1 %v23134_v47  ;;  %16257 = vmatmul.mubr.msk.bf16.gmra.mrb[160].mxu0 %vm3035_vm5, %v4806_v61  ;;  %v23229_v7 = vld [vmem:[#allocation82_spill] sm:$0xff]  ;;  %v17668_v35 = vld [vmem:[#allocation7 + $0xb10] ss:$24 sps:$4 sm:$0xff]  }
 0x795   : > { %15108 = vmatpush3.bf16.msra.mxu0 %v23096_v16  ;;  %7215 = vmatprep.subr.bf16.mxu1 %v23115_v52  ;;  %v23238_v61 = vld [vmem:[#allocation58_spill] sm:$0xff]  ;;  %v23239_v9 = vld [vmem:[#allocation37_spill] sm:$0xff]  ;;  %v23240_v49 = vld [vmem:[#allocation68_spill] sm:$0xff] }
 0x796   : > { %v4758_v31 = vadd.f32 %v20322_v32, %v4653_v63  ;;  %v4656_v41 = vadd.f32 %v14987_v42, %v20264_v39  ;;  %15109 = vmatprep.subr.bf16.mxu0 %v23100_v0  ;;  %7055 = vmatprep.mubr.bf16.mxu1 %v17667_v19  ;;  %v23232_v39 = vld [vmem:[#allocation57_spill] sm:$0xff]  ;;  %v23241_v42 = vld [vmem:[#allocation52_spill] sm:$0xff] }
 0x797   : > { %16260 = vmatprep.mubr.msk.bf16.mxu0 %vm18556_vm1, %v23065_v40 }
 0x798   : > { %v4761_v54 = vadd.f32 %v23229_v7, %v4656_v41  ;;  %7216 = vmatpush1.bf16.msra.mxu1 %v23230_v59  ;;  %v14988_v14 = vpop.f32.mrb[132].mxu0  ;;  %v17673_v41 = vld [vmem:[#allocation7 + $0xb44] ss:$24 sps:$4 sm:$0xff]  }
 0x799   : > { %15110 = vmatpush3.bf16.msra.mxu0 %v23231_v37  ;;  %v14989_v4 = vpop.f32.mrb[133].mxu0  ;;  %7217 = vmatprep.subr.bf16.mxu1 %v23115_v52 }
 0x79a   : > { %v4807_v32 = vpack.c.bf16 %v4761_v54, %v4758_v31  ;;  %v14990_v33 = vadd.f32 %v14989_v4, %v14988_v14  ;;  %15111 = vmatprep.subr.bf16.mxu0 %v23232_v39  ;;  %v14991_v15 = vpop.f32.mrb[134].mxu0  ;;  %v23242_v4 = vld [vmem:[#allocation79_spill] sm:$0xff] }
 0x79b   : > { %v14992_v18 = vpop.f32.mrb[135].mxu0  ;;  %7056 = vmatmul.mubr.bf16.gmra.mrb[208].mxu1 %v17665_v55 }
 0x79c   : > { %v4661_v48 = vadd.f32 %v14990_v33, %v23233_v50  ;;  %v14993_v28 = vadd.f32 %v14992_v18, %v14991_v15  ;;  %7218 = vmatpush1.bf16.msra.mxu1 %v23234_v62  ;;  %16261 = vmatmul.mubr.msk.bf16.gmra.mrb[164].mxu0 %vm3035_vm5, %v4807_v32  ;;  %v23243_v15 = vld [vmem:[#allocation69_spill] sm:$0xff]  ;;  %v23245_v18 = vld [vmem:[#allocation38_spill] sm:$0xff] }
 0x79d   : > { %15112 = vmatpush3.bf16.msra.mxu0 %v23235_v29  ;;  %7219 = vmatprep.subr.bf16.mxu1 %v23115_v52 }
 0x79e   : > { %v4766_v21 = vadd.f32 %v23236_v17, %v4661_v48  ;;  %v4664_v10 = vadd.f32 %v14993_v28, %v23237_v26  ;;  %15113 = vmatprep.subr.bf16.mxu0 %v23238_v61  ;;  %7063 = vmatprep.mubr.bf16.mxu1 %v17670_v44  ;;  %v23244_v44 = vld [vmem:[#allocation42_spill] sm:$0xff] }
 0x79f   : > { %16264 = vmatprep.mubr.msk.bf16.mxu0 %vm18556_vm1, %v23065_v40  ;;  %v23246_v48 = vld [vmem:[#allocation78_spill] sm:$0xff] }
 0x7a0   : > { %v4769_v19 = vadd.f32 %v23239_v9, %v4664_v10  ;;  %7220 = vmatpush1.bf16.msra.mxu1 %v23240_v49  ;;  %v14994_v63 = vpop.f32.mrb[136].mxu0  ;;  %v17671_v17 = vld [vmem:[#allocation7 + $0xb40] ss:$24 sps:$4 sm:$0xff]  }
 0x7a1   : > { %15114 = vmatpush3.bf16.msra.mxu0 %v23241_v42  ;;  %v14995_v31 = vpop.f32.mrb[137].mxu0  ;;  %7221 = vmatprep.subr.bf16.mxu1 %v23115_v52 }
 0x7a2   : > { %v4808_v55 = vpack.c.bf16 %v4769_v19, %v4766_v21  ;;  %v14996_v7 = vadd.f32 %v14995_v31, %v14994_v63  ;;  %v14997_v54 = vpop.f32.mrb[138].mxu0  ;;  %16284 = vmatprep.subr.bf16.mxu0 %v23065_v40  ;;  %v23247_v21 = vld [vmem:[#allocation88_spill] sm:$0xff] }
 0x7a3   : > { %v14998_v14 = vpop.f32.mrb[139].mxu0  ;;  %7064 = vmatmul.mubr.bf16.gmra.mrb[212].mxu1 %v17668_v35  ;;  %v17676_v35 = vld [vmem:[#allocation7 + $0xb74] ss:$24 sps:$4 sm:$0xff]  }
 0x7a4   : > { %v4669_v32 = vadd.f32 %v14996_v7, %v23242_v4  ;;  %v14999_v33 = vadd.f32 %v14998_v14, %v14997_v54  ;;  %7222 = vmatpush1.bf16.msra.mxu1 %v23243_v15  ;;  %16265 = vmatmul.mubr.msk.bf16.gmra.mrb[168].mxu0 %vm3035_vm5, %v4808_v55  ;;  %v23248_v7 = vld [vmem:[#allocation63_spill] sm:$0xff]  ;;  %v23249_v14 = vld [vmem:[#allocation89_spill] sm:$0xff] }
 0x7a5   : > { %15482 = vmatprep.subr.bf16.mxu1 %v23244_v44  ;;  %7071 = vmatprep.mubr.bf16.mxu1 %v17673_v41 }
 0x7a6   : > { %v4774_v50 = vadd.f32 %v23245_v18, %v4669_v32  ;;  %v4672_v28 = vadd.f32 %v14999_v33, %v23246_v48  ;;  %16268 = vmatprep.mubr.msk.bf16.mxu0 %vm18556_vm1, %v23065_v40  ;;  %v23250_v32 = vld [vmem:[#allocation64_spill] sm:$0xff] }
 0x7a7   : > { %v17674_v18 = vld [vmem:[#allocation7 + $0xb70] ss:$24 sps:$4 sm:$0xff]  }
 0x7a8   : > { %v4777_v26 = vadd.f32 %v23247_v21, %v4672_v28  ;;  %v15000_v10 = vpop.f32.mrb[140].mxu0  ;;  %v17679_v28 = vld [vmem:[#allocation7 + $0xba4] ss:$24 sps:$4 sm:$0xff]  }
 0x7a9   : > { %v15001_v9 = vpop.f32.mrb[141].mxu0 }
 0x7aa   : > { %v4809_v19 = vpack.c.bf16 %v4777_v26, %v4774_v50  ;;  %v15002_v63 = vadd.f32 %v15001_v9, %v15000_v10  ;;  %v15003_v31 = vpop.f32.mrb[142].mxu0 }
 0x7ab   : > { %v15004_v55 = vpop.f32.mrb[143].mxu0  ;;  %7072 = vmatmul.mubr.bf16.gmra.mrb[216].mxu1 %v17671_v17 }
 0x7ac   : > { %v4677_v41 = vadd.f32 %v15002_v63, %v23248_v7  ;;  %v15005_v54 = vadd.f32 %v15004_v55, %v15003_v31  ;;  %16269 = vmatmul.mubr.msk.bf16.gmra.mrb[172].mxu0 %vm3035_vm5, %v4809_v19  ;;  %7079 = vmatprep.mubr.bf16.mxu1 %v17676_v35  ;;  %v23251_v19 = vld [vmem:[#allocation81_spill] sm:$0xff] }
 0x7ad   : > { %16272 = vmatprep.mubr.msk.bf16.mxu0 %vm18556_vm1, %v23065_v40  ;;  %v17677_v7 = vld [vmem:[#allocation7 + $0xba0] ss:$24 sps:$4 sm:$0xff]  }
 0x7ae   : > { %v4782_v4 = vadd.f32 %v23249_v14, %v4677_v41  ;;  %v4680_v33 = vadd.f32 %v15005_v54, %v23250_v32  ;;  %v17682_v14 = vld [vmem:[#allocation7 + $0xa34] ss:$24 sps:$4 sm:$0xff]  }
 0x7b0   : > { %v4785_v50 = vadd.f32 %v20339_v13, %v4680_v33  ;;  %v15006_v48 = vpop.f32.mrb[144].mxu0  ;;  %v23252_v13 = vld [vmem:[#allocation80_spill] sm:$0xff] }
 0x7b1   : > { %v15007_v21 = vpop.f32.mrb[145].mxu0 }
 0x7b2   : > { %v4810_v17 = vpack.c.bf16 %v4785_v50, %v4782_v4  ;;  %v15008_v26 = vadd.f32 %v15007_v21, %v15006_v48  ;;  %v15009_v10 = vpop.f32.mrb[146].mxu0  ;;  %v23253_v48 = vld [vmem:[#allocation65_spill] sm:$0xff] }
 0x7b3   : > { %v15010_v9 = vpop.f32.mrb[147].mxu0  ;;  %7080 = vmatmul.mubr.bf16.gmra.mrb[220].mxu1 %v17674_v18 }
 0x7b4   : > { %v4685_v35 = vadd.f32 %v15008_v26, %v23251_v19  ;;  %v15011_v63 = vadd.f32 %v15010_v9, %v15009_v10  ;;  %16273 = vmatmul.mubr.msk.bf16.gmra.mrb[176].mxu0 %vm3035_vm5, %v4810_v17  ;;  %7087 = vmatprep.mubr.bf16.mxu1 %v17679_v28  ;;  %v17680_v26 = vld [vmem:[#allocation7 + $0xa30] ss:$24 sps:$4 sm:$0xff]   ;;  %v17685_v9 = vld [vmem:[#allocation7 + $0xa64] ss:$24 sps:$4 sm:$0xff]  }
 0x7b5   : > { %16276 = vmatprep.mubr.msk.bf16.mxu0 %vm18556_vm1, %v23065_v40 }
 0x7b6   : > { %v4790_v31 = vadd.f32 %v20347_v38, %v4685_v35  ;;  %v4688_v55 = vadd.f32 %v15011_v63, %v23252_v13  ;;  %v17688_v35 = vld [vmem:[#allocation7 + $0x6cc] ss:$24 sps:$4 sm:$0xff]   ;;  %v17683_v63 = vld [vmem:[#allocation7 + $0xa60] ss:$24 sps:$4 sm:$0xff]   ;;  %v17696_v13 = vld [vmem:[#allocation7 + $0x6fc] ss:$24 sps:$4 sm:$0xff]  }
 0x7b8   : > { %v4793_v41 = vadd.f32 %v20352_v5, %v4688_v55  ;;  %v15012_v54 = vpop.f32.mrb[148].mxu0  ;;  %v23254_v5 = vld [vmem:[#allocation83_spill] sm:$0xff]  ;;  %v23255_v55 = vld [vmem:[#allocation36_spill] sm:$0xff] }
 0x7b9   : > { %v15013_v4 = vpop.f32.mrb[149].mxu0 }
 0x7ba   : > { %v4811_v32 = vpack.c.bf16 %v4793_v41, %v4790_v31  ;;  %v15014_v33 = vadd.f32 %v15013_v4, %v15012_v54  ;;  %v15015_v18 = vpop.f32.mrb[150].mxu0  ;;  %v17693_v31 = vld [vmem:[#allocation7 + $0xa94] ss:$24 sps:$4 sm:$0xff]   ;;  %v17691_v41 = vld [vmem:[#allocation7 + $0xa90] ss:$24 sps:$4 sm:$0xff]  }
 0x7bb   : > { %v15016_v50 = vpop.f32.mrb[151].mxu0  ;;  %7088 = vmatmul.mubr.bf16.gmra.mrb[224].mxu1 %v17677_v7  ;;  %v17690_v7 = vld [vmem:[%s22830_s4 + $0x48] sm:$0xff]   ;;  %v17694_v54 = vld [vmem:[#allocation7 + $0x6f8] ss:$24 sps:$4 sm:$0xff]  }
 0x7bc   : > { %v4693_v28 = vadd.f32 %v15014_v33, %v23253_v48  ;;  %v15017_v21 = vadd.f32 %v15016_v50, %v15015_v18  ;;  %16277 = vmatmul.mubr.msk.bf16.gmra.mrb[180].mxu0 %vm3035_vm5, %v4811_v32  ;;  %13766 = vmatprep.mubr.msk.bf16.mxu1 %vm1992_vm4, %v17682_v14  ;;  %v23256_v14 = vld [vmem:[#allocation44_spill] sm:$0xff]  ;;  %v17699_v4 = vld [vmem:[#allocation7 + $0xac4] ss:$24 sps:$4 sm:$0xff]   ;;  %v23257_v32 = vld [vmem:[#allocation53_spill] sm:$0xff] }
 0x7bd   : > { %16280 = vmatprep.mubr.msk.bf16.mxu0 %vm18556_vm1, %v23065_v40  ;;  %v17702_v33 = vld [vmem:[#allocation7 + $0x72c] ss:$24 sps:$4 sm:$0xff]   ;;  %v23258_v18 = vld [vmem:[#allocation45_spill] sm:$0xff] }
 0x7be   : > { %v4798_v38 = vadd.f32 %v20362_v46, %v4693_v28  ;;  %v4696_v17 = vadd.f32 %v15017_v21, %v23254_v5  ;;  %v17686_v46 = vld [vmem:[#allocation7 + $0x6c8] ss:$24 sps:$4 sm:$0xff]   ;;  %v15045_v21 = vpop.f32.mrb[48].mxu1  ;;  %v17705_v5 = vld [vmem:[#allocation7 + $0xaf4] ss:$24 sps:$4 sm:$0xff]  }
 0x7bf   : > { %v17697_v50 = vld [vmem:[#allocation7 + $0xac0] ss:$24 sps:$4 sm:$0xff]  }
 0x7c0   : > { %v4801_v10 = vadd.f32 %v20367_v30, %v4696_v17  ;;  %v17689_v30 = vld [vmem:[%s22830_s4 + $0x40] sm:$0xff]   ;;  %v23259_v48 = vld [vmem:[#allocation39_spill] sm:$0xff] }
 0x7c1   : > { %v17700_v28 = vld [vmem:[#allocation7 + $0x728] ss:$24 sps:$4 sm:$0xff]   ;;  %v17708_v17 = vld [vmem:[#allocation7 + $0x75c] ss:$24 sps:$4 sm:$0xff]  }
 0x7c2   : > { %v4812_v19 = vpack.c.bf16 %v4801_v10, %v4798_v38  ;;  %v23260_v38 = vld [vmem:[#allocation46_spill] sm:$0xff] }
 0x7c3   : > { %7234 = vmatmul.mubr.bf16.vlgmr.msra.gmra.mrb[228].mxu1 %v17680_v26  ;;  %v15046_v26 = vpop.f32.mrb[49].mxu1 }
 0x7c4   : > { %15483 = vmatpush3.bf16.msra.mxu1 %v19099_v43  ;;  %16281 = vmatmul.mubr.msk.bf16.gmra.mrb[184].mxu0 %vm3035_vm5, %v4812_v19  ;;  %v20550_v10 = vadd.f32 %v15046_v26, %v15045_v21  ;;  %v23261_v19 = vld [vmem:[#allocation40_spill] sm:$0xff] }
 0x7c5   : > { %15484 = vmatprep.subr.bf16.mxu1 %v19173_v12  ;;  %13767 = vmatprep.mubr.msk.bf16.mxu1 %vm1992_vm4, %v17685_v9  ;;  %v15048_v9 = vpop.f32.mrb[50].mxu1  ;;  %v17717_v26 = vld [vmem:[#allocation7 + $0xb54] ss:$24 sps:$4 sm:$0xff]  }
 0x7c6   : > { %5460 = vmatprep.mubr.bf16.mxu0 %v17688_v35  ;;  %v15049_v35 = vpop.f32.mrb[51].mxu1 }
 0x7c8   : > { %15485 = vmatpush3.bf16.msra.mxu1 %v19107_v53 }
 0x7c9   : > { %15486 = vmatprep.subr.bf16.mxu1 %v19183_v23 }
 0x7cb   : > { %7242 = vmatmul.mubr.bf16.gmra.mrb[232].mxu1 %v17683_v63  ;;  %v23262_v63 = vld [vmem:[#allocation47_spill] sm:$0xff] }
 0x7cc   : > { %15487 = vmatpush3.bf16.msra.mxu1 %v23255_v55  ;;  %5461 = vmatmul.mubr.bf16.vlgmr.msra.gmra.mrb[188].mxu0 %v17686_v46  ;;  %v20555_v46 = vadd.f32 %v15049_v35, %v15048_v9  ;;  %v17720_v35 = vld [vmem:[#allocation7 + $0x7bc] ss:$24 sps:$4 sm:$0xff]  }
 0x7cd   : > { %16285 = vmatpush3.bf16.msra.mxu0 %v17689_v30  ;;  %15488 = vmatprep.subr.bf16.mxu1 %v23169_v45  ;;  %v17703_v30 = vld [vmem:[#allocation7 + $0xaf0] ss:$24 sps:$4 sm:$0xff]  }
 0x7ce   : > { %16286 = vmatprep.subr.bf16.mxu0 %v23065_v40  ;;  %13768 = vmatprep.mubr.msk.bf16.mxu1 %vm1992_vm4, %v17693_v31  ;;  %v23263_v31 = vld [vmem:[#allocation41_spill] sm:$0xff] }
 0x7cf   : > { %5468 = vmatprep.mubr.bf16.mxu0 %v17696_v13  ;;  %v17706_v13 = vld [vmem:[#allocation7 + $0x758] ss:$24 sps:$4 sm:$0xff]  }
 0x7d0   : > { %15489 = vmatpush3.bf16.msra.mxu1 %v23170_v1 }
 0x7d1   : > { %16287 = vmatpush3.bf16.msra.mxu0 %v17690_v7  ;;  %15490 = vmatprep.subr.bf16.mxu1 %v23256_v14  ;;  %v17711_v7 = vld [vmem:[#allocation7 + $0xb24] ss:$24 sps:$4 sm:$0xff]  }
 0x7d2   : > { %15250 = vmatprep.subr.bf16.mxu0 %v23257_v32 }
 0x7d3   : > { %7250 = vmatmul.mubr.bf16.gmra.mrb[236].mxu1 %v17691_v41  ;;  %v15051_v41 = vpop.f32.mrb[52].mxu1 }
 0x7d4   : > { %15491 = vmatpush3.bf16.msra.mxu1 %v23172_v2  ;;  %5469 = vmatmul.mubr.bf16.gmra.mrb[192].mxu0 %v17694_v54  ;;  %v17714_v54 = vld [vmem:[#allocation7 + $0x78c] ss:$24 sps:$4 sm:$0xff]  }
 0x7d5   : > { %15492 = vmatprep.subr.bf16.mxu1 %v23258_v18  ;;  %13769 = vmatprep.mubr.msk.bf16.mxu1 %vm1992_vm4, %v17699_v4  ;;  %v15052_v4 = vpop.f32.mrb[53].mxu1 }
 0x7d6   : > { %5476 = vmatprep.mubr.bf16.mxu0 %v17702_v33  ;;  %v20559_v33 = vadd.f32 %v15052_v4, %v15051_v41  ;;  %v17715_v41 = vld [vmem:[#allocation7 + $0xb50] ss:$24 sps:$4 sm:$0xff]   ;;  %v17723_v4 = vld [vmem:[#allocation7 + $0xb84] ss:$24 sps:$4 sm:$0xff]  }
 0x7d8   : > { %15493 = vmatpush3.bf16.msra.mxu1 %v23259_v48 }
 0x7d9   : > { %15494 = vmatprep.subr.bf16.mxu1 %v23260_v38 }
 0x7db   : > { %7258 = vmatmul.mubr.bf16.gmra.mrb[240].mxu1 %v17697_v50  ;;  %v15054_v50 = vpop.f32.mrb[54].mxu1 }
 0x7dc   : > { %15495 = vmatpush3.bf16.msra.mxu1 %v23261_v19  ;;  %5477 = vmatmul.mubr.bf16.gmra.mrb[196].mxu0 %v17700_v28  ;;  %v15055_v28 = vpop.f32.mrb[55].mxu1 }
 0x7dd   : > { %15496 = vmatprep.subr.bf16.mxu1 %v23262_v63  ;;  %13770 = vmatprep.mubr.msk.bf16.mxu1 %vm1992_vm4, %v17705_v5  ;;  %v20562_v21 = vadd.f32 %v15055_v28, %v15054_v50  ;;  %v17709_v5 = vld [vmem:[#allocation7 + $0xb20] ss:$24 sps:$4 sm:$0xff]   ;;  %v15057_v9 = vpop.f32.mrb[56].mxu1  ;;  %v17726_v28 = vld [vmem:[#allocation7 + $0x7ec] ss:$24 sps:$4 sm:$0xff]  }
 0x7de   : > { %5484 = vmatprep.mubr.bf16.mxu0 %v17708_v17  ;;  %v17712_v17 = vld [vmem:[#allocation7 + $0x788] ss:$24 sps:$4 sm:$0xff]   ;;  %v15058_v32 = vpop.f32.mrb[57].mxu1 }
 0x7df   : > { %v20564_v42 = vadd.f32 %v15058_v32, %v15057_v9  ;;  %v17724_v9 = vld [vmem:[#allocation7 + $0x7e8] ss:$24 sps:$4 sm:$0xff]  }
 0x7e0   : > { %15497 = vmatpush3.bf16.msra.mxu1 %v23263_v31 }
 0x7e1   : > { %8035 = vmatprep.subr.bf16.mxu1 %v23115_v52 }
 0x7e3   : > { %7266 = vmatmul.mubr.bf16.gmra.mrb[244].mxu1 %v17703_v30  ;;  %v15060_v30 = vpop.f32.mrb[58].mxu1 }
 0x7e4   : > { %5485 = vmatmul.mubr.bf16.gmra.mrb[200].mxu0 %v17706_v13  ;;  %13771 = vmatprep.mubr.msk.bf16.mxu1 %vm1992_vm4, %v17711_v7  ;;  %v15061_v13 = vpop.f32.mrb[59].mxu1 }
 0x7e5   : > { %5492 = vmatprep.mubr.bf16.mxu0 %v17714_v54  ;;  %v20567_v7 = vadd.f32 %v15061_v13, %v15060_v30  ;;  %v17718_v54 = vld [vmem:[#allocation7 + $0x7b8] ss:$24 sps:$4 sm:$0xff]   ;;  %v15063_v50 = vpop.f32.mrb[60].mxu1  ;;  %v17732_v13 = vld [vmem:[#allocation7 + $0x81c] ss:$24 sps:$4 sm:$0xff]  }
 0x7e6   : > { %v15064_v61 = vpop.f32.mrb[61].mxu1 }
 0x7e7   : > { %v20569_v29 = vadd.f32 %v15064_v61, %v15063_v50  ;;  %v17730_v50 = vld [vmem:[#allocation7 + $0x818] ss:$24 sps:$4 sm:$0xff]  }
 0x7eb   : > { %7274 = vmatmul.mubr.bf16.gmra.mrb[248].mxu1 %v17709_v5  ;;  %v15066_v5 = vpop.f32.mrb[62].mxu1 }
 0x7ec   : > { %5493 = vmatmul.mubr.bf16.gmra.mrb[204].mxu0 %v17712_v17  ;;  %13772 = vmatprep.mubr.msk.bf16.mxu1 %vm1992_vm4, %v17717_v26  ;;  %v15067_v32 = vpop.f32.mrb[63].mxu1  ;;  %v17721_v26 = vld [vmem:[#allocation7 + $0xb80] ss:$24 sps:$4 sm:$0xff]  }
 0x7ed   : > { %5500 = vmatprep.mubr.bf16.mxu0 %v17720_v35  ;;  %v20572_v17 = vadd.f32 %v15067_v32, %v15066_v5  ;;  %v17729_v35 = vld [vmem:[#allocation7 + $0xbb4] ss:$24 sps:$4 sm:$0xff]   ;;  %v15069_v30 = vpop.f32.mrb[64].mxu1 }
 0x7ee   : > { %v15070_v39 = vpop.f32.mrb[65].mxu1  ;;  %v17738_v32 = vld [vmem:[#allocation7 + $0x84c] ss:$24 sps:$4 sm:$0xff]  }
 0x7ef   : > { %23264 = vst [vmem:[#allocation77_spill] sm:$0xff] %v20572_v17  ;;  %v20574_v37 = vadd.f32 %v15070_v39, %v15069_v30  ;;  %v17736_v30 = vld [vmem:[#allocation7 + $0x848] ss:$24 sps:$4 sm:$0xff]  }
 0x7f1   : > { %23265 = vst [vmem:[#allocation76_spill] sm:$0xff] %v20574_v37 }
 0x7f3   : > { %7282 = vmatmul.mubr.bf16.gmra.mrb[252].mxu1 %v17715_v41  ;;  %v15072_v41 = vpop.f32.mrb[66].mxu1 }
 0x7f4   : > { %5501 = vmatmul.mubr.bf16.gmra.mrb[208].mxu0 %v17718_v54  ;;  %13773 = vmatprep.mubr.msk.bf16.mxu1 %vm1992_vm4, %v17723_v4  ;;  %v15073_v61 = vpop.f32.mrb[67].mxu1  ;;  %v17727_v4 = vld [vmem:[#allocation7 + $0xbb0] ss:$24 sps:$4 sm:$0xff]  }
 0x7f5   : > { %5508 = vmatprep.mubr.bf16.mxu0 %v17726_v28  ;;  %v20577_v54 = vadd.f32 %v15073_v61, %v15072_v41  ;;  %v17735_v28 = vld [vmem:[#allocation7 + $0xbd4] ss:$24 sps:$4 sm:$0xff]   ;;  %v15075_v5 = vpop.f32.mrb[68].mxu1  ;;  %v17741_v41 = vld [vmem:[#allocation7 + $0xc04] ss:$24 sps:$4 sm:$0xff]  }
 0x7f6   : > { %v15076_v0 = vpop.f32.mrb[69].mxu1 }
 0x7f7   : > { %23266 = vst [vmem:[#allocation82_spill] sm:$0xff] %v20577_v54  ;;  %v20579_v17 = vadd.f32 %v15076_v0, %v15075_v5 }
 0x7f9   : > { %23267 = vst [vmem:[#allocation66_spill] sm:$0xff] %v20579_v17 }
 0x7fb   : > { %7290 = vmatmul.mubr.bf16.gmra.mrb[0].mxu1 %v17721_v26  ;;  %v15078_v26 = vpop.f32.mrb[70].mxu1 }
 0x7fc   : > { %5509 = vmatmul.mubr.bf16.gmra.mrb[212].mxu0 %v17724_v9  ;;  %13774 = vmatprep.mubr.msk.bf16.mxu1 %vm1992_vm4, %v17729_v35  ;;  %v15079_v39 = vpop.f32.mrb[71].mxu1  ;;  %v17733_v35 = vld [vmem:[#allocation7 + $0xbd0] ss:$24 sps:$4 sm:$0xff]  }
 0x7fd   : > { %5516 = vmatprep.mubr.bf16.mxu0 %v17732_v13  ;;  %v20581_v9 = vadd.f32 %v15079_v39, %v15078_v26  ;;  %v15081_v13 = vpop.f32.mrb[72].mxu1 }
 0x7fe   : > { %v15082_v61 = vpop.f32.mrb[73].mxu1 }
 0x7ff   : > { %23268 = vst [vmem:[#allocation61_spill] sm:$0xff] %v20581_v9  ;;  %v20583_v54 = vadd.f32 %v15082_v61, %v15081_v13  ;;  %v15084_v37 = vpop.f32.mrb[74].mxu1  ;;  %v17747_v13 = vld [vmem:[#allocation7 + $0xc64] ss:$24 sps:$4 sm:$0xff]  }
 0x800   : > { %v15085_v0 = vpop.f32.mrb[75].mxu1 }
 0x801   : > { %23269 = vst [vmem:[#allocation43_spill] sm:$0xff] %v20583_v54  ;;  %v15087_v5 = vpop.f32.mrb[76].mxu1 }
 0x803   : > { %7298 = vmatmul.mubr.bf16.gmra.mrb[4].mxu1 %v17727_v4  ;;  %v20587_v4 = vadd.f32 %v15085_v0, %v15084_v37 }
 0x804   : > { %5517 = vmatmul.mubr.bf16.gmra.mrb[216].mxu0 %v17730_v50  ;;  %7857 = vmatprep.mubr.bf16.mxu1 %v17735_v28  ;;  %v17739_v50 = vld [vmem:[#allocation7 + $0xc00] ss:$24 sps:$4 sm:$0xff]   ;;  %v17744_v28 = vld [vmem:[#allocation7 + $0xc34] ss:$24 sps:$4 sm:$0xff]  }
 0x805   : > { %5524 = vmatprep.mubr.bf16.mxu0 %v17738_v32  ;;  %23270 = vst [vmem:[#allocation62_spill] sm:$0xff] %v20587_v4  ;;  %v15088_v32 = vpop.f32.mrb[77].mxu1 }
 0x806   : > { %v20593_v26 = vadd.f32 %v15088_v32, %v15087_v5  ;;  %v15090_v39 = vpop.f32.mrb[78].mxu1  ;;  %v17745_v32 = vld [vmem:[#allocation7 + $0xc60] ss:$24 sps:$4 sm:$0xff]  }
 0x807   : > { %v15091_v37 = vpop.f32.mrb[79].mxu1 }
 0x808   : > { %23271 = vst [vmem:[#allocation37_spill] sm:$0xff] %v20593_v26 }
 0x80b   : > { %7858 = vmatmul.mubr.bf16.vlgmr.msra.gmra.mrb[8].mxu1 %v17733_v35  ;;  %v20597_v35 = vadd.f32 %v15091_v37, %v15090_v39  ;;  %v17750_v39 = vld [vmem:[#allocation7 + $0xc94] ss:$24 sps:$4 sm:$0xff]  }
 0x80c   : > { %8036 = vmatpush1.bf16.msra.mxu1 %v23119_v8  ;;  %5525 = vmatmul.mubr.bf16.gmra.mrb[220].mxu0 %v17736_v30  ;;  %v17742_v30 = vld [vmem:[#allocation7 + $0xc30] ss:$24 sps:$4 sm:$0xff]  }
 0x80d   : > { %8037 = vmatprep.subr.bf16.mxu1 %v23115_v52  ;;  %7865 = vmatprep.mubr.bf16.mxu1 %v17741_v41  ;;  %23272 = vst [vmem:[#allocation79_spill] sm:$0xff] %v20597_v35  ;;  %v15093_v41 = vpop.f32.mrb[80].mxu1 }
 0x80e   : > { %16288 = vmatprep.mubr.msk.bf16.mxu0 %vm18556_vm1, %v23065_v40  ;;  %v15094_v61 = vpop.f32.mrb[81].mxu1 }
 0x80f   : > { %v20601_v0 = vadd.f32 %v15094_v61, %v15093_v41  ;;  %v17748_v61 = vld [vmem:[#allocation7 + $0xc90] ss:$24 sps:$4 sm:$0xff]  }
 0x810   : > { %8038 = vmatpush1.bf16.msra.mxu1 %v23120_v34 }
 0x811   : > { %8039 = vmatprep.subr.bf16.mxu1 %v23115_v52  ;;  %23273 = vst [vmem:[#allocation42_spill] sm:$0xff] %v20601_v0 }
 0x813   : > { %7866 = vmatmul.mubr.bf16.gmra.mrb[12].mxu1 %v17739_v50  ;;  %v15096_v50 = vpop.f32.mrb[82].mxu1 }
 0x814   : > { %8040 = vmatpush1.bf16.msra.mxu1 %v23124_v27  ;;  %7873 = vmatprep.mubr.bf16.mxu1 %v17744_v28  ;;  %v15097_v28 = vpop.f32.mrb[83].mxu1 }
 0x815   : > { %8041 = vmatprep.subr.bf16.mxu1 %v23115_v52  ;;  %v20605_v5 = vadd.f32 %v15097_v28, %v15096_v50  ;;  %v20609_v37 = vpop.f32.mrb[84].mxu1  ;;  %v17753_v50 = vld [vmem:[#allocation7 + $0xcc4] ss:$24 sps:$4 sm:$0xff]  }
 0x817   : > { %23274 = vst [vmem:[#allocation38_spill] sm:$0xff] %v20605_v5 }
 0x818   : > { %8042 = vmatpush1.bf16.msra.mxu1 %v23125_v20 }
 0x819   : > { %8043 = vmatprep.subr.bf16.mxu1 %v23115_v52 }
 0x81b   : > { %7874 = vmatmul.mubr.bf16.gmra.mrb[16].mxu1 %v17742_v30  ;;  %v5569_v30 = vpop.f32.mrb[85].mxu1 }
 0x81c   : > { %8044 = vmatpush1.bf16.msra.mxu1 %v23129_v60  ;;  %7881 = vmatprep.mubr.bf16.mxu1 %v17747_v13  ;;  %v20612_v41 = vpop.f32.mrb[86].mxu1  ;;  %v17751_v30 = vld [vmem:[#allocation7 + $0xcc0] ss:$24 sps:$4 sm:$0xff]  }
 0x81d   : > { %8045 = vmatprep.subr.bf16.mxu1 %v23115_v52  ;;  %v5572_v13 = vpop.f32.mrb[87].mxu1 }
 0x81e   : > { %v20617_v28 = vpop.f32.mrb[88].mxu1  ;;  %v17756_v13 = vld [vmem:[#allocation7 + $0xcf4] ss:$24 sps:$4 sm:$0xff]  }
 0x81f   : > { %v5577_v5 = vpop.f32.mrb[89].mxu1 }
 0x820   : > { %8046 = vmatpush1.bf16.msra.mxu1 %v23130_v56 }
 0x821   : > { %8047 = vmatprep.subr.bf16.mxu1 %v23115_v52 }
 0x823   : > { %7882 = vmatmul.mubr.bf16.gmra.mrb[20].mxu1 %v17745_v32  ;;  %v20620_v32 = vpop.f32.mrb[90].mxu1 }
 0x824   : > { %8048 = vmatpush1.bf16.msra.mxu1 %v23134_v47  ;;  %7889 = vmatprep.mubr.bf16.mxu1 %v17750_v39  ;;  %v5580_v39 = vpop.f32.mrb[91].mxu1 }
 0x825   : > { %8049 = vmatprep.subr.bf16.mxu1 %v23115_v52  ;;  %v20625_v0 = vpop.f32.mrb[92].mxu1  ;;  %v17759_v39 = vld [vmem:[#allocation7 + $0xd24] ss:$24 sps:$4 sm:$0xff]  }
 0x826   : > { %v5585_v35 = vpop.f32.mrb[93].mxu1 }
 0x827   : > { %v20628_v5 = vpop.f32.mrb[94].mxu1  ;;  %v17762_v35 = vld [vmem:[#allocation7 + $0xd54] ss:$24 sps:$4 sm:$0xff]  }
 0x828   : > { %8050 = vmatpush1.bf16.msra.mxu1 %v23230_v59 }
 0x829   : > { %8051 = vmatprep.subr.bf16.mxu1 %v23115_v52 }
 0x82b   : > { %7890 = vmatmul.mubr.bf16.gmra.mrb[24].mxu1 %v17748_v61  ;;  %v5588_v61 = vpop.f32.mrb[95].mxu1 }
 0x82c   : > { %8052 = vmatpush1.bf16.msra.mxu1 %v23234_v62  ;;  %7897 = vmatprep.mubr.bf16.mxu1 %v17753_v50  ;;  %v17754_v50 = vld [vmem:[#allocation7 + $0xcf0] ss:$24 sps:$4 sm:$0xff]   ;;  %v20631_v26 = vpop.f32.mrb[96].mxu1 }
 0x82d   : > { %8053 = vmatprep.subr.bf16.mxu1 %v23115_v52  ;;  %v5593_v4 = vpop.f32.mrb[97].mxu1  ;;  %v17760_v61 = vld [vmem:[#allocation7 + $0xd50] ss:$24 sps:$4 sm:$0xff]  }
 0x82e   : > { %v20633_v54 = vpop.f32.mrb[98].mxu1 }
 0x82f   : > { %23275 = vst [vmem:[#allocation78_spill] sm:$0xff] %v20633_v54  ;;  %v5596_v9 = vpop.f32.mrb[99].mxu1  ;;  %v17768_v54 = vld [vmem:[#allocation7 + $0xc14] ss:$24 sps:$4 sm:$0xff]  }
 0x830   : > { %8054 = vmatpush1.bf16.msra.mxu1 %v23240_v49  ;;  %v20635_v17 = vpop.f32.mrb[100].mxu1  ;;  %v17765_v49 = vld [vmem:[#allocation7 + $0xbe4] ss:$24 sps:$4 sm:$0xff]  }
 0x831   : > { %8055 = vmatprep.subr.bf16.mxu1 %v23115_v52  ;;  %23276 = vst [vmem:[#allocation88_spill] sm:$0xff] %v20635_v17 }
 0x833   : > { %7898 = vmatmul.mubr.bf16.gmra.mrb[28].mxu1 %v17751_v30  ;;  %v17757_v30 = vld [vmem:[#allocation7 + $0xd20] ss:$24 sps:$4 sm:$0xff]  }
 0x834   : > { %8056 = vmatpush1.bf16.msra.mxu1 %v23243_v15  ;;  %7905 = vmatprep.mubr.bf16.mxu1 %v17756_v13  ;;  %v5601_v13 = vpop.f32.mrb[101].mxu1 }
 0x835   : > { %15633 = vmatprep.subr.bf16.mxu1 %v23244_v44  ;;  %v20637_v15 = vpop.f32.mrb[102].mxu1 }
 0x836   : > { %v5604_v44 = vpop.f32.mrb[103].mxu1 }
 0x837   : > { %v20639_v62 = vpop.f32.mrb[104].mxu1 }
 0x838   : > { %v5609_v4 = vpop.f32.mrb[105].mxu1 }
 0x83b   : > { %7906 = vmatmul.mubr.bf16.gmra.mrb[32].mxu1 %v17754_v50  ;;  %v20642_v50 = vpop.f32.mrb[106].mxu1 }
 0x83c   : > { %7913 = vmatprep.mubr.bf16.mxu1 %v17759_v39  ;;  %v5612_v9 = vpop.f32.mrb[107].mxu1  ;;  %v17763_v39 = vld [vmem:[#allocation7 + $0xbe0] ss:$24 sps:$4 sm:$0xff]  }
 0x83d   : > { %v20644_v17 = vpop.f32.mrb[108].mxu1 }
 0x83e   : > { %23277 = vst [vmem:[#allocation63_spill] sm:$0xff] %v20644_v17  ;;  %v17771_v17 = vld [vmem:[#allocation7 + $0xc44] ss:$24 sps:$4 sm:$0xff]  }
 0x843   : > { %7914 = vmatmul.mubr.bf16.gmra.mrb[36].mxu1 %v17757_v30  ;;  %v5617_v30 = vpop.f32.mrb[109].mxu1 }
 0x844   : > { %7921 = vmatprep.mubr.bf16.mxu1 %v17762_v35  ;;  %v20648_v35 = vpop.f32.mrb[110].mxu1 }
 0x845   : > { %23278 = vst [vmem:[#allocation89_spill] sm:$0xff] %v20648_v35  ;;  %v5620_v13 = vpop.f32.mrb[111].mxu1 }
 0x846   : > { %v20659_v35 = vpop.f32.mrb[112].mxu1 }
 0x84b   : > { %7922 = vmatmul.mubr.bf16.gmra.mrb[40].mxu1 %v17760_v61  ;;  %v23279_v61 = vld [vmem:[#allocation54_spill] sm:$0xff] }
 0x84c   : > { %13844 = vmatprep.mubr.msk.bf16.mxu1 %vm1992_vm4, %v17765_v49  ;;  %v17766_v49 = vld [vmem:[#allocation7 + $0xc10] ss:$24 sps:$4 sm:$0xff]  }
 0x853   : > { %8068 = vmatmul.mubr.bf16.vlgmr.msra.gmra.mrb[44].mxu1 %v17763_v39 }
 0x854   : > { %15634 = vmatpush3.bf16.msra.mxu1 %v19099_v43  ;;  %13845 = vmatprep.mubr.msk.bf16.mxu1 %vm1992_vm4, %v17768_v54  ;;  %v23280_v43 = vld [vmem:[#allocation84_spill] sm:$0xff] }
 0x855   : > { %15635 = vmatprep.subr.bf16.mxu1 %v19173_v12  ;;  %v5625_v12 = vpop.f32.mrb[113].mxu1 }
 0x856   : > { %v20663_v13 = vpop.f32.mrb[114].mxu1 }
 0x857   : > { %v4891_v44 = vpop.f32.mrb[152].mxu0 }
 0x858   : > { %v20652_v4 = vadd.f32 %v4891_v44, %v23279_v61  ;;  %15636 = vmatpush3.bf16.msra.mxu1 %v19107_v53  ;;  %v16250_v9 = vpop.f32.mrb[153].mxu0  ;;  %v5628_v53 = vpop.f32.mrb[115].mxu1  ;;  %v23281_v61 = vld [vmem:[#allocation48_spill] sm:$0xff] }
 0x859   : > { %15637 = vmatprep.subr.bf16.mxu1 %v19183_v23  ;;  %v4894_v39 = vpop.f32.mrb[154].mxu0  ;;  %v17769_v23 = vld [vmem:[#allocation7 + $0xc40] ss:$24 sps:$4 sm:$0xff]   ;;  %v20674_v12 = vpop.f32.mrb[116].mxu1 }
 0x85a   : > { %v20657_v30 = vadd.f32 %v4894_v39, %v23280_v43  ;;  %v16251_v54 = vpop.f32.mrb[155].mxu0  ;;  %v17774_v43 = vld [vmem:[#allocation7 + $0xc74] ss:$24 sps:$4 sm:$0xff]  }
 0x85b   : > { %8076 = vmatmul.mubr.bf16.gmra.mrb[48].mxu1 %v17766_v49 }
 0x85c   : > { %15638 = vmatpush3.bf16.msra.mxu1 %v23255_v55  ;;  %13846 = vmatprep.mubr.msk.bf16.mxu1 %vm1992_vm4, %v17771_v17  ;;  %v23282_v55 = vld [vmem:[#allocation55_spill] sm:$0xff] }
 0x85d   : > { %15639 = vmatprep.subr.bf16.mxu1 %v23169_v45  ;;  %v5633_v45 = vpop.f32.mrb[117].mxu1 }
 0x85e   : > { %v20678_v53 = vpop.f32.mrb[118].mxu1  ;;  %v17775_v45 = vld [vmem:[#allocation7 + $0xca0] ss:$24 sps:$4 sm:$0xff]  }
 0x85f   : > { %v4899_v44 = vpop.f32.mrb[156].mxu0 }
 0x860   : > { %v20667_v9 = vadd.f32 %v4899_v44, %v23281_v61  ;;  %15640 = vmatpush3.bf16.msra.mxu1 %v23170_v1  ;;  %v16254_v39 = vpop.f32.mrb[157].mxu0  ;;  %v5636_v1 = vpop.f32.mrb[119].mxu1  ;;  %v23283_v61 = vld [vmem:[#allocation71_spill] sm:$0xff] }
 0x861   : > { %15641 = vmatprep.subr.bf16.mxu1 %v23256_v14  ;;  %v4902_v49 = vpop.f32.mrb[158].mxu0  ;;  %v17772_v14 = vld [vmem:[#allocation7 + $0xc70] ss:$24 sps:$4 sm:$0xff]  }
 0x862   : > { %v20672_v54 = vadd.f32 %v4902_v49, %v23282_v55  ;;  %v16255_v17 = vpop.f32.mrb[159].mxu0  ;;  %v17777_v55 = vld [vmem:[#allocation7 + $0xca4] ss:$24 sps:$4 sm:$0xff]   ;;  %v23286_v1 = vld [vmem:[#allocation49_spill] sm:$0xff] }
 0x863   : > { %8084 = vmatmul.mubr.bf16.gmra.mrb[52].mxu1 %v17769_v23 }
 0x864   : > { %15642 = vmatpush3.bf16.msra.mxu1 %v23172_v2  ;;  %13847 = vmatprep.mubr.msk.bf16.mxu1 %vm1992_vm4, %v17774_v43  ;;  %v23284_v2 = vld [vmem:[#allocation70_spill] sm:$0xff] }
 0x865   : > { %15643 = vmatprep.subr.bf16.mxu1 %v23258_v18 }
 0x867   : > { %v4907_v44 = vpop.f32.mrb[160].mxu0 }
 0x868   : > { %v20682_v39 = vadd.f32 %v4907_v44, %v23283_v61  ;;  %15644 = vmatpush3.bf16.msra.mxu1 %v23259_v48  ;;  %v16258_v49 = vpop.f32.mrb[161].mxu0  ;;  %v17780_v44 = vld [vmem:[#allocation7 + $0xcd4] ss:$24 sps:$4 sm:$0xff]  }
 0x869   : > { %15645 = vmatprep.subr.bf16.mxu1 %v23260_v38  ;;  %v4910_v23 = vpop.f32.mrb[162].mxu0  ;;  %v23288_v49 = vld [vmem:[#allocation85_spill] sm:$0xff] }
 0x86a   : > { %v20687_v17 = vadd.f32 %v4910_v23, %v23284_v2  ;;  %v16259_v43 = vpop.f32.mrb[163].mxu0  ;;  %v23290_v23 = vld [vmem:[#allocation87_spill] sm:$0xff] }
 0x86b   : > { %8092 = vmatmul.mubr.bf16.gmra.mrb[56].mxu1 %v17772_v14 }
 0x86c   : > { %23285 = vst [vmem:[#allocation64_spill] sm:$0xff] %v20687_v17  ;;  %15646 = vmatpush3.bf16.msra.mxu1 %v23261_v19  ;;  %13848 = vmatprep.mubr.msk.bf16.mxu1 %vm1992_vm4, %v17777_v55  ;;  %v17778_v55 = vld [vmem:[#allocation7 + $0xcd0] ss:$24 sps:$4 sm:$0xff]  }
 0x86d   : > { %15647 = vmatprep.subr.bf16.mxu1 %v23262_v63 }
 0x86f   : > { %v4915_v18 = vpop.f32.mrb[164].mxu0 }
 0x870   : > { %v20693_v48 = vadd.f32 %v4915_v18, %v23286_v1  ;;  %15648 = vmatpush3.bf16.msra.mxu1 %v23263_v31  ;;  %v16262_v38 = vpop.f32.mrb[165].mxu0  ;;  %v17783_v18 = vld [vmem:[#allocation7 + $0xd04] ss:$24 sps:$4 sm:$0xff]  }
 0x871   : > { %v4918_v61 = vpop.f32.mrb[166].mxu0  ;;  %8869 = vmatprep.subr.bf16.mxu1 %v23115_v52  ;;  %v23292_v1 = vld [vmem:[#allocation86_spill] sm:$0xff] }
 0x872   : > { %23287 = vst [vmem:[#allocation81_spill] sm:$0xff] %v20693_v48  ;;  %v20698_v14 = vadd.f32 %v4918_v61, %v23288_v49  ;;  %v16263_v19 = vpop.f32.mrb[167].mxu0  ;;  %v17781_v49 = vld [vmem:[#allocation7 + $0xd00] ss:$24 sps:$4 sm:$0xff]  }
 0x873   : > { %8100 = vmatmul.mubr.bf16.gmra.mrb[60].mxu1 %v17775_v45  ;;  %v23294_v45 = vld [vmem:[#allocation73_spill] sm:$0xff] }
 0x874   : > { %23289 = vst [vmem:[#allocation80_spill] sm:$0xff] %v20698_v14  ;;  %13849 = vmatprep.mubr.msk.bf16.mxu1 %vm1992_vm4, %v17780_v44  ;;  %v17786_v14 = vld [vmem:[#allocation7 + $0xd34] ss:$24 sps:$4 sm:$0xff]  }
 0x877   : > { %v4923_v63 = vpop.f32.mrb[168].mxu0 }
 0x878   : > { %v20702_v2 = vadd.f32 %v4923_v63, %v23290_v23  ;;  %v16266_v43 = vpop.f32.mrb[169].mxu0  ;;  %v23296_v63 = vld [vmem:[#allocation72_spill] sm:$0xff] }
 0x879   : > { %v4926_v31 = vpop.f32.mrb[170].mxu0 }
 0x87a   : > { %23291 = vst [vmem:[#allocation65_spill] sm:$0xff] %v20702_v2  ;;  %v20705_v38 = vadd.f32 %v4926_v31, %v23292_v1  ;;  %v16267_v48 = vpop.f32.mrb[171].mxu0 }
 0x87b   : > { %8108 = vmatmul.mubr.bf16.gmra.mrb[64].mxu1 %v17778_v55  ;;  %v17784_v48 = vld [vmem:[#allocation7 + $0xd30] ss:$24 sps:$4 sm:$0xff]  }
 0x87c   : > { %23293 = vst [vmem:[#allocation83_spill] sm:$0xff] %v20705_v38  ;;  %13850 = vmatprep.mubr.msk.bf16.mxu1 %vm1992_vm4, %v17783_v18  ;;  %v23298_v55 = vld [vmem:[#allocation75_spill] sm:$0xff] }
 0x87d   : > { %v17789_v38 = vld [vmem:[#allocation7 + $0xd64] ss:$24 sps:$4 sm:$0xff]  }
 0x87f   : > { %v4931_v61 = vpop.f32.mrb[172].mxu0 }
 0x880   : > { %v20709_v19 = vadd.f32 %v4931_v61, %v23294_v45  ;;  %v16270_v44 = vpop.f32.mrb[173].mxu0  ;;  %v23299_v61 = vld [vmem:[#allocation74_spill] sm:$0xff] }
 0x881   : > { %v4934_v17 = vpop.f32.mrb[174].mxu0 }
 0x882   : > { %23295 = vst [vmem:[#allocation36_spill] sm:$0xff] %v20709_v19  ;;  %v20712_v23 = vadd.f32 %v4934_v17, %v23296_v63  ;;  %v16271_v43 = vpop.f32.mrb[175].mxu0  ;;  %v17787_v63 = vld [vmem:[#allocation7 + $0xd60] ss:$24 sps:$4 sm:$0xff]  }
 0x883   : > { %8116 = vmatmul.mubr.bf16.gmra.mrb[68].mxu1 %v17781_v49  ;;  %v23301_v49 = vld [vmem:[#allocation59_spill] sm:$0xff] }
 0x884   : > { %23297 = vst [vmem:[#allocation44_spill] sm:$0xff] %v20712_v23  ;;  %13851 = vmatprep.mubr.msk.bf16.mxu1 %vm1992_vm4, %v17786_v14  ;;  %v17792_v23 = vld [vmem:[#allocation7 + $0xd84] ss:$24 sps:$4 sm:$0xff]  }
 0x887   : > { %v4939_v31 = vpop.f32.mrb[176].mxu0 }
 0x888   : > { %v20716_v1 = vadd.f32 %v4939_v31, %v23298_v55  ;;  %v16274_v18 = vpop.f32.mrb[177].mxu0  ;;  %v23302_v31 = vld [vmem:[#allocation60_spill] sm:$0xff] }
 0x889   : > { %v4942_v2 = vpop.f32.mrb[178].mxu0 }
 0x88a   : > { %v20719_v45 = vadd.f32 %v4942_v2, %v23299_v61  ;;  %v16275_v44 = vpop.f32.mrb[179].mxu0  ;;  %v17790_v61 = vld [vmem:[#allocation7 + $0xd80] ss:$24 sps:$4 sm:$0xff]  }
 0x88b   : > { %8124 = vmatmul.mubr.bf16.gmra.mrb[72].mxu1 %v17784_v48 }
 0x88c   : > { %23300 = vst [vmem:[#allocation45_spill] sm:$0xff] %v20719_v45  ;;  %13852 = vmatprep.mubr.msk.bf16.mxu1 %vm1992_vm4, %v17789_v38 }
 0x88f   : > { %v4947_v17 = vpop.f32.mrb[180].mxu0 }
 0x890   : > { %v20723_v43 = vadd.f32 %v4947_v17, %v23301_v49  ;;  %v16278_v14 = vpop.f32.mrb[181].mxu0 }
 0x891   : > { %v4950_v19 = vpop.f32.mrb[182].mxu0 }
 0x892   : > { %v20726_v55 = vadd.f32 %v4950_v19, %v23302_v31  ;;  %v16279_v18 = vpop.f32.mrb[183].mxu0 }
 0x893   : > { %8132 = vmatmul.mubr.bf16.gmra.mrb[76].mxu1 %v17787_v63 }
 0x894   : > { %8691 = vmatprep.mubr.bf16.mxu1 %v17792_v23 }
 0x897   : > { %v4955_v2 = vpop.f32.mrb[184].mxu0 }
 0x898   : > { %v20729_v48 = vadd.f32 %v4955_v2, %v20422_v24  ;;  %v16282_v38 = vpop.f32.mrb[185].mxu0 }
 0x899   : > { %v4958_v44 = vpop.f32.mrb[186].mxu0 }
 0x89a   : > { %v20732_v45 = vadd.f32 %v4958_v44, %v20425_v25  ;;  %v16283_v17 = vpop.f32.mrb[187].mxu0 }
 0x89b   : > { %8692 = vmatmul.mubr.bf16.vlgmr.msra.gmra.mrb[80].mxu1 %v17790_v61 }
 0x89c   : > { %8870 = vmatpush1.bf16.msra.mxu1 %v23119_v8 }
 0x89d   : > { %8871 = vmatprep.subr.bf16.mxu1 %v23115_v52 }
 0x89f   : > { %v15115_v19 = vpop.f32.mrb[188].mxu0 }
 0x8a0   : > { %8872 = vmatpush1.bf16.msra.mxu1 %v23120_v34  ;;  %v15116_v23 = vpop.f32.mrb[189].mxu0 }
 0x8a1   : > { %v15117_v63 = vadd.f32 %v15116_v23, %v15115_v19  ;;  %v15118_v49 = vpop.f32.mrb[190].mxu0  ;;  %8873 = vmatprep.subr.bf16.mxu1 %v23115_v52 }
 0x8a2   : > { %v15119_v24 = vpop.f32.mrb[191].mxu0 }
 0x8a3   : > { %v5463_v14 = vadd.f32 %v15117_v63, %v20550_v10  ;;  %v15120_v31 = vadd.f32 %v15119_v24, %v15118_v49 }
 0x8a4   : > { %8874 = vmatpush1.bf16.msra.mxu1 %v23124_v27 }
 0x8a5   : > { %v5568_v25 = vadd.f32 %v20609_v37, %v5463_v14  ;;  %v5466_v8 = vadd.f32 %v15120_v31, %v20555_v46  ;;  %8875 = vmatprep.subr.bf16.mxu1 %v23115_v52 }
 0x8a7   : > { %v5571_v18 = vadd.f32 %v20612_v41, %v5466_v8  ;;  %v15121_v34 = vpop.f32.mrb[192].mxu0  ;;  %v23304_v8 = vld [vmem:[#allocation77_spill] sm:$0xff] }
 0x8a8   : > { %8876 = vmatpush1.bf16.msra.mxu1 %v23125_v20  ;;  %v15122_v2 = vpop.f32.mrb[193].mxu0 }
 0x8a9   : > { %v5638_v61 = vpack.c.bf16 %v5571_v18, %v5568_v25  ;;  %v15123_v38 = vadd.f32 %v15122_v2, %v15121_v34  ;;  %v15124_v44 = vpop.f32.mrb[194].mxu0  ;;  %8877 = vmatprep.subr.bf16.mxu1 %v23115_v52  ;;  %v23305_v34 = vld [vmem:[#allocation56_spill] sm:$0xff]  ;;  %v23306_v2 = vld [vmem:[#allocation78_spill] sm:$0xff] }
 0x8aa   : > { %v15125_v10 = vpop.f32.mrb[195].mxu0 }
 0x8ab   : > { %v5471_v27 = vadd.f32 %v15123_v38, %v20559_v33  ;;  %v15126_v17 = vadd.f32 %v15125_v10, %v15124_v44  ;;  %16289 = vmatmul.mubr.msk.bf16.vlgmr.msra.gmra.mrb[224].mxu0 %vm3035_vm5, %v5638_v61  ;;  %v23307_v38 = vld [vmem:[#allocation50_spill] sm:$0xff]  ;;  %v23308_v44 = vld [vmem:[#allocation68_spill] sm:$0xff] }
 0x8ac   : > { %15251 = vmatpush3.bf16.msra.mxu0 %v19237_v36  ;;  %8878 = vmatpush1.bf16.msra.mxu1 %v23129_v60 }
 0x8ad   : > { %v5576_v46 = vadd.f32 %v20617_v28, %v5471_v27  ;;  %v5474_v20 = vadd.f32 %v15126_v17, %v20562_v21  ;;  %15252 = vmatprep.subr.bf16.mxu0 %v19278_v58  ;;  %8879 = vmatprep.subr.bf16.mxu1 %v23115_v52 }
 0x8ae   : > { %16292 = vmatprep.mubr.msk.bf16.mxu0 %vm18556_vm1, %v23065_v40 }
 0x8af   : > { %v5579_v33 = vadd.f32 %v20620_v32, %v5474_v20  ;;  %v15127_v37 = vpop.f32.mrb[196].mxu0 }
 0x8b0   : > { %15253 = vmatpush3.bf16.msra.mxu0 %v19244_v51  ;;  %8880 = vmatpush1.bf16.msra.mxu1 %v23130_v56  ;;  %v15128_v41 = vpop.f32.mrb[197].mxu0 }
 0x8b1   : > { %v5639_v60 = vpack.c.bf16 %v5579_v33, %v5576_v46  ;;  %v15129_v19 = vadd.f32 %v15128_v41, %v15127_v37  ;;  %15254 = vmatprep.subr.bf16.mxu0 %v19284_v11  ;;  %v15130_v21 = vpop.f32.mrb[198].mxu0  ;;  %8881 = vmatprep.subr.bf16.mxu1 %v23115_v52  ;;  %v23310_v33 = vld [vmem:[#allocation76_spill] sm:$0xff] }
 0x8b2   : > { %v15131_v28 = vpop.f32.mrb[199].mxu0 }
 0x8b3   : > { %v5479_v23 = vadd.f32 %v15129_v19, %v20564_v42  ;;  %v15132_v63 = vadd.f32 %v15131_v28, %v15130_v21  ;;  %16293 = vmatmul.mubr.msk.bf16.gmra.mrb[228].mxu0 %vm3035_vm5, %v5639_v60  ;;  %v23311_v60 = vld [vmem:[#allocation51_spill] sm:$0xff]  ;;  %v23312_v19 = vld [vmem:[#allocation69_spill] sm:$0xff]  ;;  %v23313_v21 = vld [vmem:[#allocation88_spill] sm:$0xff] }
 0x8b4   : > { %15255 = vmatpush3.bf16.msra.mxu0 %v19248_v3  ;;  %8882 = vmatpush1.bf16.msra.mxu1 %v23134_v47 }
 0x8b5   : > { %v5584_v56 = vadd.f32 %v20625_v0, %v5479_v23  ;;  %v5482_v32 = vadd.f32 %v15132_v63, %v20567_v7  ;;  %15256 = vmatprep.subr.bf16.mxu0 %v23086_v6  ;;  %8883 = vmatprep.subr.bf16.mxu1 %v23115_v52  ;;  %v23314_v23 = vld [vmem:[#allocation82_spill] sm:$0xff] }
 0x8b6   : > { %16296 = vmatprep.mubr.msk.bf16.mxu0 %vm18556_vm1, %v23065_v40 }
 0x8b7   : > { %v5587_v42 = vadd.f32 %v20628_v5, %v5482_v32  ;;  %v15133_v49 = vpop.f32.mrb[200].mxu0  ;;  %v23303_v5 = vld [vmem:[#allocation67_spill] sm:$0xff] }
 0x8b8   : > { %15257 = vmatpush3.bf16.msra.mxu0 %v23089_v57  ;;  %8884 = vmatpush1.bf16.msra.mxu1 %v23230_v59  ;;  %v15134_v24 = vpop.f32.mrb[201].mxu0 }
 0x8b9   : > { %v5640_v47 = vpack.c.bf16 %v5587_v42, %v5584_v56  ;;  %v15135_v14 = vadd.f32 %v15134_v24, %v15133_v49  ;;  %15258 = vmatprep.subr.bf16.mxu0 %v23091_v22  ;;  %v15136_v7 = vpop.f32.mrb[202].mxu0  ;;  %8885 = vmatprep.subr.bf16.mxu1 %v23115_v52  ;;  %v23315_v56 = vld [vmem:[#allocation58_spill] sm:$0xff]  ;;  %v23316_v49 = vld [vmem:[#allocation52_spill] sm:$0xff] }
 0x8ba   : > { %v15137_v0 = vpop.f32.mrb[203].mxu0 }
 0x8bb   : > { %v5487_v31 = vadd.f32 %v15135_v14, %v20569_v29  ;;  %v15138_v25 = vadd.f32 %v15137_v0, %v15136_v7  ;;  %16297 = vmatmul.mubr.msk.bf16.gmra.mrb[232].mxu0 %vm3035_vm5, %v5640_v47 }
 0x8bc   : > { %15259 = vmatpush3.bf16.msra.mxu0 %v23096_v16  ;;  %8886 = vmatpush1.bf16.msra.mxu1 %v23303_v5 }
 0x8bd   : > { %v5592_v59 = vadd.f32 %v20631_v26, %v5487_v31  ;;  %v5490_v18 = vadd.f32 %v15138_v25, %v23304_v8  ;;  %15260 = vmatprep.subr.bf16.mxu0 %v23305_v34  ;;  %8887 = vmatprep.subr.bf16.mxu1 %v23115_v52  ;;  %v23309_v26 = vld [vmem:[#allocation57_spill] sm:$0xff]  ;;  %v23317_v31 = vld [vmem:[#allocation66_spill] sm:$0xff] }
 0x8be   : > { %16300 = vmatprep.mubr.msk.bf16.mxu0 %vm18556_vm1, %v23065_v40 }
 0x8bf   : > { %v5595_v29 = vadd.f32 %v23306_v2, %v5490_v18  ;;  %v15139_v61 = vpop.f32.mrb[204].mxu0 }
 0x8c0   : > { %15261 = vmatpush3.bf16.msra.mxu0 %v23307_v38  ;;  %8888 = vmatpush1.bf16.msra.mxu1 %v23308_v44  ;;  %v15140_v10 = vpop.f32.mrb[205].mxu0 }
 0x8c1   : > { %v5641_v27 = vpack.c.bf16 %v5595_v29, %v5592_v59  ;;  %v15141_v17 = vadd.f32 %v15140_v10, %v15139_v61  ;;  %15262 = vmatprep.subr.bf16.mxu0 %v23309_v26  ;;  %v15142_v46 = vpop.f32.mrb[206].mxu0  ;;  %8889 = vmatprep.subr.bf16.mxu1 %v23115_v52  ;;  %v23318_v59 = vld [vmem:[#allocation61_spill] sm:$0xff] }
 0x8c2   : > { %v15143_v20 = vpop.f32.mrb[207].mxu0 }
 0x8c3   : > { %v5495_v37 = vadd.f32 %v15141_v17, %v23310_v33  ;;  %v15144_v41 = vadd.f32 %v15143_v20, %v15142_v46  ;;  %16301 = vmatmul.mubr.msk.bf16.gmra.mrb[236].mxu0 %vm3035_vm5, %v5641_v27  ;;  %v23319_v17 = vld [vmem:[#allocation43_spill] sm:$0xff] }
 0x8c4   : > { %15263 = vmatpush3.bf16.msra.mxu0 %v23311_v60  ;;  %8890 = vmatpush1.bf16.msra.mxu1 %v23312_v19  ;;  %v23320_v33 = vld [vmem:[#allocation63_spill] sm:$0xff]  ;;  %v23322_v19 = vld [vmem:[#allocation89_spill] sm:$0xff] }
 0x8c5   : > { %v5600_v28 = vadd.f32 %v23313_v21, %v5495_v37  ;;  %v5498_v63 = vadd.f32 %v15144_v41, %v23314_v23  ;;  %15264 = vmatprep.subr.bf16.mxu0 %v23315_v56  ;;  %16304 = vmatprep.mubr.msk.bf16.mxu0 %vm18556_vm1, %v23065_v40  ;;  %v23321_v37 = vld [vmem:[#allocation62_spill] sm:$0xff] }
 0x8c6   : > { %16484 = vmatprep.subr.bf16.mxu1 %v23065_v40 }
 0x8c7   : > { %v5603_v32 = vadd.f32 %v20637_v15, %v5498_v63  ;;  %v15145_v42 = vpop.f32.mrb[208].mxu0 }
 0x8c8   : > { %15265 = vmatpush3.bf16.msra.mxu0 %v23316_v49  ;;  %v15146_v24 = vpop.f32.mrb[209].mxu0 }
 0x8c9   : > { %v5642_v47 = vpack.c.bf16 %v5603_v32, %v5600_v28  ;;  %v15147_v14 = vadd.f32 %v15146_v24, %v15145_v42  ;;  %v15148_v7 = vpop.f32.mrb[210].mxu0  ;;  %16324 = vmatprep.subr.bf16.mxu0 %v23065_v40  ;;  %v23323_v24 = vld [vmem:[#allocation37_spill] sm:$0xff] }
 0x8ca   : > { %v15149_v0 = vpop.f32.mrb[211].mxu0 }
 0x8cb   : > { %v5503_v25 = vadd.f32 %v15147_v14, %v23317_v31  ;;  %v15150_v5 = vadd.f32 %v15149_v0, %v15148_v7  ;;  %16305 = vmatmul.mubr.msk.bf16.gmra.mrb[240].mxu0 %vm3035_vm5, %v5642_v47  ;;  %v23324_v0 = vld [vmem:[#allocation79_spill] sm:$0xff] }
 0x8cc   : > { %16308 = vmatprep.mubr.msk.bf16.mxu0 %vm18556_vm1, %v23065_v40 }
 0x8cd   : > { %v5608_v15 = vadd.f32 %v20639_v62, %v5503_v25  ;;  %v5506_v8 = vadd.f32 %v15150_v5, %v23318_v59 }
 0x8cf   : > { %v5611_v18 = vadd.f32 %v20642_v50, %v5506_v8  ;;  %v15151_v2 = vpop.f32.mrb[212].mxu0 }
 0x8d0   : > { %v15152_v29 = vpop.f32.mrb[213].mxu0 }
 0x8d1   : > { %v5643_v61 = vpack.c.bf16 %v5611_v18, %v5608_v15  ;;  %v15153_v44 = vadd.f32 %v15152_v29, %v15151_v2  ;;  %v15154_v10 = vpop.f32.mrb[214].mxu0  ;;  %v23325_v29 = vld [vmem:[#allocation42_spill] sm:$0xff] }
 0x8d2   : > { %v15155_v27 = vpop.f32.mrb[215].mxu0 }
 0x8d3   : > { %v5511_v46 = vadd.f32 %v15153_v44, %v23319_v17  ;;  %v15156_v20 = vadd.f32 %v15155_v27, %v15154_v10  ;;  %16309 = vmatmul.mubr.msk.bf16.gmra.mrb[244].mxu0 %vm3035_vm5, %v5643_v61  ;;  %v23326_v10 = vld [vmem:[#allocation38_spill] sm:$0xff] }
 0x8d4   : > { %16312 = vmatprep.mubr.msk.bf16.mxu0 %vm18556_vm1, %v23065_v40  ;;  %v17795_v17 = vld [vmem:[#allocation7 + $0x87c] ss:$24 sps:$4 sm:$0xff]  }
 0x8d5   : > { %v5616_v62 = vadd.f32 %v23320_v33, %v5511_v46  ;;  %v5514_v41 = vadd.f32 %v15156_v20, %v23321_v37  ;;  %v17793_v20 = vld [vmem:[#allocation7 + $0x878] ss:$24 sps:$4 sm:$0xff]   ;;  %v17796_v33 = vld [vmem:[%s22830_s4 + $0x50] sm:$0xff]   ;;  %v17803_v37 = vld [vmem:[#allocation7 + $0x8dc] ss:$24 sps:$4 sm:$0xff]  }
 0x8d7   : > { %v5619_v50 = vadd.f32 %v23322_v19, %v5514_v41  ;;  %v15157_v21 = vpop.f32.mrb[216].mxu0  ;;  %v23327_v41 = vld [vmem:[#allocation53_spill] sm:$0xff] }
 0x8d8   : > { %v15158_v28 = vpop.f32.mrb[217].mxu0  ;;  %v17801_v19 = vld [vmem:[#allocation7 + $0x8d8] ss:$24 sps:$4 sm:$0xff]  }
 0x8d9   : > { %v5644_v23 = vpack.c.bf16 %v5619_v50, %v5616_v62  ;;  %v15159_v63 = vadd.f32 %v15158_v28, %v15157_v21  ;;  %v15160_v32 = vpop.f32.mrb[218].mxu0  ;;  %v17800_v62 = vld [vmem:[#allocation7 + $0x8ac] ss:$24 sps:$4 sm:$0xff]   ;;  %v15196_v21 = vpop.f32.mrb[120].mxu1 }
 0x8da   : > { %v15161_v42 = vpop.f32.mrb[219].mxu0  ;;  %v17806_v50 = vld [vmem:[#allocation7 + $0x90c] ss:$24 sps:$4 sm:$0xff]   ;;  %v15197_v28 = vpop.f32.mrb[121].mxu1 }
 0x8db   : > { %v5519_v47 = vadd.f32 %v15159_v63, %v23323_v24  ;;  %v15162_v14 = vadd.f32 %v15161_v42, %v15160_v32  ;;  %16313 = vmatmul.mubr.msk.bf16.gmra.mrb[248].mxu0 %vm3035_vm5, %v5644_v23  ;;  %v20841_v23 = vadd.f32 %v15197_v28, %v15196_v21  ;;  %v15199_v63 = vpop.f32.mrb[122].mxu1  ;;  %v17804_v24 = vld [vmem:[#allocation7 + $0x908] ss:$24 sps:$4 sm:$0xff]  }
 0x8dc   : > { %16316 = vmatprep.mubr.msk.bf16.mxu0 %vm18556_vm1, %v23065_v40  ;;  %v15200_v32 = vpop.f32.mrb[123].mxu1 }
 0x8dd   : > { %v5624_v7 = vadd.f32 %v20659_v35, %v5519_v47  ;;  %v5522_v31 = vadd.f32 %v15162_v14, %v23324_v0  ;;  %v20843_v42 = vadd.f32 %v15200_v32, %v15199_v63  ;;  %v17809_v47 = vld [vmem:[#allocation7 + $0x93c] ss:$24 sps:$4 sm:$0xff]   ;;  %v15202_v14 = vpop.f32.mrb[124].mxu1  ;;  %v17816_v63 = vld [vmem:[#allocation7 + $0x9c8] ss:$24 sps:$4 sm:$0xff]  }
 0x8de   : > { %v17821_v32 = vld [vmem:[#allocation7 + $0x9fc] ss:$24 sps:$4 sm:$0xff]  }
 0x8df   : > { %v5627_v25 = vadd.f32 %v20663_v13, %v5522_v31  ;;  %v15163_v5 = vpop.f32.mrb[220].mxu0 }
 0x8e0   : > { %v15164_v15 = vpop.f32.mrb[221].mxu0 }
 0x8e1   : > { %v5645_v59 = vpack.c.bf16 %v5627_v25, %v5624_v7  ;;  %v15165_v8 = vadd.f32 %v15164_v15, %v15163_v5  ;;  %v15166_v18 = vpop.f32.mrb[222].mxu0  ;;  %v15203_v7 = vpop.f32.mrb[125].mxu1  ;;  %v17807_v15 = vld [vmem:[#allocation7 + $0x938] ss:$24 sps:$4 sm:$0xff]  }
 0x8e2   : > { %v15167_v2 = vpop.f32.mrb[223].mxu0  ;;  %v20845_v0 = vadd.f32 %v15203_v7, %v15202_v14  ;;  %v15205_v31 = vpop.f32.mrb[126].mxu1 }
 0x8e3   : > { %v5527_v61 = vadd.f32 %v15165_v8, %v23325_v29  ;;  %v15168_v44 = vadd.f32 %v15167_v2, %v15166_v18  ;;  %16317 = vmatmul.mubr.msk.bf16.gmra.mrb[252].mxu0 %vm3035_vm5, %v5645_v59  ;;  %v15206_v25 = vpop.f32.mrb[127].mxu1  ;;  %v17812_v59 = vld [vmem:[#allocation7 + $0x96c] ss:$24 sps:$4 sm:$0xff]  }
 0x8e4   : > { %16320 = vmatprep.mubr.msk.bf16.mxu0 %vm18556_vm1, %v23065_v40  ;;  %v20847_v5 = vadd.f32 %v15206_v25, %v15205_v31  ;;  %v15208_v8 = vpop.f32.mrb[128].mxu1 }
 0x8e5   : > { %v5632_v35 = vadd.f32 %v20674_v12, %v5527_v61  ;;  %v5530_v27 = vadd.f32 %v15168_v44, %v23326_v10  ;;  %v17797_v12 = vld [vmem:[%s22830_s4 + $0x58] sm:$0xff]   ;;  %v15209_v18 = vpop.f32.mrb[129].mxu1 }
 0x8e6   : > { %v20849_v2 = vadd.f32 %v15209_v18, %v15208_v8  ;;  %v15211_v29 = vpop.f32.mrb[130].mxu1  ;;  %v17815_v10 = vld [vmem:[#allocation7 + $0x99c] ss:$24 sps:$4 sm:$0xff]  }
 0x8e7   : > { %v5635_v13 = vadd.f32 %v20678_v53, %v5530_v27  ;;  %v17798_v53 = vld [vmem:[#allocation7 + $0x8a8] ss:$24 sps:$4 sm:$0xff]   ;;  %v15212_v61 = vpop.f32.mrb[131].mxu1 }
 0x8e8   : > { %v20851_v44 = vadd.f32 %v15212_v61, %v15211_v29  ;;  %v15214_v27 = vpop.f32.mrb[132].mxu1 }
 0x8e9   : > { %v5646_v46 = vpack.c.bf16 %v5635_v13, %v5632_v35  ;;  %v17810_v35 = vld [vmem:[#allocation7 + $0x968] ss:$24 sps:$4 sm:$0xff]   ;;  %v15215_v13 = vpop.f32.mrb[133].mxu1 }
 0x8eb   : > { %16321 = vmatmul.mubr.msk.bf16.gmra.mrb[0].mxu0 %vm3035_vm5, %v5646_v46  ;;  %v15217_v46 = vpop.f32.mrb[134].mxu1 }
 0x8ec   : > { %6294 = vmatprep.mubr.bf16.mxu0 %v17795_v17  ;;  %v20853_v17 = vadd.f32 %v15215_v13, %v15214_v27 }
 0x8f3   : > { %6295 = vmatmul.mubr.bf16.vlgmr.msra.gmra.mrb[4].mxu0 %v17793_v20  ;;  %v15218_v20 = vpop.f32.mrb[135].mxu1 }
 0x8f4   : > { %16325 = vmatpush3.bf16.msra.mxu0 %v17796_v33  ;;  %6302 = vmatprep.mubr.bf16.mxu0 %v17800_v62  ;;  %v20855_v33 = vadd.f32 %v15218_v20, %v15217_v46  ;;  %v17813_v62 = vld [vmem:[#allocation7 + $0x998] ss:$24 sps:$4 sm:$0xff]  }
 0x8f5   : > { %16326 = vmatprep.subr.bf16.mxu0 %v23065_v40 }
 0x8f8   : > { %16327 = vmatpush3.bf16.msra.mxu0 %v17797_v12  ;;  %v17818_v12 = vld [vmem:[#allocation7 + $0x9cc] ss:$24 sps:$4 sm:$0xff]  }
 0x8f9   : > { %15401 = vmatprep.subr.bf16.mxu0 %v23327_v41 }
 0x8fb   : > { %6303 = vmatmul.mubr.bf16.gmra.mrb[8].mxu0 %v17798_v53  ;;  %v15220_v53 = vpop.f32.mrb[136].mxu1 }
 0x8fc   : > { %6310 = vmatprep.mubr.bf16.mxu0 %v17803_v37  ;;  %v15221_v37 = vpop.f32.mrb[137].mxu1 }
 0x903   : > { %6311 = vmatmul.mubr.bf16.gmra.mrb[12].mxu0 %v17801_v19  ;;  %v20857_v19 = vadd.f32 %v15221_v37, %v15220_v53 }
 0x904   : > { %6318 = vmatprep.mubr.bf16.mxu0 %v17806_v50  ;;  %v15223_v50 = vpop.f32.mrb[138].mxu1 }
 0x905   : > { %v15224_v21 = vpop.f32.mrb[139].mxu1 }
 0x906   : > { %v20859_v28 = vadd.f32 %v15224_v21, %v15223_v50 }
 0x90b   : > { %6319 = vmatmul.mubr.bf16.gmra.mrb[16].mxu0 %v17804_v24  ;;  %v15226_v24 = vpop.f32.mrb[140].mxu1 }
 0x90c   : > { %6326 = vmatprep.mubr.bf16.mxu0 %v17809_v47  ;;  %v15227_v47 = vpop.f32.mrb[141].mxu1 }
 0x90d   : > { %v20861_v14 = vadd.f32 %v15227_v47, %v15226_v24  ;;  %v15229_v7 = vpop.f32.mrb[142].mxu1 }
 0x90e   : > { %v15230_v31 = vpop.f32.mrb[143].mxu1 }
 0x90f   : > { %v20863_v25 = vadd.f32 %v15230_v31, %v15229_v7 }
 0x913   : > { %6327 = vmatmul.mubr.bf16.gmra.mrb[20].mxu0 %v17807_v15  ;;  %v17819_v15 = vld [vmem:[#allocation7 + $0x9f8] ss:$24 sps:$4 sm:$0xff]  }
 0x914   : > { %6334 = vmatprep.mubr.bf16.mxu0 %v17812_v59  ;;  %v15232_v59 = vpop.f32.mrb[144].mxu1 }
 0x915   : > { %v15233_v8 = vpop.f32.mrb[145].mxu1 }
 0x916   : > { %v20865_v18 = vadd.f32 %v15233_v8, %v15232_v59  ;;  %v15235_v29 = vpop.f32.mrb[146].mxu1 }
 0x917   : > { %v15236_v61 = vpop.f32.mrb[147].mxu1 }
 0x918   : > { %23328 = vst [vmem:[#allocation39_spill] sm:$0xff] %v20865_v18 }
 0x91b   : > { %6335 = vmatmul.mubr.bf16.gmra.mrb[24].mxu0 %v17810_v35  ;;  %v20869_v35 = vadd.f32 %v15236_v61, %v15235_v29 }
 0x91c   : > { %6342 = vmatprep.mubr.bf16.mxu0 %v17815_v10  ;;  %v15238_v10 = vpop.f32.mrb[148].mxu1 }
 0x91d   : > { %23329 = vst [vmem:[#allocation46_spill] sm:$0xff] %v20869_v35  ;;  %v15239_v27 = vpop.f32.mrb[149].mxu1 }
 0x91e   : > { %v20871_v13 = vadd.f32 %v15239_v27, %v15238_v10  ;;  %v15241_v46 = vpop.f32.mrb[150].mxu1 }
 0x91f   : > { %v15242_v20 = vpop.f32.mrb[151].mxu1 }
 0x920   : > { %23330 = vst [vmem:[#allocation40_spill] sm:$0xff] %v20871_v13 }
 0x923   : > { %6343 = vmatmul.mubr.bf16.gmra.mrb[28].mxu0 %v17813_v62  ;;  %v20873_v62 = vadd.f32 %v15242_v20, %v15241_v46 }
 0x924   : > { %6350 = vmatprep.mubr.bf16.mxu0 %v17818_v12  ;;  %v15244_v12 = vpop.f32.mrb[152].mxu1 }
 0x925   : > { %23331 = vst [vmem:[#allocation47_spill] sm:$0xff] %v20873_v62  ;;  %v15245_v53 = vpop.f32.mrb[153].mxu1 }
 0x926   : > { %v20875_v37 = vadd.f32 %v15245_v53, %v15244_v12  ;;  %v15247_v50 = vpop.f32.mrb[154].mxu1 }
 0x927   : > { %v15248_v21 = vpop.f32.mrb[155].mxu1 }
 0x928   : > { %23332 = vst [vmem:[#allocation41_spill] sm:$0xff] %v20875_v37 }
 0x92b   : > { %6351 = vmatmul.mubr.bf16.gmra.mrb[32].mxu0 %v17816_v63  ;;  %v20877_v63 = vadd.f32 %v15248_v21, %v15247_v50 }
 0x92c   : > { %6358 = vmatprep.mubr.bf16.mxu0 %v17821_v32  ;;  %v20879_v32 = vpop.f32.mrb[156].mxu1 }
 0x92d   : > { %23333 = vst [vmem:[#allocation54_spill] sm:$0xff] %v20877_v63  ;;  %v6403_v24 = vpop.f32.mrb[157].mxu1 }
 0x92e   : > { %v20881_v47 = vpop.f32.mrb[158].mxu1 }
 0x92f   : > { %v6406_v7 = vpop.f32.mrb[159].mxu1 }
 0x930   : > { %v20883_v31 = vpop.f32.mrb[160].mxu1 }
 0x933   : > { %6359 = vmatmul.mubr.bf16.gmra.mrb[36].mxu0 %v17819_v15  ;;  %v6411_v15 = vpop.f32.mrb[161].mxu1 }
 0x934   : > { %16328 = vmatprep.mubr.msk.bf16.mxu0 %vm18556_vm1, %v23065_v40  ;;  %v20885_v59 = vpop.f32.mrb[162].mxu1 }
 0x935   : > { %v6414_v8 = vpop.f32.mrb[163].mxu1 }
 0x936   : > { %v20887_v29 = vpop.f32.mrb[164].mxu1 }
 0x937   : > { %v6419_v61 = vpop.f32.mrb[165].mxu1 }
 0x938   : > { %v20889_v10 = vpop.f32.mrb[166].mxu1 }
 0x939   : > { %v6422_v27 = vpop.f32.mrb[167].mxu1 }
 0x93a   : > { %v20891_v46 = vpop.f32.mrb[168].mxu1 }
 0x93b   : > { %v6427_v20 = vpop.f32.mrb[169].mxu1 }
 0x93c   : > { %v20893_v12 = vpop.f32.mrb[170].mxu1 }
 0x93d   : > { %v6430_v53 = vpop.f32.mrb[171].mxu1 }
 0x93e   : > { %v20895_v50 = vpop.f32.mrb[172].mxu1 }
 0x93f   : > { %v6435_v21 = vpop.f32.mrb[173].mxu1 }
 0x940   : > { %v20897_v24 = vpop.f32.mrb[174].mxu1 }
 0x941   : > { %v6438_v7 = vpop.f32.mrb[175].mxu1 }
 0x942   : > { %v20899_v15 = vpop.f32.mrb[176].mxu1 }
 0x943   : > { %v6443_v8 = vpop.f32.mrb[177].mxu1 }
 0x944   : > { %v20901_v52 = vpop.f32.mrb[178].mxu1 }
 0x945   : > { %v6446_v61 = vpop.f32.mrb[179].mxu1 }
 0x946   : > { %v20903_v41 = vpop.f32.mrb[180].mxu1 }
 0x947   : > { %23334 = vst [vmem:[#allocation84_spill] sm:$0xff] %v20903_v41  ;;  %v6451_v27 = vpop.f32.mrb[181].mxu1 }
 0x948   : > { %v20905_v63 = vpop.f32.mrb[182].mxu1 }
 0x949   : > { %23335 = vst [vmem:[#allocation48_spill] sm:$0xff] %v20905_v63  ;;  %v6454_v20 = vpop.f32.mrb[183].mxu1 }
 0x94a   : > { %v20913_v8 = vpop.f32.mrb[184].mxu1 }
 0x94b   : > { %v6459_v35 = vpop.f32.mrb[185].mxu1 }
 0x94c   : > { %v20915_v61 = vpop.f32.mrb[186].mxu1 }
 0x94d   : > { %23338 = vst [vmem:[#allocation70_spill] sm:$0xff] %v20915_v61  ;;  %v6462_v41 = vpop.f32.mrb[187].mxu1  ;;  %v23349_v61 = vld [vmem:[#allocation65_spill] sm:$0xff] }
 0x97e   : > { %v5725_v37 = vpop.f32.mrb[224].mxu0 }
 0x97f   : > { %v20908_v53 = vadd.f32 %v5725_v37, %v20652_v4  ;;  %v16290_v21 = vpop.f32.mrb[225].mxu0 }
 0x980   : > { %v5728_v62 = vpop.f32.mrb[226].mxu0  ;;  %v20923_v21 = vpop.f32.mrb[188].mxu1 }
 0x981   : > { %23336 = vst [vmem:[#allocation55_spill] sm:$0xff] %v20908_v53  ;;  %v20911_v7 = vadd.f32 %v5728_v62, %v20657_v30  ;;  %v16291_v13 = vpop.f32.mrb[227].mxu0  ;;  %23341 = vst [vmem:[#allocation87_spill] sm:$0xff] %v20923_v21  ;;  %v6467_v30 = vpop.f32.mrb[189].mxu1 }
 0x982   : > { %v20925_v13 = vpop.f32.mrb[190].mxu1  ;;  %v23348_v30 = vld [vmem:[#allocation80_spill] sm:$0xff] }
 0x983   : > { %23337 = vst [vmem:[#allocation71_spill] sm:$0xff] %v20911_v7  ;;  %23342 = vst [vmem:[#allocation86_spill] sm:$0xff] %v20925_v13  ;;  %v6470_v62 = vpop.f32.mrb[191].mxu1 }
 0x986   : > { %v5733_v27 = vpop.f32.mrb[228].mxu0 }
 0x987   : > { %v20918_v63 = vadd.f32 %v5733_v27, %v20667_v9  ;;  %v16294_v20 = vpop.f32.mrb[229].mxu0  ;;  %v23344_v9 = vld [vmem:[#allocation64_spill] sm:$0xff] }
 0x988   : > { %v5736_v18 = vpop.f32.mrb[230].mxu0 }
 0x989   : > { %23339 = vst [vmem:[#allocation49_spill] sm:$0xff] %v20918_v63  ;;  %v20921_v4 = vadd.f32 %v5736_v18, %v20672_v54  ;;  %v16295_v37 = vpop.f32.mrb[231].mxu0  ;;  %v23346_v54 = vld [vmem:[#allocation81_spill] sm:$0xff] }
 0x98b   : > { %23340 = vst [vmem:[#allocation85_spill] sm:$0xff] %v20921_v4 }
 0x98e   : > { %v5741_v35 = vpop.f32.mrb[232].mxu0 }
 0x98f   : > { %v20928_v7 = vadd.f32 %v5741_v35, %v20682_v39  ;;  %v16298_v41 = vpop.f32.mrb[233].mxu0 }
 0x990   : > { %v5744_v53 = vpop.f32.mrb[234].mxu0 }
 0x991   : > { %23343 = vst [vmem:[#allocation73_spill] sm:$0xff] %v20928_v7  ;;  %v20931_v27 = vadd.f32 %v5744_v53, %v23344_v9  ;;  %v16299_v20 = vpop.f32.mrb[235].mxu0  ;;  %v23351_v7 = vld [vmem:[#allocation83_spill] sm:$0xff] }
 0x993   : > { %23345 = vst [vmem:[#allocation72_spill] sm:$0xff] %v20931_v27  ;;  %v23352_v27 = vld [vmem:[#allocation36_spill] sm:$0xff] }
 0x996   : > { %v5749_v63 = vpop.f32.mrb[236].mxu0 }
 0x997   : > { %v20934_v18 = vadd.f32 %v5749_v63, %v23346_v54  ;;  %v16302_v37 = vpop.f32.mrb[237].mxu0 }
 0x998   : > { %v5752_v4 = vpop.f32.mrb[238].mxu0 }
 0x999   : > { %23347 = vst [vmem:[#allocation75_spill] sm:$0xff] %v20934_v18  ;;  %v20937_v21 = vadd.f32 %v5752_v4, %v23348_v30  ;;  %v16303_v62 = vpop.f32.mrb[239].mxu0  ;;  %v23353_v18 = vld [vmem:[#allocation44_spill] sm:$0xff] }
 0x99e   : > { %v5757_v13 = vpop.f32.mrb[240].mxu0 }
 0x99f   : > { %v20940_v39 = vadd.f32 %v5757_v13, %v23349_v61  ;;  %v16306_v35 = vpop.f32.mrb[241].mxu0 }
 0x9a0   : > { %v5760_v41 = vpop.f32.mrb[242].mxu0 }
 0x9a1   : > { %23350 = vst [vmem:[#allocation74_spill] sm:$0xff] %v20940_v39  ;;  %v20943_v53 = vadd.f32 %v5760_v41, %v23351_v7  ;;  %v16307_v9 = vpop.f32.mrb[243].mxu0  ;;  %v23354_v39 = vld [vmem:[#allocation45_spill] sm:$0xff] }
 0x9a6   : > { %v5765_v20 = vpop.f32.mrb[244].mxu0 }
 0x9a7   : > { %v20946_v63 = vadd.f32 %v5765_v20, %v23352_v27  ;;  %v16310_v54 = vpop.f32.mrb[245].mxu0 }
 0x9a8   : > { %v5768_v37 = vpop.f32.mrb[246].mxu0 }
 0x9a9   : > { %v20949_v4 = vadd.f32 %v5768_v37, %v23353_v18  ;;  %v16311_v30 = vpop.f32.mrb[247].mxu0 }
 0x9ae   : > { %v5773_v62 = vpop.f32.mrb[248].mxu0 }
 0x9af   : > { %v20952_v61 = vadd.f32 %v5773_v62, %v20716_v1  ;;  %v16314_v13 = vpop.f32.mrb[249].mxu0 }
 0x9b0   : > { %v5776_v35 = vpop.f32.mrb[250].mxu0 }
 0x9b1   : > { %v20955_v7 = vadd.f32 %v5776_v35, %v23354_v39  ;;  %v16315_v41 = vpop.f32.mrb[251].mxu0 }
 0x9b3   : > { %23355 = vst [vmem:[#allocation59_spill] sm:$0xff] %v20955_v7 }
 0x9b6   : > { %v5781_v9 = vpop.f32.mrb[252].mxu0 }
 0x9b7   : > { %v20958_v27 = vadd.f32 %v5781_v9, %v20723_v43  ;;  %v16318_v20 = vpop.f32.mrb[253].mxu0 }
 0x9b8   : > { %v5784_v54 = vpop.f32.mrb[254].mxu0 }
 0x9b9   : > { %23356 = vst [vmem:[#allocation60_spill] sm:$0xff] %v20958_v27  ;;  %v20961_v18 = vadd.f32 %v5784_v54, %v20726_v55  ;;  %v16319_v37 = vpop.f32.mrb[255].mxu0 }
 0x9be   : > { %v5789_v30 = vpop.f32.mrb[0].mxu0 }
 0x9bf   : > { %v20964_v1 = vadd.f32 %v5789_v30, %v20729_v48  ;;  %v16322_v62 = vpop.f32.mrb[1].mxu0 }
 0x9c0   : > { %v5792_v13 = vpop.f32.mrb[2].mxu0 }
 0x9c1   : > { %23357 = vst [vmem:[#allocation67_spill] sm:$0xff] %v20964_v1  ;;  %v20967_v39 = vadd.f32 %v5792_v13, %v20732_v45  ;;  %v16323_v35 = vpop.f32.mrb[3].mxu0 }
 0x9c3   : > { %23358 = vst [vmem:[#allocation77_spill] sm:$0xff] %v20967_v39 }
 0x9c6   : > { %v15266_v41 = vpop.f32.mrb[4].mxu0 }
 0x9c7   : > { %v15267_v7 = vpop.f32.mrb[5].mxu0 }
 0x9c8   : > { %v15268_v43 = vadd.f32 %v15267_v7, %v15266_v41  ;;  %v15269_v9 = vpop.f32.mrb[6].mxu0 }
 0x9c9   : > { %v15270_v20 = vpop.f32.mrb[7].mxu0 }
 0x9ca   : > { %v6297_v27 = vadd.f32 %v15268_v43, %v20841_v23  ;;  %v15271_v55 = vadd.f32 %v15270_v20, %v15269_v9 }
 0x9cc   : > { %v6402_v54 = vadd.f32 %v20879_v32, %v6297_v27  ;;  %v6300_v37 = vadd.f32 %v15271_v55, %v20843_v42 }
 0x9ce   : > { %v6405_v48 = vadd.f32 %v20881_v47, %v6300_v37  ;;  %v15272_v30 = vpop.f32.mrb[8].mxu0 }
 0x9cf   : > { %v15273_v62 = vpop.f32.mrb[9].mxu0 }
 0x9d0   : > { %v6472_v1 = vpack.c.bf16 %v6405_v48, %v6402_v54  ;;  %v15274_v45 = vadd.f32 %v15273_v62, %v15272_v30  ;;  %v15275_v13 = vpop.f32.mrb[10].mxu0 }
 0x9d1   : > { %v15276_v35 = vpop.f32.mrb[11].mxu0 }
 0x9d2   : > { %v6305_v39 = vadd.f32 %v15274_v45, %v20845_v0  ;;  %v15277_v7 = vadd.f32 %v15276_v35, %v15275_v13  ;;  %16329 = vmatmul.mubr.msk.bf16.vlgmr.msra.gmra.mrb[40].mxu0 %vm3035_vm5, %v6472_v1 }
 0x9d3   : > { %15402 = vmatpush3.bf16.msra.mxu0 %v19237_v36  ;;  %16332 = vmatprep.mubr.msk.bf16.mxu0 %vm18556_vm1, %v23065_v40 }
 0x9d4   : > { %v6410_v23 = vadd.f32 %v20883_v31, %v6305_v39  ;;  %v6308_v42 = vadd.f32 %v15277_v7, %v20847_v5  ;;  %15403 = vmatprep.subr.bf16.mxu0 %v19278_v58 }
 0x9d6   : > { %v6413_v32 = vadd.f32 %v20885_v59, %v6308_v42  ;;  %v15278_v47 = vpop.f32.mrb[12].mxu0 }
 0x9d7   : > { %15404 = vmatpush3.bf16.msra.mxu0 %v19244_v51  ;;  %v15279_v0 = vpop.f32.mrb[13].mxu0 }
 0x9d8   : > { %v6473_v27 = vpack.c.bf16 %v6413_v32, %v6410_v23  ;;  %v15280_v41 = vadd.f32 %v15279_v0, %v15278_v47  ;;  %15405 = vmatprep.subr.bf16.mxu0 %v19284_v11  ;;  %v15281_v1 = vpop.f32.mrb[14].mxu0 }
 0x9d9   : > { %v15282_v43 = vpop.f32.mrb[15].mxu0 }
 0x9da   : > { %v6313_v9 = vadd.f32 %v15280_v41, %v20849_v2  ;;  %v15283_v20 = vadd.f32 %v15282_v43, %v15281_v1  ;;  %16333 = vmatmul.mubr.msk.bf16.gmra.mrb[44].mxu0 %vm3035_vm5, %v6473_v27 }
 0x9db   : > { %15406 = vmatpush3.bf16.msra.mxu0 %v19248_v3  ;;  %16336 = vmatprep.mubr.msk.bf16.mxu0 %vm18556_vm1, %v23065_v40 }
 0x9dc   : > { %v6418_v5 = vadd.f32 %v20887_v29, %v6313_v9  ;;  %v6316_v31 = vadd.f32 %v15283_v20, %v20851_v44  ;;  %15407 = vmatprep.subr.bf16.mxu0 %v23086_v6 }
 0x9de   : > { %v6421_v59 = vadd.f32 %v20889_v10, %v6316_v31  ;;  %v15284_v39 = vpop.f32.mrb[16].mxu0 }
 0x9df   : > { %15408 = vmatpush3.bf16.msra.mxu0 %v23089_v57  ;;  %v15285_v2 = vpop.f32.mrb[17].mxu0 }
 0x9e0   : > { %v6474_v55 = vpack.c.bf16 %v6421_v59, %v6418_v5  ;;  %v15286_v54 = vadd.f32 %v15285_v2, %v15284_v39  ;;  %15409 = vmatprep.subr.bf16.mxu0 %v23091_v22  ;;  %v15287_v37 = vpop.f32.mrb[18].mxu0 }
 0x9e1   : > { %v15288_v48 = vpop.f32.mrb[19].mxu0 }
 0x9e2   : > { %v6321_v30 = vadd.f32 %v15286_v54, %v20853_v17  ;;  %v15289_v62 = vadd.f32 %v15288_v48, %v15287_v37  ;;  %16337 = vmatmul.mubr.msk.bf16.gmra.mrb[48].mxu0 %vm3035_vm5, %v6474_v55  ;;  %v23359_v55 = vld [vmem:[#allocation39_spill] sm:$0xff]  ;;  %v23360_v37 = vld [vmem:[#allocation84_spill] sm:$0xff]  ;;  %v23361_v48 = vld [vmem:[#allocation46_spill] sm:$0xff] }
 0x9e3   : > { %15410 = vmatpush3.bf16.msra.mxu0 %v23096_v16  ;;  %16340 = vmatprep.mubr.msk.bf16.mxu0 %vm18556_vm1, %v23065_v40 }
 0x9e4   : > { %v6426_v44 = vadd.f32 %v20891_v46, %v6321_v30  ;;  %v6324_v29 = vadd.f32 %v15289_v62, %v20855_v33  ;;  %15411 = vmatprep.subr.bf16.mxu0 %v23305_v34  ;;  %v23362_v30 = vld [vmem:[#allocation48_spill] sm:$0xff] }
 0x9e6   : > { %v6429_v10 = vadd.f32 %v20893_v12, %v6324_v29  ;;  %v15290_v45 = vpop.f32.mrb[20].mxu0 }
 0x9e7   : > { %15412 = vmatpush3.bf16.msra.mxu0 %v23307_v38  ;;  %v15291_v17 = vpop.f32.mrb[21].mxu0 }
 0x9e8   : > { %v6475_v13 = vpack.c.bf16 %v6429_v10, %v6426_v44  ;;  %v15292_v35 = vadd.f32 %v15291_v17, %v15290_v45  ;;  %15413 = vmatprep.subr.bf16.mxu0 %v23309_v26  ;;  %v15293_v7 = vpop.f32.mrb[22].mxu0 }
 0x9e9   : > { %v15294_v23 = vpop.f32.mrb[23].mxu0 }
 0x9ea   : > { %v6329_v42 = vadd.f32 %v15292_v35, %v20857_v19  ;;  %v15295_v32 = vadd.f32 %v15294_v23, %v15293_v7  ;;  %16341 = vmatmul.mubr.msk.bf16.gmra.mrb[52].mxu0 %vm3035_vm5, %v6475_v13  ;;  %v23363_v13 = vld [vmem:[#allocation40_spill] sm:$0xff] }
 0x9eb   : > { %15414 = vmatpush3.bf16.msra.mxu0 %v23311_v60  ;;  %16344 = vmatprep.mubr.msk.bf16.mxu0 %vm18556_vm1, %v23065_v40 }
 0x9ec   : > { %v6434_v33 = vadd.f32 %v20895_v50, %v6329_v42  ;;  %v6332_v46 = vadd.f32 %v15295_v32, %v20859_v28  ;;  %15415 = vmatprep.subr.bf16.mxu0 %v23315_v56  ;;  %v23364_v42 = vld [vmem:[#allocation47_spill] sm:$0xff] }
 0x9ee   : > { %v6437_v12 = vadd.f32 %v20897_v24, %v6332_v46  ;;  %v15296_v47 = vpop.f32.mrb[24].mxu0 }
 0x9ef   : > { %15416 = vmatpush3.bf16.msra.mxu0 %v23316_v49  ;;  %v15297_v19 = vpop.f32.mrb[25].mxu0 }
 0x9f0   : > { %v6476_v0 = vpack.c.bf16 %v6437_v12, %v6434_v33  ;;  %v15298_v27 = vadd.f32 %v15297_v19, %v15296_v47  ;;  %v15299_v41 = vpop.f32.mrb[26].mxu0  ;;  %16364 = vmatprep.subr.bf16.mxu0 %v23065_v40  ;;  %v23365_v33 = vld [vmem:[#allocation70_spill] sm:$0xff] }
 0x9f1   : > { %v15300_v1 = vpop.f32.mrb[27].mxu0 }
 0x9f2   : > { %v6337_v43 = vadd.f32 %v15298_v27, %v20861_v14  ;;  %v15301_v9 = vadd.f32 %v15300_v1, %v15299_v41  ;;  %16345 = vmatmul.mubr.msk.bf16.gmra.mrb[56].mxu0 %vm3035_vm5, %v6476_v0  ;;  %v23366_v1 = vld [vmem:[#allocation41_spill] sm:$0xff] }
 0x9f3   : > { %16348 = vmatprep.mubr.msk.bf16.mxu0 %vm18556_vm1, %v23065_v40 }
 0x9f4   : > { %v6442_v28 = vadd.f32 %v20899_v15, %v6337_v43  ;;  %v6340_v50 = vadd.f32 %v15301_v9, %v20863_v25 }
 0x9f6   : > { %v6445_v24 = vadd.f32 %v20901_v52, %v6340_v50  ;;  %v15302_v20 = vpop.f32.mrb[28].mxu0  ;;  %v23368_v50 = vld [vmem:[#allocation54_spill] sm:$0xff] }
 0x9f7   : > { %v15303_v5 = vpop.f32.mrb[29].mxu0 }
 0x9f8   : > { %v6477_v31 = vpack.c.bf16 %v6445_v24, %v6442_v28  ;;  %v15304_v59 = vadd.f32 %v15303_v5, %v15302_v20  ;;  %v15305_v39 = vpop.f32.mrb[30].mxu0  ;;  %v23367_v28 = vld [vmem:[#allocation87_spill] sm:$0xff]  ;;  %v23369_v20 = vld [vmem:[#allocation86_spill] sm:$0xff] }
 0x9f9   : > { %v15306_v2 = vpop.f32.mrb[31].mxu0 }
 0x9fa   : > { %v6345_v14 = vadd.f32 %v15304_v59, %v23359_v55  ;;  %v15307_v54 = vadd.f32 %v15306_v2, %v15305_v39  ;;  %16349 = vmatmul.mubr.msk.bf16.gmra.mrb[60].mxu0 %vm3035_vm5, %v6477_v31  ;;  %v17824_v31 = vld [vmem:[#allocation7 + $0xa2c] ss:$24 sps:$4 sm:$0xff]   ;;  %v17822_v39 = vld [vmem:[#allocation7 + $0xa28] ss:$24 sps:$4 sm:$0xff]   ;;  %v17825_v2 = vld [vmem:[%s22830_s4 + $0x60] sm:$0xff]  }
 0x9fb   : > { %16352 = vmatprep.mubr.msk.bf16.mxu0 %vm18556_vm1, %v23065_v40  ;;  %v17829_v55 = vld [vmem:[#allocation7 + $0xa5c] ss:$24 sps:$4 sm:$0xff]  }
 0x9fc   : > { %v6450_v15 = vadd.f32 %v23360_v37, %v6345_v14  ;;  %v6348_v25 = vadd.f32 %v15307_v54, %v23361_v48  ;;  %v17826_v14 = vld [vmem:[%s22830_s4 + $0x68] sm:$0xff]   ;;  %v17827_v54 = vld [vmem:[#allocation7 + $0xa58] ss:$24 sps:$4 sm:$0xff]  }
 0x9fd   : > { %v17832_v37 = vld [vmem:[#allocation7 + $0xa8c] ss:$24 sps:$4 sm:$0xff]   ;;  %v17830_v48 = vld [vmem:[#allocation7 + $0xa88] ss:$24 sps:$4 sm:$0xff]  }
 0x9fe   : > { %v6453_v52 = vadd.f32 %v23362_v30, %v6348_v25  ;;  %v15308_v62 = vpop.f32.mrb[32].mxu0  ;;  %v17835_v25 = vld [vmem:[#allocation7 + $0xabc] ss:$24 sps:$4 sm:$0xff]   ;;  %v15347_v30 = vpop.f32.mrb[192].mxu1 }
 0x9ff   : > { %v15309_v44 = vpop.f32.mrb[33].mxu0 }
 0xa00   : > { %v6478_v29 = vpack.c.bf16 %v6453_v52, %v6450_v15  ;;  %v15310_v10 = vadd.f32 %v15309_v44, %v15308_v62  ;;  %v15311_v45 = vpop.f32.mrb[34].mxu0  ;;  %v23370_v15 = vld [vmem:[#allocation53_spill] sm:$0xff]  ;;  %v15348_v52 = vpop.f32.mrb[193].mxu1 }
 0xa01   : > { %v15312_v17 = vpop.f32.mrb[35].mxu0  ;;  %v21054_v62 = vadd.f32 %v15348_v52, %v15347_v30  ;;  %v15350_v44 = vpop.f32.mrb[194].mxu1 }
 0xa02   : > { %v6353_v35 = vadd.f32 %v15310_v10, %v23363_v13  ;;  %v15313_v7 = vadd.f32 %v15312_v17, %v15311_v45  ;;  %16353 = vmatmul.mubr.msk.bf16.gmra.mrb[64].mxu0 %vm3035_vm5, %v6478_v29  ;;  %v15351_v29 = vpop.f32.mrb[195].mxu1  ;;  %v17833_v45 = vld [vmem:[#allocation7 + $0xab8] ss:$24 sps:$4 sm:$0xff]   ;;  %v17838_v17 = vld [vmem:[#allocation7 + $0xaec] ss:$24 sps:$4 sm:$0xff]  }
 0xa03   : > { %16356 = vmatprep.mubr.msk.bf16.mxu0 %vm18556_vm1, %v23065_v40  ;;  %v21056_v10 = vadd.f32 %v15351_v29, %v15350_v44  ;;  %v15353_v13 = vpop.f32.mrb[196].mxu1 }
 0xa04   : > { %v6458_v23 = vadd.f32 %v20913_v8, %v6353_v35  ;;  %v6356_v32 = vadd.f32 %v15313_v7, %v23364_v42  ;;  %v15354_v35 = vpop.f32.mrb[197].mxu1 }
 0xa05   : > { %v21058_v7 = vadd.f32 %v15354_v35, %v15353_v13 }
 0xa06   : > { %v6461_v46 = vadd.f32 %v23365_v33, %v6356_v32  ;;  %v15314_v12 = vpop.f32.mrb[36].mxu0  ;;  %v17836_v33 = vld [vmem:[#allocation7 + $0xae8] ss:$24 sps:$4 sm:$0xff]  }
 0xa07   : > { %v15315_v47 = vpop.f32.mrb[37].mxu0 }
 0xa08   : > { %v6479_v19 = vpack.c.bf16 %v6461_v46, %v6458_v23  ;;  %v15316_v0 = vadd.f32 %v15315_v47, %v15314_v12  ;;  %v15317_v27 = vpop.f32.mrb[38].mxu0  ;;  %v15356_v23 = vpop.f32.mrb[198].mxu1  ;;  %v17841_v46 = vld [vmem:[#allocation7 + $0xb1c] ss:$24 sps:$4 sm:$0xff]  }
 0xa09   : > { %v15318_v41 = vpop.f32.mrb[39].mxu0  ;;  %v15357_v42 = vpop.f32.mrb[199].mxu1 }
 0xa0a   : > { %v6361_v43 = vadd.f32 %v15316_v0, %v23366_v1  ;;  %v15319_v9 = vadd.f32 %v15318_v41, %v15317_v27  ;;  %16357 = vmatmul.mubr.msk.bf16.gmra.mrb[68].mxu0 %vm3035_vm5, %v6479_v19  ;;  %v21060_v32 = vadd.f32 %v15357_v42, %v15356_v23  ;;  %v15359_v12 = vpop.f32.mrb[200].mxu1  ;;  %v17839_v1 = vld [vmem:[#allocation7 + $0xb18] ss:$24 sps:$4 sm:$0xff]  }
 0xa0b   : > { %16360 = vmatprep.mubr.msk.bf16.mxu0 %vm18556_vm1, %v23065_v40  ;;  %v15360_v47 = vpop.f32.mrb[201].mxu1 }
 0xa0c   : > { %v6466_v8 = vadd.f32 %v23367_v28, %v6361_v43  ;;  %v6364_v24 = vadd.f32 %v15319_v9, %v23368_v50  ;;  %v21062_v19 = vadd.f32 %v15360_v47, %v15359_v12  ;;  %v15362_v0 = vpop.f32.mrb[202].mxu1  ;;  %v17844_v43 = vld [vmem:[#allocation7 + $0xb4c] ss:$24 sps:$4 sm:$0xff]  }
 0xa0d   : > { %v15363_v27 = vpop.f32.mrb[203].mxu1 }
 0xa0e   : > { %v6469_v5 = vadd.f32 %v23369_v20, %v6364_v24  ;;  %v21064_v41 = vadd.f32 %v15363_v27, %v15362_v0  ;;  %v15365_v9 = vpop.f32.mrb[204].mxu1 }
 0xa0f   : > { %v15366_v28 = vpop.f32.mrb[205].mxu1 }
 0xa10   : > { %v6480_v59 = vpack.c.bf16 %v6469_v5, %v6466_v8  ;;  %v21066_v8 = vadd.f32 %v15366_v28, %v15365_v9  ;;  %v15368_v50 = vpop.f32.mrb[206].mxu1  ;;  %v17842_v5 = vld [vmem:[#allocation7 + $0xb48] ss:$24 sps:$4 sm:$0xff]  }
 0xa11   : > { %v15369_v24 = vpop.f32.mrb[207].mxu1 }
 0xa12   : > { %16361 = vmatmul.mubr.msk.bf16.gmra.mrb[72].mxu0 %vm3035_vm5, %v6480_v59  ;;  %v21068_v20 = vadd.f32 %v15369_v24, %v15368_v50  ;;  %v15371_v59 = vpop.f32.mrb[208].mxu1 }
 0xa13   : > { %7128 = vmatprep.mubr.bf16.mxu0 %v17824_v31  ;;  %v17847_v31 = vld [vmem:[#allocation7 + $0xb7c] ss:$24 sps:$4 sm:$0xff]  }
 0xa1a   : > { %7129 = vmatmul.mubr.bf16.vlgmr.msra.gmra.mrb[76].mxu0 %v17822_v39  ;;  %v15372_v39 = vpop.f32.mrb[209].mxu1 }
 0xa1b   : > { %16365 = vmatpush3.bf16.msra.mxu0 %v17825_v2  ;;  %7136 = vmatprep.mubr.bf16.mxu0 %v17829_v55  ;;  %v15374_v2 = vpop.f32.mrb[210].mxu1 }
 0xa1c   : > { %16366 = vmatprep.subr.bf16.mxu0 %v23065_v40  ;;  %v15375_v55 = vpop.f32.mrb[211].mxu1 }
 0xa1f   : > { %16367 = vmatpush3.bf16.msra.mxu0 %v17826_v14  ;;  %v21070_v14 = vadd.f32 %v15372_v39, %v15371_v59 }
 0xa20   : > { %15552 = vmatprep.subr.bf16.mxu0 %v23370_v15 }
 0xa22   : > { %7137 = vmatmul.mubr.bf16.gmra.mrb[80].mxu0 %v17827_v54  ;;  %v21072_v54 = vadd.f32 %v15375_v55, %v15374_v2 }
 0xa23   : > { %7144 = vmatprep.mubr.bf16.mxu0 %v17832_v37  ;;  %v17845_v37 = vld [vmem:[#allocation7 + $0xb78] ss:$24 sps:$4 sm:$0xff]  }
 0xa2a   : > { %7145 = vmatmul.mubr.bf16.gmra.mrb[84].mxu0 %v17830_v48  ;;  %v17850_v48 = vld [vmem:[#allocation7 + $0xbac] ss:$24 sps:$4 sm:$0xff]  }
 0xa2b   : > { %7152 = vmatprep.mubr.bf16.mxu0 %v17835_v25  ;;  %v15377_v25 = vpop.f32.mrb[212].mxu1 }
 0xa2c   : > { %v15378_v30 = vpop.f32.mrb[213].mxu1 }
 0xa2d   : > { %v21074_v52 = vadd.f32 %v15378_v30, %v15377_v25  ;;  %v15380_v44 = vpop.f32.mrb[214].mxu1 }
 0xa2e   : > { %v15381_v29 = vpop.f32.mrb[215].mxu1 }
 0xa2f   : > { %v15383_v13 = vpop.f32.mrb[216].mxu1 }
 0xa30   : > { %v15384_v35 = vpop.f32.mrb[217].mxu1 }
 0xa31   : > { %v21078_v23 = vadd.f32 %v15384_v35, %v15383_v13  ;;  %v15386_v42 = vpop.f32.mrb[218].mxu1 }
 0xa32   : > { %7153 = vmatmul.mubr.bf16.gmra.mrb[88].mxu0 %v17833_v45  ;;  %v21076_v45 = vadd.f32 %v15381_v29, %v15380_v44 }
 0xa33   : > { %7160 = vmatprep.mubr.bf16.mxu0 %v17838_v17  ;;  %v17848_v17 = vld [vmem:[#allocation7 + $0xba8] ss:$24 sps:$4 sm:$0xff]   ;;  %23371 = vst [vmem:[#allocation56_spill] sm:$0xff] %v21078_v23 }
 0xa3a   : > { %7161 = vmatmul.mubr.bf16.gmra.mrb[92].mxu0 %v17836_v33  ;;  %v15387_v33 = vpop.f32.mrb[219].mxu1 }
 0xa3b   : > { %7168 = vmatprep.mubr.bf16.mxu0 %v17841_v46  ;;  %v21080_v46 = vadd.f32 %v15387_v33, %v15386_v42  ;;  %v15389_v12 = vpop.f32.mrb[220].mxu1 }
 0xa3c   : > { %v15390_v47 = vpop.f32.mrb[221].mxu1 }
 0xa3d   : > { %23372 = vst [vmem:[#allocation78_spill] sm:$0xff] %v21080_v46  ;;  %v21084_v0 = vadd.f32 %v15390_v47, %v15389_v12  ;;  %v15392_v27 = vpop.f32.mrb[222].mxu1 }
 0xa3f   : > { %23373 = vst [vmem:[#allocation50_spill] sm:$0xff] %v21084_v0 }
 0xa42   : > { %7169 = vmatmul.mubr.bf16.gmra.mrb[96].mxu0 %v17839_v1  ;;  %v15393_v1 = vpop.f32.mrb[223].mxu1 }
 0xa43   : > { %7176 = vmatprep.mubr.bf16.mxu0 %v17844_v43  ;;  %v21086_v43 = vadd.f32 %v15393_v1, %v15392_v27  ;;  %v15395_v9 = vpop.f32.mrb[224].mxu1 }
 0xa44   : > { %v15396_v28 = vpop.f32.mrb[225].mxu1 }
 0xa45   : > { %23374 = vst [vmem:[#allocation68_spill] sm:$0xff] %v21086_v43  ;;  %v21088_v50 = vadd.f32 %v15396_v28, %v15395_v9  ;;  %v15398_v24 = vpop.f32.mrb[226].mxu1 }
 0xa47   : > { %23375 = vst [vmem:[#allocation57_spill] sm:$0xff] %v21088_v50  ;;  %v23382_v50 = vld [vmem:[#allocation71_spill] sm:$0xff] }
 0xa4a   : > { %7177 = vmatmul.mubr.bf16.gmra.mrb[100].mxu0 %v17842_v5  ;;  %v15399_v5 = vpop.f32.mrb[227].mxu1 }
 0xa4b   : > { %7184 = vmatprep.mubr.bf16.mxu0 %v17847_v31  ;;  %v21090_v31 = vadd.f32 %v15399_v5, %v15398_v24  ;;  %v21092_v59 = vpop.f32.mrb[228].mxu1 }
 0xa4c   : > { %v7237_v39 = vpop.f32.mrb[229].mxu1 }
 0xa4d   : > { %23376 = vst [vmem:[#allocation76_spill] sm:$0xff] %v21090_v31  ;;  %v21094_v2 = vpop.f32.mrb[230].mxu1 }
 0xa4e   : > { %v7240_v55 = vpop.f32.mrb[231].mxu1 }
 0xa52   : > { %7185 = vmatmul.mubr.bf16.gmra.mrb[104].mxu0 %v17845_v37  ;;  %v21096_v37 = vpop.f32.mrb[232].mxu1 }
 0xa53   : > { %7192 = vmatprep.mubr.bf16.mxu0 %v17850_v48  ;;  %v7245_v48 = vpop.f32.mrb[233].mxu1 }
 0xa54   : > { %v21098_v25 = vpop.f32.mrb[234].mxu1 }
 0xa55   : > { %v7248_v30 = vpop.f32.mrb[235].mxu1 }
 0xa56   : > { %v21100_v44 = vpop.f32.mrb[236].mxu1 }
 0xa57   : > { %v7253_v29 = vpop.f32.mrb[237].mxu1 }
 0xa5a   : > { %7193 = vmatmul.mubr.bf16.gmra.mrb[108].mxu0 %v17848_v17  ;;  %v21102_v17 = vpop.f32.mrb[238].mxu1 }
 0xa5b   : > { %16368 = vmatprep.mubr.msk.bf16.mxu0 %vm18556_vm1, %v23065_v40  ;;  %v7256_v13 = vpop.f32.mrb[239].mxu1 }
 0xa5c   : > { %v21104_v35 = vpop.f32.mrb[240].mxu1 }
 0xa5d   : > { %v7261_v42 = vpop.f32.mrb[241].mxu1 }
 0xa5e   : > { %v21106_v33 = vpop.f32.mrb[242].mxu1 }
 0xa5f   : > { %v7264_v12 = vpop.f32.mrb[243].mxu1 }
 0xa60   : > { %v21108_v47 = vpop.f32.mrb[244].mxu1  ;;  %v23379_v12 = vld [vmem:[#allocation55_spill] sm:$0xff] }
 0xa61   : > { %v7269_v27 = vpop.f32.mrb[245].mxu1 }
 0xa62   : > { %v21110_v1 = vpop.f32.mrb[246].mxu1 }
 0xa63   : > { %v7272_v9 = vpop.f32.mrb[247].mxu1 }
 0xa64   : > { %v21112_v28 = vpop.f32.mrb[248].mxu1 }
 0xa65   : > { %v7277_v24 = vpop.f32.mrb[249].mxu1 }
 0xa66   : > { %v21114_v5 = vpop.f32.mrb[250].mxu1 }
 0xa67   : > { %v7280_v39 = vpop.f32.mrb[251].mxu1 }
 0xa68   : > { %v21116_v55 = vpop.f32.mrb[252].mxu1 }
 0xa69   : > { %23377 = vst [vmem:[#allocation51_spill] sm:$0xff] %v21116_v55  ;;  %v7285_v48 = vpop.f32.mrb[253].mxu1 }
 0xa6a   : > { %v21118_v30 = vpop.f32.mrb[254].mxu1 }
 0xa6b   : > { %23378 = vst [vmem:[#allocation69_spill] sm:$0xff] %v21118_v30  ;;  %v7288_v29 = vpop.f32.mrb[255].mxu1  ;;  %v23385_v30 = vld [vmem:[#allocation49_spill] sm:$0xff] }
 0xa6c   : > { %v21123_v9 = vpop.f32.mrb[0].mxu1 }
 0xa6d   : > { %23381 = vst [vmem:[#allocation82_spill] sm:$0xff] %v21123_v9  ;;  %v7293_v43 = vpop.f32.mrb[1].mxu1 }
 0xa6e   : > { %v21128_v39 = vpop.f32.mrb[2].mxu1 }
 0xa6f   : > { %23384 = vst [vmem:[#allocation52_spill] sm:$0xff] %v21128_v39  ;;  %v7296_v0 = vpop.f32.mrb[3].mxu1 }
 0xaa5   : > { %v6559_v13 = vpop.f32.mrb[40].mxu0 }
 0xaa6   : > { %v16330_v42 = vpop.f32.mrb[41].mxu0  ;;  %v21121_v15 = vadd.f32 %v6559_v13, %v23379_v12  ;;  %v21133_v13 = vpop.f32.mrb[4].mxu1  ;;  %v23388_v12 = vld [vmem:[#allocation85_spill] sm:$0xff] }
 0xaa7   : > { %v6562_v27 = vpop.f32.mrb[42].mxu0  ;;  %23387 = vst [vmem:[#allocation61_spill] sm:$0xff] %v21133_v13  ;;  %v23392_v13 = vld [vmem:[#allocation75_spill] sm:$0xff] }
 0xaa8   : > { %23380 = vst [vmem:[#allocation88_spill] sm:$0xff] %v21121_v15  ;;  %v16331_v31 = vpop.f32.mrb[43].mxu0  ;;  %v21126_v24 = vadd.f32 %v6562_v27, %v23382_v50  ;;  %v7301_v15 = vpop.f32.mrb[5].mxu1 }
 0xaa9   : > { %v21138_v9 = vpop.f32.mrb[6].mxu1 }
 0xaaa   : > { %23383 = vst [vmem:[#allocation58_spill] sm:$0xff] %v21126_v24  ;;  %v7304_v50 = vpop.f32.mrb[7].mxu1  ;;  %v23390_v24 = vld [vmem:[#allocation73_spill] sm:$0xff] }
 0xaad   : > { %v6567_v48 = vpop.f32.mrb[44].mxu0 }
 0xaae   : > { %v16334_v46 = vpop.f32.mrb[45].mxu0  ;;  %v21131_v29 = vadd.f32 %v6567_v48, %v23385_v30  ;;  %v23391_v30 = vld [vmem:[#allocation72_spill] sm:$0xff] }
 0xaaf   : > { %v6570_v42 = vpop.f32.mrb[46].mxu0 }
 0xab0   : > { %23386 = vst [vmem:[#allocation66_spill] sm:$0xff] %v21131_v29  ;;  %v16335_v55 = vpop.f32.mrb[47].mxu0  ;;  %v21136_v31 = vadd.f32 %v6570_v42, %v23388_v12 }
 0xab2   : > { %23389 = vst [vmem:[#allocation43_spill] sm:$0xff] %v21136_v31  ;;  %v23393_v31 = vld [vmem:[#allocation74_spill] sm:$0xff] }
 0xab5   : > { %v6575_v43 = vpop.f32.mrb[48].mxu0 }
 0xab6   : > { %v16338_v27 = vpop.f32.mrb[49].mxu0  ;;  %v21141_v0 = vadd.f32 %v6575_v43, %v23390_v24 }
 0xab7   : > { %v6578_v46 = vpop.f32.mrb[50].mxu0 }
 0xab8   : > { %v16339_v39 = vpop.f32.mrb[51].mxu0  ;;  %v21144_v48 = vadd.f32 %v6578_v46, %v23391_v30 }
 0xabd   : > { %v6583_v55 = vpop.f32.mrb[52].mxu0 }
 0xabe   : > { %v16342_v29 = vpop.f32.mrb[53].mxu0  ;;  %v21147_v23 = vadd.f32 %v6583_v55, %v23392_v13 }
 0xabf   : > { %v6586_v42 = vpop.f32.mrb[54].mxu0 }
 0xac0   : > { %v16343_v15 = vpop.f32.mrb[55].mxu0  ;;  %v21150_v12 = vadd.f32 %v6586_v42, %v20937_v21 }
 0xac5   : > { %v6591_v50 = vpop.f32.mrb[56].mxu0 }
 0xac6   : > { %v16346_v27 = vpop.f32.mrb[57].mxu0  ;;  %v21153_v24 = vadd.f32 %v6591_v50, %v23393_v31 }
 0xac7   : > { %v6594_v43 = vpop.f32.mrb[58].mxu0 }
 0xac8   : > { %23394 = vst [vmem:[#allocation63_spill] sm:$0xff] %v21153_v24  ;;  %v16347_v39 = vpop.f32.mrb[59].mxu0  ;;  %v21156_v46 = vadd.f32 %v6594_v43, %v20943_v53  ;;  %v23398_v24 = vld [vmem:[#allocation59_spill] sm:$0xff] }
 0xaca   : > { %23395 = vst [vmem:[#allocation62_spill] sm:$0xff] %v21156_v46  ;;  %v23400_v46 = vld [vmem:[#allocation60_spill] sm:$0xff] }
 0xacd   : > { %v6599_v30 = vpop.f32.mrb[60].mxu0 }
 0xace   : > { %v16350_v29 = vpop.f32.mrb[61].mxu0  ;;  %v21159_v13 = vadd.f32 %v6599_v30, %v20946_v63 }
 0xacf   : > { %v6602_v55 = vpop.f32.mrb[62].mxu0 }
 0xad0   : > { %v16351_v15 = vpop.f32.mrb[63].mxu0  ;;  %v21162_v21 = vadd.f32 %v6602_v55, %v20949_v4 }
 0xad2   : > { %23396 = vst [vmem:[#allocation89_spill] sm:$0xff] %v21162_v21  ;;  %v23402_v21 = vld [vmem:[#allocation67_spill] sm:$0xff] }
 0xad5   : > { %v6607_v42 = vpop.f32.mrb[64].mxu0 }
 0xad6   : > { %v16354_v27 = vpop.f32.mrb[65].mxu0  ;;  %v21165_v31 = vadd.f32 %v6607_v42, %v20952_v61 }
 0xad7   : > { %v6610_v50 = vpop.f32.mrb[66].mxu0 }
 0xad8   : > { %23397 = vst [vmem:[#allocation37_spill] sm:$0xff] %v21165_v31  ;;  %v16355_v39 = vpop.f32.mrb[67].mxu0  ;;  %v21168_v53 = vadd.f32 %v6610_v50, %v23398_v24  ;;  %v23404_v31 = vld [vmem:[#allocation77_spill] sm:$0xff] }
 0xada   : > { %23399 = vst [vmem:[#allocation79_spill] sm:$0xff] %v21168_v53 }
 0xadd   : > { %v6615_v43 = vpop.f32.mrb[68].mxu0 }
 0xade   : > { %v16358_v29 = vpop.f32.mrb[69].mxu0  ;;  %v21171_v63 = vadd.f32 %v6615_v43, %v23400_v46 }
 0xadf   : > { %v6618_v30 = vpop.f32.mrb[70].mxu0 }
 0xae0   : > { %23401 = vst [vmem:[#allocation42_spill] sm:$0xff] %v21171_v63  ;;  %v16359_v15 = vpop.f32.mrb[71].mxu0  ;;  %v21174_v4 = vadd.f32 %v6618_v30, %v20961_v18 }
 0xae5   : > { %v6623_v55 = vpop.f32.mrb[72].mxu0 }
 0xae6   : > { %v16362_v27 = vpop.f32.mrb[73].mxu0  ;;  %v21177_v61 = vadd.f32 %v6623_v55, %v23402_v21 }
 0xae7   : > { %v6626_v42 = vpop.f32.mrb[74].mxu0 }
 0xae8   : > { %23403 = vst [vmem:[#allocation38_spill] sm:$0xff] %v21177_v61  ;;  %v16363_v39 = vpop.f32.mrb[75].mxu0  ;;  %v21180_v24 = vadd.f32 %v6626_v42, %v23404_v31 }
 0xaea   : > { %23405 = vst [vmem:[#allocation64_spill] sm:$0xff] %v21180_v24 }
 0xaed   : > { %v15417_v50 = vpop.f32.mrb[76].mxu0 }
 0xaee   : > { %v15418_v29 = vpop.f32.mrb[77].mxu0 }
 0xaef   : > { %v15419_v53 = vadd.f32 %v15418_v29, %v15417_v50  ;;  %v15420_v46 = vpop.f32.mrb[78].mxu0 }
 0xaf0   : > { %v15421_v43 = vpop.f32.mrb[79].mxu0 }
 0xaf1   : > { %v7131_v15 = vadd.f32 %v15419_v53, %v21054_v62  ;;  %v15422_v63 = vadd.f32 %v15421_v43, %v15420_v46 }
 0xaf3   : > { %v7236_v18 = vadd.f32 %v21092_v59, %v7131_v15  ;;  %v7134_v30 = vadd.f32 %v15422_v63, %v21056_v10 }
 0xaf5   : > { %v7239_v21 = vadd.f32 %v21094_v2, %v7134_v30  ;;  %v15423_v55 = vpop.f32.mrb[80].mxu0 }
 0xaf6   : > { %v15424_v27 = vpop.f32.mrb[81].mxu0 }
 0xaf7   : > { %v7306_v39 = vpack.c.bf16 %v7239_v21, %v7236_v18  ;;  %v15425_v61 = vadd.f32 %v15424_v27, %v15423_v55  ;;  %v15426_v31 = vpop.f32.mrb[82].mxu0 }
 0xaf8   : > { %v15427_v42 = vpop.f32.mrb[83].mxu0 }
 0xaf9   : > { %v7139_v24 = vadd.f32 %v15425_v61, %v21058_v7  ;;  %v15428_v50 = vadd.f32 %v15427_v42, %v15426_v31  ;;  %16369 = vmatmul.mubr.msk.bf16.vlgmr.msra.gmra.mrb[112].mxu0 %vm3035_vm5, %v7306_v39 }
 0xafa   : > { %15553 = vmatpush3.bf16.msra.mxu0 %v19237_v36  ;;  %16372 = vmatprep.mubr.msk.bf16.mxu0 %vm18556_vm1, %v23065_v40 }
 0xafb   : > { %v7244_v62 = vadd.f32 %v21096_v37, %v7139_v24  ;;  %v7142_v10 = vadd.f32 %v15428_v50, %v21060_v32  ;;  %15554 = vmatprep.subr.bf16.mxu0 %v19278_v58 }
 0xafd   : > { %v7247_v59 = vadd.f32 %v21098_v25, %v7142_v10  ;;  %v15429_v2 = vpop.f32.mrb[84].mxu0 }
 0xafe   : > { %15555 = vmatpush3.bf16.msra.mxu0 %v19244_v51  ;;  %v15430_v7 = vpop.f32.mrb[85].mxu0 }
 0xaff   : > { %v7307_v53 = vpack.c.bf16 %v7247_v59, %v7244_v62  ;;  %v15431_v63 = vadd.f32 %v15430_v7, %v15429_v2  ;;  %15556 = vmatprep.subr.bf16.mxu0 %v19284_v11  ;;  %v15432_v61 = vpop.f32.mrb[86].mxu0 }
 0xb00   : > { %v15433_v29 = vpop.f32.mrb[87].mxu0 }
 0xb01   : > { %v7147_v46 = vadd.f32 %v15431_v63, %v21062_v19  ;;  %v15434_v43 = vadd.f32 %v15433_v29, %v15432_v61  ;;  %16373 = vmatmul.mubr.msk.bf16.gmra.mrb[116].mxu0 %vm3035_vm5, %v7307_v53 }
 0xb02   : > { %15557 = vmatpush3.bf16.msra.mxu0 %v19248_v3  ;;  %16376 = vmatprep.mubr.msk.bf16.mxu0 %vm18556_vm1, %v23065_v40 }
 0xb03   : > { %v7252_v32 = vadd.f32 %v21100_v44, %v7147_v46  ;;  %v7150_v37 = vadd.f32 %v15434_v43, %v21064_v41  ;;  %15558 = vmatprep.subr.bf16.mxu0 %v23086_v6 }
 0xb05   : > { %v7255_v25 = vadd.f32 %v21102_v17, %v7150_v37  ;;  %v15435_v24 = vpop.f32.mrb[88].mxu0 }
 0xb06   : > { %15559 = vmatpush3.bf16.msra.mxu0 %v23089_v57  ;;  %v15436_v19 = vpop.f32.mrb[89].mxu0 }
 0xb07   : > { %v7308_v15 = vpack.c.bf16 %v7255_v25, %v7252_v32  ;;  %v15437_v18 = vadd.f32 %v15436_v19, %v15435_v24  ;;  %15560 = vmatprep.subr.bf16.mxu0 %v23091_v22  ;;  %v15438_v30 = vpop.f32.mrb[90].mxu0 }
 0xb08   : > { %v15439_v21 = vpop.f32.mrb[91].mxu0 }
 0xb09   : > { %v7155_v55 = vadd.f32 %v15437_v18, %v21066_v8  ;;  %v15440_v27 = vadd.f32 %v15439_v21, %v15438_v30  ;;  %16377 = vmatmul.mubr.msk.bf16.gmra.mrb[120].mxu0 %vm3035_vm5, %v7308_v15  ;;  %v23406_v15 = vld [vmem:[#allocation56_spill] sm:$0xff]  ;;  %v23407_v30 = vld [vmem:[#allocation51_spill] sm:$0xff]  ;;  %v23408_v21 = vld [vmem:[#allocation78_spill] sm:$0xff] }
 0xb0a   : > { %15561 = vmatpush3.bf16.msra.mxu0 %v23096_v16  ;;  %16380 = vmatprep.mubr.msk.bf16.mxu0 %vm18556_vm1, %v23065_v40 }
 0xb0b   : > { %v7260_v41 = vadd.f32 %v21104_v35, %v7155_v55  ;;  %v7158_v44 = vadd.f32 %v15440_v27, %v21068_v20  ;;  %15562 = vmatprep.subr.bf16.mxu0 %v23305_v34  ;;  %v23409_v55 = vld [vmem:[#allocation69_spill] sm:$0xff] }
 0xb0d   : > { %v7263_v17 = vadd.f32 %v21106_v33, %v7158_v44  ;;  %v15441_v39 = vpop.f32.mrb[92].mxu0 }
 0xb0e   : > { %15563 = vmatpush3.bf16.msra.mxu0 %v23307_v38  ;;  %v15442_v8 = vpop.f32.mrb[93].mxu0 }
 0xb0f   : > { %v7309_v31 = vpack.c.bf16 %v7263_v17, %v7260_v41  ;;  %v15443_v42 = vadd.f32 %v15442_v8, %v15441_v39  ;;  %15564 = vmatprep.subr.bf16.mxu0 %v23309_v26  ;;  %v15444_v50 = vpop.f32.mrb[94].mxu0 }
 0xb10   : > { %v15445_v62 = vpop.f32.mrb[95].mxu0 }
 0xb11   : > { %v7163_v10 = vadd.f32 %v15443_v42, %v21070_v14  ;;  %v15446_v59 = vadd.f32 %v15445_v62, %v15444_v50  ;;  %16381 = vmatmul.mubr.msk.bf16.gmra.mrb[124].mxu0 %vm3035_vm5, %v7309_v31  ;;  %v23410_v31 = vld [vmem:[#allocation50_spill] sm:$0xff] }
 0xb12   : > { %15565 = vmatpush3.bf16.msra.mxu0 %v23311_v60  ;;  %16384 = vmatprep.mubr.msk.bf16.mxu0 %vm18556_vm1, %v23065_v40  ;;  %v23411_v62 = vld [vmem:[#allocation82_spill] sm:$0xff] }
 0xb13   : > { %v7268_v20 = vadd.f32 %v21108_v47, %v7163_v10  ;;  %v7166_v35 = vadd.f32 %v15446_v59, %v21072_v54  ;;  %15566 = vmatprep.subr.bf16.mxu0 %v23315_v56  ;;  %v23412_v59 = vld [vmem:[#allocation68_spill] sm:$0xff] }
 0xb15   : > { %v7271_v33 = vadd.f32 %v21110_v1, %v7166_v35  ;;  %v15447_v2 = vpop.f32.mrb[96].mxu0  ;;  %v23413_v35 = vld [vmem:[#allocation52_spill] sm:$0xff] }
 0xb16   : > { %15567 = vmatpush3.bf16.msra.mxu0 %v23316_v49  ;;  %v15448_v14 = vpop.f32.mrb[97].mxu0 }
 0xb17   : > { %v7310_v7 = vpack.c.bf16 %v7271_v33, %v7268_v20  ;;  %v15449_v53 = vadd.f32 %v15448_v14, %v15447_v2  ;;  %v15450_v63 = vpop.f32.mrb[98].mxu0  ;;  %16404 = vmatprep.subr.bf16.mxu0 %v23065_v40 }
 0xb18   : > { %v15451_v61 = vpop.f32.mrb[99].mxu0 }
 0xb19   : > { %v7171_v29 = vadd.f32 %v15449_v53, %v21074_v52  ;;  %v15452_v46 = vadd.f32 %v15451_v61, %v15450_v63  ;;  %16385 = vmatmul.mubr.msk.bf16.gmra.mrb[128].mxu0 %vm3035_vm5, %v7310_v7 }
 0xb1a   : > { %16388 = vmatprep.mubr.msk.bf16.mxu0 %vm18556_vm1, %v23065_v40 }
 0xb1b   : > { %v7276_v54 = vadd.f32 %v21112_v28, %v7171_v29  ;;  %v7174_v47 = vadd.f32 %v15452_v46, %v21076_v45  ;;  %v23414_v29 = vld [vmem:[#allocation57_spill] sm:$0xff] }
 0xb1d   : > { %v7279_v1 = vadd.f32 %v21114_v5, %v7174_v47  ;;  %v15453_v43 = vpop.f32.mrb[100].mxu0  ;;  %v23415_v47 = vld [vmem:[#allocation61_spill] sm:$0xff] }
 0xb1e   : > { %v15454_v32 = vpop.f32.mrb[101].mxu0 }
 0xb1f   : > { %v7311_v37 = vpack.c.bf16 %v7279_v1, %v7276_v54  ;;  %v15455_v25 = vadd.f32 %v15454_v32, %v15453_v43  ;;  %v15456_v24 = vpop.f32.mrb[102].mxu0  ;;  %v23416_v43 = vld [vmem:[#allocation76_spill] sm:$0xff] }
 0xb20   : > { %v15457_v19 = vpop.f32.mrb[103].mxu0 }
 0xb21   : > { %v7179_v52 = vadd.f32 %v15455_v25, %v23406_v15  ;;  %v15458_v18 = vadd.f32 %v15457_v19, %v15456_v24  ;;  %16389 = vmatmul.mubr.msk.bf16.gmra.mrb[132].mxu0 %vm3035_vm5, %v7311_v37  ;;  %v17853_v25 = vld [vmem:[#allocation7 + $0xbdc] ss:$24 sps:$4 sm:$0xff]   ;;  %v17851_v19 = vld [vmem:[#allocation7 + $0xbd8] ss:$24 sps:$4 sm:$0xff]   ;;  %v17854_v15 = vld [vmem:[%s22830_s4 + $0x70] sm:$0xff]  }
 0xb22   : > { %16392 = vmatprep.mubr.msk.bf16.mxu0 %vm18556_vm1, %v23065_v40 }
 0xb23   : > { %v7284_v28 = vadd.f32 %v23407_v30, %v7179_v52  ;;  %v7182_v45 = vadd.f32 %v15458_v18, %v23408_v21  ;;  %v17858_v52 = vld [vmem:[#allocation7 + $0xc0c] ss:$24 sps:$4 sm:$0xff]   ;;  %v17861_v30 = vld [vmem:[#allocation7 + $0xc3c] ss:$24 sps:$4 sm:$0xff]   ;;  %v17859_v21 = vld [vmem:[#allocation7 + $0xc38] ss:$24 sps:$4 sm:$0xff]  }
 0xb24   : > { %v17855_v18 = vld [vmem:[%s22830_s4 + $0x78] sm:$0xff]  }
 0xb25   : > { %v7287_v5 = vadd.f32 %v23409_v55, %v7182_v45  ;;  %v15459_v27 = vpop.f32.mrb[104].mxu0  ;;  %v17864_v45 = vld [vmem:[#allocation7 + $0xc6c] ss:$24 sps:$4 sm:$0xff]   ;;  %v15498_v55 = vpop.f32.mrb[8].mxu1 }
 0xb26   : > { %v15460_v41 = vpop.f32.mrb[105].mxu0 }
 0xb27   : > { %v7312_v44 = vpack.c.bf16 %v7287_v5, %v7284_v28  ;;  %v15461_v17 = vadd.f32 %v15460_v41, %v15459_v27  ;;  %v15462_v39 = vpop.f32.mrb[106].mxu0  ;;  %v23417_v28 = vld [vmem:[#allocation53_spill] sm:$0xff]  ;;  %v15499_v5 = vpop.f32.mrb[9].mxu1 }
 0xb28   : > { %v15463_v8 = vpop.f32.mrb[107].mxu0  ;;  %v21267_v27 = vadd.f32 %v15499_v5, %v15498_v55  ;;  %v15501_v41 = vpop.f32.mrb[10].mxu1 }
 0xb29   : > { %v7187_v42 = vadd.f32 %v15461_v17, %v23410_v31  ;;  %v15464_v50 = vadd.f32 %v15463_v8, %v15462_v39  ;;  %16393 = vmatmul.mubr.msk.bf16.gmra.mrb[136].mxu0 %vm3035_vm5, %v7312_v44  ;;  %v15502_v44 = vpop.f32.mrb[11].mxu1  ;;  %v17862_v39 = vld [vmem:[#allocation7 + $0xc68] ss:$24 sps:$4 sm:$0xff]   ;;  %v17867_v8 = vld [vmem:[#allocation7 + $0xc9c] ss:$24 sps:$4 sm:$0xff]  }
 0xb2a   : > { %16396 = vmatprep.mubr.msk.bf16.mxu0 %vm18556_vm1, %v23065_v40  ;;  %v21269_v17 = vadd.f32 %v15502_v44, %v15501_v41  ;;  %v15504_v31 = vpop.f32.mrb[12].mxu1 }
 0xb2b   : > { %v7292_v10 = vadd.f32 %v23411_v62, %v7187_v42  ;;  %v7190_v20 = vadd.f32 %v15464_v50, %v23412_v59  ;;  %v15505_v42 = vpop.f32.mrb[13].mxu1 }
 0xb2c   : > { %v21271_v50 = vadd.f32 %v15505_v42, %v15504_v31  ;;  %v15507_v62 = vpop.f32.mrb[14].mxu1 }
 0xb2d   : > { %v7295_v33 = vadd.f32 %v23413_v35, %v7190_v20  ;;  %v15465_v2 = vpop.f32.mrb[108].mxu0  ;;  %v17865_v20 = vld [vmem:[#allocation7 + $0xc98] ss:$24 sps:$4 sm:$0xff]   ;;  %v17870_v35 = vld [vmem:[#allocation7 + $0xccc] ss:$24 sps:$4 sm:$0xff]  }
 0xb2e   : > { %v15466_v14 = vpop.f32.mrb[109].mxu0 }
 0xb2f   : > { %v7313_v7 = vpack.c.bf16 %v7295_v33, %v7292_v10  ;;  %v15467_v53 = vadd.f32 %v15466_v14, %v15465_v2  ;;  %v15468_v63 = vpop.f32.mrb[110].mxu0  ;;  %v15508_v10 = vpop.f32.mrb[15].mxu1 }
 0xb30   : > { %v15469_v61 = vpop.f32.mrb[111].mxu0  ;;  %v21273_v59 = vadd.f32 %v15508_v10, %v15507_v62  ;;  %v15510_v33 = vpop.f32.mrb[16].mxu1 }
 0xb31   : > { %v7195_v46 = vadd.f32 %v15467_v53, %v23414_v29  ;;  %v15470_v54 = vadd.f32 %v15469_v61, %v15468_v63  ;;  %16397 = vmatmul.mubr.msk.bf16.gmra.mrb[140].mxu0 %vm3035_vm5, %v7313_v7  ;;  %v15511_v2 = vpop.f32.mrb[17].mxu1  ;;  %v17868_v61 = vld [vmem:[#allocation7 + $0xcc8] ss:$24 sps:$4 sm:$0xff]   ;;  %v17873_v29 = vld [vmem:[#allocation7 + $0xcfc] ss:$24 sps:$4 sm:$0xff]  }
 0xb32   : > { %16400 = vmatprep.mubr.msk.bf16.mxu0 %vm18556_vm1, %v23065_v40  ;;  %v21275_v14 = vadd.f32 %v15511_v2, %v15510_v33  ;;  %v15513_v7 = vpop.f32.mrb[18].mxu1 }
 0xb33   : > { %v7300_v1 = vadd.f32 %v23415_v47, %v7195_v46  ;;  %v7198_v32 = vadd.f32 %v15470_v54, %v23416_v43  ;;  %v15514_v53 = vpop.f32.mrb[19].mxu1 }
 0xb34   : > { %v21277_v63 = vadd.f32 %v15514_v53, %v15513_v7  ;;  %v15516_v46 = vpop.f32.mrb[20].mxu1 }
 0xb35   : > { %v7303_v37 = vadd.f32 %v21138_v9, %v7198_v32  ;;  %v17856_v9 = vld [vmem:[#allocation7 + $0xc08] ss:$24 sps:$4 sm:$0xff]   ;;  %v15517_v54 = vpop.f32.mrb[21].mxu1 }
 0xb36   : > { %v21279_v47 = vadd.f32 %v15517_v54, %v15516_v46 }
 0xb37   : > { %v7314_v24 = vpack.c.bf16 %v7303_v37, %v7300_v1  ;;  %v15519_v1 = vpop.f32.mrb[22].mxu1  ;;  %v17871_v37 = vld [vmem:[#allocation7 + $0xcf8] ss:$24 sps:$4 sm:$0xff]  }
 0xb38   : > { %v15520_v43 = vpop.f32.mrb[23].mxu1 }
 0xb39   : > { %16401 = vmatmul.mubr.msk.bf16.gmra.mrb[144].mxu0 %vm3035_vm5, %v7314_v24  ;;  %v21281_v32 = vadd.f32 %v15520_v43, %v15519_v1  ;;  %v15522_v24 = vpop.f32.mrb[24].mxu1 }
 0xb3a   : > { %7962 = vmatprep.mubr.bf16.mxu0 %v17853_v25  ;;  %v17876_v25 = vld [vmem:[#allocation7 + $0xd2c] ss:$24 sps:$4 sm:$0xff]  }
 0xb41   : > { %7963 = vmatmul.mubr.bf16.vlgmr.msra.gmra.mrb[148].mxu0 %v17851_v19  ;;  %v15523_v19 = vpop.f32.mrb[25].mxu1 }
 0xb42   : > { %16405 = vmatpush3.bf16.msra.mxu0 %v17854_v15  ;;  %7970 = vmatprep.mubr.bf16.mxu0 %v17858_v52  ;;  %v21283_v15 = vadd.f32 %v15523_v19, %v15522_v24  ;;  %v15525_v52 = vpop.f32.mrb[26].mxu1 }
 0xb43   : > { %16406 = vmatprep.subr.bf16.mxu0 %v23065_v40 }
 0xb46   : > { %16407 = vmatpush3.bf16.msra.mxu0 %v17855_v18  ;;  %v15526_v18 = vpop.f32.mrb[27].mxu1 }
 0xb47   : > { %15703 = vmatprep.subr.bf16.mxu0 %v23417_v28  ;;  %v17879_v28 = vld [vmem:[#allocation7 + $0xd5c] ss:$24 sps:$4 sm:$0xff]  }
 0xb49   : > { %7971 = vmatmul.mubr.bf16.gmra.mrb[152].mxu0 %v17856_v9  ;;  %v21285_v9 = vadd.f32 %v15526_v18, %v15525_v52 }
 0xb4a   : > { %7978 = vmatprep.mubr.bf16.mxu0 %v17861_v30  ;;  %v17874_v30 = vld [vmem:[#allocation7 + $0xd28] ss:$24 sps:$4 sm:$0xff]  }
 0xb51   : > { %7979 = vmatmul.mubr.bf16.gmra.mrb[156].mxu0 %v17859_v21  ;;  %v15528_v21 = vpop.f32.mrb[28].mxu1 }
 0xb52   : > { %7986 = vmatprep.mubr.bf16.mxu0 %v17864_v45  ;;  %v15529_v45 = vpop.f32.mrb[29].mxu1 }
 0xb53   : > { %v21287_v55 = vadd.f32 %v15529_v45, %v15528_v21  ;;  %v15531_v5 = vpop.f32.mrb[30].mxu1 }
 0xb54   : > { %v15532_v41 = vpop.f32.mrb[31].mxu1 }
 0xb55   : > { %v21289_v44 = vadd.f32 %v15532_v41, %v15531_v5  ;;  %v17882_v41 = vld [vmem:[#allocation7 + $0xdb4] ss:$24 sps:$4 sm:$0xff]  }
 0xb56   : > { %8699 = vmatprep.mubr.bf16.mxu1 %v17882_v41 }
 0xb59   : > { %7987 = vmatmul.mubr.bf16.gmra.mrb[160].mxu0 %v17862_v39  ;;  %v17877_v39 = vld [vmem:[#allocation7 + $0xd58] ss:$24 sps:$4 sm:$0xff]  }
 0xb5a   : > { %7994 = vmatprep.mubr.bf16.mxu0 %v17867_v8  ;;  %v15534_v8 = vpop.f32.mrb[32].mxu1 }
 0xb5b   : > { %v15535_v31 = vpop.f32.mrb[33].mxu1 }
 0xb5c   : > { %v21291_v42 = vadd.f32 %v15535_v31, %v15534_v8  ;;  %v15537_v62 = vpop.f32.mrb[34].mxu1  ;;  %v17880_v8 = vld [vmem:[#allocation7 + $0xdb0] ss:$24 sps:$4 sm:$0xff]  }
 0xb5d   : > { %v15538_v10 = vpop.f32.mrb[35].mxu1  ;;  %8700 = vmatmul.mubr.bf16.gmra.mrb[84].mxu1 %v17880_v8  ;;  %v17889_v8 = vld [vmem:[#allocation7 + $0xe40] ss:$24 sps:$4 sm:$0xff]  }
 0xb61   : > { %7995 = vmatmul.mubr.bf16.gmra.mrb[164].mxu0 %v17865_v20  ;;  %v21295_v20 = vadd.f32 %v15538_v10, %v15537_v62 }
 0xb62   : > { %8002 = vmatprep.mubr.bf16.mxu0 %v17870_v35  ;;  %v15540_v35 = vpop.f32.mrb[36].mxu1 }
 0xb63   : > { %23418 = vst [vmem:[#allocation81_spill] sm:$0xff] %v21295_v20  ;;  %v15541_v33 = vpop.f32.mrb[37].mxu1 }
 0xb64   : > { %v21297_v2 = vadd.f32 %v15541_v33, %v15540_v35  ;;  %v15543_v7 = vpop.f32.mrb[38].mxu1  ;;  %v17885_v35 = vld [vmem:[#allocation7 + $0xde4] ss:$24 sps:$4 sm:$0xff]  }
 0xb65   : > { %v15544_v53 = vpop.f32.mrb[39].mxu1  ;;  %8707 = vmatprep.mubr.bf16.mxu1 %v17885_v35 }
 0xb66   : > { %23419 = vst [vmem:[#allocation80_spill] sm:$0xff] %v21297_v2  ;;  %v17897_v2 = vld [vmem:[#allocation7 + $0xea4] ss:$24 sps:$4 sm:$0xff]  }
 0xb69   : > { %8003 = vmatmul.mubr.bf16.gmra.mrb[168].mxu0 %v17868_v61  ;;  %v21299_v61 = vadd.f32 %v15544_v53, %v15543_v7  ;;  %v17883_v7 = vld [vmem:[#allocation7 + $0xde0] ss:$24 sps:$4 sm:$0xff]  }
 0xb6a   : > { %8010 = vmatprep.mubr.bf16.mxu0 %v17873_v29  ;;  %v15546_v29 = vpop.f32.mrb[40].mxu1  ;;  %8708 = vmatmul.mubr.bf16.gmra.mrb[88].mxu1 %v17883_v7  ;;  %v17894_v7 = vld [vmem:[#allocation7 + $0xe74] ss:$24 sps:$4 sm:$0xff]  }
 0xb6b   : > { %23420 = vst [vmem:[#allocation65_spill] sm:$0xff] %v21299_v61  ;;  %v15547_v46 = vpop.f32.mrb[41].mxu1  ;;  %v23426_v61 = vld [vmem:[#allocation58_spill] sm:$0xff] }
 0xb6c   : > { %v21301_v54 = vadd.f32 %v15547_v46, %v15546_v29  ;;  %v15549_v1 = vpop.f32.mrb[42].mxu1 }
 0xb6d   : > { %v15550_v43 = vpop.f32.mrb[43].mxu1 }
 0xb6e   : > { %23421 = vst [vmem:[#allocation83_spill] sm:$0xff] %v21301_v54 }
 0xb71   : > { %8011 = vmatmul.mubr.bf16.gmra.mrb[172].mxu0 %v17871_v37  ;;  %v21303_v37 = vadd.f32 %v15550_v43, %v15549_v1  ;;  %v17888_v1 = vld [vmem:[#allocation7 + $0xe14] ss:$24 sps:$4 sm:$0xff]  }
 0xb72   : > { %8018 = vmatprep.mubr.bf16.mxu0 %v17876_v25  ;;  %v21305_v25 = vpop.f32.mrb[44].mxu1  ;;  %8715 = vmatprep.mubr.bf16.mxu1 %v17888_v1 }
 0xb73   : > { %23422 = vst [vmem:[#allocation36_spill] sm:$0xff] %v21303_v37  ;;  %v8071_v24 = vpop.f32.mrb[45].mxu1 }
 0xb74   : > { %v21307_v19 = vpop.f32.mrb[46].mxu1  ;;  %v17886_v24 = vld [vmem:[#allocation7 + $0xe10] ss:$24 sps:$4 sm:$0xff]  }
 0xb75   : > { %v8074_v52 = vpop.f32.mrb[47].mxu1  ;;  %8716 = vmatmul.mubr.bf16.gmra.mrb[92].mxu1 %v17886_v24  ;;  %v23424_v24 = vld [vmem:[#allocation88_spill] sm:$0xff] }
 0xb76   : > { %v21309_v18 = vpop.f32.mrb[48].mxu1 }
 0xb79   : > { %8019 = vmatmul.mubr.bf16.gmra.mrb[176].mxu0 %v17874_v30  ;;  %v8079_v30 = vpop.f32.mrb[49].mxu1 }
 0xb7a   : > { %8026 = vmatprep.mubr.bf16.mxu0 %v17879_v28  ;;  %v21311_v28 = vpop.f32.mrb[50].mxu1 }
 0xb7b   : > { %v8082_v21 = vpop.f32.mrb[51].mxu1 }
 0xb7c   : > { %v21313_v45 = vpop.f32.mrb[52].mxu1 }
 0xb7d   : > { %v8087_v5 = vpop.f32.mrb[53].mxu1 }
 0xb7e   : > { %v17891_v5 = vld [vmem:[#allocation7 + $0xe44] ss:$24 sps:$4 sm:$0xff]  }
 0xb7f   : > { %8723 = vmatprep.mubr.bf16.mxu1 %v17891_v5 }
 0xb80   : > { %8724 = vmatmul.mubr.bf16.gmra.mrb[96].mxu1 %v17889_v8 }
 0xb81   : > { %8027 = vmatmul.mubr.bf16.gmra.mrb[180].mxu0 %v17877_v39  ;;  %v21315_v39 = vpop.f32.mrb[54].mxu1  ;;  %8731 = vmatprep.mubr.bf16.mxu1 %v17894_v7 }
 0xb82   : > { %16408 = vmatprep.mubr.msk.bf16.mxu0 %vm18556_vm1, %v23065_v40  ;;  %v8090_v31 = vpop.f32.mrb[55].mxu1 }
 0xb83   : > { %v21317_v62 = vpop.f32.mrb[56].mxu1 }
 0xb84   : > { %v8095_v10 = vpop.f32.mrb[57].mxu1 }
 0xb85   : > { %v21319_v33 = vpop.f32.mrb[58].mxu1 }
 0xb86   : > { %v8098_v53 = vpop.f32.mrb[59].mxu1 }
 0xb87   : > { %v21321_v29 = vpop.f32.mrb[60].mxu1 }
 0xb88   : > { %v8103_v46 = vpop.f32.mrb[61].mxu1 }
 0xb89   : > { %v21323_v43 = vpop.f32.mrb[62].mxu1  ;;  %v17892_v46 = vld [vmem:[#allocation7 + $0xe70] ss:$24 sps:$4 sm:$0xff]  }
 0xb8a   : > { %v8106_v52 = vpop.f32.mrb[63].mxu1  ;;  %8732 = vmatmul.mubr.bf16.gmra.mrb[100].mxu1 %v17892_v46  ;;  %v23430_v46 = vld [vmem:[#allocation66_spill] sm:$0xff] }
 0xb8b   : > { %v21325_v30 = vpop.f32.mrb[64].mxu1  ;;  %8739 = vmatprep.mubr.bf16.mxu1 %v17897_v2 }
 0xb8c   : > { %v8111_v21 = vpop.f32.mrb[65].mxu1 }
 0xb8d   : > { %v21327_v41 = vpop.f32.mrb[66].mxu1 }
 0xb8e   : > { %v8114_v31 = vpop.f32.mrb[67].mxu1 }
 0xb8f   : > { %v21329_v10 = vpop.f32.mrb[68].mxu1 }
 0xb90   : > { %v8119_v35 = vpop.f32.mrb[69].mxu1 }
 0xb91   : > { %v21331_v53 = vpop.f32.mrb[70].mxu1 }
 0xb92   : > { %23423 = vst [vmem:[#allocation44_spill] sm:$0xff] %v21331_v53  ;;  %v8122_v52 = vpop.f32.mrb[71].mxu1  ;;  %v17895_v53 = vld [vmem:[#allocation7 + $0xea0] ss:$24 sps:$4 sm:$0xff]  }
 0xb93   : > { %v21339_v8 = vpop.f32.mrb[72].mxu1  ;;  %8740 = vmatmul.mubr.bf16.gmra.mrb[104].mxu1 %v17895_v53 }
 0xb94   : > { %23428 = vst [vmem:[#allocation84_spill] sm:$0xff] %v21339_v8  ;;  %v8127_v35 = vpop.f32.mrb[73].mxu1 }
 0xb95   : > { %v21341_v20 = vpop.f32.mrb[74].mxu1 }
 0xb96   : > { %23429 = vst [vmem:[#allocation46_spill] sm:$0xff] %v21341_v20  ;;  %v8130_v52 = vpop.f32.mrb[75].mxu1  ;;  %v17898_v20 = vld [vmem:[#allocation7 + $0xed0] ss:$24 sps:$4 sm:$0xff]  }
 0xbcc   : > { %v7393_v1 = vpop.f32.mrb[112].mxu0 }
 0xbcd   : > { %v21334_v21 = vadd.f32 %v7393_v1, %v23424_v24  ;;  %v16370_v37 = vpop.f32.mrb[113].mxu0 }
 0xbce   : > { %v7396_v54 = vpop.f32.mrb[114].mxu0 }
 0xbcf   : > { %23425 = vst [vmem:[#allocation45_spill] sm:$0xff] %v21334_v21  ;;  %v21337_v31 = vadd.f32 %v7396_v54, %v23426_v61  ;;  %v16371_v5 = vpop.f32.mrb[115].mxu0  ;;  %v23431_v21 = vld [vmem:[#allocation43_spill] sm:$0xff] }
 0xbd0   : > { %v21349_v5 = vpop.f32.mrb[76].mxu1 }
 0xbd1   : > { %23427 = vst [vmem:[#allocation39_spill] sm:$0xff] %v21337_v31  ;;  %v8135_v35 = vpop.f32.mrb[77].mxu1  ;;  %v17900_v31 = vld [vmem:[#allocation7 + $0xed4] ss:$24 sps:$4 sm:$0xff]  }
 0xbd2   : > { %v21351_v8 = vpop.f32.mrb[78].mxu1  ;;  %8747 = vmatprep.mubr.bf16.mxu1 %v17900_v31 }
 0xbd3   : > { %v8138_v52 = vpop.f32.mrb[79].mxu1  ;;  %8748 = vmatmul.mubr.bf16.gmra.mrb[108].mxu1 %v17898_v20 }
 0xbd4   : > { %v7401_v7 = vpop.f32.mrb[116].mxu0 }
 0xbd5   : > { %v21344_v1 = vadd.f32 %v7401_v7, %v23430_v46  ;;  %v16374_v37 = vpop.f32.mrb[117].mxu0 }
 0xbd6   : > { %v7404_v24 = vpop.f32.mrb[118].mxu0 }
 0xbd7   : > { %v21347_v61 = vadd.f32 %v7404_v24, %v23431_v21  ;;  %v16375_v54 = vpop.f32.mrb[119].mxu0  ;;  %v17901_v24 = vld [vmem:[#allocation7 + $0xf00] ss:$24 sps:$4 sm:$0xff]  }
 0xbd8   : > { %v17903_v54 = vld [vmem:[#allocation7 + $0xf04] ss:$24 sps:$4 sm:$0xff]  }
 0xbd9   : > { %23432 = vst [vmem:[#allocation48_spill] sm:$0xff] %v21347_v61  ;;  %8755 = vmatprep.mubr.bf16.mxu1 %v17903_v54 }
 0xbdb   : > { %8756 = vmatmul.mubr.bf16.gmra.mrb[112].mxu1 %v17901_v24 }
 0xbdc   : > { %v7409_v2 = vpop.f32.mrb[120].mxu0 }
 0xbdd   : > { %v21354_v53 = vadd.f32 %v7409_v2, %v21141_v0  ;;  %v16378_v7 = vpop.f32.mrb[121].mxu0  ;;  %v17907_v2 = vld [vmem:[#allocation7 + $0xd90] ss:$24 sps:$4 sm:$0xff]  }
 0xbde   : > { %v7412_v46 = vpop.f32.mrb[122].mxu0  ;;  %v17909_v7 = vld [vmem:[#allocation7 + $0xd94] ss:$24 sps:$4 sm:$0xff]  }
 0xbdf   : > { %v21357_v21 = vadd.f32 %v7412_v46, %v21144_v48  ;;  %v16379_v37 = vpop.f32.mrb[123].mxu0  ;;  %13922 = vmatprep.mubr.msk.bf16.mxu1 %vm1992_vm4, %v17909_v7  ;;  %v23435_v46 = vld [vmem:[#allocation63_spill] sm:$0xff]  ;;  %v23440_v7 = vld [vmem:[#allocation89_spill] sm:$0xff] }
 0xbe1   : > { %23433 = vst [vmem:[#allocation40_spill] sm:$0xff] %v21357_v21  ;;  %v23437_v21 = vld [vmem:[#allocation62_spill] sm:$0xff] }
 0xbe3   : > { %8902 = vmatmul.mubr.bf16.vlgmr.msra.gmra.mrb[116].mxu1 %v17907_v2 }
 0xbe4   : > { %v7417_v35 = vpop.f32.mrb[124].mxu0 }
 0xbe5   : > { %v21360_v61 = vadd.f32 %v7417_v35, %v21147_v23  ;;  %v16382_v31 = vpop.f32.mrb[125].mxu0 }
 0xbe6   : > { %v7420_v20 = vpop.f32.mrb[126].mxu0  ;;  %v17913_v31 = vld [vmem:[#allocation7 + $0xdc0] ss:$24 sps:$4 sm:$0xff]  }
 0xbe7   : > { %23434 = vst [vmem:[#allocation47_spill] sm:$0xff] %v21360_v61  ;;  %v21363_v52 = vadd.f32 %v7420_v20, %v21150_v12  ;;  %v16383_v0 = vpop.f32.mrb[127].mxu0  ;;  %v17915_v61 = vld [vmem:[#allocation7 + $0xdc4] ss:$24 sps:$4 sm:$0xff]  }
 0xbe8   : > { %13923 = vmatprep.mubr.msk.bf16.mxu1 %vm1992_vm4, %v17915_v61 }
 0xbeb   : > { %8910 = vmatmul.mubr.bf16.gmra.mrb[120].mxu1 %v17913_v31 }
 0xbec   : > { %v7425_v48 = vpop.f32.mrb[128].mxu0 }
 0xbed   : > { %v21367_v37 = vadd.f32 %v7425_v48, %v23435_v46  ;;  %v16386_v24 = vpop.f32.mrb[129].mxu0 }
 0xbee   : > { %v7428_v54 = vpop.f32.mrb[130].mxu0  ;;  %v17919_v24 = vld [vmem:[#allocation7 + $0xdf0] ss:$24 sps:$4 sm:$0xff]  }
 0xbef   : > { %23436 = vst [vmem:[#allocation70_spill] sm:$0xff] %v21367_v37  ;;  %v21370_v23 = vadd.f32 %v7428_v54, %v23437_v21  ;;  %v16387_v35 = vpop.f32.mrb[131].mxu0  ;;  %v17921_v37 = vld [vmem:[#allocation7 + $0xdf4] ss:$24 sps:$4 sm:$0xff]  }
 0xbf0   : > { %13924 = vmatprep.mubr.msk.bf16.mxu1 %vm1992_vm4, %v17921_v37  ;;  %v23441_v54 = vld [vmem:[#allocation37_spill] sm:$0xff] }
 0xbf1   : > { %23438 = vst [vmem:[#allocation41_spill] sm:$0xff] %v21370_v23  ;;  %v23443_v23 = vld [vmem:[#allocation79_spill] sm:$0xff] }
 0xbf3   : > { %8918 = vmatmul.mubr.bf16.gmra.mrb[124].mxu1 %v17919_v24 }
 0xbf4   : > { %v7433_v12 = vpop.f32.mrb[132].mxu0 }
 0xbf5   : > { %v21374_v20 = vadd.f32 %v7433_v12, %v21159_v13  ;;  %v16390_v0 = vpop.f32.mrb[133].mxu0 }
 0xbf6   : > { %v7436_v2 = vpop.f32.mrb[134].mxu0  ;;  %v17925_v0 = vld [vmem:[#allocation7 + $0xe20] ss:$24 sps:$4 sm:$0xff]  }
 0xbf7   : > { %23439 = vst [vmem:[#allocation87_spill] sm:$0xff] %v21374_v20  ;;  %v21377_v48 = vadd.f32 %v7436_v2, %v23440_v7  ;;  %v16391_v46 = vpop.f32.mrb[135].mxu0  ;;  %v17927_v20 = vld [vmem:[#allocation7 + $0xe24] ss:$24 sps:$4 sm:$0xff]  }
 0xbf8   : > { %13925 = vmatprep.mubr.msk.bf16.mxu1 %vm1992_vm4, %v17927_v20  ;;  %v23445_v7 = vld [vmem:[#allocation42_spill] sm:$0xff] }
 0xbfb   : > { %8926 = vmatmul.mubr.bf16.gmra.mrb[128].mxu1 %v17925_v0 }
 0xbfc   : > { %v7441_v21 = vpop.f32.mrb[136].mxu0 }
 0xbfd   : > { %v21381_v35 = vadd.f32 %v7441_v21, %v23441_v54  ;;  %v16394_v61 = vpop.f32.mrb[137].mxu0 }
 0xbfe   : > { %v7444_v31 = vpop.f32.mrb[138].mxu0  ;;  %v17931_v61 = vld [vmem:[#allocation7 + $0xe50] ss:$24 sps:$4 sm:$0xff]  }
 0xbff   : > { %23442 = vst [vmem:[#allocation54_spill] sm:$0xff] %v21381_v35  ;;  %v21384_v13 = vadd.f32 %v7444_v31, %v23443_v23  ;;  %v16395_v12 = vpop.f32.mrb[139].mxu0  ;;  %v17933_v35 = vld [vmem:[#allocation7 + $0xe54] ss:$24 sps:$4 sm:$0xff]   ;;  %v23448_v31 = vld [vmem:[#allocation38_spill] sm:$0xff] }
 0xc00   : > { %13926 = vmatprep.mubr.msk.bf16.mxu1 %vm1992_vm4, %v17933_v35 }
 0xc01   : > { %23444 = vst [vmem:[#allocation86_spill] sm:$0xff] %v21384_v13  ;;  %v23450_v13 = vld [vmem:[#allocation64_spill] sm:$0xff] }
 0xc03   : > { %8934 = vmatmul.mubr.bf16.gmra.mrb[132].mxu1 %v17931_v61 }
 0xc04   : > { %v7449_v2 = vpop.f32.mrb[140].mxu0 }
 0xc05   : > { %v21388_v46 = vadd.f32 %v7449_v2, %v23445_v7  ;;  %v16398_v37 = vpop.f32.mrb[141].mxu0 }
 0xc06   : > { %v7452_v24 = vpop.f32.mrb[142].mxu0  ;;  %v17937_v37 = vld [vmem:[#allocation7 + $0xe80] ss:$24 sps:$4 sm:$0xff]  }
 0xc07   : > { %23446 = vst [vmem:[#allocation55_spill] sm:$0xff] %v21388_v46  ;;  %v21391_v21 = vadd.f32 %v7452_v24, %v21174_v4  ;;  %v16399_v54 = vpop.f32.mrb[143].mxu0  ;;  %v17939_v46 = vld [vmem:[#allocation7 + $0xe84] ss:$24 sps:$4 sm:$0xff]  }
 0xc08   : > { %13927 = vmatprep.mubr.msk.bf16.mxu1 %vm1992_vm4, %v17939_v46 }
 0xc09   : > { %23447 = vst [vmem:[#allocation71_spill] sm:$0xff] %v21391_v21 }
 0xc0b   : > { %8942 = vmatmul.mubr.bf16.gmra.mrb[136].mxu1 %v17937_v37 }
 0xc0c   : > { %v7457_v23 = vpop.f32.mrb[144].mxu0 }
 0xc0d   : > { %v21395_v12 = vadd.f32 %v7457_v23, %v23448_v31  ;;  %v16402_v20 = vpop.f32.mrb[145].mxu0  ;;  %v17943_v31 = vld [vmem:[#allocation7 + $0xeb0] ss:$24 sps:$4 sm:$0xff]  }
 0xc0e   : > { %v7460_v0 = vpop.f32.mrb[146].mxu0  ;;  %v17945_v20 = vld [vmem:[#allocation7 + $0xeb4] ss:$24 sps:$4 sm:$0xff]  }
 0xc0f   : > { %23449 = vst [vmem:[#allocation49_spill] sm:$0xff] %v21395_v12  ;;  %v21398_v2 = vadd.f32 %v7460_v0, %v23450_v13  ;;  %v16403_v7 = vpop.f32.mrb[147].mxu0  ;;  %13928 = vmatprep.mubr.msk.bf16.mxu1 %vm1992_vm4, %v17945_v20 }
 0xc11   : > { %23451 = vst [vmem:[#allocation85_spill] sm:$0xff] %v21398_v2 }
 0xc13   : > { %8950 = vmatmul.mubr.bf16.gmra.mrb[140].mxu1 %v17943_v31  ;;  %v17957_v31 = vld [vmem:[#allocation7 + $0xf14] ss:$24 sps:$4 sm:$0xff]  }
 0xc14   : > { %v15568_v4 = vpop.f32.mrb[148].mxu0 }
 0xc15   : > { %v15569_v24 = vpop.f32.mrb[149].mxu0 }
 0xc16   : > { %v15570_v54 = vadd.f32 %v15569_v24, %v15568_v4  ;;  %v15571_v35 = vpop.f32.mrb[150].mxu0 }
 0xc17   : > { %v15572_v61 = vpop.f32.mrb[151].mxu0 }
 0xc18   : > { %v7965_v21 = vadd.f32 %v15570_v54, %v21267_v27  ;;  %v15573_v23 = vadd.f32 %v15572_v61, %v15571_v35  ;;  %v17949_v35 = vld [vmem:[#allocation7 + $0xee0] ss:$24 sps:$4 sm:$0xff]  }
 0xc1a   : > { %v8070_v12 = vadd.f32 %v21305_v25, %v7965_v21  ;;  %v7968_v13 = vadd.f32 %v15573_v23, %v21269_v17  ;;  %v17951_v25 = vld [vmem:[#allocation7 + $0xee4] ss:$24 sps:$4 sm:$0xff]  }
 0xc1b   : > { %13929 = vmatprep.mubr.msk.bf16.mxu1 %vm1992_vm4, %v17951_v25 }
 0xc1c   : > { %v8073_v46 = vadd.f32 %v21307_v19, %v7968_v13  ;;  %v15574_v0 = vpop.f32.mrb[152].mxu0  ;;  %8958 = vmatmul.mubr.bf16.gmra.mrb[144].mxu1 %v17949_v35 }
 0xc1d   : > { %v15575_v7 = vpop.f32.mrb[153].mxu0  ;;  %13930 = vmatprep.mubr.msk.bf16.mxu1 %vm1992_vm4, %v17957_v31 }
 0xc1e   : > { %v8140_v37 = vpack.c.bf16 %v8073_v46, %v8070_v12  ;;  %v15576_v4 = vadd.f32 %v15575_v7, %v15574_v0  ;;  %v15577_v24 = vpop.f32.mrb[154].mxu0 }
 0xc1f   : > { %v15578_v2 = vpop.f32.mrb[155].mxu0 }
 0xc20   : > { %v7973_v27 = vadd.f32 %v15576_v4, %v21271_v50  ;;  %v15579_v54 = vadd.f32 %v15578_v2, %v15577_v24  ;;  %16409 = vmatmul.mubr.msk.bf16.vlgmr.msra.gmra.mrb[184].mxu0 %vm3035_vm5, %v8140_v37 }
 0xc21   : > { %15704 = vmatpush3.bf16.msra.mxu0 %v19237_v36  ;;  %16412 = vmatprep.mubr.msk.bf16.mxu0 %vm18556_vm1, %v23065_v40 }
 0xc22   : > { %v8078_v17 = vadd.f32 %v21309_v18, %v7973_v27  ;;  %v7976_v19 = vadd.f32 %v15579_v54, %v21273_v59  ;;  %15705 = vmatprep.subr.bf16.mxu0 %v19278_v58  ;;  %v17955_v58 = vld [vmem:[#allocation7 + $0xf10] ss:$24 sps:$4 sm:$0xff]  }
 0xc24   : > { %v8081_v50 = vadd.f32 %v21311_v28, %v7976_v19  ;;  %v15580_v21 = vpop.f32.mrb[156].mxu0  ;;  %8966 = vmatmul.mubr.bf16.gmra.mrb[148].mxu1 %v17955_v58 }
 0xc25   : > { %15706 = vmatpush3.bf16.msra.mxu0 %v19244_v51  ;;  %v15581_v12 = vpop.f32.mrb[157].mxu0  ;;  %16488 = vmatprep.mubr.msk.bf16.mxu1 %vm18556_vm1, %v23065_v40 }
 0xc26   : > { %v8141_v2 = vpack.c.bf16 %v8081_v50, %v8078_v17  ;;  %v15582_v36 = vadd.f32 %v15581_v12, %v15580_v21  ;;  %15707 = vmatprep.subr.bf16.mxu0 %v19284_v11  ;;  %v15583_v61 = vpop.f32.mrb[158].mxu0 }
 0xc27   : > { %v15584_v23 = vpop.f32.mrb[159].mxu0 }
 0xc28   : > { %v7981_v18 = vadd.f32 %v15582_v36, %v21275_v14  ;;  %v15585_v59 = vadd.f32 %v15584_v23, %v15583_v61  ;;  %16413 = vmatmul.mubr.msk.bf16.gmra.mrb[188].mxu0 %vm3035_vm5, %v8141_v2  ;;  %v23452_v2 = vld [vmem:[#allocation81_spill] sm:$0xff]  ;;  %v23453_v36 = vld [vmem:[#allocation44_spill] sm:$0xff] }
 0xc29   : > { %15708 = vmatpush3.bf16.msra.mxu0 %v19248_v3  ;;  %16416 = vmatprep.mubr.msk.bf16.mxu0 %vm18556_vm1, %v23065_v40 }
 0xc2a   : > { %v8086_v51 = vadd.f32 %v21313_v45, %v7981_v18  ;;  %v7984_v28 = vadd.f32 %v15585_v59, %v21277_v63  ;;  %15709 = vmatprep.subr.bf16.mxu0 %v23086_v6 }
 0xc2c   : > { %v8089_v11 = vadd.f32 %v21315_v39, %v7984_v28  ;;  %v15586_v14 = vpop.f32.mrb[160].mxu0 }
 0xc2d   : > { %15710 = vmatpush3.bf16.msra.mxu0 %v23089_v57  ;;  %v15587_v3 = vpop.f32.mrb[161].mxu0 }
 0xc2e   : > { %v8142_v20 = vpack.c.bf16 %v8089_v11, %v8086_v51  ;;  %v15588_v13 = vadd.f32 %v15587_v3, %v15586_v14  ;;  %15711 = vmatprep.subr.bf16.mxu0 %v23091_v22  ;;  %v15589_v45 = vpop.f32.mrb[162].mxu0  ;;  %v23454_v51 = vld [vmem:[#allocation80_spill] sm:$0xff]  ;;  %v23456_v14 = vld [vmem:[#allocation65_spill] sm:$0xff] }
 0xc2f   : > { %v15590_v63 = vpop.f32.mrb[163].mxu0  ;;  %v23455_v11 = vld [vmem:[#allocation84_spill] sm:$0xff] }
 0xc30   : > { %v7989_v6 = vadd.f32 %v15588_v13, %v21279_v47  ;;  %v15591_v46 = vadd.f32 %v15590_v63, %v15589_v45  ;;  %16417 = vmatmul.mubr.msk.bf16.gmra.mrb[192].mxu0 %vm3035_vm5, %v8142_v20  ;;  %v23457_v20 = vld [vmem:[#allocation46_spill] sm:$0xff] }
 0xc31   : > { %15712 = vmatpush3.bf16.msra.mxu0 %v23096_v16  ;;  %16420 = vmatprep.mubr.msk.bf16.mxu0 %vm18556_vm1, %v23065_v40 }
 0xc32   : > { %v8094_v39 = vadd.f32 %v21317_v62, %v7989_v6  ;;  %v7992_v57 = vadd.f32 %v15591_v46, %v21281_v32  ;;  %15713 = vmatprep.subr.bf16.mxu0 %v23305_v34 }
 0xc34   : > { %v8097_v22 = vadd.f32 %v21319_v33, %v7992_v57  ;;  %v15592_v0 = vpop.f32.mrb[164].mxu0 }
 0xc35   : > { %15714 = vmatpush3.bf16.msra.mxu0 %v23307_v38  ;;  %v15593_v47 = vpop.f32.mrb[165].mxu0 }
 0xc36   : > { %v8143_v7 = vpack.c.bf16 %v8097_v22, %v8094_v39  ;;  %v15594_v37 = vadd.f32 %v15593_v47, %v15592_v0  ;;  %15715 = vmatprep.subr.bf16.mxu0 %v23309_v26  ;;  %v15595_v16 = vpop.f32.mrb[166].mxu0  ;;  %v23458_v22 = vld [vmem:[#allocation83_spill] sm:$0xff] }
 0xc37   : > { %v15596_v4 = vpop.f32.mrb[167].mxu0 }
 0xc38   : > { %v7997_v24 = vadd.f32 %v15594_v37, %v21283_v15  ;;  %v15597_v27 = vadd.f32 %v15596_v4, %v15595_v16  ;;  %16421 = vmatmul.mubr.msk.bf16.gmra.mrb[196].mxu0 %vm3035_vm5, %v8143_v7  ;;  %v23459_v37 = vld [vmem:[#allocation36_spill] sm:$0xff] }
 0xc39   : > { %15716 = vmatpush3.bf16.msra.mxu0 %v23311_v60  ;;  %16424 = vmatprep.mubr.msk.bf16.mxu0 %vm18556_vm1, %v23065_v40 }
 0xc3a   : > { %v8102_v34 = vadd.f32 %v21321_v29, %v7997_v24  ;;  %v8000_v38 = vadd.f32 %v15597_v27, %v21285_v9  ;;  %15717 = vmatprep.subr.bf16.mxu0 %v23315_v56  ;;  %v17906_v24 = vld [vmem:[#allocation7 + $0xd8c] ss:$24 sps:$4 sm:$0xff]  }
 0xc3c   : > { %v8105_v26 = vadd.f32 %v21323_v43, %v8000_v38  ;;  %v15598_v32 = vpop.f32.mrb[168].mxu0  ;;  %v17912_v38 = vld [vmem:[#allocation7 + $0xdbc] ss:$24 sps:$4 sm:$0xff]  }
 0xc3d   : > { %15718 = vmatpush3.bf16.msra.mxu0 %v23316_v49  ;;  %v15599_v15 = vpop.f32.mrb[169].mxu0 }
 0xc3e   : > { %v8144_v62 = vpack.c.bf16 %v8105_v26, %v8102_v34  ;;  %v15600_v33 = vadd.f32 %v15599_v15, %v15598_v32  ;;  %v15601_v54 = vpop.f32.mrb[170].mxu0  ;;  %16444 = vmatprep.subr.bf16.mxu0 %v23065_v40  ;;  %v17904_v34 = vld [vmem:[#allocation7 + $0xd88] ss:$24 sps:$4 sm:$0xff]   ;;  %v17910_v26 = vld [vmem:[#allocation7 + $0xdb8] ss:$24 sps:$4 sm:$0xff]  }
 0xc3f   : > { %v15602_v60 = vpop.f32.mrb[171].mxu0  ;;  %v17918_v32 = vld [vmem:[#allocation7 + $0xdec] ss:$24 sps:$4 sm:$0xff]   ;;  %v17916_v15 = vld [vmem:[#allocation7 + $0xde8] ss:$24 sps:$4 sm:$0xff]  }
 0xc40   : > { %v8005_v35 = vadd.f32 %v15600_v33, %v21287_v55  ;;  %v15603_v25 = vadd.f32 %v15602_v60, %v15601_v54  ;;  %16425 = vmatmul.mubr.msk.bf16.gmra.mrb[200].mxu0 %vm3035_vm5, %v8144_v62  ;;  %v17924_v62 = vld [vmem:[#allocation7 + $0xe1c] ss:$24 sps:$4 sm:$0xff]  }
 0xc41   : > { %16428 = vmatprep.mubr.msk.bf16.mxu0 %vm18556_vm1, %v23065_v40 }
 0xc42   : > { %v8110_v56 = vadd.f32 %v21325_v30, %v8005_v35  ;;  %v8008_v9 = vadd.f32 %v15603_v25, %v21289_v44  ;;  %v17922_v25 = vld [vmem:[#allocation7 + $0xe18] ss:$24 sps:$4 sm:$0xff]  }
 0xc44   : > { %v8113_v49 = vadd.f32 %v21327_v41, %v8008_v9  ;;  %v15604_v29 = vpop.f32.mrb[172].mxu0 }
 0xc45   : > { %v15605_v43 = vpop.f32.mrb[173].mxu0 }
 0xc46   : > { %v8145_v17 = vpack.c.bf16 %v8113_v49, %v8110_v56  ;;  %v15606_v19 = vadd.f32 %v15605_v43, %v15604_v29  ;;  %v15607_v50 = vpop.f32.mrb[174].mxu0  ;;  %v17930_v56 = vld [vmem:[#allocation7 + $0xe4c] ss:$24 sps:$4 sm:$0xff]  }
 0xc47   : > { %v15608_v21 = vpop.f32.mrb[175].mxu0 }
 0xc48   : > { %v8013_v55 = vadd.f32 %v15606_v19, %v21291_v42  ;;  %v15609_v12 = vadd.f32 %v15608_v21, %v15607_v50  ;;  %16429 = vmatmul.mubr.msk.bf16.gmra.mrb[204].mxu0 %vm3035_vm5, %v8145_v17  ;;  %v17928_v50 = vld [vmem:[#allocation7 + $0xe48] ss:$24 sps:$4 sm:$0xff]   ;;  %v17936_v21 = vld [vmem:[#allocation7 + $0xe7c] ss:$24 sps:$4 sm:$0xff]  }
 0xc49   : > { %16432 = vmatprep.mubr.msk.bf16.mxu0 %vm18556_vm1, %v23065_v40 }
 0xc4a   : > { %v8118_v30 = vadd.f32 %v21329_v10, %v8013_v55  ;;  %v8016_v44 = vadd.f32 %v15609_v12, %v23452_v2 }
 0xc4c   : > { %v8121_v41 = vadd.f32 %v23453_v36, %v8016_v44  ;;  %v15610_v61 = vpop.f32.mrb[176].mxu0 }
 0xc4d   : > { %v15611_v23 = vpop.f32.mrb[177].mxu0 }
 0xc4e   : > { %v8146_v18 = vpack.c.bf16 %v8121_v41, %v8118_v30  ;;  %v15612_v59 = vadd.f32 %v15611_v23, %v15610_v61  ;;  %v15613_v58 = vpop.f32.mrb[178].mxu0  ;;  %v17934_v41 = vld [vmem:[#allocation7 + $0xe78] ss:$24 sps:$4 sm:$0xff]   ;;  %v17942_v23 = vld [vmem:[#allocation7 + $0xeac] ss:$24 sps:$4 sm:$0xff]  }
 0xc4f   : > { %v15614_v31 = vpop.f32.mrb[179].mxu0  ;;  %v17958_v61 = vld [vmem:[%s22830_s4 + $0x80] sm:$0xff]  }
 0xc50   : > { %v8021_v42 = vadd.f32 %v15612_v59, %v23454_v51  ;;  %v15615_v28 = vadd.f32 %v15614_v31, %v15613_v58  ;;  %16433 = vmatmul.mubr.msk.bf16.gmra.mrb[208].mxu0 %vm3035_vm5, %v8146_v18 }
 0xc51   : > { %16436 = vmatprep.mubr.msk.bf16.mxu0 %vm18556_vm1, %v23065_v40 }
 0xc52   : > { %v8126_v10 = vadd.f32 %v23455_v11, %v8021_v42  ;;  %v8024_v3 = vadd.f32 %v15615_v28, %v23456_v14  ;;  %v17940_v28 = vld [vmem:[#allocation7 + $0xea8] ss:$24 sps:$4 sm:$0xff]   ;;  %v17948_v11 = vld [vmem:[#allocation7 + $0xedc] ss:$24 sps:$4 sm:$0xff]  }
 0xc54   : > { %v8129_v13 = vadd.f32 %v23457_v20, %v8024_v3  ;;  %v15616_v45 = vpop.f32.mrb[180].mxu0 }
 0xc55   : > { %v15617_v63 = vpop.f32.mrb[181].mxu0 }
 0xc56   : > { %v8147_v6 = vpack.c.bf16 %v8129_v13, %v8126_v10  ;;  %v15618_v46 = vadd.f32 %v15617_v63, %v15616_v45  ;;  %v15619_v39 = vpop.f32.mrb[182].mxu0  ;;  %v17946_v63 = vld [vmem:[#allocation7 + $0xed8] ss:$24 sps:$4 sm:$0xff]  }
 0xc57   : > { %v15620_v57 = vpop.f32.mrb[183].mxu0 }
 0xc58   : > { %v8029_v0 = vadd.f32 %v15618_v46, %v23458_v22  ;;  %v15621_v47 = vadd.f32 %v15620_v57, %v15619_v39  ;;  %16437 = vmatmul.mubr.msk.bf16.gmra.mrb[212].mxu0 %vm3035_vm5, %v8147_v6  ;;  %v17954_v6 = vld [vmem:[#allocation7 + $0xf0c] ss:$24 sps:$4 sm:$0xff]  }
 0xc59   : > { %16440 = vmatprep.mubr.msk.bf16.mxu0 %vm18556_vm1, %v23065_v40 }
 0xc5a   : > { %v8134_v7 = vadd.f32 %v21349_v5, %v8029_v0  ;;  %v8032_v16 = vadd.f32 %v15621_v47, %v23459_v37  ;;  %v15649_v5 = vpop.f32.mrb[80].mxu1 }
 0xc5b   : > { %v15650_v33 = vpop.f32.mrb[81].mxu1 }
 0xc5c   : > { %v8137_v4 = vadd.f32 %v21351_v8, %v8032_v16  ;;  %v21483_v54 = vadd.f32 %v15650_v33, %v15649_v5  ;;  %v15652_v8 = vpop.f32.mrb[82].mxu1  ;;  %v23460_v33 = vmov 0  }
 0xc5d   : > { %v15653_v60 = vpop.f32.mrb[83].mxu1 }
 0xc5e   : > { %v8148_v27 = vpack.c.bf16 %v8137_v4, %v8134_v7  ;;  %v21485_v35 = vadd.f32 %v15653_v60, %v15652_v8  ;;  %v15655_v9 = vpop.f32.mrb[84].mxu1  ;;  %v17952_v7 = vld [vmem:[#allocation7 + $0xf08] ss:$24 sps:$4 sm:$0xff]  }
 0xc5f   : > { %v15656_v49 = vpop.f32.mrb[85].mxu1 }
 0xc60   : > { %16441 = vmatmul.mubr.msk.bf16.gmra.mrb[216].mxu0 %vm3035_vm5, %v8148_v27  ;;  %v21487_v29 = vadd.f32 %v15656_v49, %v15655_v9  ;;  %v15658_v43 = vpop.f32.mrb[86].mxu1 }
 0xc61   : > { %8796 = vmatprep.mubr.bf16.mxu0 %v17906_v24  ;;  %v15659_v17 = vpop.f32.mrb[87].mxu1 }
 0xc62   : > { %v21489_v19 = vadd.f32 %v15659_v17, %v15658_v43  ;;  %v15661_v55 = vpop.f32.mrb[88].mxu1 }
 0xc63   : > { %v15662_v12 = vpop.f32.mrb[89].mxu1 }
 0xc64   : > { %v21491_v30 = vadd.f32 %v15662_v12, %v15661_v55  ;;  %v15664_v2 = vpop.f32.mrb[90].mxu1 }
 0xc65   : > { %v15665_v44 = vpop.f32.mrb[91].mxu1 }
 0xc66   : > { %v21493_v36 = vadd.f32 %v15665_v44, %v15664_v2  ;;  %v15667_v18 = vpop.f32.mrb[92].mxu1 }
 0xc67   : > { %v15668_v59 = vpop.f32.mrb[93].mxu1 }
 0xc68   : > { %8797 = vmatmul.mubr.bf16.vlgmr.msra.gmra.mrb[220].mxu0 %v17904_v34  ;;  %v21499_v58 = vadd.f32 %v15668_v59, %v15667_v18  ;;  %v15670_v31 = vpop.f32.mrb[94].mxu1 }
 0xc69   : > { %8804 = vmatprep.mubr.bf16.mxu0 %v17912_v38  ;;  %16445 = vmatpush3.bf16.msra.mxu0 %v17958_v61  ;;  %v15671_v51 = vpop.f32.mrb[95].mxu1 }
 0xc6a   : > { %16446 = vmatprep.subr.bf16.mxu0 %v23065_v40  ;;  %v21501_v42 = vadd.f32 %v15671_v51, %v15670_v31  ;;  %v15673_v10 = vpop.f32.mrb[96].mxu1 }
 0xc6b   : > { %v15674_v14 = vpop.f32.mrb[97].mxu1 }
 0xc6c   : > { %v21503_v3 = vadd.f32 %v15674_v14, %v15673_v10  ;;  %v15676_v20 = vpop.f32.mrb[98].mxu1 }
 0xc6d   : > { %v15677_v13 = vpop.f32.mrb[99].mxu1 }
 0xc6e   : > { %v21505_v45 = vadd.f32 %v15677_v13, %v15676_v20  ;;  %v15679_v46 = vpop.f32.mrb[100].mxu1 }
 0xc6f   : > { %v15680_v39 = vpop.f32.mrb[101].mxu1 }
 0xc70   : > { %8805 = vmatmul.mubr.bf16.gmra.mrb[224].mxu0 %v17910_v26  ;;  %v21507_v57 = vadd.f32 %v15680_v39, %v15679_v46  ;;  %v15682_v22 = vpop.f32.mrb[102].mxu1  ;;  %v17959_v26 = vld [vmem:[%s22830_s4 + $0x88] sm:$0xff]  }
 0xc71   : > { %8812 = vmatprep.mubr.bf16.mxu0 %v17918_v32  ;;  %v15683_v0 = vpop.f32.mrb[103].mxu1  ;;  %16447 = vmatpush3.bf16.msra.mxu0 %v17959_v26 }
 0xc72   : > { %v21509_v47 = vadd.f32 %v15683_v0, %v15682_v22  ;;  %v15685_v37 = vpop.f32.mrb[104].mxu1  ;;  %9423 = vmatprep.subr.bf16.mxu0 %v23460_v33  ;;  %v23474_v33 = vld [vmem:[#allocation86_spill] sm:$0xff] }
 0xc73   : > { %v15686_v16 = vpop.f32.mrb[105].mxu1 }
 0xc74   : > { %v21511_v4 = vadd.f32 %v15686_v16, %v15685_v37  ;;  %v15688_v24 = vpop.f32.mrb[106].mxu1 }
 0xc75   : > { %v15689_v27 = vpop.f32.mrb[107].mxu1 }
 0xc76   : > { %v21515_v34 = vadd.f32 %v15689_v27, %v15688_v24  ;;  %v23461_v24 = vld [vmem:[#allocation45_spill] sm:$0xff] }
 0xc78   : > { %8813 = vmatmul.mubr.bf16.gmra.mrb[228].mxu0 %v17916_v15 }
 0xc79   : > { %8820 = vmatprep.mubr.bf16.mxu0 %v17924_v62 }
 0xc80   : > { %8821 = vmatmul.mubr.bf16.gmra.mrb[232].mxu0 %v17922_v25 }
 0xc81   : > { %8828 = vmatprep.mubr.bf16.mxu0 %v17930_v56 }
 0xc88   : > { %8829 = vmatmul.mubr.bf16.gmra.mrb[236].mxu0 %v17928_v50 }
 0xc89   : > { %8836 = vmatprep.mubr.bf16.mxu0 %v17936_v21 }
 0xc90   : > { %8837 = vmatmul.mubr.bf16.gmra.mrb[240].mxu0 %v17934_v41 }
 0xc91   : > { %8844 = vmatprep.mubr.bf16.mxu0 %v17942_v23 }
 0xc98   : > { %8845 = vmatmul.mubr.bf16.gmra.mrb[244].mxu0 %v17940_v28 }
 0xc99   : > { %8852 = vmatprep.mubr.bf16.mxu0 %v17948_v11 }
 0xca0   : > { %8853 = vmatmul.mubr.bf16.gmra.mrb[248].mxu0 %v17946_v63 }
 0xca1   : > { %8860 = vmatprep.mubr.bf16.mxu0 %v17954_v6 }
 0xca6   : > { %v15691_v38 = vpop.f32.mrb[108].mxu1 }
 0xca7   : > { %v15692_v32 = vpop.f32.mrb[109].mxu1 }
 0xca8   : > { %8861 = vmatmul.mubr.bf16.gmra.mrb[252].mxu0 %v17952_v7  ;;  %v21520_v15 = vadd.f32 %v15692_v32, %v15691_v38  ;;  %v15694_v62 = vpop.f32.mrb[110].mxu1  ;;  %v23462_v32 = vld [vmem:[#allocation39_spill] sm:$0xff] }
 0xca9   : > { %16448 = vmatprep.mubr.msk.bf16.mxu0 %vm18556_vm1, %v23065_v40  ;;  %v15695_v5 = vpop.f32.mrb[111].mxu1 }
 0xcaa   : > { %v21523_v8 = vadd.f32 %v15695_v5, %v15694_v62 }
 0xcae   : > { %v15697_v60 = vpop.f32.mrb[112].mxu1 }
 0xcaf   : > { %v15698_v25 = vpop.f32.mrb[113].mxu1 }
 0xcb0   : > { %v21525_v56 = vadd.f32 %v15698_v25, %v15697_v60  ;;  %v15700_v9 = vpop.f32.mrb[114].mxu1 }
 0xcb1   : > { %v15701_v49 = vpop.f32.mrb[115].mxu1 }
 0xcb2   : > { %v21527_v43 = vadd.f32 %v15701_v49, %v15700_v9 }
 0xcb6   : > { %v21529_v17 = vpop.f32.mrb[116].mxu1 }
 0xcb7   : > { %v8905_v50 = vpop.f32.mrb[117].mxu1 }
 0xcb8   : > { %v21531_v21 = vpop.f32.mrb[118].mxu1 }
 0xcb9   : > { %v8908_v55 = vpop.f32.mrb[119].mxu1 }
 0xcbe   : > { %v21533_v12 = vpop.f32.mrb[120].mxu1 }
 0xcbf   : > { %v8913_v2 = vpop.f32.mrb[121].mxu1 }
 0xcc0   : > { %v21535_v44 = vpop.f32.mrb[122].mxu1 }
 0xcc1   : > { %v8916_v41 = vpop.f32.mrb[123].mxu1 }
 0xcc6   : > { %v21537_v61 = vpop.f32.mrb[124].mxu1 }
 0xcc7   : > { %v8921_v23 = vpop.f32.mrb[125].mxu1 }
 0xcc8   : > { %v21539_v18 = vpop.f32.mrb[126].mxu1  ;;  %v23463_v23 = vld [vmem:[#allocation48_spill] sm:$0xff] }
 0xcc9   : > { %v8924_v59 = vpop.f32.mrb[127].mxu1 }
 0xcce   : > { %v21541_v31 = vpop.f32.mrb[128].mxu1 }
 0xccf   : > { %v8929_v51 = vpop.f32.mrb[129].mxu1 }
 0xcd0   : > { %v21543_v28 = vpop.f32.mrb[130].mxu1 }
 0xcd1   : > { %v8932_v11 = vpop.f32.mrb[131].mxu1 }
 0xcd6   : > { %v21545_v10 = vpop.f32.mrb[132].mxu1 }
 0xcd7   : > { %v8937_v14 = vpop.f32.mrb[133].mxu1 }
 0xcd8   : > { %v21547_v20 = vpop.f32.mrb[134].mxu1 }
 0xcd9   : > { %v8940_v13 = vpop.f32.mrb[135].mxu1 }
 0xcde   : > { %v21549_v63 = vpop.f32.mrb[136].mxu1 }
 0xcdf   : > { %v8945_v6 = vpop.f32.mrb[137].mxu1 }
 0xce0   : > { %v21551_v46 = vpop.f32.mrb[138].mxu1 }
 0xce1   : > { %v8948_v39 = vpop.f32.mrb[139].mxu1 }
 0xce6   : > { %v21553_v22 = vpop.f32.mrb[140].mxu1 }
 0xce7   : > { %v8953_v0 = vpop.f32.mrb[141].mxu1 }
 0xce8   : > { %v21555_v7 = vpop.f32.mrb[142].mxu1 }
 0xce9   : > { %v8956_v37 = vpop.f32.mrb[143].mxu1 }
 0xcef   : > { %v21563_v60 = vpop.f32.mrb[144].mxu1 }
 0xcf0   : > { %v8961_v25 = vpop.f32.mrb[145].mxu1 }
 0xcf1   : > { %v21565_v9 = vpop.f32.mrb[146].mxu1 }
 0xcf2   : > { %v8964_v49 = vpop.f32.mrb[147].mxu1 }
 0xcf3   : > { %v8227_v16 = vpop.f32.mrb[184].mxu0 }
 0xcf4   : > { %v21558_v27 = vadd.f32 %v8227_v16, %v23461_v24  ;;  %v16410_v38 = vpop.f32.mrb[185].mxu0 }
 0xcf5   : > { %v8230_v26 = vpop.f32.mrb[186].mxu0 }
 0xcf6   : > { %v21561_v62 = vadd.f32 %v8230_v26, %v23462_v32  ;;  %v16411_v5 = vpop.f32.mrb[187].mxu0  ;;  %v23465_v32 = vld [vmem:[#allocation47_spill] sm:$0xff] }
 0xcf7   : > { %v21573_v11 = vpop.f32.mrb[148].mxu1 }
 0xcf8   : > { %v8969_v14 = vpop.f32.mrb[149].mxu1 }
 0xcf9   : > { %v21575_v13 = vpop.f32.mrb[150].mxu1 }
 0xcfa   : > { %v8972_v6 = vpop.f32.mrb[151].mxu1 }
 0xcfb   : > { %v8235_v50 = vpop.f32.mrb[188].mxu0  ;;  %v23467_v6 = vld [vmem:[#allocation41_spill] sm:$0xff] }
 0xcfc   : > { %v21568_v55 = vadd.f32 %v8235_v50, %v21344_v1  ;;  %v16414_v2 = vpop.f32.mrb[189].mxu0  ;;  %v23464_v1 = vld [vmem:[#allocation40_spill] sm:$0xff] }
 0xcfd   : > { %v8238_v41 = vpop.f32.mrb[190].mxu0 }
 0xcfe   : > { %v21571_v59 = vadd.f32 %v8238_v41, %v23463_v23  ;;  %v16415_v51 = vpop.f32.mrb[191].mxu0  ;;  %v23466_v23 = vld [vmem:[#allocation70_spill] sm:$0xff] }
 0xd03   : > { %v8243_v39 = vpop.f32.mrb[192].mxu0 }
 0xd04   : > { %v21578_v0 = vadd.f32 %v8243_v39, %v21354_v53  ;;  %v16418_v37 = vpop.f32.mrb[193].mxu0 }
 0xd05   : > { %v8246_v16 = vpop.f32.mrb[194].mxu0 }
 0xd06   : > { %v21581_v24 = vadd.f32 %v8246_v16, %v23464_v1  ;;  %v16419_v38 = vpop.f32.mrb[195].mxu0  ;;  %v23469_v1 = vld [vmem:[#allocation87_spill] sm:$0xff] }
 0xd0b   : > { %v8251_v26 = vpop.f32.mrb[196].mxu0 }
 0xd0c   : > { %v21584_v5 = vadd.f32 %v8251_v26, %v23465_v32  ;;  %v16422_v25 = vpop.f32.mrb[197].mxu0 }
 0xd0d   : > { %v8254_v49 = vpop.f32.mrb[198].mxu0 }
 0xd0e   : > { %v21587_v50 = vadd.f32 %v8254_v49, %v21363_v52  ;;  %v16423_v2 = vpop.f32.mrb[199].mxu0 }
 0xd0f   : > { %v23472_v2 = vld [vmem:[#allocation54_spill] sm:$0xff] }
 0xd13   : > { %v8259_v41 = vpop.f32.mrb[200].mxu0 }
 0xd14   : > { %v21590_v53 = vadd.f32 %v8259_v41, %v23466_v23  ;;  %v16426_v51 = vpop.f32.mrb[201].mxu0 }
 0xd15   : > { %v8262_v14 = vpop.f32.mrb[202].mxu0 }
 0xd16   : > { %v21593_v39 = vadd.f32 %v8262_v14, %v23467_v6  ;;  %v16427_v37 = vpop.f32.mrb[203].mxu0 }
 0xd18   : > { %23468 = vst [vmem:[#allocation73_spill] sm:$0xff] %v21593_v39  ;;  %v23476_v39 = vld [vmem:[#allocation55_spill] sm:$0xff] }
 0xd1b   : > { %v8267_v16 = vpop.f32.mrb[204].mxu0 }
 0xd1c   : > { %v21596_v38 = vadd.f32 %v8267_v16, %v23469_v1  ;;  %v16430_v26 = vpop.f32.mrb[205].mxu0 }
 0xd1d   : > { %v8270_v32 = vpop.f32.mrb[206].mxu0 }
 0xd1e   : > { %23470 = vst [vmem:[#allocation72_spill] sm:$0xff] %v21596_v38  ;;  %v21599_v52 = vadd.f32 %v8270_v32, %v21377_v48  ;;  %v16431_v25 = vpop.f32.mrb[207].mxu0  ;;  %v23478_v38 = vld [vmem:[#allocation71_spill] sm:$0xff] }
 0xd20   : > { %23471 = vst [vmem:[#allocation75_spill] sm:$0xff] %v21599_v52  ;;  %v23479_v52 = vld [vmem:[#allocation49_spill] sm:$0xff] }
 0xd23   : > { %v8275_v49 = vpop.f32.mrb[208].mxu0 }
 0xd24   : > { %v21602_v41 = vadd.f32 %v8275_v49, %v23472_v2  ;;  %v16434_v23 = vpop.f32.mrb[209].mxu0 }
 0xd25   : > { %v8278_v51 = vpop.f32.mrb[210].mxu0 }
 0xd26   : > { %23473 = vst [vmem:[#allocation74_spill] sm:$0xff] %v21602_v41  ;;  %v21605_v14 = vadd.f32 %v8278_v51, %v23474_v33  ;;  %v16435_v6 = vpop.f32.mrb[211].mxu0  ;;  %v23481_v41 = vld [vmem:[#allocation85_spill] sm:$0xff] }
 0xd28   : > { %23475 = vst [vmem:[#allocation59_spill] sm:$0xff] %v21605_v14 }
 0xd2b   : > { %v8283_v37 = vpop.f32.mrb[212].mxu0 }
 0xd2c   : > { %v21608_v16 = vadd.f32 %v8283_v37, %v23476_v39  ;;  %v16438_v1 = vpop.f32.mrb[213].mxu0 }
 0xd2d   : > { %v8286_v26 = vpop.f32.mrb[214].mxu0 }
 0xd2e   : > { %23477 = vst [vmem:[#allocation60_spill] sm:$0xff] %v21608_v16  ;;  %v21611_v48 = vadd.f32 %v8286_v26, %v23478_v38  ;;  %v16439_v32 = vpop.f32.mrb[215].mxu0 }
 0xd33   : > { %v8291_v25 = vpop.f32.mrb[216].mxu0 }
 0xd34   : > { %v21614_v49 = vadd.f32 %v8291_v25, %v23479_v52  ;;  %v16442_v2 = vpop.f32.mrb[217].mxu0 }
 0xd35   : > { %v8294_v23 = vpop.f32.mrb[218].mxu0 }
 0xd36   : > { %23480 = vst [vmem:[#allocation67_spill] sm:$0xff] %v21614_v49  ;;  %v21617_v33 = vadd.f32 %v8294_v23, %v23481_v41  ;;  %v16443_v51 = vpop.f32.mrb[219].mxu0 }
 0xd38   : > { %23482 = vst [vmem:[#allocation77_spill] sm:$0xff] %v21617_v33 }
 0xd3b   : > { %v15719_v6 = vpop.f32.mrb[220].mxu0 }
 0xd3c   : > { %v15720_v14 = vpop.f32.mrb[221].mxu0 }
 0xd3d   : > { %v15721_v39 = vadd.f32 %v15720_v14, %v15719_v6  ;;  %v15722_v37 = vpop.f32.mrb[222].mxu0 }
 0xd3e   : > { %v15723_v1 = vpop.f32.mrb[223].mxu0 }
 0xd3f   : > { %v8799_v16 = vadd.f32 %v15721_v39, %v21483_v54  ;;  %v15724_v38 = vadd.f32 %v15723_v1, %v15722_v37 }
 0xd41   : > { %v8904_v26 = vadd.f32 %v21529_v17, %v8799_v16  ;;  %v8802_v32 = vadd.f32 %v15724_v38, %v21485_v35 }
 0xd43   : > { %v8907_v52 = vadd.f32 %v21531_v21, %v8802_v32  ;;  %v15725_v25 = vpop.f32.mrb[224].mxu0 }
 0xd44   : > { %v15726_v2 = vpop.f32.mrb[225].mxu0 }
 0xd45   : > { %v8974_v49 = vpack.c.bf16 %v8907_v52, %v8904_v26  ;;  %v15727_v41 = vadd.f32 %v15726_v2, %v15725_v25  ;;  %v15728_v23 = vpop.f32.mrb[226].mxu0 }
 0xd46   : > { %v15729_v51 = vpop.f32.mrb[227].mxu0 }
 0xd47   : > { %v8807_v33 = vadd.f32 %v15727_v41, %v21487_v29  ;;  %v15730_v14 = vadd.f32 %v15729_v51, %v15728_v23  ;;  %16449 = vmatmul.mubr.msk.bf16.vlgmr.msra.gmra.mrb[0].mxu0 %vm3035_vm5, %v8974_v49 }
 0xd48   : > { %16452 = vmatprep.mubr.msk.bf16.mxu0 %vm18556_vm1, %v23065_v40 }
 0xd49   : > { %v8912_v54 = vadd.f32 %v21533_v12, %v8807_v33  ;;  %v8810_v35 = vadd.f32 %v15730_v14, %v21489_v19 }
 0xd4b   : > { %v8915_v17 = vadd.f32 %v21535_v44, %v8810_v35  ;;  %v15731_v21 = vpop.f32.mrb[228].mxu0 }
 0xd4c   : > { %v15732_v16 = vpop.f32.mrb[229].mxu0 }
 0xd4d   : > { %v8975_v6 = vpack.c.bf16 %v8915_v17, %v8912_v54  ;;  %v15733_v39 = vadd.f32 %v15732_v16, %v15731_v21  ;;  %v15734_v37 = vpop.f32.mrb[230].mxu0 }
 0xd4e   : > { %v15735_v1 = vpop.f32.mrb[231].mxu0 }
 0xd4f   : > { %v8815_v29 = vadd.f32 %v15733_v39, %v21491_v30  ;;  %v15736_v38 = vadd.f32 %v15735_v1, %v15734_v37  ;;  %16453 = vmatmul.mubr.msk.bf16.gmra.mrb[4].mxu0 %vm3035_vm5, %v8975_v6 }
 0xd50   : > { %16456 = vmatprep.mubr.msk.bf16.mxu0 %vm18556_vm1, %v23065_v40 }
 0xd51   : > { %v8920_v12 = vadd.f32 %v21537_v61, %v8815_v29  ;;  %v8818_v19 = vadd.f32 %v15736_v38, %v21493_v36 }
 0xd53   : > { %v8923_v44 = vadd.f32 %v21539_v18, %v8818_v19  ;;  %v15737_v49 = vpop.f32.mrb[232].mxu0 }
 0xd54   : > { %v15738_v33 = vpop.f32.mrb[233].mxu0 }
 0xd55   : > { %v8976_v26 = vpack.c.bf16 %v8923_v44, %v8920_v12  ;;  %v15739_v32 = vadd.f32 %v15738_v33, %v15737_v49  ;;  %v15740_v52 = vpop.f32.mrb[234].mxu0 }
 0xd56   : > { %v15741_v25 = vpop.f32.mrb[235].mxu0 }
 0xd57   : > { %v8823_v30 = vadd.f32 %v15739_v32, %v21499_v58  ;;  %v15742_v2 = vadd.f32 %v15741_v25, %v15740_v52  ;;  %16457 = vmatmul.mubr.msk.bf16.gmra.mrb[8].mxu0 %vm3035_vm5, %v8976_v26 }
 0xd58   : > { %16460 = vmatprep.mubr.msk.bf16.mxu0 %vm18556_vm1, %v23065_v40 }
 0xd59   : > { %v8928_v61 = vadd.f32 %v21541_v31, %v8823_v30  ;;  %v8826_v36 = vadd.f32 %v15742_v2, %v21501_v42 }
 0xd5b   : > { %v8931_v18 = vadd.f32 %v21543_v28, %v8826_v36  ;;  %v15743_v41 = vpop.f32.mrb[236].mxu0 }
 0xd5c   : > { %v15744_v23 = vpop.f32.mrb[237].mxu0 }
 0xd5d   : > { %v8977_v51 = vpack.c.bf16 %v8931_v18, %v8928_v61  ;;  %v15745_v14 = vadd.f32 %v15744_v23, %v15743_v41  ;;  %v15746_v54 = vpop.f32.mrb[238].mxu0 }
 0xd5e   : > { %v15747_v35 = vpop.f32.mrb[239].mxu0 }
 0xd5f   : > { %v8831_v58 = vadd.f32 %v15745_v14, %v21503_v3  ;;  %v15748_v17 = vadd.f32 %v15747_v35, %v15746_v54  ;;  %16461 = vmatmul.mubr.msk.bf16.gmra.mrb[12].mxu0 %vm3035_vm5, %v8977_v51 }
 0xd60   : > { %16464 = vmatprep.mubr.msk.bf16.mxu0 %vm18556_vm1, %v23065_v40 }
 0xd61   : > { %v8936_v31 = vadd.f32 %v21545_v10, %v8831_v58  ;;  %v8834_v42 = vadd.f32 %v15748_v17, %v21505_v45  ;;  %v17960_v17 = vld [vmem:[#allocation10] sm:$0xff]  }
 0xd62   : > { %16485 = vmatpush3.bf16.msra.mxu1 %v17960_v17 }
 0xd63   : > { %v8939_v28 = vadd.f32 %v21547_v20, %v8834_v42  ;;  %v15749_v21 = vpop.f32.mrb[240].mxu0  ;;  %16486 = vmatprep.subr.bf16.mxu1 %v23065_v40 }
 0xd64   : > { %v15750_v16 = vpop.f32.mrb[241].mxu0 }
 0xd65   : > { %v8978_v6 = vpack.c.bf16 %v8939_v28, %v8936_v31  ;;  %v15751_v39 = vadd.f32 %v15750_v16, %v15749_v21  ;;  %v15752_v37 = vpop.f32.mrb[242].mxu0 }
 0xd66   : > { %v15753_v1 = vpop.f32.mrb[243].mxu0 }
 0xd67   : > { %v8839_v3 = vadd.f32 %v15751_v39, %v21507_v57  ;;  %v15754_v29 = vadd.f32 %v15753_v1, %v15752_v37  ;;  %16465 = vmatmul.mubr.msk.bf16.gmra.mrb[16].mxu0 %vm3035_vm5, %v8978_v6 }
 0xd68   : > { %16468 = vmatprep.mubr.msk.bf16.mxu0 %vm18556_vm1, %v23065_v40 }
 0xd69   : > { %v8944_v10 = vadd.f32 %v21549_v63, %v8839_v3  ;;  %v8842_v45 = vadd.f32 %v15754_v29, %v21509_v47  ;;  %v21686_v3 = vld [vmem:[#allocation8] ss:$0 sm:$0xff] }
 0xd6b   : > { %v8947_v20 = vadd.f32 %v21551_v46, %v8842_v45  ;;  %v15755_v38 = vpop.f32.mrb[244].mxu0 }
 0xd6c   : > { %v15756_v12 = vpop.f32.mrb[245].mxu0 }
 0xd6d   : > { %v8979_v19 = vpack.c.bf16 %v8947_v20, %v8944_v10  ;;  %v15757_v44 = vadd.f32 %v15756_v12, %v15755_v38  ;;  %v15758_v49 = vpop.f32.mrb[246].mxu0 }
 0xd6e   : > { %v15759_v33 = vpop.f32.mrb[247].mxu0 }
 0xd6f   : > { %v8847_v57 = vadd.f32 %v15757_v44, %v21511_v4  ;;  %v15760_v26 = vadd.f32 %v15759_v33, %v15758_v49  ;;  %16469 = vmatmul.mubr.msk.bf16.gmra.mrb[20].mxu0 %vm3035_vm5, %v8979_v19 }
 0xd70   : > { %16472 = vmatprep.mubr.msk.bf16.mxu0 %vm18556_vm1, %v23065_v40 }
 0xd71   : > { %v8952_v63 = vadd.f32 %v21553_v22, %v8847_v57  ;;  %v8850_v47 = vadd.f32 %v15760_v26, %v21515_v34 }
 0xd73   : > { %v8955_v46 = vadd.f32 %v21555_v7, %v8850_v47  ;;  %v15761_v32 = vpop.f32.mrb[248].mxu0 }
 0xd74   : > { %v15762_v52 = vpop.f32.mrb[249].mxu0 }
 0xd75   : > { %v8980_v25 = vpack.c.bf16 %v8955_v46, %v8952_v63  ;;  %v15763_v30 = vadd.f32 %v15762_v52, %v15761_v32  ;;  %v15764_v2 = vpop.f32.mrb[250].mxu0 }
 0xd76   : > { %v15765_v61 = vpop.f32.mrb[251].mxu0 }
 0xd77   : > { %v8855_v4 = vadd.f32 %v15763_v30, %v21520_v15  ;;  %v15766_v36 = vadd.f32 %v15765_v61, %v15764_v2  ;;  %16473 = vmatmul.mubr.msk.bf16.gmra.mrb[24].mxu0 %vm3035_vm5, %v8980_v25 }
 0xd78   : > { %16476 = vmatprep.mubr.msk.bf16.mxu0 %vm18556_vm1, %v23065_v40 }
 0xd79   : > { %v8960_v22 = vadd.f32 %v21563_v60, %v8855_v4  ;;  %v8858_v34 = vadd.f32 %v15766_v36, %v21523_v8 }
 0xd7b   : > { %v8963_v7 = vadd.f32 %v21565_v9, %v8858_v34  ;;  %v15767_v18 = vpop.f32.mrb[252].mxu0 }
 0xd7c   : > { %v15768_v41 = vpop.f32.mrb[253].mxu0 }
 0xd7d   : > { %v8981_v23 = vpack.c.bf16 %v8963_v7, %v8960_v22  ;;  %v15769_v51 = vadd.f32 %v15768_v41, %v15767_v18  ;;  %v15770_v14 = vpop.f32.mrb[254].mxu0 }
 0xd7e   : > { %v15771_v54 = vpop.f32.mrb[255].mxu0 }
 0xd7f   : > { %v8863_v15 = vadd.f32 %v15769_v51, %v21525_v56  ;;  %v15772_v35 = vadd.f32 %v15771_v54, %v15770_v14  ;;  %16477 = vmatmul.mubr.msk.bf16.gmra.mrb[28].mxu0 %vm3035_vm5, %v8981_v23  ;;  %v17961_v56 = vld [vmem:[#allocation10 + $0x8] sm:$0xff]   ;;  %v23483_v54 = vld [vmem:[#allocation73_spill] sm:$0xff] }
 0xd80   : > { %16480 = vmatprep.mubr.msk.bf16.mxu0 %vm18556_vm1, %v23065_v40  ;;  %16487 = vmatpush3.bf16.msra.mxu1 %v17961_v56 }
 0xd81   : > { %v8968_v60 = vadd.f32 %v21573_v11, %v8863_v15  ;;  %v8866_v8 = vadd.f32 %v15772_v35, %v21527_v43  ;;  %16492 = vmatprep.subr.bf16.mxu1 %v23065_v40 }
 0xd83   : > { %v8971_v9 = vadd.f32 %v21575_v13, %v8866_v8 }
 0xd85   : > { %v8982_v58 = vpack.c.bf16 %v8971_v9, %v8968_v60 }
 0xd87   : > { %16481 = vmatmul.mubr.msk.bf16.gmra.mrb[32].mxu0 %vm3035_vm5, %v8982_v58 }
 0xe1a   : > { %v9061_v31 = vpop.f32.mrb[0].mxu0 }
 0xe1b   : > { %v9132_v42 = vadd.f32 %v9061_v31, %v21558_v27  ;;  %v16450_v28 = vpop.f32.mrb[1].mxu0 }
 0xe1c   : > { %v9064_v11 = vpop.f32.mrb[2].mxu0  ;;  %v23484_v28 = vld [vmem:[#allocation72_spill] sm:$0xff] }
 0xe1d   : > { %v9133_v43 = vadd.f32 %v9064_v11, %v21561_v62  ;;  %v16451_v21 = vpop.f32.mrb[3].mxu0  ;;  %v21693_v62 = vadd.f32 %v21686_v3, %v9132_v42 }
 0xe1f   : > { %v21689_v10 = vadd.f32 %v21686_v3, %v9133_v43  ;;  %v9175_v19 = vmax.f32 %v21693_v62, 0.0 }
 0xe21   : > { %v9176_v12 = vmax.f32 %v21689_v10, 0.0  ;;  %v9193_v47 = vsel %vm3035_vm5, %v9175_v19, 0.0 }
 0xe22   : > { %v9069_v13 = vpop.f32.mrb[4].mxu0 }
 0xe23   : > { %v9134_v16 = vadd.f32 %v9069_v13, %v21568_v55  ;;  %v16454_v6 = vpop.f32.mrb[5].mxu0  ;;  %v9194_v33 = vsel %vm3035_vm5, %v9176_v12, 0.0 }
 0xe24   : > { %v9072_v39 = vpop.f32.mrb[6].mxu0  ;;  %v9195_v30 = vadd.f32 %v9194_v33, %v9193_v47 }
 0xe25   : > { %v9135_v37 = vadd.f32 %v9072_v39, %v21571_v59  ;;  %v16455_v1 = vpop.f32.mrb[7].mxu0  ;;  %v21696_v55 = vadd.f32 %v21686_v3, %v9134_v16  ;;  %v23485_v39 = vld [vmem:[#allocation75_spill] sm:$0xff] }
 0xe27   : > { %v9177_v44 = vmax.f32 %v21696_v55, 0.0  ;;  %v21703_v49 = vadd.f32 %v21686_v3, %v9135_v37 }
 0xe29   : > { %v9196_v46 = vsel %vm3035_vm5, %v9177_v44, 0.0  ;;  %v9178_v32 = vmax.f32 %v21703_v49, 0.0 }
 0xe2a   : > { %v9077_v29 = vpop.f32.mrb[8].mxu0  ;;  %v9197_v61 = vadd.f32 %v9196_v46, %v9195_v30  ;;  %v23487_v30 = vld [vmem:[#allocation59_spill] sm:$0xff] }
 0xe2b   : > { %v9136_v27 = vadd.f32 %v9077_v29, %v21578_v0  ;;  %v16458_v45 = vpop.f32.mrb[9].mxu0  ;;  %v9198_v4 = vsel %vm3035_vm5, %v9178_v32, 0.0 }
 0xe2c   : > { %v9080_v20 = vpop.f32.mrb[10].mxu0  ;;  %v9199_v41 = vadd.f32 %v9198_v4, %v9197_v61 }
 0xe2d   : > { %v9137_v38 = vadd.f32 %v9080_v20, %v21581_v24  ;;  %v16459_v59 = vpop.f32.mrb[11].mxu0  ;;  %v21709_v57 = vadd.f32 %v21686_v3, %v9136_v27 }
 0xe2f   : > { %v9179_v2 = vmax.f32 %v21709_v57, 0.0 }
 0xe32   : > { %v9085_v0 = vpop.f32.mrb[12].mxu0 }
 0xe33   : > { %v9138_v24 = vadd.f32 %v9085_v0, %v21584_v5  ;;  %v16462_v26 = vpop.f32.mrb[13].mxu0  ;;  %v21722_v5 = vadd.f32 %v21686_v3, %v9137_v38 }
 0xe34   : > { %v9088_v63 = vpop.f32.mrb[14].mxu0 }
 0xe35   : > { %v9139_v52 = vadd.f32 %v9088_v63, %v21587_v50  ;;  %v16463_v25 = vpop.f32.mrb[15].mxu0  ;;  %v21728_v36 = vadd.f32 %v21686_v3, %v9138_v24  ;;  %v9200_v50 = vsel %vm3035_vm5, %v9179_v2, 0.0  ;;  %v9180_v34 = vmax.f32 %v21722_v5, 0.0  ;;  %v23486_v24 = vld [vmem:[#allocation74_spill] sm:$0xff] }
 0xe36   : > { %v9201_v60 = vadd.f32 %v9200_v50, %v9199_v41 }
 0xe37   : > { %v9181_v51 = vmax.f32 %v21728_v36, 0.0  ;;  %v21737_v14 = vadd.f32 %v21686_v3, %v9139_v52  ;;  %v9202_v8 = vsel %vm3035_vm5, %v9180_v34, 0.0 }
 0xe38   : > { %v9203_v17 = vadd.f32 %v9202_v8, %v9201_v60 }
 0xe39   : > { %v9182_v58 = vmax.f32 %v21737_v14, 0.0 }
 0xe3a   : > { %v9093_v22 = vpop.f32.mrb[16].mxu0 }
 0xe3b   : > { %v9140_v7 = vadd.f32 %v9093_v22, %v21590_v53  ;;  %v16466_v18 = vpop.f32.mrb[17].mxu0  ;;  %v9204_v53 = vsel %vm3035_vm5, %v9181_v51, 0.0  ;;  %v9206_v16 = vsel %vm3035_vm5, %v9182_v58, 0.0 }
 0xe3c   : > { %v9096_v23 = vpop.f32.mrb[18].mxu0  ;;  %v9205_v21 = vadd.f32 %v9204_v53, %v9203_v17 }
 0xe3d   : > { %v9141_v15 = vadd.f32 %v9096_v23, %v23483_v54  ;;  %v16467_v35 = vpop.f32.mrb[19].mxu0  ;;  %v21744_v9 = vadd.f32 %v21686_v3, %v9140_v7 }
 0xe3e   : > { %v9207_v45 = vadd.f32 %v9206_v16, %v9205_v21  ;;  %v23488_v35 = vld [vmem:[#allocation60_spill] sm:$0xff] }
 0xe3f   : > { %v9183_v31 = vmax.f32 %v21744_v9, 0.0  ;;  %v21752_v42 = vadd.f32 %v21686_v3, %v9141_v15 }
 0xe41   : > { %v9208_v29 = vsel %vm3035_vm5, %v9183_v31, 0.0  ;;  %v9184_v27 = vmax.f32 %v21752_v42, 0.0 }
 0xe42   : > { %v9101_v56 = vpop.f32.mrb[20].mxu0  ;;  %v9209_v59 = vadd.f32 %v9208_v29, %v9207_v45 }
 0xe43   : > { %v9142_v11 = vadd.f32 %v9101_v56, %v23484_v28  ;;  %v16470_v43 = vpop.f32.mrb[21].mxu0  ;;  %v9210_v33 = vsel %vm3035_vm5, %v9184_v27, 0.0 }
 0xe44   : > { %v9104_v13 = vpop.f32.mrb[22].mxu0  ;;  %v9211_v22 = vadd.f32 %v9210_v33, %v9209_v59 }
 0xe45   : > { %v21759_v6 = vadd.f32 %v21686_v3, %v9142_v11  ;;  %v9143_v37 = vadd.f32 %v9104_v13, %v23485_v39  ;;  %v16471_v1 = vpop.f32.mrb[23].mxu0 }
 0xe47   : > { %v9185_v20 = vmax.f32 %v21759_v6, 0.0  ;;  %v21768_v38 = vadd.f32 %v21686_v3, %v9143_v37 }
 0xe49   : > { %v9212_v46 = vsel %vm3035_vm5, %v9185_v20, 0.0  ;;  %v9186_v52 = vmax.f32 %v21768_v38, 0.0  ;;  %v17964_v38 = vld [vmem:[%s22834_s8 + $0x20] ss:$8 sps:$4 sm:$0xff]  }
 0xe4a   : > { %v9109_v0 = vpop.f32.mrb[24].mxu0  ;;  %v9213_v18 = vadd.f32 %v9212_v46, %v9211_v22 }
 0xe4b   : > { %v9144_v26 = vadd.f32 %v9109_v0, %v23486_v24  ;;  %v16474_v63 = vpop.f32.mrb[25].mxu0  ;;  %v9214_v41 = vsel %vm3035_vm5, %v9186_v52, 0.0 }
 0xe4c   : > { %v9112_v47 = vpop.f32.mrb[26].mxu0  ;;  %v9215_v53 = vadd.f32 %v9214_v41, %v9213_v18  ;;  %v23490_v63 = vld [vmem:[#allocation77_spill] sm:$0xff] }
 0xe4d   : > { %v21779_v25 = vadd.f32 %v21686_v3, %v9144_v26  ;;  %v9145_v61 = vadd.f32 %v9112_v47, %v23487_v30  ;;  %v16475_v4 = vpop.f32.mrb[27].mxu0 }
 0xe4f   : > { %v9187_v50 = vmax.f32 %v21779_v25, 0.0  ;;  %v21784_v7 = vadd.f32 %v21686_v3, %v9145_v61  ;;  %v17969_v25 = vld [vmem:[%s22834_s8 + $0x34] ss:$8 sps:$4 sm:$0x1f]  }
 0xe51   : > { %v9216_v54 = vsel %vm3035_vm5, %v9187_v50, 0.0  ;;  %v9188_v15 = vmax.f32 %v21784_v7, 0.0  ;;  %v17967_v7 = vld [vmem:[%s22834_s8 + $0x30] ss:$8 sps:$4 sm:$0x1f]  }
 0xe52   : > { %v9117_v23 = vpop.f32.mrb[28].mxu0  ;;  %v9217_v43 = vadd.f32 %v9216_v54, %v9215_v53 }
 0xe53   : > { %v9146_v60 = vadd.f32 %v9117_v23, %v23488_v35  ;;  %v16478_v8 = vpop.f32.mrb[29].mxu0  ;;  %v9218_v21 = vsel %vm3035_vm5, %v9188_v15, 0.0 }
 0xe54   : > { %v9120_v17 = vpop.f32.mrb[30].mxu0  ;;  %v9219_v1 = vadd.f32 %v9218_v21, %v9217_v43  ;;  %v17963_v21 = vld [vmem:[#allocation11 + $0x8] sm:$0xff]  }
 0xe55   : > { %v21795_v56 = vadd.f32 %v21686_v3, %v9146_v60  ;;  %v9147_v28 = vadd.f32 %v9120_v17, %v21611_v48  ;;  %v16479_v11 = vpop.f32.mrb[31].mxu0  ;;  %v23489_v48 = vld [vmem:[#allocation67_spill] sm:$0xff] }
 0xe56   : > { %v17962_v11 = vld [vmem:[#allocation11] sm:$0xff]  }
 0xe57   : > { %v9189_v13 = vmax.f32 %v21795_v56, 0.0  ;;  %v21803_v16 = vadd.f32 %v21686_v3, %v9147_v28  ;;  %v17978_v56 = vld [vmem:[%s22834_s8 + $0x44] ss:$8 sps:$4 sm:$0xff]  }
 0xe59   : > { %v9220_v39 = vsel %vm3035_vm5, %v9189_v13, 0.0  ;;  %v9190_v37 = vmax.f32 %v21803_v16, 0.0  ;;  %v17981_v16 = vld [vmem:[%s22834_s8 + $0x54] ss:$8 sps:$4 sm:$0x1f]  }
 0xe5a   : > { %v9125_v29 = vpop.f32.mrb[32].mxu0  ;;  %v9221_v0 = vadd.f32 %v9220_v39, %v9219_v1  ;;  %v23491_v39 = vmov 0  }
 0xe5b   : > { %v9148_v45 = vadd.f32 %v9125_v29, %v23489_v48  ;;  %v16482_v59 = vpop.f32.mrb[33].mxu0  ;;  %v9222_v24 = vsel %vm3035_vm5, %v9190_v37, 0.0 }
 0xe5c   : > { %v9128_v33 = vpop.f32.mrb[34].mxu0  ;;  %v9223_v4 = vadd.f32 %v9222_v24, %v9221_v0  ;;  %v17972_v24 = vld [vmem:[%s22834_s8 + $0x4] ss:$8 sps:$4 sm:$0xff]  }
 0xe5d   : > { %v21814_v26 = vadd.f32 %v21686_v3, %v9148_v45  ;;  %v9149_v47 = vadd.f32 %v9128_v33, %v23490_v63  ;;  %v16483_v46 = vpop.f32.mrb[35].mxu0  ;;  %v17966_v33 = vld [vmem:[%s22834_s8 + $0x24] ss:$8 sps:$4 sm:$0xff]   ;;  %13958 = vmatprep.mubr.msk.bf16.mxu0 %vm9416_vm6, %v17972_v24 }
 0xe5f   : > { %v9191_v30 = vmax.f32 %v21814_v26, 0.0  ;;  %v21819_v61 = vadd.f32 %v21686_v3, %v9149_v47  ;;  %v17984_v26 = vld [vmem:[%s22834_s8 + $0x84] ss:$8 sps:$4 sm:$0xff]  }
 0xe61   : > { %v9224_v22 = vsel %vm3035_vm5, %v9191_v30, 0.0  ;;  %v9192_v18 = vmax.f32 %v21819_v61, 0.0  ;;  %v17987_v61 = vld [vmem:[%s22834_s8 + $0x94] ss:$8 sps:$4 sm:$0x1f]  }
 0xe62   : > { %v9225_v41 = vadd.f32 %v9224_v22, %v9223_v4 }
 0xe63   : > { %v9226_v23 = vsel %vm3035_vm5, %v9192_v18, 0.0 }
 0xe64   : > { %v9227_v54 = vadd.f32 %v9226_v23, %v9225_v41 }
 0xe66   : > { %v9228_v35 = vrot.slane %v9227_v54, 4 }
 0xe68   : > { %v9229_v60 = vadd.f32 %v9228_v35, %v9227_v54  ;;  %v9363_v54 = vlaneseq }
 0xe6a   : > { %v9230_v8 = vrot.slane %v9229_v60, 2  ;;  %v21842_v35 = vshrl.u32 %v9363_v54, 7 }
 0xe6c   : > { %v9231_v53 = vadd.f32 %v9230_v8, %v9229_v60  ;;  %v9365_v60 = vsub.s32 0, %v21842_v35  ;;  %v18046_v35 = vld [vmem:[%s23492_s24 + $0x8] sm:$0xff]  }
 0xe6e   : > { %v9232_v17 = vrot.slane %v9231_v53, 1 }
 0xe70   : > { %v9233_v3 = vadd.f32 %v9232_v17, %v9231_v53 }
 0xe72   : > { %v9235_v28 = vmul.f32 0.0069444445, %v9233_v3 }
 0xe74   : > { %v9236_v43 = vpack.c.bf16 %v9235_v28, %v9235_v28 }
 0xe76   : > { %16489 = vmatmul.mubr.msk.bf16.vlgmr.msra.gmra.mrb[152].mxu1 %vm3035_vm5, %v9236_v43 }
 0xe77   : > { %16493 = vmatpush3.bf16.msra.mxu1 %v17962_v11  ;;  %16496 = vmatprep.mubr.msk.bf16.mxu1 %vm18556_vm1, %v23065_v40 }
 0xe78   : > { %16494 = vmatprep.subr.bf16.mxu1 %v23065_v40 }
 0xe7b   : > { %16495 = vmatpush3.bf16.msra.mxu1 %v17963_v21  ;;  %v17990_v21 = vld [vmem:[%s22834_s8 + $0xa4] ss:$8 sps:$4 sm:$0xff]  }
 0xe7c   : > { %9507 = vmatprep.subr.bf16.mxu1 %v23491_v39 }
 0xf49   : > { %v9290_v1 = vpop.f32.mrb[152].mxu1 }
 0xf4a   : > { %v9296_v29 = vmax.f32 %v9290_v1, 0.0  ;;  %v16490_v48 = vpop.f32.mrb[153].mxu1  ;;  %v17991_v1 = vld [vmem:[%s22835_s9 + $0x10] sm:$0xff]  }
 0xf4b   : > { %v9293_v45 = vpop.f32.mrb[154].mxu1  ;;  %v17993_v48 = vld [vmem:[%s22835_s9] sm:$0xff]  }
 0xf4c   : > { %v9297_v59 = vpack.c.bf16 %v9296_v29, %v9296_v29  ;;  %v16491_v0 = vpop.f32.mrb[155].mxu1  ;;  %v17992_v29 = vld [vmem:[%s22835_s9 + $0x18] sm:$0xff]   ;;  %v17988_v45 = vld [vmem:[%s22834_s8 + $0xa0] ss:$8 sps:$4 sm:$0xff]  }
 0xf4d   : > { %v18005_v0 = vld [vmem:[%s22834_s8 + $0xb4] ss:$8 sps:$4 sm:$0x1f]  }
 0xf4e   : > { %16497 = vmatmul.mubr.msk.bf16.vlgmr.msra.gmra.mrb[156].mxu1 %vm3035_vm5, %v9297_v59  ;;  %v18003_v59 = vld [vmem:[%s22834_s8 + $0xb0] ss:$8 sps:$4 sm:$0x1f]  }
 0xf4f   : > { %13968 = vmatprep.mubr.msk.bf16.mxu1 %vm9416_vm6, %v17966_v33 }
0x1021   : > { %v9351_v63 = vpop.f32.mrb[156].mxu1 }
0x1022   : > { %v13953_v47 = vmul.f32 -1.442695, %v9351_v63  ;;  %v16498_v46 = vpop.f32.mrb[157].mxu1 }
0x1023   : > { %v9354_v4 = vpop.f32.mrb[158].mxu1 }
0x1024   : > { %18131 = vpow2.f32 %v13953_v47  ;;  %v16499_v22 = vpop.f32.mrb[159].mxu1 }
0x102e   : > { %v18132_v41 = vpop.eup %18131 }
0x102f   : > { %v9360_v23 = vadd.f32 1.0, %v18132_v41 }
0x1031   : > { %18133 = vrcp.f32 %v9360_v23 }
0x103b   : > { %v18134_v8 = vpop.eup %18133 }
0x103c   : > { %v9366_v53 = vrot.slane %v18134_v8, %v9365_v60 }
0x103e   : > { %v9367_v17 = vmul.f32 %v9366_v53, %v9175_v19  ;;  %v9368_v3 = vmul.f32 %v9366_v53, %v9176_v12  ;;  %v9369_v11 = vmul.f32 %v9366_v53, %v9177_v44  ;;  %v9370_v43 = vmul.f32 %v9366_v53, %v9178_v32 }
0x103f   : > { %v9371_v10 = vmul.f32 %v9366_v53, %v9179_v2  ;;  %v9372_v55 = vmul.f32 %v9366_v53, %v9180_v34  ;;  %v9373_v19 = vmul.f32 %v9366_v53, %v9181_v51  ;;  %v9374_v44 = vmul.f32 %v9366_v53, %v9182_v58 }
0x1040   : > { %v21851_v28 = vpack.c.bf16 %v9368_v3, %v9367_v17  ;;  %v21861_v62 = vpack.c.bf16 %v9370_v43, %v9369_v11  ;;  %v9375_v57 = vmul.f32 %v9366_v53, %v9183_v31  ;;  %v9376_v32 = vmul.f32 %v9366_v53, %v9184_v27 }
0x1041   : > { %v21871_v12 = vpack.c.bf16 %v9372_v55, %v9371_v10  ;;  %v21881_v49 = vpack.c.bf16 %v9374_v44, %v9373_v19  ;;  %v9377_v5 = vmul.f32 %v9366_v53, %v9185_v20  ;;  %v9378_v36 = vmul.f32 %v9366_v53, %v9186_v52  ;;  %v17970_v52 = vld [vmem:[%s22834_s8] ss:$8 sps:$4 sm:$0xff]  }
0x1042   : > { %9424 = vmatpush1.bf16.msra.mxu0 %v21851_v28  ;;  %9508 = vmatpush1.bf16.msra.mxu1 %v21851_v28  ;;  %v21891_v2 = vpack.c.bf16 %v9376_v32, %v9375_v57  ;;  %v9379_v51 = vmul.f32 %v9366_v53, %v9187_v50  ;;  %v9380_v14 = vmul.f32 %v9366_v53, %v9188_v15  ;;  %v17975_v50 = vld [vmem:[%s22834_s8 + $0x14] ss:$8 sps:$4 sm:$0x1f]   ;;  %v17973_v15 = vld [vmem:[%s22834_s8 + $0x10] ss:$8 sps:$4 sm:$0x1f]  }
0x1043   : > { %9425 = vmatprep.subr.bf16.mxu0 %v23491_v39  ;;  %9509 = vmatprep.subr.bf16.mxu1 %v23491_v39  ;;  %v21901_v34 = vpack.c.bf16 %v9378_v36, %v9377_v5  ;;  %v9381_v58 = vmul.f32 %v9366_v53, %v9189_v13  ;;  %v9382_v31 = vmul.f32 %v9366_v53, %v9190_v37  ;;  %v17976_v13 = vld [vmem:[%s22834_s8 + $0x40] ss:$8 sps:$4 sm:$0xff]   ;;  %v17979_v37 = vld [vmem:[%s22834_s8 + $0x50] ss:$8 sps:$4 sm:$0x1f]  }
0x1044   : > { %v21911_v9 = vpack.c.bf16 %v9380_v14, %v9379_v51  ;;  %v9383_v6 = vmul.f32 %v9366_v53, %v9191_v30  ;;  %v9384_v27 = vmul.f32 %v9366_v53, %v9192_v18  ;;  %v17982_v30 = vld [vmem:[%s22834_s8 + $0x80] ss:$8 sps:$4 sm:$0xff]   ;;  %v17985_v18 = vld [vmem:[%s22834_s8 + $0x90] ss:$8 sps:$4 sm:$0x1f]  }
0x1045   : > { %v21921_v42 = vpack.c.bf16 %v9382_v31, %v9381_v58  ;;  %v17994_v19 = vld [vmem:[%s22835_s9 + $0x8] sm:$0xff]   ;;  %v17995_v32 = vld [vmem:[%s22835_s9 + $0x20] sm:$0xff]  }
0x1046   : > { %9426 = vmatpush1.bf16.msra.mxu0 %v21861_v62  ;;  %9510 = vmatpush1.bf16.msra.mxu1 %v21861_v62  ;;  %v21931_v20 = vpack.c.bf16 %v9384_v27, %v9383_v6  ;;  %v17996_v5 = vld [vmem:[%s22835_s9 + $0x28] sm:$0xff]  }
0x1047   : > { %9427 = vmatprep.subr.bf16.mxu0 %v23491_v39  ;;  %9511 = vmatprep.subr.bf16.mxu1 %v23491_v39 }
0x104a   : > { %9428 = vmatpush1.bf16.msra.mxu0 %v21871_v12  ;;  %9512 = vmatpush1.bf16.msra.mxu1 %v21871_v12 }
0x104b   : > { %9429 = vmatprep.subr.bf16.mxu0 %v23491_v39  ;;  %9513 = vmatprep.subr.bf16.mxu1 %v23491_v39 }
0x104e   : > { %9430 = vmatpush1.bf16.msra.mxu0 %v21881_v49  ;;  %9514 = vmatpush1.bf16.msra.mxu1 %v21881_v49 }
0x104f   : > { %9431 = vmatprep.subr.bf16.mxu0 %v23491_v39  ;;  %9515 = vmatprep.subr.bf16.mxu1 %v23491_v39 }
0x1052   : > { %9432 = vmatpush1.bf16.msra.mxu0 %v21891_v2  ;;  %9516 = vmatpush1.bf16.msra.mxu1 %v21891_v2 }
0x1053   : > { %9433 = vmatprep.subr.bf16.mxu0 %v23491_v39  ;;  %9517 = vmatprep.subr.bf16.mxu1 %v23491_v39 }
0x1056   : > { %9434 = vmatpush1.bf16.msra.mxu0 %v21901_v34  ;;  %9518 = vmatpush1.bf16.msra.mxu1 %v21901_v34 }
0x1057   : > { %9435 = vmatprep.subr.bf16.mxu0 %v23491_v39  ;;  %9519 = vmatprep.subr.bf16.mxu1 %v23491_v39 }
0x105a   : > { %9436 = vmatpush1.bf16.msra.mxu0 %v21911_v9  ;;  %9520 = vmatpush1.bf16.msra.mxu1 %v21911_v9 }
0x105b   : > { %9437 = vmatprep.subr.bf16.mxu0 %v23491_v39  ;;  %9521 = vmatprep.subr.bf16.mxu1 %v23491_v39 }
0x105e   : > { %9438 = vmatpush1.bf16.msra.mxu0 %v21921_v42  ;;  %9522 = vmatpush1.bf16.msra.mxu1 %v21921_v42 }
0x105f   : > { %9439 = vmatprep.subr.bf16.mxu0 %v23491_v39  ;;  %9523 = vmatprep.subr.bf16.mxu1 %v23491_v39 }
0x1062   : > { %9440 = vmatpush1.bf16.msra.mxu0 %v21931_v20  ;;  %9524 = vmatpush1.bf16.msra.mxu1 %v21931_v20 }
0x1063   : > { %9726 = vmatprep.subr.bf16.mxu1 %v23491_v39  ;;  %16500 = vmatprep.subr.bf16.mxu0 %v17991_v1 }
0x1065   : > { %9540 = vmatmul.mubr.bf16.vlgmr.msra.gmra.mrb[160].mxu1 %v17964_v38  ;;  %9456 = vmatmul.mubr.bf16.vlgmr.msra.gmra.mrb[36].mxu0 %v17970_v52  ;;  %v17999_v52 = vld [vmem:[%s22834_s8 + $0x64] ss:$8 sps:$4 sm:$0xff]  }
0x1066   : > { %9727 = vmatpush1.bf16.msra.mxu1 %v21851_v28  ;;  %13969 = vmatprep.mubr.msk.bf16.mxu1 %vm9416_vm6, %v17969_v25 }
0x1067   : > { %9728 = vmatprep.subr.bf16.mxu1 %v23491_v39  ;;  %13959 = vmatprep.mubr.msk.bf16.mxu0 %vm9416_vm6, %v17975_v50 }
0x1068   : > { %16501 = vmatpush3.bf16.msra.mxu0 %v17991_v1 }
0x1069   : > { %16502 = vmatprep.subr.bf16.mxu0 %v17992_v29 }
0x106a   : > { %9729 = vmatpush1.bf16.msra.mxu1 %v21861_v62 }
0x106b   : > { %9730 = vmatprep.subr.bf16.mxu1 %v23491_v39 }
0x106c   : > { %16503 = vmatpush3.bf16.msra.mxu0 %v17992_v29 }
0x106d   : > { %9548 = vmatmul.mubr.bf16.gmra.mrb[164].mxu1 %v17967_v7  ;;  %9464 = vmatmul.mubr.bf16.gmra.mrb[40].mxu0 %v17973_v15 }
0x106e   : > { %9731 = vmatpush1.bf16.msra.mxu1 %v21871_v12  ;;  %13990 = vmatprep.mubr.msk.bf16.mxu1 %vm9416_vm6, %v17978_v56 }
0x106f   : > { %9732 = vmatprep.subr.bf16.mxu1 %v23491_v39  ;;  %16508 = vmatprep.subr.bf16.mxu0 %v17993_v48 }
0x1072   : > { %9733 = vmatpush1.bf16.msra.mxu1 %v21881_v49 }
0x1073   : > { %9734 = vmatprep.subr.bf16.mxu1 %v23491_v39 }
0x1076   : > { %9735 = vmatpush1.bf16.msra.mxu1 %v21891_v2 }
0x1077   : > { %9736 = vmatprep.subr.bf16.mxu1 %v23491_v39 }
0x107a   : > { %9737 = vmatpush1.bf16.msra.mxu1 %v21901_v34 }
0x107b   : > { %9738 = vmatprep.subr.bf16.mxu1 %v23491_v39 }
0x107e   : > { %9739 = vmatpush1.bf16.msra.mxu1 %v21911_v9 }
0x107f   : > { %9740 = vmatprep.subr.bf16.mxu1 %v23491_v39 }
0x1082   : > { %9741 = vmatpush1.bf16.msra.mxu1 %v21921_v42 }
0x1083   : > { %9742 = vmatprep.subr.bf16.mxu1 %v23491_v39 }
0x1086   : > { %9743 = vmatpush1.bf16.msra.mxu1 %v21931_v20 }
0x1087   : > { %10038 = vmatprep.subr.bf16.mxu1 %v23491_v39 }
0x1089   : > { %9759 = vmatmul.mubr.bf16.vlgmr.msra.gmra.mrb[168].mxu1 %v17976_v13 }
0x108a   : > { %10039 = vmatpush1.bf16.msra.mxu1 %v21851_v28  ;;  %13991 = vmatprep.mubr.msk.bf16.mxu1 %vm9416_vm6, %v17981_v16 }
0x108b   : > { %10040 = vmatprep.subr.bf16.mxu1 %v23491_v39 }
0x108e   : > { %10041 = vmatpush1.bf16.msra.mxu1 %v21861_v62 }
0x108f   : > { %10042 = vmatprep.subr.bf16.mxu1 %v23491_v39 }
0x1091   : > { %9767 = vmatmul.mubr.bf16.gmra.mrb[172].mxu1 %v17979_v37  ;;  %v17997_v37 = vld [vmem:[%s22834_s8 + $0x60] ss:$8 sps:$4 sm:$0xff]  }
0x1092   : > { %10043 = vmatpush1.bf16.msra.mxu1 %v21871_v12  ;;  %14026 = vmatprep.mubr.msk.bf16.mxu1 %vm9416_vm6, %v17984_v26  ;;  %v18002_v26 = vld [vmem:[%s22834_s8 + $0x74] ss:$8 sps:$4 sm:$0x1f]  }
0x1093   : > { %10044 = vmatprep.subr.bf16.mxu1 %v23491_v39 }
0x1096   : > { %10045 = vmatpush1.bf16.msra.mxu1 %v21881_v49 }
0x1097   : > { %10046 = vmatprep.subr.bf16.mxu1 %v23491_v39 }
0x109a   : > { %10047 = vmatpush1.bf16.msra.mxu1 %v21891_v2 }
0x109b   : > { %10048 = vmatprep.subr.bf16.mxu1 %v23491_v39 }
0x109e   : > { %10049 = vmatpush1.bf16.msra.mxu1 %v21901_v34 }
0x109f   : > { %10050 = vmatprep.subr.bf16.mxu1 %v23491_v39 }
0x10a2   : > { %10051 = vmatpush1.bf16.msra.mxu1 %v21911_v9 }
0x10a3   : > { %10052 = vmatprep.subr.bf16.mxu1 %v23491_v39 }
0x10a6   : > { %10053 = vmatpush1.bf16.msra.mxu1 %v21921_v42 }
0x10a7   : > { %10054 = vmatprep.subr.bf16.mxu1 %v23491_v39 }
0x10aa   : > { %10055 = vmatpush1.bf16.msra.mxu1 %v21931_v20 }
0x10ab   : > { %10194 = vmatprep.subr.bf16.mxu1 %v23491_v39 }
0x10ad   : > { %10071 = vmatmul.mubr.bf16.vlgmr.msra.gmra.mrb[176].mxu1 %v17982_v30  ;;  %v18000_v30 = vld [vmem:[%s22834_s8 + $0x70] ss:$8 sps:$4 sm:$0x1f]  }
0x10ae   : > { %10195 = vmatpush1.bf16.msra.mxu1 %v21851_v28  ;;  %14027 = vmatprep.mubr.msk.bf16.mxu1 %vm9416_vm6, %v17987_v61  ;;  %v18006_v61 = vld [vmem:[%s22835_s9 + $0x30] sm:$0xff]  }
0x10af   : > { %10196 = vmatprep.subr.bf16.mxu1 %v23491_v39 }
0x10b2   : > { %10197 = vmatpush1.bf16.msra.mxu1 %v21861_v62 }
0x10b3   : > { %10198 = vmatprep.subr.bf16.mxu1 %v23491_v39 }
0x10b5   : > { %10079 = vmatmul.mubr.bf16.gmra.mrb[180].mxu1 %v17985_v18  ;;  %v18007_v18 = vld [vmem:[%s22835_s9 + $0x38] sm:$0xff]  }
0x10b6   : > { %10199 = vmatpush1.bf16.msra.mxu1 %v21871_v12  ;;  %14044 = vmatprep.mubr.msk.bf16.mxu1 %vm9416_vm6, %v17990_v21  ;;  %v18008_v21 = vld [vmem:[%s22835_s9 + $0x40] sm:$0xff]  }
0x10b7   : > { %10200 = vmatprep.subr.bf16.mxu1 %v23491_v39 }
0x10ba   : > { %10201 = vmatpush1.bf16.msra.mxu1 %v21881_v49 }
0x10bb   : > { %10202 = vmatprep.subr.bf16.mxu1 %v23491_v39 }
0x10be   : > { %10203 = vmatpush1.bf16.msra.mxu1 %v21891_v2 }
0x10bf   : > { %10204 = vmatprep.subr.bf16.mxu1 %v23491_v39 }
0x10c2   : > { %10205 = vmatpush1.bf16.msra.mxu1 %v21901_v34 }
0x10c3   : > { %10206 = vmatprep.subr.bf16.mxu1 %v23491_v39 }
0x10c6   : > { %10207 = vmatpush1.bf16.msra.mxu1 %v21911_v9 }
0x10c7   : > { %10208 = vmatprep.subr.bf16.mxu1 %v23491_v39 }
0x10ca   : > { %10209 = vmatpush1.bf16.msra.mxu1 %v21921_v42 }
0x10cb   : > { %10210 = vmatprep.subr.bf16.mxu1 %v23491_v39 }
0x10ce   : > { %10211 = vmatpush1.bf16.msra.mxu1 %v21931_v20 }
0x10cf   : > { %10506 = vmatprep.subr.bf16.mxu1 %v23491_v39 }
0x10d1   : > { %10227 = vmatmul.mubr.bf16.vlgmr.msra.gmra.mrb[184].mxu1 %v17988_v45 }
0x10d2   : > { %10507 = vmatpush1.bf16.msra.mxu1 %v21851_v28  ;;  %14045 = vmatprep.mubr.msk.bf16.mxu1 %vm9416_vm6, %v18005_v0 }
0x10d3   : > { %10508 = vmatprep.subr.bf16.mxu1 %v23491_v39 }
0x10d6   : > { %10509 = vmatpush1.bf16.msra.mxu1 %v21861_v62 }
0x10d7   : > { %10510 = vmatprep.subr.bf16.mxu1 %v23491_v39 }
0x10d9   : > { %10235 = vmatmul.mubr.bf16.gmra.mrb[188].mxu1 %v18003_v59 }
0x10da   : > { %10511 = vmatpush1.bf16.msra.mxu1 %v21871_v12 }
0x10db   : > { %10512 = vmatprep.subr.bf16.mxu1 %v23491_v39 }
0x10de   : > { %10513 = vmatpush1.bf16.msra.mxu1 %v21881_v49 }
0x10df   : > { %10514 = vmatprep.subr.bf16.mxu1 %v23491_v39 }
0x10e2   : > { %10515 = vmatpush1.bf16.msra.mxu1 %v21891_v2 }
0x10e3   : > { %10516 = vmatprep.subr.bf16.mxu1 %v23491_v39 }
0x10e6   : > { %10517 = vmatpush1.bf16.msra.mxu1 %v21901_v34 }
0x10e7   : > { %10518 = vmatprep.subr.bf16.mxu1 %v23491_v39 }
0x10ea   : > { %10519 = vmatpush1.bf16.msra.mxu1 %v21911_v9 }
0x10eb   : > { %10520 = vmatprep.subr.bf16.mxu1 %v23491_v39 }
0x10ee   : > { %10521 = vmatpush1.bf16.msra.mxu1 %v21921_v42 }
0x10ef   : > { %10522 = vmatprep.subr.bf16.mxu1 %v23491_v39 }
0x10f2   : > { %10523 = vmatpush1.bf16.msra.mxu1 %v21931_v20 }
0x10f3   : > { %16572 = vmatprep.subr.bf16.mxu1 %v23065_v40 }
0x1138   : > { %v9541_v33 = vpop.f32.mrb[160].mxu1  ;;  %v9457_v24 = vpop.f32.mrb[36].mxu0 }
0x1139   : > { %v9543_v63 = vpop.f32.mrb[161].mxu1  ;;  %v9459_v47 = vpop.f32.mrb[37].mxu0 }
0x113a   : > { %v9544_v46 = vpop.f32.mrb[162].mxu1  ;;  %v9460_v4 = vpop.f32.mrb[38].mxu0 }
0x113b   : > { %v9556_v22 = vpack.c.bf16 %v9544_v46, %v9541_v33  ;;  %v9546_v41 = vpop.f32.mrb[163].mxu1  ;;  %v9472_v23 = vpack.c.bf16 %v9460_v4, %v9457_v24  ;;  %v9462_v54 = vpop.f32.mrb[39].mxu0 }
0x113c   : > { %v18018_v54 = vld [vmem:[%s22834_s8 + $0xe0] ss:$8 sps:$4 sm:$0xff]  }
0x113d   : > { %16504 = vmatprep.mubr.msk.bf16.mxu0 %vm3035_vm5, %v9556_v22 }
0x1140   : > { %v9549_v8 = vpop.f32.mrb[164].mxu1  ;;  %v9465_v53 = vpop.f32.mrb[40].mxu0 }
0x1141   : > { %v9551_v17 = vpop.f32.mrb[165].mxu1  ;;  %v9467_v3 = vpop.f32.mrb[41].mxu0 }
0x1142   : > { %v9552_v11 = vpop.f32.mrb[166].mxu1  ;;  %v9468_v43 = vpop.f32.mrb[42].mxu0  ;;  %v18021_v17 = vld [vmem:[%s22834_s8 + $0xf0] ss:$8 sps:$4 sm:$0x1f]  }
0x1143   : > { %v9557_v10 = vpack.c.bf16 %v9552_v11, %v9549_v8  ;;  %v9554_v55 = vpop.f32.mrb[167].mxu1  ;;  %v9473_v44 = vpack.c.bf16 %v9468_v43, %v9465_v53  ;;  %v9470_v57 = vpop.f32.mrb[43].mxu0  ;;  %v18020_v8 = vld [vmem:[%s22834_s8 + $0xe4] ss:$8 sps:$4 sm:$0xff]  }
0x1144   : > { %v18023_v53 = vld [vmem:[%s22834_s8 + $0xf4] ss:$8 sps:$4 sm:$0x1f]   ;;  %14080 = vmatprep.mubr.msk.bf16.mxu1 %vm9416_vm6, %v18020_v8  ;;  %v18037_v8 = vld [vmem:[#allocation14 + $0x8] sm:$0xff]  }
0x1145   : > { %16505 = vmatmul.mubr.msk.bf16.vlgmr.msra.gmra.mrb[44].mxu0 %vm3035_vm5, %v9557_v10  ;;  %10539 = vmatmul.mubr.bf16.vlgmr.msra.gmra.mrb[192].mxu1 %v18018_v54  ;;  %v18036_v54 = vld [vmem:[#allocation14] sm:$0xff]  }
0x1146   : > { %16509 = vmatpush3.bf16.msra.mxu0 %v17993_v48  ;;  %16512 = vmatprep.mubr.msk.bf16.mxu0 %vm3035_vm5, %v9472_v23 }
0x1147   : > { %16510 = vmatprep.subr.bf16.mxu0 %v17994_v19  ;;  %14081 = vmatprep.mubr.msk.bf16.mxu1 %vm9416_vm6, %v18023_v53  ;;  %v18038_v53 = vld [vmem:[#allocation14 + $0x10] sm:$0xff]  }
0x1148   : > { %16573 = vmatpush3.bf16.msra.mxu1 %v18036_v54  ;;  %v18052_v54 = vld [vmem:[%s23492_s24 + $0x50] sm:$0xff]  }
0x1149   : > { %16574 = vmatprep.subr.bf16.mxu1 %v23065_v40 }
0x114a   : > { %16511 = vmatpush3.bf16.msra.mxu0 %v17994_v19 }
0x114b   : > { %16516 = vmatprep.subr.bf16.mxu0 %v17995_v32 }
0x114c   : > { %16575 = vmatpush3.bf16.msra.mxu1 %v18037_v8  ;;  %v18053_v8 = vld [vmem:[%s23492_s24 + $0x58] sm:$0xff]  }
0x114d   : > { %10547 = vmatmul.mubr.bf16.gmra.mrb[196].mxu1 %v18021_v17  ;;  %16576 = vmatprep.subr.bf16.mxu1 %v23065_v40  ;;  %v14108_v17 = vld [vmem:[#allocation13] ss:$0 sm:$0xff] }
0x114e   : > { %16578 = vmatprep.mubr.msk.bf16.mxu1 %vm18556_vm1, %v23065_v40 }
0x1150   : > { %16577 = vmatpush3.bf16.msra.mxu1 %v18038_v53  ;;  %v18054_v53 = vld [vmem:[%s23492_s24 + $0x60] sm:$0xff]  }
0x1151   : > { %16513 = vmatmul.mubr.msk.bf16.vlgmr.msra.gmra.mrb[44].mxu0 %vm3035_vm5, %v9473_v44  ;;  %16582 = vmatprep.subr.bf16.mxu1 %v23065_v40 }
0x1152   : > { %16517 = vmatpush3.bf16.msra.mxu0 %v17995_v32 }
0x1153   : > { %16518 = vmatprep.subr.bf16.mxu0 %v17996_v5 }
0x1156   : > { %16519 = vmatpush3.bf16.msra.mxu0 %v17996_v5 }
0x1157   : > { %9882 = vmatprep.subr.bf16.mxu0 %v23491_v39 }
0x115c   : > { %v9760_v36 = vpop.f32.mrb[168].mxu1 }
0x115d   : > { %v9762_v51 = vpop.f32.mrb[169].mxu1 }
0x115e   : > { %v9763_v14 = vpop.f32.mrb[170].mxu1  ;;  %v18010_v51 = vld [vmem:[%s22835_s9 + $0x50] sm:$0xff]  }
0x115f   : > { %v9775_v58 = vpack.c.bf16 %v9763_v14, %v9760_v36  ;;  %v9765_v31 = vpop.f32.mrb[171].mxu1  ;;  %v18009_v36 = vld [vmem:[%s22835_s9 + $0x48] sm:$0xff]   ;;  %v18011_v14 = vld [vmem:[%s22835_s9 + $0x58] sm:$0xff]  }
0x1160   : > { %v18012_v31 = vld [vmem:[%s22834_s8 + $0xc0] ss:$8 sps:$4 sm:$0xff]  }
0x1161   : > { %16520 = vmatprep.mubr.msk.bf16.mxu0 %vm3035_vm5, %v9775_v58  ;;  %v18014_v58 = vld [vmem:[%s22834_s8 + $0xc4] ss:$8 sps:$4 sm:$0xff]  }
0x1164   : > { %v9768_v6 = vpop.f32.mrb[172].mxu1 }
0x1165   : > { %v9770_v27 = vpop.f32.mrb[173].mxu1 }
0x1166   : > { %v9771_v38 = vpop.f32.mrb[174].mxu1  ;;  %v18015_v27 = vld [vmem:[%s22834_s8 + $0xd0] ss:$8 sps:$4 sm:$0x1f]  }
0x1167   : > { %v9776_v25 = vpack.c.bf16 %v9771_v38, %v9768_v6  ;;  %v9773_v50 = vpop.f32.mrb[175].mxu1  ;;  %v18017_v6 = vld [vmem:[%s22834_s8 + $0xd4] ss:$8 sps:$4 sm:$0x1f]   ;;  %v18024_v38 = vld [vmem:[%s22835_s9 + $0x60] sm:$0xff]  }
0x1168   : > { %v18026_v50 = vld [vmem:[%s22835_s9 + $0x70] sm:$0xff]  }
0x1169   : > { %16521 = vmatmul.mubr.msk.bf16.vlgmr.msra.gmra.mrb[44].mxu0 %vm3035_vm5, %v9776_v25 }
0x116a   : > { %9883 = vmatpush1.bf16.msra.mxu0 %v21851_v28  ;;  %14008 = vmatprep.mubr.msk.bf16.mxu0 %vm9416_vm6, %v17999_v52  ;;  %v18025_v52 = vld [vmem:[%s22835_s9 + $0x68] sm:$0xff]  }
0x116b   : > { %9884 = vmatprep.subr.bf16.mxu0 %v23491_v39 }
0x116e   : > { %9885 = vmatpush1.bf16.msra.mxu0 %v21861_v62 }
0x116f   : > { %9886 = vmatprep.subr.bf16.mxu0 %v23491_v39 }
0x1172   : > { %9887 = vmatpush1.bf16.msra.mxu0 %v21871_v12 }
0x1173   : > { %9888 = vmatprep.subr.bf16.mxu0 %v23491_v39 }
0x1176   : > { %9889 = vmatpush1.bf16.msra.mxu0 %v21881_v49 }
0x1177   : > { %9890 = vmatprep.subr.bf16.mxu0 %v23491_v39 }
0x117a   : > { %9891 = vmatpush1.bf16.msra.mxu0 %v21891_v2 }
0x117b   : > { %9892 = vmatprep.subr.bf16.mxu0 %v23491_v39 }
0x117e   : > { %9893 = vmatpush1.bf16.msra.mxu0 %v21901_v34 }
0x117f   : > { %9894 = vmatprep.subr.bf16.mxu0 %v23491_v39 }
0x1180   : > { %v10072_v7 = vpop.f32.mrb[176].mxu1 }
0x1181   : > { %v10074_v15 = vpop.f32.mrb[177].mxu1 }
0x1182   : > { %9895 = vmatpush1.bf16.msra.mxu0 %v21911_v9  ;;  %v10075_v56 = vpop.f32.mrb[178].mxu1 }
0x1183   : > { %9896 = vmatprep.subr.bf16.mxu0 %v23491_v39  ;;  %v10087_v13 = vpack.c.bf16 %v10075_v56, %v10072_v7  ;;  %v10077_v16 = vpop.f32.mrb[179].mxu1 }
0x1186   : > { %9897 = vmatpush1.bf16.msra.mxu0 %v21921_v42 }
0x1187   : > { %9898 = vmatprep.subr.bf16.mxu0 %v23491_v39 }
0x1188   : > { %v10080_v1 = vpop.f32.mrb[180].mxu1 }
0x1189   : > { %v10082_v29 = vpop.f32.mrb[181].mxu1 }
0x118a   : > { %9899 = vmatpush1.bf16.msra.mxu0 %v21931_v20  ;;  %v10083_v48 = vpop.f32.mrb[182].mxu1 }
0x118b   : > { %16524 = vmatprep.subr.bf16.mxu0 %v18006_v61  ;;  %v10088_v45 = vpack.c.bf16 %v10083_v48, %v10080_v1  ;;  %v10085_v59 = vpop.f32.mrb[183].mxu1 }
0x118d   : > { %9915 = vmatmul.mubr.bf16.vlgmr.msra.gmra.mrb[48].mxu0 %v17997_v37 }
0x118e   : > { %14009 = vmatprep.mubr.msk.bf16.mxu0 %vm9416_vm6, %v18002_v26  ;;  %16525 = vmatpush3.bf16.msra.mxu0 %v18006_v61 }
0x118f   : > { %16526 = vmatprep.subr.bf16.mxu0 %v18007_v18 }
0x1192   : > { %16527 = vmatpush3.bf16.msra.mxu0 %v18007_v18 }
0x1193   : > { %16532 = vmatprep.subr.bf16.mxu0 %v18008_v21 }
0x1195   : > { %9923 = vmatmul.mubr.bf16.gmra.mrb[52].mxu0 %v18000_v30 }
0x11a4   : > { %v10228_v0 = vpop.f32.mrb[184].mxu1 }
0x11a5   : > { %v10230_v33 = vpop.f32.mrb[185].mxu1 }
0x11a6   : > { %v10231_v24 = vpop.f32.mrb[186].mxu1 }
0x11a7   : > { %v10243_v63 = vpack.c.bf16 %v10231_v24, %v10228_v0  ;;  %v10233_v47 = vpop.f32.mrb[187].mxu1  ;;  %v18027_v24 = vld [vmem:[%s22835_s9 + $0x78] sm:$0xff]  }
0x11a8   : > { %v18030_v47 = vld [vmem:[%s22834_s8 + $0x104] ss:$8 sps:$4 sm:$0xff]  }
0x11ac   : > { %v10236_v46 = vpop.f32.mrb[188].mxu1 }
0x11ad   : > { %v10238_v4 = vpop.f32.mrb[189].mxu1 }
0x11ae   : > { %v10239_v22 = vpop.f32.mrb[190].mxu1 }
0x11af   : > { %v10244_v41 = vpack.c.bf16 %v10239_v22, %v10236_v46  ;;  %v10241_v23 = vpop.f32.mrb[191].mxu1 }
0x1218   : > { %v10540_v25 = vpop.f32.mrb[192].mxu1 }
0x1219   : > { %v10542_v7 = vpop.f32.mrb[193].mxu1 }
0x121a   : > { %v10543_v15 = vpop.f32.mrb[194].mxu1 }
0x121b   : > { %v10555_v56 = vpack.c.bf16 %v10543_v15, %v10540_v25 }
0x1260   : > { %v9916_v3 = vpop.f32.mrb[48].mxu0 }
0x1261   : > { %v9918_v11 = vpop.f32.mrb[49].mxu0 }
0x1262   : > { %v9919_v43 = vpop.f32.mrb[50].mxu0 }
0x1263   : > { %v9931_v10 = vpack.c.bf16 %v9919_v43, %v9916_v3  ;;  %v9921_v55 = vpop.f32.mrb[51].mxu0 }
0x1265   : > { %16528 = vmatprep.mubr.msk.bf16.mxu0 %vm3035_vm5, %v9931_v10 }
0x1268   : > { %v9924_v19 = vpop.f32.mrb[52].mxu0 }
0x1269   : > { %v9926_v44 = vpop.f32.mrb[53].mxu0 }
0x126a   : > { %v9927_v57 = vpop.f32.mrb[54].mxu0 }
0x126b   : > { %v9932_v32 = vpack.c.bf16 %v9927_v57, %v9924_v19  ;;  %v9929_v5 = vpop.f32.mrb[55].mxu0 }
0x126d   : > { %16529 = vmatmul.mubr.msk.bf16.vlgmr.msra.gmra.mrb[44].mxu0 %vm3035_vm5, %v9932_v32 }
0x126e   : > { %16536 = vmatprep.mubr.msk.bf16.mxu0 %vm3035_vm5, %v10087_v13  ;;  %16533 = vmatpush3.bf16.msra.mxu0 %v18008_v21  ;;  %v10545_v13 = vpop.f32.mrb[195].mxu1 }
0x126f   : > { %16534 = vmatprep.subr.bf16.mxu0 %v18009_v36  ;;  %v10548_v16 = vpop.f32.mrb[196].mxu1 }
0x1270   : > { %v10550_v37 = vpop.f32.mrb[197].mxu1 }
0x1271   : > { %v10551_v26 = vpop.f32.mrb[198].mxu1  ;;  %v18039_v37 = vld [vmem:[#allocation16] sm:$0xff]  }
0x1272   : > { %16535 = vmatpush3.bf16.msra.mxu0 %v18009_v36  ;;  %v10556_v30 = vpack.c.bf16 %v10551_v26, %v10548_v16  ;;  %v10553_v61 = vpop.f32.mrb[199].mxu1 }
0x1273   : > { %16540 = vmatprep.subr.bf16.mxu0 %v18010_v51  ;;  %v18041_v61 = vld [vmem:[#allocation16 + $0x10] sm:$0xff]  }
0x1279   : > { %16537 = vmatmul.mubr.msk.bf16.vlgmr.msra.gmra.mrb[44].mxu0 %vm3035_vm5, %v10088_v45 }
0x127a   : > { %16541 = vmatpush3.bf16.msra.mxu0 %v18010_v51  ;;  %16544 = vmatprep.mubr.msk.bf16.mxu0 %vm3035_vm5, %v10243_v63 }
0x127b   : > { %16542 = vmatprep.subr.bf16.mxu0 %v18011_v14 }
0x127e   : > { %16543 = vmatpush3.bf16.msra.mxu0 %v18011_v14 }
0x127f   : > { %10350 = vmatprep.subr.bf16.mxu0 %v23491_v39 }
0x1285   : > { %16545 = vmatmul.mubr.msk.bf16.vlgmr.msra.gmra.mrb[44].mxu0 %vm3035_vm5, %v10244_v41 }
0x1286   : > { %10351 = vmatpush1.bf16.msra.mxu0 %v21851_v28  ;;  %14062 = vmatprep.mubr.msk.bf16.mxu0 %vm9416_vm6, %v18014_v58 }
0x1287   : > { %10352 = vmatprep.subr.bf16.mxu0 %v23491_v39 }
0x128a   : > { %10353 = vmatpush1.bf16.msra.mxu0 %v21861_v62 }
0x128b   : > { %10354 = vmatprep.subr.bf16.mxu0 %v23491_v39 }
0x128e   : > { %10355 = vmatpush1.bf16.msra.mxu0 %v21871_v12 }
0x128f   : > { %10356 = vmatprep.subr.bf16.mxu0 %v23491_v39 }
0x1292   : > { %10357 = vmatpush1.bf16.msra.mxu0 %v21881_v49 }
0x1293   : > { %10358 = vmatprep.subr.bf16.mxu0 %v23491_v39 }
0x1296   : > { %10359 = vmatpush1.bf16.msra.mxu0 %v21891_v2 }
0x1297   : > { %10360 = vmatprep.subr.bf16.mxu0 %v23491_v39 }
0x129a   : > { %10361 = vmatpush1.bf16.msra.mxu0 %v21901_v34 }
0x129b   : > { %10362 = vmatprep.subr.bf16.mxu0 %v23491_v39 }
0x129e   : > { %10363 = vmatpush1.bf16.msra.mxu0 %v21911_v9 }
0x129f   : > { %10364 = vmatprep.subr.bf16.mxu0 %v23491_v39 }
0x12a2   : > { %10365 = vmatpush1.bf16.msra.mxu0 %v21921_v42 }
0x12a3   : > { %10366 = vmatprep.subr.bf16.mxu0 %v23491_v39 }
0x12a6   : > { %10367 = vmatpush1.bf16.msra.mxu0 %v21931_v20 }
0x12a7   : > { %16548 = vmatprep.subr.bf16.mxu0 %v18024_v38 }
0x12a9   : > { %10383 = vmatmul.mubr.bf16.vlgmr.msra.gmra.mrb[56].mxu0 %v18012_v31 }
0x12aa   : > { %14063 = vmatprep.mubr.msk.bf16.mxu0 %vm9416_vm6, %v18017_v6  ;;  %16549 = vmatpush3.bf16.msra.mxu0 %v18024_v38 }
0x12ab   : > { %16550 = vmatprep.subr.bf16.mxu0 %v18025_v52 }
0x12ae   : > { %16551 = vmatpush3.bf16.msra.mxu0 %v18025_v52 }
0x12af   : > { %16556 = vmatprep.subr.bf16.mxu0 %v18026_v50 }
0x12b1   : > { %10391 = vmatmul.mubr.bf16.gmra.mrb[60].mxu0 %v18015_v27 }
0x137c   : > { %v10384_v18 = vpop.f32.mrb[56].mxu0 }
0x137d   : > { %v10386_v21 = vpop.f32.mrb[57].mxu0 }
0x137e   : > { %v10387_v1 = vpop.f32.mrb[58].mxu0 }
0x137f   : > { %v10399_v29 = vpack.c.bf16 %v10387_v1, %v10384_v18  ;;  %v10389_v48 = vpop.f32.mrb[59].mxu0 }
0x1381   : > { %16552 = vmatprep.mubr.msk.bf16.mxu0 %vm3035_vm5, %v10399_v29 }
0x1384   : > { %v10392_v45 = vpop.f32.mrb[60].mxu0 }
0x1385   : > { %v10394_v59 = vpop.f32.mrb[61].mxu0 }
0x1386   : > { %v10395_v0 = vpop.f32.mrb[62].mxu0  ;;  %v18042_v59 = vld [vmem:[%s23492_s24 + $0x18] sm:$0xff]  }
0x1387   : > { %v10400_v33 = vpack.c.bf16 %v10395_v0, %v10392_v45  ;;  %v10397_v63 = vpop.f32.mrb[63].mxu0  ;;  %v18043_v0 = vld [vmem:[%s23492_s24 + $0x20] sm:$0xff]  }
0x1389   : > { %16553 = vmatmul.mubr.msk.bf16.vlgmr.msra.gmra.mrb[44].mxu0 %vm3035_vm5, %v10400_v33  ;;  %v18044_v33 = vld [vmem:[%s23492_s24 + $0x28] sm:$0xff]  }
0x138a   : > { %16557 = vmatpush3.bf16.msra.mxu0 %v18026_v50  ;;  %16560 = vmatprep.mubr.msk.bf16.mxu0 %vm3035_vm5, %v10555_v56 }
0x138b   : > { %16558 = vmatprep.subr.bf16.mxu0 %v18027_v24 }
0x138e   : > { %16559 = vmatpush3.bf16.msra.mxu0 %v18027_v24 }
0x138f   : > { %10662 = vmatprep.subr.bf16.mxu0 %v23491_v39 }
0x1395   : > { %16561 = vmatmul.mubr.msk.bf16.vlgmr.msra.gmra.mrb[44].mxu0 %vm3035_vm5, %v10556_v30  ;;  %v18040_v30 = vld [vmem:[#allocation16 + $0x8] sm:$0xff]  }
0x1396   : > { %10663 = vmatpush1.bf16.msra.mxu0 %v21851_v28  ;;  %14098 = vmatprep.mubr.msk.bf16.mxu0 %vm9416_vm6, %v18030_v47  ;;  %v18028_v28 = vld [vmem:[%s22834_s8 + $0x100] ss:$8 sps:$4 sm:$0xff]  }
0x1397   : > { %10664 = vmatprep.subr.bf16.mxu0 %v23491_v39 }
0x139a   : > { %10665 = vmatpush1.bf16.msra.mxu0 %v21861_v62  ;;  %v18033_v62 = vld [vmem:[%s22834_s8 + $0x114] ss:$8 sps:$4 sm:$0x1f]  }
0x139b   : > { %10666 = vmatprep.subr.bf16.mxu0 %v23491_v39 }
0x139e   : > { %10667 = vmatpush1.bf16.msra.mxu0 %v21871_v12  ;;  %v18031_v12 = vld [vmem:[%s22834_s8 + $0x110] ss:$8 sps:$4 sm:$0x1f]  }
0x139f   : > { %10668 = vmatprep.subr.bf16.mxu0 %v23491_v39 }
0x13a2   : > { %10669 = vmatpush1.bf16.msra.mxu0 %v21881_v49  ;;  %v18035_v49 = vld [vmem:[%s22835_s9 + $0x88] sm:$0xff]  }
0x13a3   : > { %10670 = vmatprep.subr.bf16.mxu0 %v23491_v39 }
0x13a6   : > { %10671 = vmatpush1.bf16.msra.mxu0 %v21891_v2 }
0x13a7   : > { %10672 = vmatprep.subr.bf16.mxu0 %v23491_v39 }
0x13aa   : > { %10673 = vmatpush1.bf16.msra.mxu0 %v21901_v34 }
0x13ab   : > { %10674 = vmatprep.subr.bf16.mxu0 %v23491_v39 }
0x13ae   : > { %10675 = vmatpush1.bf16.msra.mxu0 %v21911_v9 }
0x13af   : > { %10676 = vmatprep.subr.bf16.mxu0 %v23491_v39 }
0x13b2   : > { %10677 = vmatpush1.bf16.msra.mxu0 %v21921_v42 }
0x13b3   : > { %10678 = vmatprep.subr.bf16.mxu0 %v23491_v39  ;;  %v18034_v39 = vld [vmem:[%s22835_s9 + $0x80] sm:$0xff]  }
0x13b6   : > { %10679 = vmatpush1.bf16.msra.mxu0 %v21931_v20 }
0x13b7   : > { %16564 = vmatprep.subr.bf16.mxu0 %v18034_v39 }
0x13b9   : > { %10695 = vmatmul.mubr.bf16.vlgmr.msra.gmra.mrb[64].mxu0 %v18028_v28 }
0x13ba   : > { %14099 = vmatprep.mubr.msk.bf16.mxu0 %vm9416_vm6, %v18033_v62  ;;  %16565 = vmatpush3.bf16.msra.mxu0 %v18034_v39 }
0x13bb   : > { %16566 = vmatprep.subr.bf16.mxu0 %v18035_v49 }
0x13be   : > { %16567 = vmatpush3.bf16.msra.mxu0 %v18035_v49 }
0x13bf   : > { %16842 = vmatprep.subr.bf16.mxu0 %v23065_v40 }
0x13c1   : > { %10703 = vmatmul.mubr.bf16.gmra.mrb[68].mxu0 %v18031_v12 }
0x148c   : > { %v10696_v2 = vpop.f32.mrb[64].mxu0 }
0x148d   : > { %v10698_v34 = vpop.f32.mrb[65].mxu0 }
0x148e   : > { %v10699_v9 = vpop.f32.mrb[66].mxu0 }
0x148f   : > { %v10711_v42 = vpack.c.bf16 %v10699_v9, %v10696_v2  ;;  %v10701_v20 = vpop.f32.mrb[67].mxu0 }
0x1491   : > { %16568 = vmatprep.mubr.msk.bf16.mxu0 %vm3035_vm5, %v10711_v42  ;;  %v18045_v42 = vld [vmem:[%s23492_s24] sm:$0xff]  }
0x1494   : > { %v10704_v46 = vpop.f32.mrb[68].mxu0 }
0x1495   : > { %v10706_v4 = vpop.f32.mrb[69].mxu0 }
0x1496   : > { %v10707_v22 = vpop.f32.mrb[70].mxu0  ;;  %v18049_v4 = vld [vmem:[%s23492_s24 + $0x38] sm:$0xff]  }
0x1497   : > { %v10712_v41 = vpack.c.bf16 %v10707_v22, %v10704_v46  ;;  %v10709_v23 = vpop.f32.mrb[71].mxu0  ;;  %v18048_v46 = vld [vmem:[%s23492_s24 + $0x30] sm:$0xff]   ;;  %v18050_v22 = vld [vmem:[%s23492_s24 + $0x40] sm:$0xff]  }
0x1499   : > { %16569 = vmatmul.mubr.msk.bf16.vlgmr.msra.gmra.mrb[44].mxu0 %vm3035_vm5, %v10712_v41  ;;  %v18051_v41 = vld [vmem:[%s23492_s24 + $0x48] sm:$0xff]  }
0x149a   : > { %16856 = vmatprep.mubr.msk.bf16.mxu0 %vm18556_vm1, %v23065_v40 }
0x156c   : > { %v16570_v3 = vpop.f32.mrb[44].mxu0 }
0x156d   : > { %v10770_v11 = vpop.f32.mrb[45].mxu0  ;;  %v22260_v43 = vadd.f32 %v16570_v3, %v14108_v17  ;;  %v18055_v3 = vld [vmem:[%s23492_s24 + $0x68] sm:$0xff]  }
0x156e   : > { %v22262_v10 = vadd.f32 %v14108_v17, %v10770_v11  ;;  %v16571_v55 = vpop.f32.mrb[46].mxu0  ;;  %v18056_v11 = vld [vmem:[%s23492_s24 + $0x70] sm:$0xff]  }
0x156f   : > { %v10773_v19 = vpop.f32.mrb[47].mxu0  ;;  %v22265_v57 = vadd.f32 %v16571_v55, %v14108_v17  ;;  %v10802_v5 = vmax.f32 %v22260_v43, 0.0  ;;  %v18094_v43 = vld [vmem:[%s23492_s24 + $0x1a0] sm:$0xff]  }
0x1570   : > { %v10800_v44 = vmax.f32 %v22262_v10, 0.0  ;;  %v22267_v32 = vadd.f32 %v14108_v17, %v10773_v19  ;;  %v18057_v10 = vld [vmem:[%s23492_s24 + $0x78] sm:$0xff]   ;;  %v18058_v19 = vld [vmem:[%s23492_s24 + $0x80] sm:$0xff]  }
0x1571   : > { %v10803_v14 = vmax.f32 %v22265_v57, 0.0  ;;  %v10808_v6 = vsel %vm10804_vm7, %v10802_v5, 0.0  ;;  %v18123_v57 = vld [vmem:[%s23493_s13 + $0x30] sm:$0x3f]  }
0x1572   : > { %v10801_v36 = vmax.f32 %v22267_v32, 0.0  ;;  %v10805_v51 = vsel %vm10804_vm7, %v10800_v44, 0.0  ;;  %v18070_v32 = vld [vmem:[%s23492_s24 + $0xe0] sm:$0xff]  }
0x1573   : > { %v10811_v38 = vsel %vm10810_vm8, %v10803_v14, 0.0 }
0x1574   : > { %v10806_v58 = vsel %vm10804_vm7, %v10801_v36, 0.0 }
0x1575   : > { %v10807_v31 = vadd.f32 %v10806_v58, %v10805_v51  ;;  %v18060_v51 = vld [vmem:[%s23492_s24 + $0x90] sm:$0xff]  }
0x1577   : > { %v10809_v27 = vadd.f32 %v10808_v6, %v10807_v31  ;;  %v18061_v31 = vld [vmem:[%s23492_s24 + $0x98] sm:$0xff]   ;;  %v18062_v6 = vld [vmem:[%s23492_s24 + $0xa0] sm:$0xff]  }
0x1579   : > { %v10812_v52 = vadd.f32 %v10811_v38, %v10809_v27  ;;  %v18063_v27 = vld [vmem:[%s23492_s24 + $0xa8] sm:$0xff]  }
0x157b   : > { %v10813_v25 = vrot.slane %v10812_v52, 4 }
0x157d   : > { %v10814_v50 = vadd.f32 %v10813_v25, %v10812_v52  ;;  %v18064_v52 = vld [vmem:[%s23492_s24 + $0xb0] sm:$0xff]   ;;  %v18065_v25 = vld [vmem:[%s23492_s24 + $0xb8] sm:$0xff]  }
0x157f   : > { %v10815_v7 = vrot.slane %v10814_v50, 2 }
0x1581   : > { %v10816_v15 = vadd.f32 %v10815_v7, %v10814_v50  ;;  %v18066_v50 = vld [vmem:[%s23492_s24 + $0xc0] sm:$0xff]  }
0x1583   : > { %v10817_v56 = vrot.slane %v10816_v15, 1 }
0x1585   : > { %v10818_v13 = vadd.f32 %v10817_v56, %v10816_v15  ;;  %v18067_v15 = vld [vmem:[%s23492_s24 + $0xc8] sm:$0xff]   ;;  %v18068_v56 = vld [vmem:[%s23492_s24 + $0xd0] sm:$0xff]  }
0x1587   : > { %v10820_v16 = vmul.f32 0.04, %v10818_v13 }
0x1589   : > { %v10821_v26 = vpack.c.bf16 %v10820_v16, %v10820_v16  ;;  %v18069_v16 = vld [vmem:[%s23492_s24 + $0xd8] sm:$0xff]  }
0x158b   : > { %16579 = vmatmul.mubr.msk.bf16.vlgmr.msra.gmra.mrb[200].mxu1 %vm10804_vm7, %v10821_v26  ;;  %v18072_v26 = vld [vmem:[%s23492_s24 + $0xf0] sm:$0xff]  }
0x158c   : > { %16583 = vmatpush3.bf16.msra.mxu1 %v18039_v37  ;;  %16588 = vmatprep.mubr.msk.bf16.mxu1 %vm18556_vm1, %v23065_v40 }
0x158d   : > { %16584 = vmatprep.subr.bf16.mxu1 %v23065_v40 }
0x1590   : > { %16585 = vmatpush3.bf16.msra.mxu1 %v18040_v30 }
0x1591   : > { %16586 = vmatprep.subr.bf16.mxu1 %v23065_v40 }
0x1594   : > { %16587 = vmatpush3.bf16.msra.mxu1 %v18041_v61  ;;  %v18073_v61 = vld [vmem:[%s23492_s24 + $0xf8] sm:$0xff]  }
0x1595   : > { %16592 = vmatprep.subr.bf16.mxu1 %v23065_v40 }
0x165e   : > { %v10883_v18 = vpop.f32.mrb[200].mxu1 }
0x165f   : > { %v10889_v21 = vmax.f32 %v10883_v18, 0.0  ;;  %v16580_v1 = vpop.f32.mrb[201].mxu1  ;;  %v18074_v18 = vld [vmem:[%s23492_s24 + $0x100] sm:$0xff]  }
0x1660   : > { %v10886_v29 = vpop.f32.mrb[202].mxu1 }
0x1661   : > { %v10890_v48 = vpack.c.bf16 %v10889_v21, %v10889_v21  ;;  %v16581_v45 = vpop.f32.mrb[203].mxu1  ;;  %v18075_v21 = vld [vmem:[%s23492_s24 + $0x108] sm:$0xff]   ;;  %v18076_v29 = vld [vmem:[%s23492_s24 + $0x110] sm:$0xff]  }
0x1662   : > { %v18078_v45 = vld [vmem:[%s23492_s24 + $0x120] sm:$0xff]  }
0x1663   : > { %16589 = vmatmul.mubr.msk.bf16.vlgmr.msra.gmra.mrb[204].mxu1 %vm10804_vm7, %v10890_v48  ;;  %v18077_v48 = vld [vmem:[%s23492_s24 + $0x118] sm:$0xff]  }
0x1664   : > { %16598 = vmatprep.mubr.msk.bf16.mxu1 %vm18556_vm1, %v23065_v40  ;;  %16593 = vmatpush3.bf16.msra.mxu1 %v18042_v59 }
0x1665   : > { %16594 = vmatprep.subr.bf16.mxu1 %v23065_v40 }
0x1668   : > { %16595 = vmatpush3.bf16.msra.mxu1 %v18043_v0  ;;  %v18079_v0 = vld [vmem:[%s23492_s24 + $0x128] sm:$0xff]  }
0x1669   : > { %16596 = vmatprep.subr.bf16.mxu1 %v23065_v40 }
0x166c   : > { %16597 = vmatpush3.bf16.msra.mxu1 %v18044_v33  ;;  %v18080_v33 = vld [vmem:[%s23492_s24 + $0x130] sm:$0xff]  }
0x166d   : > { %16602 = vmatprep.subr.bf16.mxu1 %v23065_v40 }
0x1736   : > { %v10952_v24 = vpop.f32.mrb[204].mxu1 }
0x1737   : > { %v14117_v63 = vmul.f32 -1.442695, %v10952_v24  ;;  %v16590_v47 = vpop.f32.mrb[205].mxu1  ;;  %v18081_v24 = vld [vmem:[%s23492_s24 + $0x138] sm:$0xff]  }
0x1738   : > { %v10955_v28 = vpop.f32.mrb[206].mxu1  ;;  %v18082_v47 = vld [vmem:[%s23492_s24 + $0x140] sm:$0xff]  }
0x1739   : > { %18135 = vpow2.f32 %v14117_v63  ;;  %v16591_v62 = vpop.f32.mrb[207].mxu1  ;;  %v18083_v28 = vld [vmem:[%s23492_s24 + $0x148] sm:$0xff]  }
0x173a   : > { %v18084_v62 = vld [vmem:[%s23492_s24 + $0x150] sm:$0xff]  }
0x1743   : > { %v18136_v12 = vpop.eup %18135 }
0x1744   : > { %v10961_v39 = vadd.f32 1.0, %v18136_v12 }
0x1746   : > { %18137 = vrcp.f32 %v10961_v39  ;;  %v18085_v39 = vld [vmem:[%s23492_s24 + $0x158] sm:$0xff]  }
0x1750   : > { %v18138_v49 = vpop.eup %18137 }
0x1751   : > { %v22304_v2 = vrot.slane %v18138_v49, %v9365_v60  ;;  %v18047_v60 = vld [vmem:[%s23492_s24 + $0x10] sm:$0xff]   ;;  %v18117_v49 = vld [vmem:[%s23493_s13] sm:$0xff]  }
0x1752   : > { %16843 = vmatpush3.bf16.msra.mxu0 %v18117_v49  ;;  %v18125_v49 = vld [vmem:[%s23494_s7 + $0x8] sm:$0xff]  }
0x1753   : > { %v10968_v34 = vmul.f32 %v22304_v2, %v10800_v44  ;;  %v18059_v44 = vld [vmem:[%s23492_s24 + $0x88] sm:$0xff]   ;;  %v10969_v13 = vmul.f32 %v22304_v2, %v10801_v36  ;;  %16844 = vmatprep.subr.bf16.mxu0 %v23065_v40 }
0x1754   : > { %v18071_v36 = vld [vmem:[%s23492_s24 + $0xe8] sm:$0xff]  }
0x1755   : > { %v22307_v9 = vpack.c.bf16 %v10968_v34, %v10968_v34  ;;  %v22445_v37 = vpack.c.bf16 %v10969_v13, %v10969_v13  ;;  %v18086_v34 = vld [vmem:[%s23492_s24 + $0x160] sm:$0xff]   ;;  %v18109_v13 = vld [vmem:[%s23492_s24 + $0x218] sm:$0xff]  }
0x1757   : > { %v22313_v20 = vshrl.u32 %v22307_v9, 16  ;;  %v11118_v23 = vrot.slane %v22307_v9, 1  ;;  %v11258_v55 = vrot.slane %v22307_v9, 2  ;;  %v11398_v38 = vrot.slane %v22307_v9, 3 }
0x1758   : > { %v22464_v30 = vshrl.u32 %v22445_v37, 16  ;;  %v11680_v1 = vrot.slane %v22445_v37, 1  ;;  %v11820_v63 = vrot.slane %v22445_v37, 2 }
0x1759   : > { %16599 = vmatmul.mubr.msk.bf16.vlgmr.msra.gmra.mrb[208].mxu1 %vm10804_vm7, %v22313_v20  ;;  %v11188_v17 = vrot.slane %v22313_v20, 1  ;;  %v11328_v58 = vrot.slane %v22313_v20, 2  ;;  %v11468_v7 = vrot.slane %v22313_v20, 3  ;;  %v11960_v20 = vrot.slane %v22445_v37, 3 }
0x175a   : > { %16603 = vmatpush3.bf16.msra.mxu1 %v18045_v42  ;;  %16608 = vmatprep.mubr.msk.bf16.mxu1 %vm18556_vm1, %v23065_v40  ;;  %v11750_v59 = vrot.slane %v22464_v30, 1  ;;  %v11890_v12 = vrot.slane %v22464_v30, 2  ;;  %v18087_v42 = vld [vmem:[%s23492_s24 + $0x168] sm:$0xff]  }
0x175b   : > { %16604 = vmatprep.subr.bf16.mxu1 %v23065_v40 }
0x175e   : > { %16605 = vmatpush3.bf16.msra.mxu1 %v18046_v35  ;;  %v18119_v35 = vld [vmem:[%s23493_s13 + $0x10] sm:$0xff]  }
0x175f   : > { %16606 = vmatprep.subr.bf16.mxu1 %v23065_v40 }
0x1762   : > { %16607 = vmatpush3.bf16.msra.mxu1 %v18047_v60  ;;  %v18088_v60 = vld [vmem:[%s23492_s24 + $0x170] sm:$0xff]  }
0x1763   : > { %16612 = vmatprep.subr.bf16.mxu1 %v23065_v40 }
0x1765   : > { %16609 = vmatmul.mubr.msk.bf16.vlgmr.msra.gmra.mrb[208].mxu1 %vm10804_vm7, %v22307_v9  ;;  %v18118_v9 = vld [vmem:[%s23493_s13 + $0x8] sm:$0xff]  }
0x1766   : > { %16613 = vmatpush3.bf16.msra.mxu1 %v18048_v46  ;;  %16618 = vmatprep.mubr.msk.bf16.mxu1 %vm18556_vm1, %v23065_v40  ;;  %v18120_v46 = vld [vmem:[%s23493_s13 + $0x18] sm:$0xff]  }
0x1767   : > { %16614 = vmatprep.subr.bf16.mxu1 %v23065_v40  ;;  %16845 = vmatpush3.bf16.msra.mxu0 %v18118_v9  ;;  %v18127_v9 = vld [vmem:[%s23494_s7 + $0x18] sm:$0xff]  }
0x1768   : > { %16846 = vmatprep.subr.bf16.mxu0 %v23065_v40 }
0x176a   : > { %16615 = vmatpush3.bf16.msra.mxu1 %v18049_v4  ;;  %v18089_v4 = vld [vmem:[%s23492_s24 + $0x178] sm:$0xff]  }
0x176b   : > { %16616 = vmatprep.subr.bf16.mxu1 %v23065_v40  ;;  %16847 = vmatpush3.bf16.msra.mxu0 %v18119_v35  ;;  %v18130_v35 = vld [vmem:[%s23494_s7 + $0x30] sm:$0x3f]  }
0x176c   : > { %16848 = vmatprep.subr.bf16.mxu0 %v23065_v40 }
0x176e   : > { %16617 = vmatpush3.bf16.msra.mxu1 %v18050_v22  ;;  %v18090_v22 = vld [vmem:[%s23492_s24 + $0x180] sm:$0xff]  }
0x176f   : > { %16622 = vmatprep.subr.bf16.mxu1 %v23065_v40  ;;  %16849 = vmatpush3.bf16.msra.mxu0 %v18120_v46  ;;  %v12745_v46 = vld [vmem:[#allocation17] sm:$0x1] }
0x1770   : > { %16850 = vmatprep.subr.bf16.mxu0 %v23065_v40 }
0x1771   : > { %16619 = vmatmul.mubr.msk.bf16.vlgmr.msra.gmra.mrb[208].mxu1 %vm10804_vm7, %v11118_v23  ;;  %v18091_v23 = vld [vmem:[%s23492_s24 + $0x188] sm:$0xff]  }
0x1772   : > { %16623 = vmatpush3.bf16.msra.mxu1 %v18051_v41  ;;  %16628 = vmatprep.mubr.msk.bf16.mxu1 %vm18556_vm1, %v23065_v40  ;;  %v12030_v41 = vrot.slane %v22464_v30, 3 }
0x1773   : > { %16624 = vmatprep.subr.bf16.mxu1 %v23065_v40 }
0x1776   : > { %16625 = vmatpush3.bf16.msra.mxu1 %v18052_v54  ;;  %v18092_v54 = vld [vmem:[%s23492_s24 + $0x190] sm:$0xff]  }
0x1777   : > { %16626 = vmatprep.subr.bf16.mxu1 %v23065_v40 }
0x177a   : > { %16627 = vmatpush3.bf16.msra.mxu1 %v18053_v8  ;;  %v10970_v8 = vmul.f32 %v22304_v2, %v10802_v5  ;;  %v18095_v5 = vld [vmem:[%s23492_s24 + $0x1a8] sm:$0xff]  }
0x177b   : > { %16632 = vmatprep.subr.bf16.mxu1 %v23065_v40 }
0x177d   : > { %16629 = vmatmul.mubr.msk.bf16.vlgmr.msra.gmra.mrb[208].mxu1 %vm10804_vm7, %v11188_v17  ;;  %v22597_v17 = vpack.c.bf16 %v10970_v8, %v10970_v8 }
0x177e   : > { %16633 = vmatpush3.bf16.msra.mxu1 %v18054_v53  ;;  %16638 = vmatprep.mubr.msk.bf16.mxu1 %vm18556_vm1, %v23065_v40  ;;  %v18093_v53 = vld [vmem:[%s23492_s24 + $0x198] sm:$0xff]  }
0x177f   : > { %16634 = vmatprep.subr.bf16.mxu1 %v23065_v40 }
0x1782   : > { %16635 = vmatpush3.bf16.msra.mxu1 %v18055_v3  ;;  %v18096_v3 = vld [vmem:[%s23492_s24 + $0x1b0] sm:$0xff]  }
0x1783   : > { %16636 = vmatprep.subr.bf16.mxu1 %v23065_v40 }
0x1786   : > { %16637 = vmatpush3.bf16.msra.mxu1 %v18056_v11  ;;  %v22616_v11 = vshrl.u32 %v22597_v17, 16 }
0x1787   : > { %16642 = vmatprep.subr.bf16.mxu1 %v23065_v40 }
0x1789   : > { %16639 = vmatmul.mubr.msk.bf16.vlgmr.msra.gmra.mrb[208].mxu1 %vm10804_vm7, %v11258_v55  ;;  %v18098_v55 = vld [vmem:[%s23492_s24 + $0x1c0] sm:$0xff]  }
0x178a   : > { %16643 = vmatpush3.bf16.msra.mxu1 %v18057_v10  ;;  %16648 = vmatprep.mubr.msk.bf16.mxu1 %vm18556_vm1, %v23065_v40  ;;  %v18097_v10 = vld [vmem:[%s23492_s24 + $0x1b8] sm:$0xff]  }
0x178b   : > { %16644 = vmatprep.subr.bf16.mxu1 %v23065_v40 }
0x178e   : > { %16645 = vmatpush3.bf16.msra.mxu1 %v18058_v19  ;;  %v18099_v19 = vld [vmem:[%s23492_s24 + $0x1c8] sm:$0xff]  }
0x178f   : > { %16646 = vmatprep.subr.bf16.mxu1 %v23065_v40 }
0x1792   : > { %16647 = vmatpush3.bf16.msra.mxu1 %v18059_v44  ;;  %v12242_v44 = vrot.slane %v22597_v17, 1 }
0x1793   : > { %16652 = vmatprep.subr.bf16.mxu1 %v23065_v40 }
0x1795   : > { %16649 = vmatmul.mubr.msk.bf16.vlgmr.msra.gmra.mrb[208].mxu1 %vm10804_vm7, %v11328_v58  ;;  %v18101_v58 = vld [vmem:[%s23492_s24 + $0x1d8] sm:$0xff]  }
0x1796   : > { %16653 = vmatpush3.bf16.msra.mxu1 %v18060_v51  ;;  %16658 = vmatprep.mubr.msk.bf16.mxu1 %vm18556_vm1, %v23065_v40  ;;  %v18100_v51 = vld [vmem:[%s23492_s24 + $0x1d0] sm:$0xff]  }
0x1797   : > { %16654 = vmatprep.subr.bf16.mxu1 %v23065_v40 }
0x179a   : > { %16655 = vmatpush3.bf16.msra.mxu1 %v18061_v31  ;;  %v18102_v31 = vld [vmem:[%s23492_s24 + $0x1e0] sm:$0xff]  }
0x179b   : > { %16656 = vmatprep.subr.bf16.mxu1 %v23065_v40 }
0x179e   : > { %16657 = vmatpush3.bf16.msra.mxu1 %v18062_v6  ;;  %v12312_v6 = vrot.slane %v22616_v11, 1 }
0x179f   : > { %16662 = vmatprep.subr.bf16.mxu1 %v23065_v40 }
0x17a1   : > { %16659 = vmatmul.mubr.msk.bf16.vlgmr.msra.gmra.mrb[208].mxu1 %vm10804_vm7, %v11398_v38  ;;  %v18104_v38 = vld [vmem:[%s23492_s24 + $0x1f0] sm:$0xff]  }
0x17a2   : > { %16663 = vmatpush3.bf16.msra.mxu1 %v18063_v27  ;;  %16668 = vmatprep.mubr.msk.bf16.mxu1 %vm18556_vm1, %v23065_v40  ;;  %v18103_v27 = vld [vmem:[%s23492_s24 + $0x1e8] sm:$0xff]  }
0x17a3   : > { %16664 = vmatprep.subr.bf16.mxu1 %v23065_v40 }
0x17a6   : > { %16665 = vmatpush3.bf16.msra.mxu1 %v18064_v52  ;;  %v18105_v52 = vld [vmem:[%s23492_s24 + $0x1f8] sm:$0xff]  }
0x17a7   : > { %16666 = vmatprep.subr.bf16.mxu1 %v23065_v40 }
0x17aa   : > { %16667 = vmatpush3.bf16.msra.mxu1 %v18065_v25  ;;  %v12382_v25 = vrot.slane %v22597_v17, 2 }
0x17ab   : > { %16672 = vmatprep.subr.bf16.mxu1 %v23065_v40 }
0x17ad   : > { %16669 = vmatmul.mubr.msk.bf16.vlgmr.msra.gmra.mrb[208].mxu1 %vm10804_vm7, %v11468_v7  ;;  %v18107_v7 = vld [vmem:[%s23492_s24 + $0x208] sm:$0xff]  }
0x17ae   : > { %16673 = vmatpush3.bf16.msra.mxu1 %v18066_v50  ;;  %16678 = vmatprep.mubr.msk.bf16.mxu1 %vm18556_vm1, %v23065_v40  ;;  %v18106_v50 = vld [vmem:[%s23492_s24 + $0x200] sm:$0xff]  }
0x17af   : > { %16674 = vmatprep.subr.bf16.mxu1 %v23065_v40 }
0x17b2   : > { %16675 = vmatpush3.bf16.msra.mxu1 %v18067_v15  ;;  %v18108_v15 = vld [vmem:[%s23492_s24 + $0x210] sm:$0xff]  }
0x17b3   : > { %16676 = vmatprep.subr.bf16.mxu1 %v23065_v40 }
0x17b6   : > { %16677 = vmatpush3.bf16.msra.mxu1 %v18068_v56  ;;  %v12452_v56 = vrot.slane %v22616_v11, 2 }
0x17b7   : > { %16682 = vmatprep.subr.bf16.mxu1 %v23065_v40 }
0x17b9   : > { %16679 = vmatmul.mubr.msk.bf16.vlgmr.msra.gmra.mrb[208].mxu1 %vm10804_vm7, %v22445_v37  ;;  %v18111_v37 = vld [vmem:[%s23492_s24 + $0x228] sm:$0xff]  }
0x17ba   : > { %16683 = vmatpush3.bf16.msra.mxu1 %v18069_v16  ;;  %16688 = vmatprep.mubr.msk.bf16.mxu1 %vm18556_vm1, %v23065_v40  ;;  %v18110_v16 = vld [vmem:[%s23492_s24 + $0x220] sm:$0xff]  }
0x17bb   : > { %16684 = vmatprep.subr.bf16.mxu1 %v23065_v40 }
0x17be   : > { %16685 = vmatpush3.bf16.msra.mxu1 %v18070_v32  ;;  %v12522_v32 = vrot.slane %v22597_v17, 3 }
0x17bf   : > { %16686 = vmatprep.subr.bf16.mxu1 %v23065_v40 }
0x17c2   : > { %16687 = vmatpush3.bf16.msra.mxu1 %v18071_v36  ;;  %v18112_v36 = vld [vmem:[%s23492_s24 + $0x230] sm:$0xff]  }
0x17c3   : > { %16692 = vmatprep.subr.bf16.mxu1 %v23065_v40 }
0x17c5   : > { %16689 = vmatmul.mubr.msk.bf16.vlgmr.msra.gmra.mrb[208].mxu1 %vm10804_vm7, %v22464_v30  ;;  %v18114_v30 = vld [vmem:[%s23492_s24 + $0x240] sm:$0xff]  }
0x17c6   : > { %16693 = vmatpush3.bf16.msra.mxu1 %v18072_v26  ;;  %16698 = vmatprep.mubr.msk.bf16.mxu1 %vm18556_vm1, %v23065_v40  ;;  %v18113_v26 = vld [vmem:[%s23492_s24 + $0x238] sm:$0xff]  }
0x17c7   : > { %16694 = vmatprep.subr.bf16.mxu1 %v23065_v40 }
0x17ca   : > { %16695 = vmatpush3.bf16.msra.mxu1 %v18073_v61  ;;  %v12592_v61 = vrot.slane %v22616_v11, 3 }
0x17cb   : > { %16696 = vmatprep.subr.bf16.mxu1 %v23065_v40 }
0x17ce   : > { %16697 = vmatpush3.bf16.msra.mxu1 %v18074_v18  ;;  %v18115_v18 = vld [vmem:[%s23492_s24 + $0x248] sm:$0xff]  }
0x17cf   : > { %16702 = vmatprep.subr.bf16.mxu1 %v23065_v40 }
0x17d1   : > { %16699 = vmatmul.mubr.msk.bf16.vlgmr.msra.gmra.mrb[208].mxu1 %vm10804_vm7, %v11680_v1  ;;  %v10971_v1 = vmul.f32 %v22304_v2, %v10803_v14  ;;  %v12793_v14 = vsel %vm12791_vm9, %v18123_v57, 0 }
0x17d2   : > { %16703 = vmatpush3.bf16.msra.mxu1 %v18075_v21  ;;  %16708 = vmatprep.mubr.msk.bf16.mxu1 %vm18556_vm1, %v23065_v40  ;;  %v18116_v21 = vld [vmem:[%s23492_s24 + $0x250] sm:$0xff]  }
0x17d3   : > { %16704 = vmatprep.subr.bf16.mxu1 %v23065_v40 }
0x17d6   : > { %16705 = vmatpush3.bf16.msra.mxu1 %v18076_v29  ;;  %v12655_v29 = vpack.c.bf16 %v10971_v1, %v10971_v1 }
0x17d7   : > { %16706 = vmatprep.subr.bf16.mxu1 %v23065_v40 }
0x17da   : > { %16707 = vmatpush3.bf16.msra.mxu1 %v18077_v48  ;;  %v18121_v48 = vld [vmem:[%s23493_s13 + $0x20] sm:$0xff]  }
0x17db   : > { %16712 = vmatprep.subr.bf16.mxu1 %v23065_v40  ;;  %16851 = vmatpush3.bf16.msra.mxu0 %v18121_v48 }
0x17dc   : > { %16852 = vmatprep.subr.bf16.mxu0 %v23065_v40 }
0x17dd   : > { %16709 = vmatmul.mubr.msk.bf16.vlgmr.msra.gmra.mrb[208].mxu1 %vm10804_vm7, %v11750_v59 }
0x17de   : > { %16713 = vmatpush3.bf16.msra.mxu1 %v18078_v45  ;;  %16718 = vmatprep.mubr.msk.bf16.mxu1 %vm18556_vm1, %v23065_v40  ;;  %v18122_v45 = vld [vmem:[%s23493_s13 + $0x28] sm:$0xff]  }
0x17df   : > { %16714 = vmatprep.subr.bf16.mxu1 %v23065_v40  ;;  %16853 = vmatpush3.bf16.msra.mxu0 %v18122_v45 }
0x17e0   : > { %16854 = vmatprep.subr.bf16.mxu0 %v23065_v40 }
0x17e2   : > { %16715 = vmatpush3.bf16.msra.mxu1 %v18079_v0 }
0x17e3   : > { %16716 = vmatprep.subr.bf16.mxu1 %v23065_v40  ;;  %16855 = vmatpush3.bf16.msra.mxu0 %v12793_v14 }
0x17e4   : > { %16860 = vmatprep.subr.bf16.mxu0 %v23065_v40 }
0x17e6   : > { %16717 = vmatpush3.bf16.msra.mxu1 %v18080_v33 }
0x17e7   : > { %16722 = vmatprep.subr.bf16.mxu1 %v23065_v40 }
0x17e9   : > { %16719 = vmatmul.mubr.msk.bf16.vlgmr.msra.gmra.mrb[208].mxu1 %vm10804_vm7, %v11820_v63 }
0x17ea   : > { %16723 = vmatpush3.bf16.msra.mxu1 %v18081_v24  ;;  %16728 = vmatprep.mubr.msk.bf16.mxu1 %vm18556_vm1, %v23065_v40 }
0x17eb   : > { %16724 = vmatprep.subr.bf16.mxu1 %v23065_v40 }
0x17ee   : > { %16725 = vmatpush3.bf16.msra.mxu1 %v18082_v47 }
0x17ef   : > { %16726 = vmatprep.subr.bf16.mxu1 %v23065_v40 }
0x17f2   : > { %16727 = vmatpush3.bf16.msra.mxu1 %v18083_v28 }
0x17f3   : > { %16732 = vmatprep.subr.bf16.mxu1 %v23065_v40 }
0x17f5   : > { %16729 = vmatmul.mubr.msk.bf16.vlgmr.msra.gmra.mrb[208].mxu1 %vm10804_vm7, %v11890_v12  ;;  %v18124_v12 = vld [vmem:[%s23494_s7] sm:$0xff]  }
0x17f6   : > { %16733 = vmatpush3.bf16.msra.mxu1 %v18084_v62  ;;  %16738 = vmatprep.mubr.msk.bf16.mxu1 %vm18556_vm1, %v23065_v40 }
0x17f7   : > { %16734 = vmatprep.subr.bf16.mxu1 %v23065_v40 }
0x17fa   : > { %16735 = vmatpush3.bf16.msra.mxu1 %v18085_v39 }
0x17fb   : > { %16736 = vmatprep.subr.bf16.mxu1 %v23065_v40 }
0x17fe   : > { %16737 = vmatpush3.bf16.msra.mxu1 %v18086_v34  ;;  %v18126_v34 = vld [vmem:[%s23494_s7 + $0x10] sm:$0xff]  }
0x17ff   : > { %16742 = vmatprep.subr.bf16.mxu1 %v23065_v40 }
0x1801   : > { %16739 = vmatmul.mubr.msk.bf16.vlgmr.msra.gmra.mrb[208].mxu1 %vm10804_vm7, %v11960_v20  ;;  %v18129_v20 = vld [vmem:[%s23494_s7 + $0x28] sm:$0xff]  }
0x1802   : > { %16743 = vmatpush3.bf16.msra.mxu1 %v18087_v42  ;;  %16748 = vmatprep.mubr.msk.bf16.mxu1 %vm18556_vm1, %v23065_v40  ;;  %v18128_v42 = vld [vmem:[%s23494_s7 + $0x20] sm:$0xff]  }
0x1803   : > { %16744 = vmatprep.subr.bf16.mxu1 %v23065_v40 }
0x1806   : > { %16745 = vmatpush3.bf16.msra.mxu1 %v18088_v60  ;;  %v12901_v60 = vsel %vm12791_vm9, %v18130_v35, 0 }
0x1807   : > { %16746 = vmatprep.subr.bf16.mxu1 %v23065_v40 }
0x180a   : > { %16747 = vmatpush3.bf16.msra.mxu1 %v18089_v4 }
0x180b   : > { %16752 = vmatprep.subr.bf16.mxu1 %v23065_v40 }
0x180d   : > { %16749 = vmatmul.mubr.msk.bf16.vlgmr.msra.gmra.mrb[208].mxu1 %vm10804_vm7, %v12030_v41 }
0x180e   : > { %16753 = vmatpush3.bf16.msra.mxu1 %v18090_v22  ;;  %16758 = vmatprep.mubr.msk.bf16.mxu1 %vm18556_vm1, %v23065_v40 }
0x180f   : > { %16754 = vmatprep.subr.bf16.mxu1 %v23065_v40 }
0x1812   : > { %16755 = vmatpush3.bf16.msra.mxu1 %v18091_v23 }
0x1813   : > { %16756 = vmatprep.subr.bf16.mxu1 %v23065_v40 }
0x1816   : > { %16757 = vmatpush3.bf16.msra.mxu1 %v18092_v54 }
0x1817   : > { %16762 = vmatprep.subr.bf16.mxu1 %v23065_v40 }
0x1819   : > { %16759 = vmatmul.mubr.msk.bf16.vlgmr.msra.gmra.mrb[208].mxu1 %vm10804_vm7, %v22597_v17 }
0x181a   : > { %16763 = vmatpush3.bf16.msra.mxu1 %v18093_v53  ;;  %16768 = vmatprep.mubr.msk.bf16.mxu1 %vm18556_vm1, %v23065_v40 }
0x181b   : > { %16764 = vmatprep.subr.bf16.mxu1 %v23065_v40 }
0x181e   : > { %16765 = vmatpush3.bf16.msra.mxu1 %v18094_v43 }
0x181f   : > { %16766 = vmatprep.subr.bf16.mxu1 %v23065_v40 }
0x1822   : > { %16767 = vmatpush3.bf16.msra.mxu1 %v18095_v5 }
0x1823   : > { %16772 = vmatprep.subr.bf16.mxu1 %v23065_v40 }
0x1825   : > { %16769 = vmatmul.mubr.msk.bf16.vlgmr.msra.gmra.mrb[208].mxu1 %vm10804_vm7, %v22616_v11 }
0x1826   : > { %16773 = vmatpush3.bf16.msra.mxu1 %v18096_v3  ;;  %16778 = vmatprep.mubr.msk.bf16.mxu1 %vm18556_vm1, %v23065_v40 }
0x1827   : > { %16774 = vmatprep.subr.bf16.mxu1 %v23065_v40 }
0x182a   : > { %16775 = vmatpush3.bf16.msra.mxu1 %v18097_v10 }
0x182b   : > { %16776 = vmatprep.subr.bf16.mxu1 %v23065_v40 }
0x182e   : > { %16777 = vmatpush3.bf16.msra.mxu1 %v18098_v55 }
0x182f   : > { %16782 = vmatprep.subr.bf16.mxu1 %v23065_v40 }
0x1831   : > { %16779 = vmatmul.mubr.msk.bf16.vlgmr.msra.gmra.mrb[208].mxu1 %vm10804_vm7, %v12242_v44 }
0x1832   : > { %16783 = vmatpush3.bf16.msra.mxu1 %v18099_v19  ;;  %16788 = vmatprep.mubr.msk.bf16.mxu1 %vm18556_vm1, %v23065_v40 }
0x1833   : > { %16784 = vmatprep.subr.bf16.mxu1 %v23065_v40 }
0x1836   : > { %16785 = vmatpush3.bf16.msra.mxu1 %v18100_v51 }
0x1837   : > { %16786 = vmatprep.subr.bf16.mxu1 %v23065_v40 }
0x183a   : > { %16787 = vmatpush3.bf16.msra.mxu1 %v18101_v58 }
0x183b   : > { %16792 = vmatprep.subr.bf16.mxu1 %v23065_v40 }
0x183d   : > { %16789 = vmatmul.mubr.msk.bf16.vlgmr.msra.gmra.mrb[208].mxu1 %vm10804_vm7, %v12312_v6 }
0x183e   : > { %16793 = vmatpush3.bf16.msra.mxu1 %v18102_v31  ;;  %16798 = vmatprep.mubr.msk.bf16.mxu1 %vm18556_vm1, %v23065_v40 }
0x183f   : > { %16794 = vmatprep.subr.bf16.mxu1 %v23065_v40 }
0x1842   : > { %16795 = vmatpush3.bf16.msra.mxu1 %v18103_v27 }
0x1843   : > { %16796 = vmatprep.subr.bf16.mxu1 %v23065_v40 }
0x1846   : > { %16797 = vmatpush3.bf16.msra.mxu1 %v18104_v38 }
0x1847   : > { %16802 = vmatprep.subr.bf16.mxu1 %v23065_v40 }
0x1849   : > { %16799 = vmatmul.mubr.msk.bf16.vlgmr.msra.gmra.mrb[208].mxu1 %vm10804_vm7, %v12382_v25 }
0x184a   : > { %16803 = vmatpush3.bf16.msra.mxu1 %v18105_v52  ;;  %16808 = vmatprep.mubr.msk.bf16.mxu1 %vm18556_vm1, %v23065_v40 }
0x184b   : > { %16804 = vmatprep.subr.bf16.mxu1 %v23065_v40 }
0x184e   : > { %16805 = vmatpush3.bf16.msra.mxu1 %v18106_v50 }
0x184f   : > { %16806 = vmatprep.subr.bf16.mxu1 %v23065_v40 }
0x1852   : > { %16807 = vmatpush3.bf16.msra.mxu1 %v18107_v7 }
0x1853   : > { %16812 = vmatprep.subr.bf16.mxu1 %v23065_v40 }
0x1855   : > { %16809 = vmatmul.mubr.msk.bf16.vlgmr.msra.gmra.mrb[208].mxu1 %vm10804_vm7, %v12452_v56 }
0x1856   : > { %16813 = vmatpush3.bf16.msra.mxu1 %v18108_v15  ;;  %16818 = vmatprep.mubr.msk.bf16.mxu1 %vm18556_vm1, %v23065_v40 }
0x1857   : > { %16814 = vmatprep.subr.bf16.mxu1 %v23065_v40 }
0x185a   : > { %16815 = vmatpush3.bf16.msra.mxu1 %v18109_v13 }
0x185b   : > { %16816 = vmatprep.subr.bf16.mxu1 %v23065_v40 }
0x185e   : > { %16817 = vmatpush3.bf16.msra.mxu1 %v18110_v16 }
0x185f   : > { %16822 = vmatprep.subr.bf16.mxu1 %v23065_v40 }
0x1861   : > { %16819 = vmatmul.mubr.msk.bf16.vlgmr.msra.gmra.mrb[208].mxu1 %vm10804_vm7, %v12522_v32 }
0x1862   : > { %16823 = vmatpush3.bf16.msra.mxu1 %v18111_v37  ;;  %16828 = vmatprep.mubr.msk.bf16.mxu1 %vm18556_vm1, %v23065_v40 }
0x1863   : > { %16824 = vmatprep.subr.bf16.mxu1 %v23065_v40 }
0x1866   : > { %16825 = vmatpush3.bf16.msra.mxu1 %v18112_v36 }
0x1867   : > { %16826 = vmatprep.subr.bf16.mxu1 %v23065_v40 }
0x186a   : > { %16827 = vmatpush3.bf16.msra.mxu1 %v18113_v26 }
0x186b   : > { %16832 = vmatprep.subr.bf16.mxu1 %v23065_v40 }
0x186d   : > { %16829 = vmatmul.mubr.msk.bf16.vlgmr.msra.gmra.mrb[208].mxu1 %vm10804_vm7, %v12592_v61 }
0x186e   : > { %16833 = vmatpush3.bf16.msra.mxu1 %v18114_v30  ;;  %16838 = vmatprep.mubr.msk.bf16.mxu1 %vm18556_vm1, %v23065_v40 }
0x186f   : > { %16834 = vmatprep.subr.bf16.mxu1 %v23065_v40 }
0x1872   : > { %16835 = vmatpush3.bf16.msra.mxu1 %v18115_v18 }
0x1873   : > { %16836 = vmatprep.subr.bf16.mxu1 %v23065_v40 }
0x1876   : > { %16837 = vmatpush3.bf16.msra.mxu1 %v18116_v21 }
0x1879   : > { %16839 = vmatmul.mubr.msk.bf16.vlgmr.msra.gmra.mrb[208].mxu1 %vm10804_vm7, %v12655_v29 }
0x194c   : > { %v12718_v2 = vpop.f32.mrb[208].mxu1 }
0x194d   : > { %v12725_v59 = vadd.f32 3.0, %v12718_v2  ;;  %v16840_v0 = vpop.f32.mrb[209].mxu1 }
0x194e   : > { %v12721_v33 = vpop.f32.mrb[210].mxu1 }
0x194f   : > { %v12726_v24 = vmax.f32 %v12725_v59, 0.0  ;;  %v16841_v63 = vpop.f32.mrb[211].mxu1 }
0x1951   : > { %v12727_v47 = vmin.f32 %v12726_v24, 6.0 }
0x1953   : > { %v12728_v28 = vmul.f32 0.16666667, %v12727_v47 }
0x1955   : > { %v12729_v62 = vmul.f32 %v12728_v28, %v12718_v2 }
0x1957   : > { %v12730_v39 = vpack.c.bf16 %v12729_v62, %v12729_v62 }
0x1959   : > { %16857 = vmatmul.mubr.msk.bf16.vlgmr.msra.gmra.mrb[72].mxu0 %vm12787_vm10, %v12730_v39 }
0x195a   : > { %16861 = vmatpush3.bf16.msra.mxu0 %v18124_v12  ;;  %16874 = vmatprep.mubr.msk.bf16.mxu0 %vm18556_vm1, %v23065_v40 }
0x195b   : > { %16862 = vmatprep.subr.bf16.mxu0 %v23065_v40 }
0x195e   : > { %16863 = vmatpush3.bf16.msra.mxu0 %v18125_v49 }
0x195f   : > { %16864 = vmatprep.subr.bf16.mxu0 %v23065_v40 }
0x1962   : > { %16865 = vmatpush3.bf16.msra.mxu0 %v18126_v34 }
0x1963   : > { %16866 = vmatprep.subr.bf16.mxu0 %v23065_v40 }
0x1966   : > { %16867 = vmatpush3.bf16.msra.mxu0 %v18127_v9 }
0x1967   : > { %16868 = vmatprep.subr.bf16.mxu0 %v23065_v40 }
0x196a   : > { %16869 = vmatpush3.bf16.msra.mxu0 %v18128_v42 }
0x196b   : > { %16870 = vmatprep.subr.bf16.mxu0 %v23065_v40 }
0x196e   : > { %16871 = vmatpush3.bf16.msra.mxu0 %v18129_v20 }
0x196f   : > { %16872 = vmatprep.subr.bf16.mxu0 %v23065_v40  ;;  %v12855_v40 = vld [vmem:[#allocation19] sm:$0x1] }
0x1972   : > { %16873 = vmatpush3.bf16.msra.mxu0 %v12901_v60 }
0x1a2c   : > { %v12829_v4 = vpop.f32.mrb[72].mxu0 }
0x1a2d   : > { %v12830_v22 = vadd.f32 %v12829_v4, %v12745_v46  ;;  %v16858_v41 = vpop.f32.mrb[73].mxu0 }
0x1a2e   : > { %v12832_v23 = vpop.f32.mrb[74].mxu0 }
0x1a2f   : > { %v12835_v54 = vadd.f32 3.0, %v12830_v22  ;;  %v16859_v8 = vpop.f32.mrb[75].mxu0 }
0x1a31   : > { %v12836_v53 = vmax.f32 %v12835_v54, 0.0 }
0x1a33   : > { %v12837_v17 = vmin.f32 %v12836_v53, 6.0 }
0x1a35   : > { %v12838_v43 = vmul.f32 0.16666667, %v12837_v17 }
0x1a37   : > { %v12839_v5 = vmul.f32 %v12838_v43, %v12830_v22 }
0x1a39   : > { %v12840_v3 = vpack.c.bf16 %v12839_v5, %v12839_v5 }
0x1a3b   : > { %16875 = vmatmul.mubr.msk.bf16.vlgmr.msra.gmra.mrb[76].mxu0 %vm12787_vm10, %v12840_v3 }
0x1b0e   : > { %v12937_v11 = vpop.f32.mrb[76].mxu0 }
0x1b0f   : > { %v12938_v10 = vadd.f32 %v12937_v11, %v12855_v40  ;;  %v16876_v55 = vpop.f32.mrb[77].mxu0 }
0x1b10   : > { %v12940_v19 = vpop.f32.mrb[78].mxu0 }
0x1b11   : > { %v16877_v44 = vpop.f32.mrb[79].mxu0  ;;  %v12944_v51 = vsel %vm12943_vm11, %v12938_v10, -inf }
0x1b12   : > { %12945 = vmax.xlane.f32.xlu0 %v12944_v51 }
0x1b9f   : > { %v12946_v58 = vpop.xlane.xlu0 %12945 }
0x1ba0   : > { %v12947_v31 = vsub.f32 %v12938_v10, %v12946_v58 }
0x1ba2   : > { %v12948_v6 = vmul.f32 1.442695, %v12947_v31 }
0x1ba4   : > { %18139 = vpow2.f32 %v12948_v6 }
0x1bae   : > { %v18140_v27 = vpop.eup %18139 }
0x1baf   : > { %v12950_v38 = vsel %vm12943_vm11, %v18140_v27, 0.0 }
0x1bb0   : > { %12951 = vadd.xlane.f32.xlu0 %v12950_v38 }
0x1c3d   : > { %v12952_v52 = vpop.xlane.xlu0 %12951 }
0x1c3e   : > { %18141 = vlog2.f32 %v12952_v52 }
0x1c48   : > { %v18142_v25 = vpop.eup %18141 }
0x1c49   : > { %v12954_v50 = vmul.f32 0.6931472, %v18142_v25 }
0x1c4b   : > { %v12955_v7 = vadd.f32 %v12954_v50, %v12946_v58 }
0x1c4d   : > { %v12956_v15 = vsub.f32 %v12938_v10, %v12955_v7 }
0x1c4f   : > { %12957 = vst.msk [vmem:[%s717_s27] sm:$0x1] %vm12943_vm11, %v12956_v15 }
0x1c50   : > { %18465 = shalt.err (!%p18462_p10)
}
0x1c51   : > { %s18466_s29 = scalar_lea.hbm %s22783_s25, 16  ;;  %s18470_s18 = scalar_lea.hbm %s23498_s26, 32 }
0x1c52   : > { %p18467_p2 = scmp.ne.s32.totalorder %s22783_s25, %s18466_s29  ;;  %p18471_p7 = scmp.lt.u32.totalorder %s22783_s25, %s23498_s26 }
0x1c53   : > { %p18472_p8 = scmp.lt.u32.totalorder %s18470_s18, %s18466_s29  ;;  %p18474_p13 = scmp.lt.u32.totalorder %s18466_s29, %s22783_s25 }
0x1c54   : > { %p18468_p3 = pnand %p18467_p2, %p23499_p1 }
0x1c55   : > { %p18473_p11 = por %p18472_p8, %p18471_p7 }
0x1c56   : > { %p18469_p4 = pneg %p18468_p3 }
0x1c57   : > { %p18475_p0 = por %p18474_p13, %p18473_p11 }
0x1c59   : > { %p18476_p6 = pnand %p18475_p0, %p18469_p4 }
0x1c5b   : > { %18479 = shalt.err (!%p18476_p6)
}
0x1c5c   : > { %17055 = dma.vmem_to_hbm [thread:$0]  (%p23499_p1), %s22785_s5, 16, %s22783_s25, %s12959_s20  }
0x1c5d PF: > { %s23500_s28 = sld [smem:[#allocation31_spill]]  ;;  %s23501_s30 = sld [smem:[#allocation28_spill]] }
0x1c5e   : > { %s23502_s1 = sld [smem:[#allocation35_spill]] }
0x1c63   : > { %p17117_p5 = scmp.ge.s32.totalorder %s23500_s28, 2  ;;  %s12983_s0 = sand.u32 1, %s23501_s30  }
0x1c64   : > { %p23503_p9 = scmp.ne.s32.totalorder %s23502_s1, 0  ;;  %s12984_s21 = scalar_lea.sflag [#allocation4], %s12983_s0 }
0x1c66   : > { %p17092_p12 = pnand %p17117_p5, %p23503_p9 }
0x1c68   : > { %18521 = dma.done.wait (!%p17092_p12), %s12984_s21, 16  }
0x1c69   : > { %18523 = vsyncadd (!%p17092_p12), %s12984_s21, 4294967280  ;;  %s23504_s30 = sld [smem:[#allocation32_spill]]  ;;  %s23505_s27 = sld [smem:[#allocation29_spill]] }
0x1c6a   : > { %s23506_s28 = sld [smem:[#allocation30_spill]]  ;;  %s23507_s29 = sld [smem:[#allocation33_spill]] }
0x1c6f   : > { %p34_p10 = scmp.ge.s32.totalorder %s23504_s30, 4  }
0x1c71   :  { %36 = sbr.rel (!%p34_p10) target bundleno = 19 (0x13), region = 228 }
0x1c78   :  { %12988 = vsyncpa [#allocation3], 1 }
0x1c79   :  { %12990 = vsyncpa [#allocation3 + $0x1], 1 }
0x1c7a   :  { %12991 = vsyncpa [#allocation6], 1 }
0x1c7b   :  { %12992 = vsyncpa [#allocation9], 1 }
0x1c7c   :  { %12993 = vsyncpa [#allocation12], 1 }
0x1c7d   :  { %12994 = vsyncpa [#allocation15], 1 }
0x1c7e   :  { %12995 = vsyncpa [#allocation18], 1 }
0x1c7f   :  { %12996 = vsyncpa [#allocation4], 1 }
0x1c80   :  { %12998 = vsyncpa [#allocation4 + $0x1], 1 }

</bundles_post_ra>
